<compile_context>
chip_gen: v6e
topology: v6e:2x2x1
jax: 0.10.0
libtpu: 0.0.40
codegen_flags: <defaults>
</compile_context>

<pallas_src>
import functools

import jax
import jax.numpy as jnp
from jax.experimental import pallas as pl
from jax.experimental.pallas import tpu as pltpu

_INV_SQRT2 = 0.7071067811865476


def _round_up(x, m):
    return ((x + m - 1) // m) * m


def _pick_pixel_tile(npix, tile_pixels, max_tile_pixels=2048):
    """Pick a lane-dense pixel tile (multiple of 128).

    Auto mode targets <= max_tile_pixels (v7x-safe VMEM) and at least two
    pixel tiles so the pipeline can hide the output writeback.  v5e/v6e users
    with more VMEM headroom may pass tile_pixels=4096..8192.
    """
    if tile_pixels is None:
        ntiles = max(2, pl.cdiv(npix, max_tile_pixels))
        tn = _round_up(pl.cdiv(npix, ntiles), 128)
    else:
        tn = _round_up(int(tile_pixels), 128)
    return max(128, min(tn, _round_up(npix, 128)))


def _fcu_down_kernel(x_ref, w_ref, o_ref, *, approximate_gelu):
    # x_ref: (Cin+1, TN)  -- last row is all-ones (bias column of W).
    # w_ref: (Cout, Cin+1) -- BN scale folded, bias as last column.
    # o_ref: (Cout, TN)   -- pixel axis is the dense 128-lane axis.
    y = jnp.dot(w_ref[...], x_ref[...], preferred_element_type=jnp.float32)
    if approximate_gelu:
        # tanh approximation -> EUP slot (cheap); does NOT bit-match nn.GELU().
        g = jax.nn.gelu(y, approximate=True)
    else:
        # exact GELU (erf), matching nn.GELU() default.
        g = 0.5 * y * (1.0 + jax.lax.erf(y * _INV_SQRT2))
    o_ref[...] = g.astype(o_ref.dtype)


def fcu_down_forward(y, params, *, down_stride, out_T=16, eps=1e-6,
                     approximate_gelu=True, out_dtype=jnp.bfloat16,
                     bf16_matmul_inputs=True, tile_pixels=None,
                     out_buffer_count=2):
    """fusion=False forward of FCUDown.

    y: (B, C_in, T, H, W) float32, NCDHW.
    params: (conv_w (Cout,Cin,1,1,1), conv_b, gamma, beta, running_mean,
             running_var), each per-channel (Cout,).
    returns: (B, Cout, out_T, H//down_stride, W//down_stride), NCDHW.

    Flags (fast defaults deviate from strict float32 / nn.GELU bit-matching):
      approximate_gelu : tanh GELU (EUP) instead of exact erf.
      out_dtype        : bfloat16 output (f32 compute inside the kernel).
      bf16_matmul_inputs: cast x/W to bf16 for the MXU dot (f32 accumulate).
      tile_pixels      : pixel-axis tile (multiple of 128); None = auto <=2048.
      out_buffer_count : >2 adds extra output pipeline buffers (pl.Buffered).
    """
    conv_w, conv_b, gamma, beta, run_mean, run_var = params
    B, Cin, T, H, W = y.shape
    Cout = conv_w.shape[0]

    # 1x1x1 conv with stride (1, s, s) == spatial slicing + channel matmul.
    ys = y[:, :, :, ::down_stride, ::down_stride]        # (B, Cin, T, Ho, Wo)
    Ho, Wo = ys.shape[3], ys.shape[4]

    # Fold F.interpolate(size=(out_T, Ho, Wo), mode='nearest') into the tiny
    # Cin-channel input (pointwise op commutes with frame duplication).
    src_t = (jnp.arange(out_T) * T) // out_T             # floor(t*T/out_T)
    xd = jnp.take(ys, src_t, axis=2)                     # (B, Cin, out_T, Ho, Wo)
    Npix = out_T * Ho * Wo
    x3 = xd.reshape(B, Cin, Npix).astype(jnp.float32)    # pixels on the lane axis

    # Fold BatchNorm3d (inference, running stats) into conv weight / bias.
    inv_std = 1.0 / jnp.sqrt(run_var.astype(jnp.float32) + eps)
    scale = gamma.astype(jnp.float32) * inv_std                          # (Cout,)
    w_eff = scale[:, None] * conv_w.reshape(Cout, Cin).astype(jnp.float32)
    bias_eff = ((conv_b.astype(jnp.float32) - run_mean.astype(jnp.float32))
                * scale + beta.astype(jnp.float32)).reshape(Cout, 1)

    # Fold the bias into the matmul: extra column on W, ones row on x (K+1).
    in_dtype = jnp.bfloat16 if bf16_matmul_inputs else jnp.float32
    w_aug = jnp.concatenate([w_eff, bias_eff], axis=1).astype(in_dtype)   # (Cout, Cin+1)
    ones = jnp.ones((B, 1, Npix), jnp.float32)
    x_aug = jnp.concatenate([x3, ones], axis=1).astype(in_dtype)          # (B, Cin+1, Npix)
    K = Cin + 1

    # Lane-dense pixel tiling.
    tn = _pick_pixel_tile(Npix, tile_pixels)
    n_ptiles = pl.cdiv(Npix, tn)

    out_spec_kwargs = {}
    if out_buffer_count != 2:
        out_spec_kwargs["pipeline_mode"] = pl.Buffered(out_buffer_count)

    kernel = functools.partial(_fcu_down_kernel,
                               approximate_gelu=approximate_gelu)

    out3 = pl.pallas_call(
        kernel,
        out_shape=jax.ShapeDtypeStruct((B, Cout, Npix), out_dtype),
        grid_spec=pltpu.PrefetchScalarGridSpec(
            num_scalar_prefetch=0,
            grid=(B, n_ptiles),
            in_specs=[
                pl.BlockSpec((None, K, tn), lambda b, p: (b, 0, p)),
                pl.BlockSpec((Cout, K), lambda b, p: (0, 0)),
            ],
            out_specs=pl.BlockSpec((None, Cout, tn), lambda b, p: (b, 0, p),
                                   **out_spec_kwargs),
        ),
        compiler_params=pltpu.CompilerParams(
            dimension_semantics=("parallel", "parallel")),
    )(x_aug, w_aug)

    # Free (contiguous) reshape back to NCDHW -- no transpose pass.
    return out3.reshape(B, Cout, out_T, Ho, Wo)


def _reference_forward(y, params, *, down_stride, out_T=16, eps=1e-6):
    """Pure-JAX reference of the fusion=False forward (unfolded form)."""
    conv_w, conv_b, gamma, beta, run_mean, run_var = params
    B, Cin, T, H, W = y.shape
    Cout = conv_w.shape[0]
    ys = y[:, :, :, ::down_stride, ::down_stride]
    z = jnp.einsum('oc,bcthw->bothw', conv_w.reshape(Cout, Cin), ys)
    z = z + conv_b[None, :, None, None, None]
    inv_std = 1.0 / jnp.sqrt(run_var + eps)
    zn = (z - run_mean[None, :, None, None, None]) \
        * (gamma * inv_std)[None, :, None, None, None] \
        + beta[None, :, None, None, None]
    g = 0.5 * zn * (1.0 + jax.lax.erf(zn * _INV_SQRT2))
    src_t = (jnp.arange(out_T) * T) // out_T
    return jnp.take(g, src_t, axis=2)


if __name__ == "__main__":
    key = jax.random.PRNGKey(0)
    k1, k2, k3, k4, k5, k6, k7 = jax.random.split(key, 7)

    # Small shapes consistent with the module: inplanes=4, outplanes forced to
    # 768 (fusion=False), down_stride=2, video input (B, C, T, H, W).
    B, Cin, T, H, W = 2, 4, 8, 16, 16
    down_stride = 2
    Cout = 768

    y = jax.random.normal(k1, (B, Cin, T, H, W), jnp.float32)
    # x_t is unused on the fusion=False path, but constructed to mirror forward()
    x_t = jax.random.normal(k2, (B, Cout, 16, 14, 14), jnp.float32)

    conv_w = 0.02 * jax.random.normal(k3, (Cout, Cin, 1, 1, 1), jnp.float32)
    conv_b = 0.01 * jax.random.normal(k4, (Cout,), jnp.float32)
    gamma = 1.0 + 0.1 * jax.random.normal(k5, (Cout,), jnp.float32)
    beta = 0.1 * jax.random.normal(k6, (Cout,), jnp.float32)
    run_mean = 0.05 * jax.random.normal(k7, (Cout,), jnp.float32)
    run_var = jnp.ones((Cout,), jnp.float32)

    params = (conv_w, conv_b, gamma, beta, run_mean, run_var)
    expected_shape = (B, Cout, 16, H // down_stride, W // down_stride)
    ref = _reference_forward(y, params, down_stride=down_stride)

    # 1) Fast defaults (perf-review config): bf16 out, tanh GELU, bf16 MXU in.
    out_fast = fcu_down_forward(y, params, down_stride=down_stride)
    jax.block_until_ready(out_fast)
    assert out_fast.shape == expected_shape, (out_fast.shape, expected_shape)
    assert out_fast.dtype == jnp.bfloat16, out_fast.dtype
    err_fast = float(jnp.max(jnp.abs(out_fast.astype(jnp.float32) - ref)))
    assert err_fast < 2e-2, ("fast-mode max abs error vs reference", err_fast)

    # 2) Exact mode: f32 output + erf GELU + f32 matmul inputs, matching the
    #    PyTorch module's nn.GELU()/float32 semantics.
    out_exact = fcu_down_forward(
        y, params, down_stride=down_stride,
        approximate_gelu=False, out_dtype=jnp.float32,
        bf16_matmul_inputs=False)
    jax.block_until_ready(out_exact)
    assert out_exact.shape == expected_shape, (out_exact.shape, expected_shape)
    err_exact = float(jnp.max(jnp.abs(out_exact - ref)))
    assert err_exact < 5e-3, ("exact-mode max abs error vs reference", err_exact)

    print("KERNEL_OK")
</pallas_src>

<mosaic_0001>
module attributes {stable_mosaic.version = 11 : i64} {
  func.func @_fcu_down_kernel(%arg0: i32, %arg1: i32, %arg2: memref<1x5x512xbf16, #tpu.memory_space<vmem>>, %arg3: memref<768x5xbf16, #tpu.memory_space<vmem>>, %arg4: memref<1x768x512xbf16, #tpu.memory_space<vmem>>) attributes {dimension_semantics = [#tpu.dimension_semantics<parallel>, #tpu.dimension_semantics<parallel>], iteration_bounds = array<i64: 2, 2>, scalar_prefetch = 0 : i64, scratch_operands = 0 : i64, tpu.core_type = #tpu.core_type<tc>, window_params = [{transform_indices = @transform_0, window_bounds = array<i64: 1, 5, 512>}, {pipeline_mode = #tpu.pipeline_mode<synchronous>, transform_indices = @transform_1, window_bounds = array<i64: 768, 5>}, {transform_indices = @transform_2, window_bounds = array<i64: 1, 768, 512>}]} {
    %c0 = arith.constant 0 : index
    %c0_0 = arith.constant 0 : index
    %0 = vector.load %arg3[%c0, %c0_0] : memref<768x5xbf16, #tpu.memory_space<vmem>>, vector<768x5xbf16>
    %c0_1 = arith.constant 0 : index
    %c0_2 = arith.constant 0 : index
    %c0_3 = arith.constant 0 : index
    %1 = vector.load %arg2[%c0_1, %c0_2, %c0_3] : memref<1x5x512xbf16, #tpu.memory_space<vmem>>, vector<1x5x512xbf16>
    %2 = vector.shape_cast %1 : vector<1x5x512xbf16> to vector<5x512xbf16>
    %cst = arith.constant dense<0.000000e+00> : vector<768x512xf32>
    %3 = tpu.matmul %0, %2, %cst {dimension_numbers = #tpu.dot_dimension_numbers<[1], [0], [0], [1], [0, 0, 1, 1], [], []>} : vector<768x5xbf16>, vector<5x512xbf16>, vector<768x512xf32> -> vector<768x512xf32>
    %4 = arith.mulf %3, %3 : vector<768x512xf32>
    %5 = arith.mulf %3, %4 : vector<768x512xf32>
    %cst_4 = arith.constant 4.471500e-02 : f32
    %6 = vector.broadcast %cst_4 : f32 to vector<768x512xf32>
    %7 = arith.mulf %6, %5 : vector<768x512xf32>
    %8 = arith.addf %3, %7 : vector<768x512xf32>
    %cst_5 = arith.constant 0.797884583 : f32
    %9 = vector.broadcast %cst_5 : f32 to vector<768x512xf32>
    %10 = arith.mulf %9, %8 : vector<768x512xf32>
    %11 = math.tanh %10 : vector<768x512xf32>
    %cst_6 = arith.constant 1.000000e+00 : f32
    %12 = vector.broadcast %cst_6 : f32 to vector<768x512xf32>
    %13 = arith.addf %12, %11 : vector<768x512xf32>
    %cst_7 = arith.constant 5.000000e-01 : f32
    %14 = vector.broadcast %cst_7 : f32 to vector<768x512xf32>
    %15 = arith.mulf %14, %13 : vector<768x512xf32>
    %16 = arith.mulf %3, %15 : vector<768x512xf32>
    %17 = arith.truncf %16 : vector<768x512xf32> to vector<768x512xbf16>
    %c0_8 = arith.constant 0 : index
    %c0_9 = arith.constant 0 : index
    %c0_10 = arith.constant 0 : index
    %18 = vector.load %arg4[%c0_8, %c0_9, %c0_10] : memref<1x768x512xbf16, #tpu.memory_space<vmem>>, vector<1x768x512xbf16>
    %19 = vector.shape_cast %18 : vector<1x768x512xbf16> to vector<768x512xbf16>
    %20 = vector.shape_cast %17 : vector<768x512xbf16> to vector<1x768x512xbf16>
    tpu.vector_store %arg4[%c0_8, %c0_9, %c0_10], %20 {strides = array<i32>} : memref<1x768x512xbf16, #tpu.memory_space<vmem>>, vector<1x768x512xbf16>,
    return
  }
  func.func @transform_0(%arg0: i32, %arg1: i32) -> (i32, i32, i32) {
    %c0_i32 = arith.constant 0 : i32
    %c0_i32_0 = arith.constant 0 : i32
    return %arg0, %c0_i32, %arg1 : i32, i32, i32
  }
  func.func @transform_1(%arg0: i32, %arg1: i32) -> (i32, i32) {
    %c0_i32 = arith.constant 0 : i32
    %c0_i32_0 = arith.constant 0 : i32
    %c0_i32_1 = arith.constant 0 : i32
    return %c0_i32, %c0_i32_0 : i32, i32
  }
  func.func @transform_2(%arg0: i32, %arg1: i32) -> (i32, i32, i32) {
    %c0_i32 = arith.constant 0 : i32
    %c0_i32_0 = arith.constant 0 : i32
    return %arg0, %c0_i32, %arg1 : i32, i32, i32
  }
}

</mosaic_0001>

<bundles_post_ra>
// kernel: tpu_custom_call.1
= control target key start
LH: loop header
LB: loop body
LE: loop exit
PB: predicated region body
PF: predicated region fallthrough
CT: control target
= control target key end

     0   :  { %7 = vsyncpa [#allocation3], 0  ;;  %s11595_s0 = inlined_call_operand.vmem [shape: bf16[2,5,1024], index: 0, kind: input, shape index: {}]   ;;  %s11596_s1 = inlined_call_operand.vmem [shape: bf16[768,5], index: 1, kind: input, shape index: {}]   ;;  %s11597_s2 = inlined_call_operand.hbm [shape: bf16[2,768,1024], index: 2, kind: output, shape index: {}]  }
   0x1   :  { %9 = vsyncpa [#allocation3 + $0x1], 0  ;;  %s8164_s9 = smov 0   ;;  %s8166_s10 = smov 0  }
   0x2   :  { %s8168_s11 = smov 0   ;;  %s8170_s12 = smov 0  }
   0x3   :  { %s8172_s13 = smov 0   ;;  %s8174_s14 = smov 0  }
   0x4   :  { %s8176_s15 = smov 0   ;;  %s8178_s16 = smov 0  }
   0x5 LB: > { %s6607_s17 = sadd.s32 4294967295, %s8141_s16   ;;  %s6608_s18 = sadd.s32 4294967294, %s8141_s16   ;;  %s8141_s16 = sphi %s8178_s16, %s15_s16   ;;  %s8137_s15 = sphi %s8176_s15, %s11630_s15   ;;  %s8133_s14 = sphi %s8174_s14, %s11629_s14   ;;  %s8129_s13 = sphi %s8172_s13, %s11628_s13   ;;  %s8125_s12 = sphi %s8170_s12, %s11627_s12   ;;  %s8121_s11 = sphi %s8168_s11, %s11626_s11   ;;  %s8117_s10 = sphi %s8166_s10, %s11625_s10   ;;  %s8113_s9 = sphi %s8164_s9, %s11624_s9  }
   0x6   : > { %s24_s19 = sadd.s32 1, %s8133_s14  ;;  %s27_s20 = sadd.s32 1, %s8137_s15 }
   0x7   : > { %p25_p0 = scmp.ge.s32.totalorder %s24_s19, 2  ;;  %p95_p1 = scmp.ne.s32.totalorder %s8121_s11, %s8117_s10 }
   0x8   : > { %p96_p2 = scmp.eq.s32.totalorder %s6607_s17, 3  ;;  %p101_p5 = scmp.ne.s32.totalorder %s8117_s10, %s8113_s9 }
   0x9   : > { %s11632_s19 = smov (%p25_p0, %s24_s19), 0  ;;  %s11634_s20 = smov (!%p25_p0, %s27_s20), %s8137_s15 }
   0xa   : > { %s81_s21 = ssub.s32 %s8133_s14, %s11632_s19  ;;  %p8215_p3 = por %p96_p2, %p95_p1 }
   0xb   : > { %p29_p4 = scmp.ge.s32.totalorder %s11634_s20, 2  ;;  %p102_p6 = scmp.eq.s32.totalorder %s6608_s18, 3 }
   0xc   : > { %p6611_p7 = scmp.ge.s32.totalorder %s8141_s16, 1  ;;  %p136_p9 = scmp.lt.s32.totalorder %s8141_s16, 5 }
   0xd   : > { %s11636_s20 = smov (%p29_p4, %s11634_s20), 0  ;;  %p8224_p8 = por %p102_p6, %p101_p5 }
   0xe   : > { %s80_s24 = ssub.s32 %s8137_s15, %s11636_s20  ;;  %s85_s25 = sadd.s32 1, %s8121_s11 }
   0xf   : > { %s82_s26 = sor.u32 %s81_s21, %s80_s24  ;;  %p137_p10 = pnand %p6611_p7, %p136_p9 }
  0x10   : > { %p83_p11 = scmp.eq.s32.totalorder %s82_s26, 0 }
  0x11   : > { %140 = sbr.rel (%p137_p10) target bundleno = 1179 (0x49b), region = 28 }
  0x12   : > { %s8233_s27 = scalar_select %p83_p11, %s8121_s11, %s85_s25  }
  0x16   : > { %s8236_s28 = sshll.u32 %s8125_s12, 2  ;;  %p163_p12 = scmp.lt.s32.totalorder %s8129_s13, 1  ;;  %vm667_vm0 = vcmask 1041408   ;;  %v11598_v0 = vmov 0   ;;  %vm668_vm1 = vcmask 1042432   ;;  %v8144_v1 = vmov 65535  }
  0x17   : > { %p165_p13 = scmp.lt.s32.totalorder %s8236_s28, 7  ;;  %715 = vmatprep.mubr.bf16.mxu0 %v11598_v0  ;;  %1228 = vmatprep.mubr.bf16.mxu1 %v11598_v0  ;;  %v669_v2 = vsel %vm667_vm0, 4294967295, %v8144_v1  ;;  %v7233_v14 = vld [vmem:[%s11596_s1] sm:$0xff]   ;;  %vm522_vm2 = vcmask 39936   ;;  %v7234_v15 = vld [vmem:[%s11596_s1 + $0x8] sm:$0xff]   ;;  %v7235_v16 = vld [vmem:[%s11596_s1 + $0x10] sm:$0xff]  }
  0x18   : > { %s164_s29 = scalar_select %p163_p12, %s8129_s13, 1  ;;  %v670_v3 = vsel %vm668_vm1, %v669_v2, 0  ;;  %v7236_v17 = vld [vmem:[%s11596_s1 + $0x18] sm:$0xff]   ;;  %v7237_v18 = vld [vmem:[%s11596_s1 + $0x20] sm:$0xff]   ;;  %v7238_v19 = vld [vmem:[%s11596_s1 + $0x28] sm:$0xff]  }
  0x19   : > { %s166_s30 = scalar_select %p165_p13, %s8236_s28, 7  ;;  %v7239_v20 = vld [vmem:[%s11596_s1 + $0x30] sm:$0xff]   ;;  %v7240_v21 = vld [vmem:[%s11596_s1 + $0x38] sm:$0xff]   ;;  %v7241_v22 = vld [vmem:[%s11596_s1 + $0x40] sm:$0xff]  }
  0x1a   : > { %s6613_s3 = sshll.u32 %s164_s29, 3  ;;  %v7242_v23 = vld [vmem:[%s11596_s1 + $0x48] sm:$0xff]   ;;  %v7243_v24 = vld [vmem:[%s11596_s1 + $0x50] sm:$0xff]   ;;  %v7244_v25 = vld [vmem:[%s11596_s1 + $0x58] sm:$0xff]   ;;  %s8145_s29 = smov [#allocation2]  }
  0x1b   : > { %s168_s4 = sadd.s32 %s6613_s3, %s166_s30  ;;  %v7245_v26 = vld [vmem:[%s11596_s1 + $0x60] sm:$0xff]   ;;  %v7246_v27 = vld [vmem:[%s11596_s1 + $0x68] sm:$0xff]   ;;  %v7247_v28 = vld [vmem:[%s11596_s1 + $0x70] sm:$0xff]   ;;  %s8053_s30 = sshll.u32 %s8145_s29, 4  ;;  %s8054_s30 = int_to_ptr.vmem [resolvable:$false] %s8053_s30 }
  0x1c   : > { %s6614_s5 = sshll.u32 %s168_s4, 2  ;;  %v7248_v29 = vld [vmem:[%s11596_s1 + $0x78] sm:$0xff]   ;;  %v7249_v30 = vld [vmem:[%s11596_s1 + $0x80] sm:$0xff]   ;;  %v7250_v31 = vld [vmem:[%s11596_s1 + $0x88] sm:$0xff]   ;;  %s8055_s3 = scalar_lea.vmem %s8054_s30, 49152 }
  0x1d   : > { %s170_s8 = scalar_lea.vmem %s11595_s0, %s6614_s5  ;;  %v7251_v32 = vld [vmem:[%s11596_s1 + $0x90] sm:$0xff]   ;;  %v7252_v33 = vld [vmem:[%s11596_s1 + $0x98] sm:$0xff]   ;;  %v7253_v34 = vld [vmem:[%s11596_s1 + $0xa0] sm:$0xff]   ;;  %s159_s5 = sand.u32 1, %s8117_s10  }
  0x1e   : > { %v270_v4 = vld [vmem:[%s170_s8] sm:$0x77]  ;;  %v271_v5 = vld [vmem:[%s170_s8 + $0x8] sm:$0x77]  ;;  %v7255_v36 = vld [vmem:[%s11596_s1 + $0xb0] sm:$0xff]   ;;  %s8570_s6 = smul.u32 1536, %s159_s5 }
  0x1f   : > { %v6664_v6 = vcombine.high %v270_v4, %v270_v4  ;;  %v6666_v7 = vcombine.high %v271_v5, %v271_v5  ;;  %v6663_v8 = vcombine.low %v270_v4, %v270_v4  ;;  %v6665_v9 = vcombine.low %v271_v5, %v271_v5  ;;  %v7254_v35 = vld [vmem:[%s11596_s1 + $0xa8] sm:$0xff]   ;;  %v7256_v37 = vld [vmem:[%s11596_s1 + $0xb8] sm:$0xff]   ;;  %v7257_v38 = vld [vmem:[%s11596_s1 + $0xc0] sm:$0xff]   ;;  %s7152_s8 = smul.u32 768, %s8129_s13  ;;  %s11544_s25 = scalar_lea.sflag [#allocation3], %s159_s5 }
  0x20   : > { %v7258_v51 = vld [vmem:[%s11596_s1 + $0xc8] sm:$0xff]   ;;  %s8604_s12 = scalar_lea.vmem [#allocation2], %s8570_s6 }
  0x21   : > { %v675_v10 = vand.u32 %v6664_v6, %v670_v3  ;;  %v681_v11 = vand.u32 %v6666_v7, %v670_v3  ;;  %v672_v12 = vand.u32 %v6663_v8, %v670_v3  ;;  %v678_v13 = vand.u32 %v6665_v9, %v670_v3  ;;  %s6522_s17 = sadd.s32 %s7152_s8, %s8236_s28  ;;  %s6525_s13 = sshll.u32 %s8604_s12, 4  ;;  %s11538_s13 = int_to_ptr.vmem [resolvable:$true] %s6525_s13 }
  0x22   : > { %s6956_s18 = sshll.u32 %s6522_s17, 6  ;;  %s8049_s26 = scalar_lea.vmem %s11538_s13, 24576 }
  0x23   : > { %697 = vmatprep.subr.bf16.mxu0 %v675_v10  ;;  %1210 = vmatprep.subr.bf16.mxu1 %v681_v11  ;;  %s11534_s24 = scalar_lea.hbm %s11597_s2, %s6956_s18  ;;  %p8050_p0 = scmp.ne.s32.totalorder %s11538_s13, %s8049_s26 }
  0x24   : > { %698 = vmatpush1.bf16.msra.mxu0 %v672_v12  ;;  %1211 = vmatpush1.bf16.msra.mxu1 %v678_v13  ;;  %p8056_p4 = scmp.lt.s32.totalorder %s11538_s13, %s8054_s30  ;;  %p8057_p5 = scmp.lt.s32.totalorder %s8055_s3, %s8049_s26 }
  0x25   : > { %p8051_p1 = pnand %p8050_p0, %p8215_p3 }
  0x26   : > { %p8058_p6 = por %p8057_p5, %p8056_p4 }
  0x27   : > { %6667 = vmatmul.mubr.msk.bf16.vlgmr.msra.gmra.mxu0 %vm522_vm2, %v7233_v14  ;;  %6715 = vmatmul.mubr.msk.bf16.vlgmr.msra.gmra.mxu1 %vm522_vm2, %v7233_v14  ;;  %p8052_p2 = pneg %p8051_p1 }
  0x28   : > { %725 = vmatprep.mubr.bf16.mxu0 %v11598_v0  ;;  %1238 = vmatprep.mubr.bf16.mxu1 %v11598_v0 }
  0x29   : > { %p8059_p7 = pnand %p8058_p6, %p8052_p2 }
  0x2f   : > { %6668 = vmatmul.mubr.msk.bf16.gmra.mxu0 %vm522_vm2, %v7234_v15  ;;  %6716 = vmatmul.mubr.msk.bf16.gmra.mxu1 %vm522_vm2, %v7234_v15 }
  0x30   : > { %735 = vmatprep.mubr.bf16.mxu0 %v11598_v0  ;;  %1248 = vmatprep.mubr.bf16.mxu1 %v11598_v0 }
  0x37   : > { %6669 = vmatmul.mubr.msk.bf16.gmra.mxu0 %vm522_vm2, %v7235_v16  ;;  %6717 = vmatmul.mubr.msk.bf16.gmra.mxu1 %vm522_vm2, %v7235_v16 }
  0x38   : > { %745 = vmatprep.mubr.bf16.mxu0 %v11598_v0  ;;  %1258 = vmatprep.mubr.bf16.mxu1 %v11598_v0 }
  0x3f   : > { %6670 = vmatmul.mubr.msk.bf16.gmra.mxu0 %vm522_vm2, %v7236_v17  ;;  %6718 = vmatmul.mubr.msk.bf16.gmra.mxu1 %vm522_vm2, %v7236_v17 }
  0x40   : > { %755 = vmatprep.mubr.bf16.mxu0 %v11598_v0  ;;  %1268 = vmatprep.mubr.bf16.mxu1 %v11598_v0 }
  0x47   : > { %6671 = vmatmul.mubr.msk.bf16.gmra.mxu0 %vm522_vm2, %v7237_v18  ;;  %6719 = vmatmul.mubr.msk.bf16.gmra.mxu1 %vm522_vm2, %v7237_v18 }
  0x48   : > { %765 = vmatprep.mubr.bf16.mxu0 %v11598_v0  ;;  %1278 = vmatprep.mubr.bf16.mxu1 %v11598_v0 }
  0x4f   : > { %6672 = vmatmul.mubr.msk.bf16.gmra.mxu0 %vm522_vm2, %v7238_v19  ;;  %6720 = vmatmul.mubr.msk.bf16.gmra.mxu1 %vm522_vm2, %v7238_v19 }
  0x50   : > { %775 = vmatprep.mubr.bf16.mxu0 %v11598_v0  ;;  %1288 = vmatprep.mubr.bf16.mxu1 %v11598_v0 }
  0x57   : > { %6673 = vmatmul.mubr.msk.bf16.gmra.mxu0 %vm522_vm2, %v7239_v20  ;;  %6721 = vmatmul.mubr.msk.bf16.gmra.mxu1 %vm522_vm2, %v7239_v20 }
  0x58   : > { %785 = vmatprep.mubr.bf16.mxu0 %v11598_v0  ;;  %1298 = vmatprep.mubr.bf16.mxu1 %v11598_v0 }
  0x5f   : > { %6674 = vmatmul.mubr.msk.bf16.gmra.mxu0 %vm522_vm2, %v7240_v21  ;;  %6722 = vmatmul.mubr.msk.bf16.gmra.mxu1 %vm522_vm2, %v7240_v21 }
  0x60   : > { %795 = vmatprep.mubr.bf16.mxu0 %v11598_v0  ;;  %1308 = vmatprep.mubr.bf16.mxu1 %v11598_v0 }
  0x67   : > { %6675 = vmatmul.mubr.msk.bf16.gmra.mxu0 %vm522_vm2, %v7241_v22  ;;  %6723 = vmatmul.mubr.msk.bf16.gmra.mxu1 %vm522_vm2, %v7241_v22 }
  0x68   : > { %805 = vmatprep.mubr.bf16.mxu0 %v11598_v0  ;;  %1318 = vmatprep.mubr.bf16.mxu1 %v11598_v0 }
  0x6f   : > { %6676 = vmatmul.mubr.msk.bf16.gmra.mxu0 %vm522_vm2, %v7242_v23  ;;  %6724 = vmatmul.mubr.msk.bf16.gmra.mxu1 %vm522_vm2, %v7242_v23 }
  0x70   : > { %815 = vmatprep.mubr.bf16.mxu0 %v11598_v0  ;;  %1328 = vmatprep.mubr.bf16.mxu1 %v11598_v0 }
  0x77   : > { %6677 = vmatmul.mubr.msk.bf16.gmra.mxu0 %vm522_vm2, %v7243_v24  ;;  %6725 = vmatmul.mubr.msk.bf16.gmra.mxu1 %vm522_vm2, %v7243_v24 }
  0x78   : > { %825 = vmatprep.mubr.bf16.mxu0 %v11598_v0  ;;  %1338 = vmatprep.mubr.bf16.mxu1 %v11598_v0 }
  0x7f   : > { %6678 = vmatmul.mubr.msk.bf16.gmra.mxu0 %vm522_vm2, %v7244_v25  ;;  %6726 = vmatmul.mubr.msk.bf16.gmra.mxu1 %vm522_vm2, %v7244_v25  ;;  %v7259_v25 = vld [vmem:[%s11596_s1 + $0xd0] sm:$0xff]  }
  0x80   : > { %835 = vmatprep.mubr.bf16.mxu0 %v11598_v0  ;;  %1348 = vmatprep.mubr.bf16.mxu1 %v11598_v0 }
  0x87   : > { %6679 = vmatmul.mubr.msk.bf16.gmra.mxu0 %vm522_vm2, %v7245_v26  ;;  %6727 = vmatmul.mubr.msk.bf16.gmra.mxu1 %vm522_vm2, %v7245_v26 }
  0x88   : > { %845 = vmatprep.mubr.bf16.mxu0 %v11598_v0  ;;  %1358 = vmatprep.mubr.bf16.mxu1 %v11598_v0 }
  0x8f   : > { %6680 = vmatmul.mubr.msk.bf16.gmra.mxu0 %vm522_vm2, %v7246_v27  ;;  %6728 = vmatmul.mubr.msk.bf16.gmra.mxu1 %vm522_vm2, %v7246_v27 }
  0x90   : > { %855 = vmatprep.mubr.bf16.mxu0 %v11598_v0  ;;  %1368 = vmatprep.mubr.bf16.mxu1 %v11598_v0 }
  0x97   : > { %6681 = vmatmul.mubr.msk.bf16.gmra.mxu0 %vm522_vm2, %v7247_v28  ;;  %6729 = vmatmul.mubr.msk.bf16.gmra.mxu1 %vm522_vm2, %v7247_v28 }
  0x98   : > { %865 = vmatprep.mubr.bf16.mxu0 %v11598_v0  ;;  %1378 = vmatprep.mubr.bf16.mxu1 %v11598_v0 }
  0x9f   : > { %6682 = vmatmul.mubr.msk.bf16.gmra.mxu0 %vm522_vm2, %v7248_v29  ;;  %6730 = vmatmul.mubr.msk.bf16.gmra.mxu1 %vm522_vm2, %v7248_v29 }
  0xa0   : > { %875 = vmatprep.mubr.bf16.mxu0 %v11598_v0  ;;  %1388 = vmatprep.mubr.bf16.mxu1 %v11598_v0 }
  0xa7   : > { %6683 = vmatmul.mubr.msk.bf16.gmra.mxu0 %vm522_vm2, %v7249_v30  ;;  %6731 = vmatmul.mubr.msk.bf16.gmra.mxu1 %vm522_vm2, %v7249_v30 }
  0xa8   : > { %885 = vmatprep.mubr.bf16.mxu0 %v11598_v0  ;;  %1398 = vmatprep.mubr.bf16.mxu1 %v11598_v0 }
  0xaf   : > { %6684 = vmatmul.mubr.msk.bf16.gmra.mxu0 %vm522_vm2, %v7250_v31  ;;  %6732 = vmatmul.mubr.msk.bf16.gmra.mxu1 %vm522_vm2, %v7250_v31 }
  0xb0   : > { %895 = vmatprep.mubr.bf16.mxu0 %v11598_v0  ;;  %1408 = vmatprep.mubr.bf16.mxu1 %v11598_v0 }
  0xb7   : > { %6685 = vmatmul.mubr.msk.bf16.gmra.mxu0 %vm522_vm2, %v7251_v32  ;;  %6733 = vmatmul.mubr.msk.bf16.gmra.mxu1 %vm522_vm2, %v7251_v32 }
  0xb8   : > { %905 = vmatprep.mubr.bf16.mxu0 %v11598_v0  ;;  %1418 = vmatprep.mubr.bf16.mxu1 %v11598_v0 }
  0xbf   : > { %6686 = vmatmul.mubr.msk.bf16.gmra.mxu0 %vm522_vm2, %v7252_v33  ;;  %6734 = vmatmul.mubr.msk.bf16.gmra.mxu1 %vm522_vm2, %v7252_v33 }
  0xc0   : > { %915 = vmatprep.mubr.bf16.mxu0 %v11598_v0  ;;  %1428 = vmatprep.mubr.bf16.mxu1 %v11598_v0 }
  0xc7   : > { %6687 = vmatmul.mubr.msk.bf16.gmra.mxu0 %vm522_vm2, %v7253_v34  ;;  %6735 = vmatmul.mubr.msk.bf16.gmra.mxu1 %vm522_vm2, %v7253_v34 }
  0xc8   : > { %925 = vmatprep.mubr.bf16.mxu0 %v11598_v0  ;;  %1438 = vmatprep.mubr.bf16.mxu1 %v11598_v0 }
  0xcf   : > { %6688 = vmatmul.mubr.msk.bf16.gmra.mxu0 %vm522_vm2, %v7254_v35  ;;  %6736 = vmatmul.mubr.msk.bf16.gmra.mxu1 %vm522_vm2, %v7254_v35 }
  0xd0   : > { %935 = vmatprep.mubr.bf16.mxu0 %v11598_v0  ;;  %1448 = vmatprep.mubr.bf16.mxu1 %v11598_v0 }
  0xd7   : > { %6689 = vmatmul.mubr.msk.bf16.gmra.mxu0 %vm522_vm2, %v7255_v36  ;;  %6737 = vmatmul.mubr.msk.bf16.gmra.mxu1 %vm522_vm2, %v7255_v36 }
  0xd8   : > { %945 = vmatprep.mubr.bf16.mxu0 %v11598_v0  ;;  %1458 = vmatprep.mubr.bf16.mxu1 %v11598_v0 }
  0xdf   : > { %6690 = vmatmul.mubr.msk.bf16.gmra.mxu0 %vm522_vm2, %v7256_v37  ;;  %6738 = vmatmul.mubr.msk.bf16.gmra.mxu1 %vm522_vm2, %v7256_v37 }
  0xe0   : > { %955 = vmatprep.mubr.bf16.mxu0 %v11598_v0  ;;  %1468 = vmatprep.mubr.bf16.mxu1 %v11598_v0 }
  0xe7   : > { %v8418_v39 = vpop.f32.mrf.mxu0  ;;  %6691 = vmatmul.mubr.msk.bf16.gmra.mxu0 %vm522_vm2, %v7257_v38  ;;  %v8421_v40 = vpop.f32.mrf.mxu1  ;;  %6739 = vmatmul.mubr.msk.bf16.gmra.mxu1 %vm522_vm2, %v7257_v38 }
  0xe8   : > { %v1709_v41 = vmul.f32 %v8418_v39, %v8418_v39  ;;  %v1711_v42 = vmul.f32 %v8421_v40, %v8421_v40  ;;  %965 = vmatprep.mubr.bf16.mxu0 %v11598_v0  ;;  %1478 = vmatprep.mubr.bf16.mxu1 %v11598_v0 }
  0xe9   : > { %v8430_v43 = vpop.f32.mrf.mxu0  ;;  %v8432_v44 = vpop.f32.mrf.mxu1 }
  0xea   : > { %v2093_v45 = vmul.f32 %v1709_v41, %v8418_v39  ;;  %v2095_v46 = vmul.f32 %v1711_v42, %v8421_v40  ;;  %v1710_v47 = vmul.f32 %v8430_v43, %v8430_v43  ;;  %v1712_v48 = vmul.f32 %v8432_v44, %v8432_v44 }
  0xeb   : > { %v8440_v49 = vpop.f32.mrf.mxu0  ;;  %v8442_v50 = vpop.f32.mrf.mxu1 }
  0xec   : > { %v2477_v52 = vmul.f32 0.044715, %v2093_v45  ;;  %v2479_v53 = vmul.f32 0.044715, %v2095_v46  ;;  %v2094_v54 = vmul.f32 %v1710_v47, %v8430_v43  ;;  %v2096_v55 = vmul.f32 %v1712_v48, %v8432_v44 }
  0xed   : > { %v1713_v56 = vmul.f32 %v8440_v49, %v8440_v49  ;;  %v1715_v57 = vmul.f32 %v8442_v50, %v8442_v50  ;;  %v8453_v58 = vpop.f32.mrf.mxu0  ;;  %v8455_v59 = vpop.f32.mrf.mxu1 }
  0xee   : > { %v2861_v60 = vadd.f32 %v2477_v52, %v8418_v39  ;;  %v2863_v61 = vadd.f32 %v2479_v53, %v8421_v40  ;;  %v2478_v62 = vmul.f32 0.044715, %v2094_v54  ;;  %v2480_v63 = vmul.f32 0.044715, %v2096_v55 }
  0xef   : > { %v2097_v1 = vmul.f32 %v1713_v56, %v8440_v49  ;;  %v2099_v2 = vmul.f32 %v1715_v57, %v8442_v50  ;;  %v1714_v3 = vmul.f32 %v8453_v58, %v8453_v58  ;;  %v1716_v4 = vmul.f32 %v8455_v59, %v8455_v59  ;;  %v8465_v5 = vpop.f32.mrf.mxu0  ;;  %6692 = vmatmul.mubr.msk.bf16.gmra.mxu0 %vm522_vm2, %v7258_v51  ;;  %v8468_v6 = vpop.f32.mrf.mxu1 }
  0xf0   : > { %v3245_v7 = vmul.f32 0.7978846, %v2861_v60  ;;  %v3247_v8 = vmul.f32 0.7978846, %v2863_v61  ;;  %v2862_v9 = vadd.f32 %v2478_v62, %v8430_v43  ;;  %v2864_v10 = vadd.f32 %v2480_v63, %v8432_v44  ;;  %6740 = vmatmul.mubr.msk.bf16.gmra.mxu1 %vm522_vm2, %v7258_v51  ;;  %975 = vmatprep.mubr.bf16.mxu0 %v11598_v0  ;;  %v7260_v62 = vld [vmem:[%s11596_s1 + $0xd8] sm:$0xff]  }
  0xf1   : > { %v2481_v11 = vmul.f32 0.044715, %v2097_v1  ;;  %v2483_v12 = vmul.f32 0.044715, %v2099_v2  ;;  %v2098_v13 = vmul.f32 %v1714_v3, %v8453_v58  ;;  %v2100_v14 = vmul.f32 %v1716_v4, %v8455_v59  ;;  %v8476_v15 = vpop.f32.mrf.mxu0  ;;  %v8478_v16 = vpop.f32.mrf.mxu1  ;;  %1488 = vmatprep.mubr.bf16.mxu1 %v11598_v0 }
  0xf2   : > { %7281 = vtanh.f32 %v3245_v7  ;;  %v3246_v17 = vmul.f32 0.7978846, %v2862_v9  ;;  %v3248_v18 = vmul.f32 0.7978846, %v2864_v10  ;;  %v1717_v19 = vmul.f32 %v8465_v5, %v8465_v5 }
  0xf3   : > { %7283 = vtanh.f32 %v3247_v8  ;;  %v2865_v20 = vadd.f32 %v2481_v11, %v8440_v49  ;;  %v2867_v21 = vadd.f32 %v2483_v12, %v8442_v50  ;;  %v2482_v22 = vmul.f32 0.044715, %v2098_v13  ;;  %v8485_v23 = vpop.f32.mrf.mxu0  ;;  %v8487_v24 = vpop.f32.mrf.mxu1 }
  0xf4   : > { %7285 = vtanh.f32 %v3246_v17  ;;  %v2484_v26 = vmul.f32 0.044715, %v2100_v14  ;;  %v2101_v27 = vmul.f32 %v1717_v19, %v8465_v5  ;;  %v1719_v28 = vmul.f32 %v8468_v6, %v8468_v6 }
  0xf5   : > { %7287 = vtanh.f32 %v3248_v18  ;;  %v3249_v29 = vmul.f32 0.7978846, %v2865_v20  ;;  %v3251_v30 = vmul.f32 0.7978846, %v2867_v21  ;;  %v2866_v31 = vadd.f32 %v2482_v22, %v8453_v58  ;;  %v8496_v32 = vpop.f32.mrf.mxu0  ;;  %v8498_v33 = vpop.f32.mrf.mxu1 }
  0xf6   : > { %v2868_v34 = vadd.f32 %v2484_v26, %v8455_v59  ;;  %v2485_v35 = vmul.f32 0.044715, %v2101_v27  ;;  %v2103_v36 = vmul.f32 %v1719_v28, %v8468_v6  ;;  %v1718_v37 = vmul.f32 %v8476_v15, %v8476_v15 }
  0xf7   : > { %7289 = vtanh.f32 %v3249_v29  ;;  %v3250_v38 = vmul.f32 0.7978846, %v2866_v31  ;;  %v1720_v41 = vmul.f32 %v8478_v16, %v8478_v16  ;;  %v1721_v42 = vmul.f32 %v8485_v23, %v8485_v23  ;;  %v8508_v45 = vpop.f32.mrf.mxu0  ;;  %6693 = vmatmul.mubr.msk.bf16.gmra.mxu0 %vm522_vm2, %v7259_v25  ;;  %v8511_v46 = vpop.f32.mrf.mxu1 }
  0xf8   : > { %7291 = vtanh.f32 %v3251_v30  ;;  %v3252_v47 = vmul.f32 0.7978846, %v2868_v34  ;;  %v2869_v48 = vadd.f32 %v2485_v35, %v8465_v5  ;;  %v2487_v51 = vmul.f32 0.044715, %v2103_v36  ;;  %6741 = vmatmul.mubr.msk.bf16.gmra.mxu1 %vm522_vm2, %v7259_v25  ;;  %985 = vmatprep.mubr.bf16.mxu0 %v11598_v0 }
  0xf9   : > { %7293 = vtanh.f32 %v3250_v38  ;;  %v2102_v52 = vmul.f32 %v1718_v37, %v8476_v15  ;;  %v2104_v53 = vmul.f32 %v1720_v41, %v8478_v16  ;;  %v2105_v54 = vmul.f32 %v1721_v42, %v8485_v23  ;;  %v8519_v55 = vpop.f32.mrf.mxu0  ;;  %v8521_v56 = vpop.f32.mrf.mxu1  ;;  %1498 = vmatprep.mubr.bf16.mxu1 %v11598_v0 }
  0xfa   : > { %7295 = vtanh.f32 %v3252_v47  ;;  %v3253_v57 = vmul.f32 0.7978846, %v2869_v48  ;;  %v2871_v60 = vadd.f32 %v2487_v51, %v8468_v6  ;;  %v1723_v61 = vmul.f32 %v8487_v24, %v8487_v24 }
  0xfb   : > { %v2486_v63 = vmul.f32 0.044715, %v2102_v52  ;;  %v2488_v1 = vmul.f32 0.044715, %v2104_v53  ;;  %v2489_v2 = vmul.f32 0.044715, %v2105_v54  ;;  %v1722_v3 = vmul.f32 %v8496_v32, %v8496_v32  ;;  %v8532_v4 = vpop.f32.mrf.mxu0  ;;  %v8534_v7 = vpop.f32.mrf.mxu1 }
  0xfc   : > { %7297 = vtanh.f32 %v3253_v57  ;;  %v3255_v8 = vmul.f32 0.7978846, %v2871_v60  ;;  %v2107_v9 = vmul.f32 %v1723_v61, %v8487_v24  ;;  %v1724_v10 = vmul.f32 %v8498_v33, %v8498_v33 }
  0xfd   : > { %v2870_v11 = vadd.f32 %v2486_v63, %v8476_v15  ;;  %v2872_v12 = vadd.f32 %v2488_v1, %v8478_v16  ;;  %v2873_v13 = vadd.f32 %v2489_v2, %v8485_v23  ;;  %v2106_v14 = vmul.f32 %v1722_v3, %v8496_v32  ;;  %v8543_v17 = vpop.f32.mrf.mxu0  ;;  %v8545_v18 = vpop.f32.mrf.mxu1  ;;  %v7261_v2 = vld [vmem:[%s11596_s1 + $0xe0] sm:$0xff]  }
  0xfe   : > { %7299 = vtanh.f32 %v3255_v8  ;;  %v2491_v19 = vmul.f32 0.044715, %v2107_v9  ;;  %v2108_v20 = vmul.f32 %v1724_v10, %v8498_v33  ;;  %v1725_v21 = vmul.f32 %v8508_v45, %v8508_v45 }
  0xff   : > { %v7282_v22 = vpop.eup %7281  ;;  %v3254_v25 = vmul.f32 0.7978846, %v2870_v11  ;;  %v3256_v26 = vmul.f32 0.7978846, %v2872_v12  ;;  %v3257_v27 = vmul.f32 0.7978846, %v2873_v13  ;;  %v1727_v28 = vmul.f32 %v8511_v46, %v8511_v46  ;;  %v8552_v29 = vpop.f32.mrf.mxu0  ;;  %6694 = vmatmul.mubr.msk.bf16.gmra.mxu0 %vm522_vm2, %v7260_v62 }
 0x100   : > { %v8555_v30 = vpop.f32.mrf.mxu1  ;;  %v7284_v31 = vpop.eup %7283  ;;  %v4013_v34 = vadd.f32 1.0, %v7282_v22  ;;  %v2875_v35 = vadd.f32 %v2491_v19, %v8487_v24  ;;  %v2490_v36 = vmul.f32 0.044715, %v2106_v14  ;;  %v2492_v37 = vmul.f32 0.044715, %v2108_v20  ;;  %6742 = vmatmul.mubr.msk.bf16.gmra.mxu1 %vm522_vm2, %v7260_v62  ;;  %995 = vmatprep.mubr.bf16.mxu0 %v11598_v0 }
 0x101   : > { %v7286_v38 = vpop.eup %7285  ;;  %v4015_v41 = vadd.f32 1.0, %v7284_v31  ;;  %7301 = vtanh.f32 %v3254_v25  ;;  %v2109_v42 = vmul.f32 %v1725_v21, %v8508_v45  ;;  %v2111_v47 = vmul.f32 %v1727_v28, %v8511_v46  ;;  %v8563_v48 = vpop.f32.mrf.mxu0  ;;  %1508 = vmatprep.mubr.bf16.mxu1 %v11598_v0 }
 0x102   : > { %v8565_v51 = vpop.f32.mrf.mxu1  ;;  %v7288_v52 = vpop.eup %7287  ;;  %v4397_v53 = vmul.f32 0.5, %v4013_v34  ;;  %v4014_v54 = vadd.f32 1.0, %v7286_v38  ;;  %7303 = vtanh.f32 %v3256_v26  ;;  %v3259_v57 = vmul.f32 0.7978846, %v2875_v35 }
 0x103   : > { %v4399_v60 = vmul.f32 0.5, %v4015_v41  ;;  %v4016_v61 = vadd.f32 1.0, %v7288_v52  ;;  %7305 = vtanh.f32 %v3257_v27  ;;  %v2874_v62 = vadd.f32 %v2490_v36, %v8496_v32  ;;  %v8573_v63 = vpop.f32.mrf.mxu0 }
 0x104   : > { %v8575_v1 = vpop.f32.mrf.mxu1  ;;  %v7290_v3 = vpop.eup %7289  ;;  %v4781_v8 = vmul.f32 %v4397_v53, %v8418_v39  ;;  %v4398_v9 = vmul.f32 0.5, %v4014_v54  ;;  %7307 = vtanh.f32 %v3259_v57  ;;  %v2876_v10 = vadd.f32 %v2492_v37, %v8498_v33 }
 0x105   : > { %v7292_v11 = vpop.eup %7291  ;;  %v4783_v12 = vmul.f32 %v4399_v60, %v8421_v40  ;;  %v4400_v13 = vmul.f32 0.5, %v4016_v61  ;;  %v4017_v14 = vadd.f32 1.0, %v7290_v3  ;;  %v3258_v19 = vmul.f32 0.7978846, %v2874_v62  ;;  %v8583_v20 = vpop.f32.mrf.mxu0 }
 0x106   : > { %v8585_v21 = vpop.f32.mrf.mxu1  ;;  %v7294_v22 = vpop.eup %7293  ;;  %v4782_v25 = vmul.f32 %v4398_v9, %v8430_v43  ;;  %v4019_v26 = vadd.f32 1.0, %v7292_v11  ;;  %v3260_v27 = vmul.f32 0.7978846, %v2876_v10  ;;  %v2493_v39 = vmul.f32 0.044715, %v2109_v42 }
 0x107   : > { %v7296_v28 = vpop.eup %7295  ;;  %v4784_v31 = vmul.f32 %v4400_v13, %v8432_v44  ;;  %v4401_v34 = vmul.f32 0.5, %v4017_v14  ;;  %v4018_v35 = vadd.f32 1.0, %v7294_v22  ;;  %7309 = vtanh.f32 %v3258_v19  ;;  %v8589_v40 = vpop.f32.mrf.mxu0  ;;  %6695 = vmatmul.mubr.msk.bf16.gmra.mxu0 %vm522_vm2, %v7261_v2 }
 0x108   : > { %v8592_v36 = vpop.f32.mrf.mxu1  ;;  %v6959_v37 = vpack.c.bf16 %v4782_v25, %v4781_v8  ;;  %v4403_v38 = vmul.f32 0.5, %v4019_v26  ;;  %v4020_v41 = vadd.f32 1.0, %v7296_v28  ;;  %7311 = vtanh.f32 %v3260_v27  ;;  %6743 = vmatmul.mubr.msk.bf16.gmra.mxu1 %vm522_vm2, %v7261_v2  ;;  %1005 = vmatprep.mubr.bf16.mxu0 %v11598_v0 }
 0x109   : > { %v7298_v43 = vpop.eup %7297  ;;  %v6960_v44 = vpack.c.bf16 %v4784_v31, %v4783_v12  ;;  %v4785_v42 = vmul.f32 %v4401_v34, %v8440_v49  ;;  %v4402_v52 = vmul.f32 0.5, %v4018_v35  ;;  %v2877_v53 = vadd.f32 %v2493_v39, %v8508_v45  ;;  %v8598_v54 = vpop.f32.mrf.mxu0  ;;  %1518 = vmatprep.mubr.bf16.mxu1 %v11598_v0 }
 0x10a   : > { %v8600_v57 = vpop.f32.mrf.mxu1  ;;  %6317 = vst [vmem:[%s8604_s12] sm:$0xff] %v6959_v37  ;;  %v4787_v60 = vmul.f32 %v4403_v38, %v8442_v50  ;;  %v4404_v61 = vmul.f32 0.5, %v4020_v41  ;;  %v4021_v62 = vadd.f32 1.0, %v7298_v43  ;;  %v2495_v2 = vmul.f32 0.044715, %v2111_v47  ;;  %v7262_v50 = vld [vmem:[%s11596_s1 + $0xe8] sm:$0xff]  }
 0x10b   : > { %v7300_v49 = vpop.eup %7299  ;;  %6318 = vst [vmem:[%s8604_s12 + $0x8] sm:$0xff] %v6960_v44  ;;  %v4786_v3 = vmul.f32 %v4402_v52, %v8453_v58  ;;  %v3261_v8 = vmul.f32 0.7978846, %v2877_v53  ;;  %v1726_v9 = vmul.f32 %v8519_v55, %v8519_v55  ;;  %v1728_v10 = vmul.f32 %v8521_v56, %v8521_v56  ;;  %v8614_v11 = vpop.f32.mrf.mxu0 }
 0x10c   : > { %v8616_v12 = vpop.f32.mrf.mxu1  ;;  %v4788_v47 = vmul.f32 %v4404_v61, %v8455_v59  ;;  %v4405_v13 = vmul.f32 0.5, %v4021_v62  ;;  %v4023_v58 = vadd.f32 1.0, %v7300_v49  ;;  %v2879_v14 = vadd.f32 %v2495_v2, %v8511_v46 }
 0x10d   : > { %v6961_v19 = vpack.c.bf16 %v4786_v3, %v4785_v42  ;;  %7313 = vtanh.f32 %v3261_v8  ;;  %v2110_v22 = vmul.f32 %v1726_v9, %v8519_v55  ;;  %v2112_v25 = vmul.f32 %v1728_v10, %v8521_v56  ;;  %v8625_v26 = vpop.f32.mrf.mxu0 }
 0x10e   : > { %v8627_v27 = vpop.f32.mrf.mxu1  ;;  %v7302_v39 = vpop.eup %7301  ;;  %v6962_v28 = vpack.c.bf16 %v4788_v47, %v4787_v60  ;;  %v4789_v59 = vmul.f32 %v4405_v13, %v8465_v5  ;;  %v4407_v31 = vmul.f32 0.5, %v4023_v58  ;;  %v3263_v34 = vmul.f32 0.7978846, %v2879_v14 }
 0x10f   : > { %v7304_v35 = vpop.eup %7303  ;;  %6319 = vst [vmem:[%s8604_s12 + $0x10] sm:$0xff] %v6961_v19  ;;  %v4022_v37 = vadd.f32 1.0, %v7302_v39  ;;  %v2494_v38 = vmul.f32 0.044715, %v2110_v22  ;;  %v2496_v41 = vmul.f32 0.044715, %v2112_v25  ;;  %v1729_v43 = vmul.f32 %v8532_v4, %v8532_v4  ;;  %v8633_v44 = vpop.f32.mrf.mxu0  ;;  %6696 = vmatmul.mubr.msk.bf16.gmra.mxu0 %vm522_vm2, %v7262_v50 }
 0x110   : > { %v8636_v42 = vpop.f32.mrf.mxu1  ;;  %v7306_v52 = vpop.eup %7305  ;;  %6320 = vst [vmem:[%s8604_s12 + $0x18] sm:$0xff] %v6962_v28  ;;  %v4791_v5 = vmul.f32 %v4407_v31, %v8468_v6  ;;  %v4024_v53 = vadd.f32 1.0, %v7304_v35  ;;  %7315 = vtanh.f32 %v3263_v34  ;;  %v1731_v60 = vmul.f32 %v8534_v7, %v8534_v7  ;;  %6744 = vmatmul.mubr.msk.bf16.gmra.mxu1 %vm522_vm2, %v7262_v50  ;;  %1015 = vmatprep.mubr.bf16.mxu0 %v11598_v0  ;;  %v7263_v39 = vld [vmem:[%s11596_s1 + $0xf0] sm:$0xff]  }
 0x111   : > { %v7308_v61 = vpop.eup %7307  ;;  %v4406_v62 = vmul.f32 0.5, %v4022_v37  ;;  %v4025_v2 = vadd.f32 1.0, %v7306_v52  ;;  %v2878_v49 = vadd.f32 %v2494_v38, %v8519_v55  ;;  %v2880_v3 = vadd.f32 %v2496_v41, %v8521_v56  ;;  %v8646_v8 = vpop.f32.mrf.mxu0  ;;  %1528 = vmatprep.mubr.bf16.mxu1 %v11598_v0 }
 0x112   : > { %v8648_v9 = vpop.f32.mrf.mxu1  ;;  %v4408_v6 = vmul.f32 0.5, %v4024_v53  ;;  %v4027_v10 = vadd.f32 1.0, %v7308_v61  ;;  %v2113_v47 = vmul.f32 %v1729_v43, %v8532_v4  ;;  %v2115_v50 = vmul.f32 %v1731_v60, %v8534_v7 }
 0x113   : > { %v4790_v13 = vmul.f32 %v4406_v62, %v8476_v15  ;;  %v4409_v58 = vmul.f32 0.5, %v4025_v2  ;;  %v3262_v14 = vmul.f32 0.7978846, %v2878_v49  ;;  %v3264_v19 = vmul.f32 0.7978846, %v2880_v3  ;;  %v8654_v22 = vpop.f32.mrf.mxu0 }
 0x114   : > { %v8656_v25 = vpop.f32.mrf.mxu1  ;;  %v7310_v28 = vpop.eup %7309  ;;  %v4792_v31 = vmul.f32 %v4408_v6, %v8478_v16  ;;  %v4411_v34 = vmul.f32 0.5, %v4027_v10  ;;  %v2497_v35 = vmul.f32 0.044715, %v2113_v47  ;;  %v2499_v37 = vmul.f32 0.044715, %v2115_v50 }
 0x115   : > { %v7312_v38 = vpop.eup %7311  ;;  %v6963_v15 = vpack.c.bf16 %v4790_v13, %v4789_v59  ;;  %v4793_v41 = vmul.f32 %v4409_v58, %v8485_v23  ;;  %v4026_v43 = vadd.f32 1.0, %v7310_v28  ;;  %7317 = vtanh.f32 %v3262_v14  ;;  %v8664_v61 = vpop.f32.mrf.mxu0 }
 0x116   : > { %v6964_v52 = vpack.c.bf16 %v4792_v31, %v4791_v5  ;;  %v4795_v53 = vmul.f32 %v4411_v34, %v8487_v24  ;;  %v4028_v60 = vadd.f32 1.0, %v7312_v38  ;;  %7319 = vtanh.f32 %v3264_v19  ;;  %v8666_v62 = vpop.f32.mrf.mxu1 }
 0x117   : > { %6321 = vst [vmem:[%s8604_s12 + $0x20] sm:$0xff] %v6963_v15  ;;  %v4410_v16 = vmul.f32 0.5, %v4026_v43  ;;  %v2881_v2 = vadd.f32 %v2497_v35, %v8532_v4  ;;  %v2883_v59 = vadd.f32 %v2499_v37, %v8534_v7  ;;  %v1730_v23 = vmul.f32 %v8543_v17, %v8543_v17  ;;  %6697 = vmatmul.mubr.msk.bf16.gmra.mxu0 %vm522_vm2, %v7263_v39  ;;  %v8690_v28 = vpop.f32.mrf.mxu0 }
 0x118   : > { %6322 = vst [vmem:[%s8604_s12 + $0x28] sm:$0xff] %v6964_v52  ;;  %v4412_v5 = vmul.f32 0.5, %v4028_v60  ;;  %v1732_v24 = vmul.f32 %v8545_v18, %v8545_v18  ;;  %v1733_v49 = vmul.f32 %v8552_v29, %v8552_v29  ;;  %v1735_v3 = vmul.f32 %v8555_v30, %v8555_v30  ;;  %6745 = vmatmul.mubr.msk.bf16.gmra.mxu1 %vm522_vm2, %v7263_v39  ;;  %v8692_v31 = vpop.f32.mrf.mxu1 }
 0x119   : > { %1025 = vmatprep.mubr.bf16.mxu0 %v11598_v0  ;;  %v4794_v6 = vmul.f32 %v4410_v16, %v8496_v32  ;;  %v3265_v10 = vmul.f32 0.7978846, %v2881_v2  ;;  %v3267_v47 = vmul.f32 0.7978846, %v2883_v59  ;;  %v2114_v50 = vmul.f32 %v1730_v23, %v8543_v17  ;;  %1538 = vmatprep.mubr.bf16.mxu1 %v11598_v0 }
 0x11a   : > { %v7314_v13 = vpop.eup %7313  ;;  %v4796_v58 = vmul.f32 %v4412_v5, %v8498_v33  ;;  %v2116_v14 = vmul.f32 %v1732_v24, %v8545_v18  ;;  %v2117_v19 = vmul.f32 %v1733_v49, %v8552_v29  ;;  %v2119_v39 = vmul.f32 %v1735_v3, %v8555_v30  ;;  %v7264_v33 = vld [vmem:[%s11596_s1 + $0xf8] sm:$0xff]   ;;  %v8706_v5 = vpop.f32.mrf.mxu0 }
 0x11b   : > { %v6965_v32 = vpack.c.bf16 %v4794_v6, %v4793_v41  ;;  %v4029_v34 = vadd.f32 1.0, %v7314_v13  ;;  %7321 = vtanh.f32 %v3265_v10  ;;  %v2498_v35 = vmul.f32 0.044715, %v2114_v50  ;;  %v8708_v24 = vpop.f32.mrf.mxu1 }
 0x11c   : > { %v6966_v37 = vpack.c.bf16 %v4796_v58, %v4795_v53  ;;  %7323 = vtanh.f32 %v3267_v47  ;;  %v2500_v38 = vmul.f32 0.044715, %v2116_v14  ;;  %v2501_v15 = vmul.f32 0.044715, %v2117_v19 }
 0x11d   : > { %v7316_v43 = vpop.eup %7315  ;;  %6323 = vst [vmem:[%s8604_s12 + $0x30] sm:$0xff] %v6965_v32  ;;  %v4413_v52 = vmul.f32 0.5, %v4029_v34  ;;  %v2882_v60 = vadd.f32 %v2498_v35, %v8543_v17  ;;  %v2503_v16 = vmul.f32 0.044715, %v2119_v39  ;;  %v1734_v41 = vmul.f32 %v8563_v48, %v8563_v48 }
 0x11e   : > { %6324 = vst [vmem:[%s8604_s12 + $0x38] sm:$0xff] %v6966_v37  ;;  %v4031_v2 = vadd.f32 1.0, %v7316_v43  ;;  %v2884_v59 = vadd.f32 %v2500_v38, %v8545_v18  ;;  %v2885_v23 = vadd.f32 %v2501_v15, %v8552_v29  ;;  %v1736_v53 = vmul.f32 %v8565_v51, %v8565_v51  ;;  %v8725_v37 = vpop.f32.mrf.mxu0 }
 0x11f   : > { %v8711_v49 = vmul.f32 %v4413_v52, %v8508_v45  ;;  %v3266_v3 = vmul.f32 0.7978846, %v2882_v60  ;;  %v2887_v6 = vadd.f32 %v2503_v16, %v8555_v30  ;;  %v2118_v10 = vmul.f32 %v1734_v41, %v8563_v48  ;;  %6698 = vmatmul.mubr.msk.bf16.gmra.mxu0 %vm522_vm2, %v7264_v33 }
 0x120   : > { %v4415_v47 = vmul.f32 0.5, %v4031_v2  ;;  %v3268_v50 = vmul.f32 0.7978846, %v2884_v59  ;;  %v3269_v13 = vmul.f32 0.7978846, %v2885_v23  ;;  %v2120_v58 = vmul.f32 %v1736_v53, %v8565_v51  ;;  %6746 = vmatmul.mubr.msk.bf16.gmra.mxu1 %vm522_vm2, %v7264_v33  ;;  %1035 = vmatprep.mubr.bf16.mxu0 %v11598_v0  ;;  %v8727_v33 = vpop.f32.mrf.mxu1 }
 0x121   : > { %7325 = vtanh.f32 %v3266_v3  ;;  %v3271_v14 = vmul.f32 0.7978846, %v2887_v6  ;;  %v2502_v45 = vmul.f32 0.044715, %v2118_v10  ;;  %v1737_v19 = vmul.f32 %v8573_v63, %v8573_v63  ;;  %1548 = vmatprep.mubr.bf16.mxu1 %v11598_v0 }
 0x122   : > { %v7318_v39 = vpop.eup %7317  ;;  %v4799_v32 = vmul.f32 %v4415_v47, %v8511_v46  ;;  %7327 = vtanh.f32 %v3268_v50  ;;  %v2504_v34 = vmul.f32 0.044715, %v2120_v58  ;;  %v1739_v35 = vmul.f32 %v8575_v1, %v8575_v1  ;;  %v7265_v46 = vld [vmem:[%s11596_s1 + $0x100] sm:$0xff]   ;;  %v8740_v50 = vpop.f32.mrf.mxu0 }
 0x123   : > { %v7320_v38 = vpop.eup %7319  ;;  %v4030_v15 = vadd.f32 1.0, %v7318_v39  ;;  %7329 = vtanh.f32 %v3269_v13  ;;  %v2886_v43 = vadd.f32 %v2502_v45, %v8563_v48  ;;  %v2121_v52 = vmul.f32 %v1737_v19, %v8573_v63  ;;  %v8742_v13 = vpop.f32.mrf.mxu1 }
 0x124   : > { %v4032_v60 = vadd.f32 1.0, %v7320_v38  ;;  %7331 = vtanh.f32 %v3271_v14  ;;  %v2888_v16 = vadd.f32 %v2504_v34, %v8565_v51  ;;  %v2123_v41 = vmul.f32 %v1739_v35, %v8575_v1 }
 0x125   : > { %v4414_v2 = vmul.f32 0.5, %v4030_v15  ;;  %v3270_v59 = vmul.f32 0.7978846, %v2886_v43  ;;  %v2505_v23 = vmul.f32 0.044715, %v2121_v52  ;;  %v1738_v53 = vmul.f32 %v8583_v20, %v8583_v20 }
 0x126   : > { %v4416_v3 = vmul.f32 0.5, %v4032_v60  ;;  %v3272_v6 = vmul.f32 0.7978846, %v2888_v16  ;;  %v2507_v10 = vmul.f32 0.044715, %v2123_v41  ;;  %v1740_v47 = vmul.f32 %v8585_v21, %v8585_v21 }
 0x127   : > { %v4798_v58 = vmul.f32 %v4414_v2, %v8519_v55  ;;  %7333 = vtanh.f32 %v3270_v59  ;;  %v2889_v14 = vadd.f32 %v2505_v23, %v8573_v63  ;;  %v2122_v45 = vmul.f32 %v1738_v53, %v8583_v20  ;;  %6699 = vmatmul.mubr.msk.bf16.gmra.mxu0 %vm522_vm2, %v7265_v46  ;;  %v8755_v2 = vpop.f32.mrf.mxu0  ;;  %v8757_v59 = vpop.f32.mrf.mxu1  ;;  %v7266_v53 = vld [vmem:[%s11596_s1 + $0x108] sm:$0xff]  }
 0x128   : > { %v7322_v19 = vpop.eup %7321  ;;  %v4800_v39 = vmul.f32 %v4416_v3, %v8521_v56  ;;  %7335 = vtanh.f32 %v3272_v6  ;;  %v2891_v34 = vadd.f32 %v2507_v10, %v8575_v1  ;;  %v2124_v35 = vmul.f32 %v1740_v47, %v8585_v21  ;;  %6747 = vmatmul.mubr.msk.bf16.gmra.mxu1 %vm522_vm2, %v7265_v46  ;;  %1045 = vmatprep.mubr.bf16.mxu0 %v11598_v0 }
 0x129   : > { %v7324_v55 = vpop.eup %7323  ;;  %v6967_v38 = vpack.c.bf16 %v4798_v58, %v8711_v49  ;;  %v4033_v15 = vadd.f32 1.0, %v7322_v19  ;;  %v3273_v43 = vmul.f32 0.7978846, %v2889_v14  ;;  %v2506_v52 = vmul.f32 0.044715, %v2122_v45  ;;  %1558 = vmatprep.mubr.bf16.mxu1 %v11598_v0 }
 0x12a   : > { %v6968_v56 = vpack.c.bf16 %v4800_v39, %v4799_v32  ;;  %v4035_v60 = vadd.f32 1.0, %v7324_v55  ;;  %v3275_v16 = vmul.f32 0.7978846, %v2891_v34  ;;  %v2508_v41 = vmul.f32 0.044715, %v2124_v35  ;;  %v8778_v55 = vpop.f32.mrf.mxu0 }
 0x12b   : > { %6325 = vst [vmem:[%s8604_s12 + $0x40] sm:$0xff] %v6967_v38  ;;  %v4417_v46 = vmul.f32 0.5, %v4033_v15  ;;  %7337 = vtanh.f32 %v3273_v43  ;;  %v2890_v23 = vadd.f32 %v2506_v52, %v8583_v20  ;;  %v1741_v49 = vmul.f32 %v8589_v40, %v8589_v40  ;;  %v8780_v38 = vpop.f32.mrf.mxu1 }
 0x12c   : > { %6326 = vst [vmem:[%s8604_s12 + $0x48] sm:$0xff] %v6968_v56  ;;  %v4419_v32 = vmul.f32 0.5, %v4035_v60  ;;  %7339 = vtanh.f32 %v3275_v16  ;;  %v2892_v3 = vadd.f32 %v2508_v41, %v8585_v21  ;;  %v1743_v6 = vmul.f32 %v8592_v36, %v8592_v36 }
 0x12d   : > { %v4801_v10 = vmul.f32 %v4417_v46, %v8532_v4  ;;  %v3274_v47 = vmul.f32 0.7978846, %v2890_v23  ;;  %v2125_v58 = vmul.f32 %v1741_v49, %v8589_v40  ;;  %v1742_v14 = vmul.f32 %v8598_v54, %v8598_v54 }
 0x12e   : > { %v7326_v45 = vpop.eup %7325  ;;  %v4803_v19 = vmul.f32 %v4419_v32, %v8534_v7  ;;  %v3276_v39 = vmul.f32 0.7978846, %v2892_v3  ;;  %v2127_v34 = vmul.f32 %v1743_v6, %v8592_v36  ;;  %v1744_v35 = vmul.f32 %v8600_v57, %v8600_v57 }
 0x12f   : > { %v7328_v4 = vpop.eup %7327  ;;  %v4034_v15 = vadd.f32 1.0, %v7326_v45  ;;  %7341 = vtanh.f32 %v3274_v47  ;;  %v2509_v43 = vmul.f32 0.044715, %v2125_v58  ;;  %v2126_v52 = vmul.f32 %v1742_v14, %v8598_v54  ;;  %6700 = vmatmul.mubr.msk.bf16.gmra.mxu0 %vm522_vm2, %v7266_v53  ;;  %v8790_v14 = vpop.f32.mrf.mxu0 }
 0x130   : > { %v7330_v56 = vpop.eup %7329  ;;  %v4036_v7 = vadd.f32 1.0, %v7328_v4  ;;  %7343 = vtanh.f32 %v3276_v39  ;;  %v2511_v60 = vmul.f32 0.044715, %v2127_v34  ;;  %v2128_v16 = vmul.f32 %v1744_v35, %v8600_v57  ;;  %6748 = vmatmul.mubr.msk.bf16.gmra.mxu1 %vm522_vm2, %v7266_v53  ;;  %1055 = vmatprep.mubr.bf16.mxu0 %v11598_v0  ;;  %v8792_v45 = vpop.f32.mrf.mxu1  ;;  %v7267_v4 = vld [vmem:[%s11596_s1 + $0x110] sm:$0xff]  }
 0x131   : > { %v7332_v41 = vpop.eup %7331  ;;  %v4418_v46 = vmul.f32 0.5, %v4034_v15  ;;  %v4037_v23 = vadd.f32 1.0, %v7330_v56  ;;  %v2893_v49 = vadd.f32 %v2509_v43, %v8589_v40  ;;  %v2510_v32 = vmul.f32 0.044715, %v2126_v52  ;;  %1568 = vmatprep.mubr.bf16.mxu1 %v11598_v0 }
 0x132   : > { %v4420_v3 = vmul.f32 0.5, %v4036_v7  ;;  %v4039_v6 = vadd.f32 1.0, %v7332_v41  ;;  %v2895_v47 = vadd.f32 %v2511_v60, %v8592_v36  ;;  %v2512_v58 = vmul.f32 0.044715, %v2128_v16  ;;  %v8805_v0 = vpop.f32.mrf.mxu1 }
 0x133   : > { %v4802_v53 = vmul.f32 %v4418_v46, %v8543_v17  ;;  %v4421_v39 = vmul.f32 0.5, %v4037_v23  ;;  %v3277_v34 = vmul.f32 0.7978846, %v2893_v49  ;;  %v2894_v35 = vadd.f32 %v2510_v32, %v8598_v54  ;;  %v8803_v32 = vpop.f32.mrf.mxu0 }
 0x134   : > { %v7334_v15 = vpop.eup %7333  ;;  %v4804_v43 = vmul.f32 %v4420_v3, %v8545_v18  ;;  %v4423_v52 = vmul.f32 0.5, %v4039_v6  ;;  %v3279_v56 = vmul.f32 0.7978846, %v2895_v47  ;;  %v2896_v7 = vadd.f32 %v2512_v58, %v8600_v57 }
 0x135   : > { %v7336_v60 = vpop.eup %7335  ;;  %v6969_v16 = vpack.c.bf16 %v4802_v53, %v4801_v10  ;;  %v4805_v17 = vmul.f32 %v4421_v39, %v8552_v29  ;;  %v4038_v41 = vadd.f32 1.0, %v7334_v15  ;;  %7345 = vtanh.f32 %v3277_v34 }
 0x136   : > { %v6970_v46 = vpack.c.bf16 %v4804_v43, %v4803_v19  ;;  %v4807_v23 = vmul.f32 %v4423_v52, %v8555_v30  ;;  %v4040_v49 = vadd.f32 1.0, %v7336_v60  ;;  %7347 = vtanh.f32 %v3279_v56 }
 0x137   : > { %6327 = vst [vmem:[%s8604_s12 + $0x50] sm:$0xff] %v6969_v16  ;;  %v4422_v18 = vmul.f32 0.5, %v4038_v41  ;;  %v3278_v3 = vmul.f32 0.7978846, %v2894_v35  ;;  %v3280_v6 = vmul.f32 0.7978846, %v2896_v7  ;;  %v1745_v10 = vmul.f32 %v8614_v11, %v8614_v11  ;;  %6701 = vmatmul.mubr.msk.bf16.gmra.mxu0 %vm522_vm2, %v7267_v4  ;;  %v8825_v7 = vpop.f32.mrf.mxu0 }
 0x138   : > { %v7338_v29 = vpop.eup %7337  ;;  %6328 = vst [vmem:[%s8604_s12 + $0x58] sm:$0xff] %v6970_v46  ;;  %v4424_v19 = vmul.f32 0.5, %v4040_v49  ;;  %v1747_v30 = vmul.f32 %v8616_v12, %v8616_v12  ;;  %v1746_v47 = vmul.f32 %v8625_v26, %v8625_v26  ;;  %v1748_v58 = vmul.f32 %v8627_v27, %v8627_v27  ;;  %6749 = vmatmul.mubr.msk.bf16.gmra.mxu1 %vm522_vm2, %v7267_v4  ;;  %v8827_v4 = vpop.f32.mrf.mxu1  ;;  %v7268_v46 = vld [vmem:[%s11596_s1 + $0x118] sm:$0xff]  }
 0x139   : > { %v11609_v53 = vmov 0   ;;  %v7340_v39 = vpop.eup %7339  ;;  %v4806_v34 = vmul.f32 %v4422_v18, %v8563_v48  ;;  %v4041_v35 = vadd.f32 1.0, %v7338_v29  ;;  %7349 = vtanh.f32 %v3278_v3 }
 0x13a   : > { %1065 = vmatprep.mubr.bf16.mxu0 %v11609_v53  ;;  %v2129_v15 = vmul.f32 %v1745_v10, %v8614_v11  ;;  %1578 = vmatprep.mubr.bf16.mxu1 %v11609_v53  ;;  %v4808_v43 = vmul.f32 %v4424_v19, %v8565_v51  ;;  %v4043_v52 = vadd.f32 1.0, %v7340_v39  ;;  %7351 = vtanh.f32 %v3280_v6 }
 0x13b   : > { %v2131_v56 = vmul.f32 %v1747_v30, %v8616_v12  ;;  %v6971_v60 = vpack.c.bf16 %v4806_v34, %v4805_v17  ;;  %v4425_v48 = vmul.f32 0.5, %v4041_v35  ;;  %v2130_v41 = vmul.f32 %v1746_v47, %v8625_v26 }
 0x13c   : > { %v2513_v16 = vmul.f32 0.044715, %v2129_v15  ;;  %v7342_v51 = vpop.eup %7341  ;;  %v6972_v49 = vpack.c.bf16 %v4808_v43, %v4807_v23  ;;  %v4427_v18 = vmul.f32 0.5, %v4043_v52  ;;  %v2132_v6 = vmul.f32 %v1748_v58, %v8627_v27  ;;  %v8840_v23 = vpop.f32.mrf.mxu0 }
 0x13d   : > { %v2515_v3 = vmul.f32 0.044715, %v2131_v56  ;;  %v7344_v10 = vpop.eup %7343  ;;  %6329 = vst [vmem:[%s8604_s12 + $0x60] sm:$0xff] %v6971_v60  ;;  %v4809_v29 = vmul.f32 %v4425_v48, %v8573_v63  ;;  %v4042_v17 = vadd.f32 1.0, %v7342_v51  ;;  %v2514_v30 = vmul.f32 0.044715, %v2130_v41  ;;  %v8842_v15 = vpop.f32.mrf.mxu1 }
 0x13e   : > { %v2897_v19 = vadd.f32 %v2513_v16, %v8614_v11  ;;  %6330 = vst [vmem:[%s8604_s12 + $0x68] sm:$0xff] %v6972_v49  ;;  %v4811_v47 = vmul.f32 %v4427_v18, %v8575_v1  ;;  %v4044_v39 = vadd.f32 1.0, %v7344_v10  ;;  %v2516_v35 = vmul.f32 0.044715, %v2132_v6  ;;  %v8858_v10 = vpop.f32.mrf.mxu0 }
 0x13f   : > { %v2899_v34 = vadd.f32 %v2515_v3, %v8616_v12  ;;  %v4426_v58 = vmul.f32 0.5, %v4042_v17  ;;  %v2898_v52 = vadd.f32 %v2514_v30, %v8625_v26  ;;  %v1749_v63 = vmul.f32 %v8633_v44, %v8633_v44  ;;  %6702 = vmatmul.mubr.msk.bf16.gmra.mxu0 %vm522_vm2, %v7268_v46 }
 0x140   : > { %v3281_v43 = vmul.f32 0.7978846, %v2897_v19  ;;  %v4428_v56 = vmul.f32 0.5, %v4044_v39  ;;  %v2900_v1 = vadd.f32 %v2516_v35, %v8627_v27  ;;  %v1751_v48 = vmul.f32 %v8636_v42, %v8636_v42  ;;  %6750 = vmatmul.mubr.msk.bf16.gmra.mxu1 %vm522_vm2, %v7268_v46  ;;  %1075 = vmatprep.mubr.bf16.mxu0 %v11609_v53  ;;  %v8860_v46 = vpop.f32.mrf.mxu1  ;;  %v7269_v39 = vld [vmem:[%s11596_s1 + $0x120] sm:$0xff]  }
 0x141   : > { %v3283_v60 = vmul.f32 0.7978846, %v2899_v34  ;;  %v4810_v16 = vmul.f32 %v4426_v58, %v8583_v20  ;;  %v3282_v41 = vmul.f32 0.7978846, %v2898_v52  ;;  %v2133_v51 = vmul.f32 %v1749_v63, %v8633_v44  ;;  %1588 = vmatprep.mubr.bf16.mxu1 %v11609_v53 }
 0x142   : > { %7353 = vtanh.f32 %v3281_v43  ;;  %v7346_v49 = vpop.eup %7345  ;;  %v4812_v18 = vmul.f32 %v4428_v56, %v8585_v21  ;;  %v3284_v3 = vmul.f32 0.7978846, %v2900_v1  ;;  %v2135_v6 = vmul.f32 %v1751_v48, %v8636_v42  ;;  %v8877_v48 = vpop.f32.mrf.mxu0 }
 0x143   : > { %7355 = vtanh.f32 %v3283_v60  ;;  %v7348_v17 = vpop.eup %7347  ;;  %v6973_v20 = vpack.c.bf16 %v4810_v16, %v4809_v29  ;;  %v4045_v19 = vadd.f32 1.0, %v7346_v49  ;;  %v2517_v30 = vmul.f32 0.044715, %v2133_v51  ;;  %v8879_v16 = vpop.f32.mrf.mxu1 }
 0x144   : > { %7357 = vtanh.f32 %v3282_v41  ;;  %v6974_v21 = vpack.c.bf16 %v4812_v18, %v4811_v47  ;;  %v4047_v34 = vadd.f32 1.0, %v7348_v17  ;;  %v2519_v35 = vmul.f32 0.044715, %v2135_v6 }
 0x145   : > { %7359 = vtanh.f32 %v3284_v3  ;;  %6331 = vst [vmem:[%s8604_s12 + $0x70] sm:$0xff] %v6973_v20  ;;  %v4429_v58 = vmul.f32 0.5, %v4045_v19  ;;  %v2901_v43 = vadd.f32 %v2517_v30, %v8633_v44  ;;  %v1750_v52 = vmul.f32 %v8646_v8, %v8646_v8 }
 0x146   : > { %v1752_v29 = vmul.f32 %v8648_v9, %v8648_v9  ;;  %v7350_v63 = vpop.eup %7349  ;;  %6332 = vst [vmem:[%s8604_s12 + $0x78] sm:$0xff] %v6974_v21  ;;  %v4431_v56 = vmul.f32 0.5, %v4047_v34  ;;  %v2903_v60 = vadd.f32 %v2519_v35, %v8636_v42  ;;  %v1753_v47 = vmul.f32 %v8654_v22, %v8654_v22 }
 0x147   : > { %v1755_v1 = vmul.f32 %v8656_v25, %v8656_v25  ;;  %v7352_v41 = vpop.eup %7351  ;;  %v4813_v51 = vmul.f32 %v4429_v58, %v8589_v40  ;;  %v4046_v49 = vadd.f32 1.0, %v7350_v63  ;;  %v3285_v18 = vmul.f32 0.7978846, %v2901_v43  ;;  %6703 = vmatmul.mubr.msk.bf16.gmra.mxu0 %vm522_vm2, %v7269_v39  ;;  %v8891_v58 = vpop.f32.mrf.mxu0 }
 0x148   : > { %v2134_v3 = vmul.f32 %v1750_v52, %v8646_v8  ;;  %v4815_v6 = vmul.f32 %v4431_v56, %v8592_v36  ;;  %v4048_v17 = vadd.f32 1.0, %v7352_v41  ;;  %v3287_v20 = vmul.f32 0.7978846, %v2903_v60  ;;  %6751 = vmatmul.mubr.msk.bf16.gmra.mxu1 %vm522_vm2, %v7269_v39  ;;  %1085 = vmatprep.mubr.bf16.mxu0 %v11609_v53  ;;  %v8893_v43 = vpop.f32.mrf.mxu1 }
 0x149   : > { %v2136_v19 = vmul.f32 %v1752_v29, %v8648_v9  ;;  %v4430_v30 = vmul.f32 0.5, %v4046_v49  ;;  %7361 = vtanh.f32 %v3285_v18  ;;  %v2137_v40 = vmul.f32 %v1753_v47, %v8654_v22  ;;  %1598 = vmatprep.mubr.bf16.mxu1 %v11609_v53 }
 0x14a   : > { %v2518_v21 = vmul.f32 0.044715, %v2134_v3  ;;  %v4432_v34 = vmul.f32 0.5, %v4048_v17  ;;  %7363 = vtanh.f32 %v3287_v20  ;;  %v2139_v36 = vmul.f32 %v1755_v1, %v8656_v25 }
 0x14b   : > { %v2520_v35 = vmul.f32 0.044715, %v2136_v19  ;;  %v4814_v39 = vmul.f32 %v4430_v30, %v8598_v54  ;;  %v2521_v29 = vmul.f32 0.044715, %v2137_v40  ;;  %v1754_v63 = vmul.f32 %v8664_v61, %v8664_v61  ;;  %v8907_v30 = vpop.f32.mrf.mxu0 }
 0x14c   : > { %v2902_v52 = vadd.f32 %v2518_v21, %v8646_v8  ;;  %v4816_v56 = vmul.f32 %v4432_v34, %v8600_v57  ;;  %v2523_v47 = vmul.f32 0.044715, %v2139_v36  ;;  %v1756_v1 = vmul.f32 %v8666_v62, %v8666_v62  ;;  %v8909_v21 = vpop.f32.mrf.mxu1 }
 0x14d   : > { %v2904_v60 = vadd.f32 %v2520_v35, %v8648_v9  ;;  %v6975_v41 = vpack.c.bf16 %v4814_v39, %v4813_v51  ;;  %v2905_v18 = vadd.f32 %v2521_v29, %v8654_v22  ;;  %v2138_v54 = vmul.f32 %v1754_v63, %v8664_v61 }
 0x14e   : > { %v3286_v49 = vmul.f32 0.7978846, %v2902_v52  ;;  %v6976_v17 = vpack.c.bf16 %v4816_v56, %v4815_v6  ;;  %v2907_v19 = vadd.f32 %v2523_v47, %v8656_v25  ;;  %v2140_v57 = vmul.f32 %v1756_v1, %v8666_v62 }
 0x14f   : > { %v7354_v3 = vpop.eup %7353  ;;  %v3288_v20 = vmul.f32 0.7978846, %v2904_v60  ;;  %6333 = vst [vmem:[%s8604_s12 + $0x80] sm:$0xff] %v6975_v41  ;;  %v3289_v34 = vmul.f32 0.7978846, %v2905_v18  ;;  %v8917_v18 = vpop.f32.mrf.mxu1 }
 0x150   : > { %v7356_v40 = vpop.eup %7355  ;;  %v4049_v51 = vadd.f32 1.0, %v7354_v3  ;;  %7365 = vtanh.f32 %v3286_v49  ;;  %v2522_v35 = vmul.f32 0.044715, %v2138_v54  ;;  %6334 = vst [vmem:[%s8604_s12 + $0x88] sm:$0xff] %v6976_v17  ;;  %v3291_v6 = vmul.f32 0.7978846, %v2907_v19  ;;  %v8915_v49 = vpop.f32.mrf.mxu0 }
 0x151   : > { %v7358_v36 = vpop.eup %7357  ;;  %v4051_v39 = vadd.f32 1.0, %v7356_v40  ;;  %7367 = vtanh.f32 %v3288_v20  ;;  %v2524_v52 = vmul.f32 0.044715, %v2140_v57  ;;  %v1757_v20 = vmul.f32 %v8690_v28, %v8690_v28 }
 0x152   : > { %v7360_v29 = vpop.eup %7359  ;;  %v4433_v63 = vmul.f32 0.5, %v4049_v51  ;;  %v4050_v56 = vadd.f32 1.0, %v7358_v36  ;;  %7369 = vtanh.f32 %v3289_v34  ;;  %v2906_v60 = vadd.f32 %v2522_v35, %v8664_v61  ;;  %v7270_v34 = vld [vmem:[%s11596_s1 + $0x128] sm:$0xff]  }
 0x153   : > { %v4435_v47 = vmul.f32 0.5, %v4051_v39  ;;  %v4052_v1 = vadd.f32 1.0, %v7360_v29  ;;  %7371 = vtanh.f32 %v3291_v6  ;;  %v2908_v41 = vadd.f32 %v2524_v52, %v8666_v62  ;;  %v8936_v29 = vpop.f32.mrf.mxu0  ;;  %6704 = vmatmul.mubr.msk.bf16.gmra.mxu0 %vm522_vm2, %v7270_v34 }
 0x154   : > { %v4817_v54 = vmul.f32 %v4433_v63, %v8614_v11  ;;  %v4434_v3 = vmul.f32 0.5, %v4050_v56  ;;  %v3290_v17 = vmul.f32 0.7978846, %v2906_v60  ;;  %v1759_v51 = vmul.f32 %v8692_v31, %v8692_v31  ;;  %v8938_v63 = vpop.f32.mrf.mxu1  ;;  %6752 = vmatmul.mubr.msk.bf16.gmra.mxu1 %vm522_vm2, %v7270_v34  ;;  %1095 = vmatprep.mubr.bf16.mxu0 %v11609_v53 }
 0x155   : > { %v4819_v19 = vmul.f32 %v4435_v47, %v8616_v12  ;;  %v4436_v57 = vmul.f32 0.5, %v4052_v1  ;;  %v3292_v40 = vmul.f32 0.7978846, %v2908_v41  ;;  %v2141_v11 = vmul.f32 %v1757_v20, %v8690_v28  ;;  %1608 = vmatprep.mubr.bf16.mxu1 %v11609_v53 }
 0x156   : > { %v4818_v35 = vmul.f32 %v4434_v3, %v8625_v26  ;;  %7373 = vtanh.f32 %v3290_v17  ;;  %v1758_v36 = vmul.f32 %v8706_v5, %v8706_v5  ;;  %v7362_v39 = vpop.eup %7361  ;;  %v2143_v6 = vmul.f32 %v1759_v51, %v8692_v31 }
 0x157   : > { %v4820_v12 = vmul.f32 %v4436_v57, %v8627_v27  ;;  %7375 = vtanh.f32 %v3292_v40  ;;  %v1760_v52 = vmul.f32 %v8708_v24, %v8708_v24  ;;  %v7364_v26 = vpop.eup %7363  ;;  %v4053_v60 = vadd.f32 1.0, %v7362_v39 }
 0x158   : > { %v6977_v56 = vpack.c.bf16 %v4818_v35, %v4817_v54  ;;  %v2525_v27 = vmul.f32 0.044715, %v2141_v11  ;;  %v2142_v47 = vmul.f32 %v1758_v36, %v8706_v5  ;;  %v4055_v41 = vadd.f32 1.0, %v7364_v26 }
 0x159   : > { %v6978_v1 = vpack.c.bf16 %v4820_v12, %v4819_v19  ;;  %v2527_v3 = vmul.f32 0.044715, %v2143_v6  ;;  %v2144_v17 = vmul.f32 %v1760_v52, %v8708_v24  ;;  %v4437_v20 = vmul.f32 0.5, %v4053_v60 }
 0x15a   : > { %6335 = vst [vmem:[%s8604_s12 + $0x90] sm:$0xff] %v6977_v56  ;;  %v2909_v57 = vadd.f32 %v2525_v27, %v8690_v28  ;;  %v2526_v40 = vmul.f32 0.044715, %v2142_v47  ;;  %v1761_v54 = vmul.f32 %v8725_v37, %v8725_v37  ;;  %v4439_v51 = vmul.f32 0.5, %v4055_v41 }
 0x15b   : > { %6336 = vst [vmem:[%s8604_s12 + $0x98] sm:$0xff] %v6978_v1  ;;  %v2911_v34 = vadd.f32 %v2527_v3, %v8692_v31  ;;  %v2528_v35 = vmul.f32 0.044715, %v2144_v17  ;;  %v1763_v19 = vmul.f32 %v8727_v33, %v8727_v33  ;;  %v4821_v11 = vmul.f32 %v4437_v20, %v8633_v44 }
 0x15c   : > { %v3293_v36 = vmul.f32 0.7978846, %v2909_v57  ;;  %v2910_v39 = vadd.f32 %v2526_v40, %v8706_v5  ;;  %v2145_v12 = vmul.f32 %v1761_v54, %v8725_v37  ;;  %v4823_v52 = vmul.f32 %v4439_v51, %v8636_v42  ;;  %v8960_v57 = vpop.f32.mrf.mxu0  ;;  %v8962_v40 = vpop.f32.mrf.mxu1 }
 0x15d   : > { %v7366_v6 = vpop.eup %7365  ;;  %v3295_v26 = vmul.f32 0.7978846, %v2911_v34  ;;  %v2912_v56 = vadd.f32 %v2528_v35, %v8708_v24  ;;  %v2147_v60 = vmul.f32 %v1763_v19, %v8727_v33 }
 0x15e   : > { %v7368_v27 = vpop.eup %7367  ;;  %v4054_v47 = vadd.f32 1.0, %v7366_v6  ;;  %7377 = vtanh.f32 %v3293_v36  ;;  %v3294_v1 = vmul.f32 0.7978846, %v2910_v39  ;;  %v2529_v41 = vmul.f32 0.044715, %v2145_v12 }
 0x15f   : > { %v7370_v3 = vpop.eup %7369  ;;  %v4056_v44 = vadd.f32 1.0, %v7368_v27  ;;  %7379 = vtanh.f32 %v3295_v26  ;;  %v3296_v17 = vmul.f32 0.7978846, %v2912_v56  ;;  %v2531_v20 = vmul.f32 0.044715, %v2147_v60 }
 0x160   : > { %v7372_v42 = vpop.eup %7371  ;;  %v4438_v54 = vmul.f32 0.5, %v4054_v47  ;;  %v4057_v51 = vadd.f32 1.0, %v7370_v3  ;;  %7381 = vtanh.f32 %v3294_v1  ;;  %v2913_v34 = vadd.f32 %v2529_v41, %v8725_v37  ;;  %v8972_v41 = vpop.f32.mrf.mxu0 }
 0x161   : > { %v4440_v35 = vmul.f32 0.5, %v4056_v44  ;;  %v4059_v19 = vadd.f32 1.0, %v7372_v42  ;;  %7383 = vtanh.f32 %v3296_v17  ;;  %v2915_v36 = vadd.f32 %v2531_v20, %v8727_v33  ;;  %v8974_v3 = vpop.f32.mrf.mxu1 }
 0x162   : > { %v4822_v39 = vmul.f32 %v4438_v54, %v8646_v8  ;;  %v4441_v12 = vmul.f32 0.5, %v4057_v51  ;;  %v3297_v6 = vmul.f32 0.7978846, %v2913_v34  ;;  %v1762_v26 = vmul.f32 %v8740_v50, %v8740_v50 }
 0x163   : > { %v7374_v56 = vpop.eup %7373  ;;  %v4824_v60 = vmul.f32 %v4440_v35, %v8648_v9  ;;  %v4443_v27 = vmul.f32 0.5, %v4059_v19  ;;  %v3299_v47 = vmul.f32 0.7978846, %v2915_v36  ;;  %v1764_v1 = vmul.f32 %v8742_v13, %v8742_v13  ;;  %v8990_v36 = vpop.f32.mrf.mxu0 }
 0x164   : > { %v7376_v8 = vpop.eup %7375  ;;  %v6979_v44 = vpack.c.bf16 %v4822_v39, %v4821_v11  ;;  %v4825_v17 = vmul.f32 %v4441_v12, %v8654_v22  ;;  %v4058_v20 = vadd.f32 1.0, %v7374_v56  ;;  %7385 = vtanh.f32 %v3297_v6  ;;  %v8992_v39 = vpop.f32.mrf.mxu1 }
 0x165   : > { %v6980_v42 = vpack.c.bf16 %v4824_v60, %v4823_v52  ;;  %v4827_v54 = vmul.f32 %v4443_v27, %v8656_v25  ;;  %v4060_v9 = vadd.f32 1.0, %v7376_v8  ;;  %7387 = vtanh.f32 %v3299_v47  ;;  %v7271_v8 = vld [vmem:[%s11596_s1 + $0x130] sm:$0xff]  }
 0x166   : > { %6337 = vst [vmem:[%s8604_s12 + $0xa0] sm:$0xff] %v6979_v44  ;;  %v4442_v51 = vmul.f32 0.5, %v4058_v20  ;;  %v2146_v34 = vmul.f32 %v1762_v26, %v8740_v50  ;;  %v2148_v35 = vmul.f32 %v1764_v1, %v8742_v13  ;;  %v1765_v19 = vmul.f32 %v8755_v2, %v8755_v2 }
 0x167   : > { %6338 = vst [vmem:[%s8604_s12 + $0xa8] sm:$0xff] %v6980_v42  ;;  %v4444_v11 = vmul.f32 0.5, %v4060_v9  ;;  %v1767_v22 = vmul.f32 %v8757_v59, %v8757_v59  ;;  %v1766_v52 = vmul.f32 %v8778_v55, %v8778_v55  ;;  %v1768_v25 = vmul.f32 %v8780_v38, %v8780_v38 }
 0x168   : > { %v4826_v12 = vmul.f32 %v4442_v51, %v8664_v61  ;;  %v2530_v6 = vmul.f32 0.044715, %v2146_v34  ;;  %v2532_v26 = vmul.f32 0.044715, %v2148_v35  ;;  %v2149_v56 = vmul.f32 %v1765_v19, %v8755_v2  ;;  %v9005_v19 = vpop.f32.mrf.mxu0  ;;  %6705 = vmatmul.mubr.msk.bf16.gmra.mxu0 %vm522_vm2, %v7271_v8 }
 0x169   : > { %v4828_v60 = vmul.f32 %v4444_v11, %v8666_v62  ;;  %v2151_v27 = vmul.f32 %v1767_v22, %v8757_v59  ;;  %v2150_v47 = vmul.f32 %v1766_v52, %v8778_v55  ;;  %v2152_v1 = vmul.f32 %v1768_v25, %v8780_v38  ;;  %v9007_v11 = vpop.f32.mrf.mxu1  ;;  %6753 = vmatmul.mubr.msk.bf16.gmra.mxu1 %vm522_vm2, %v7271_v8 }
 0x16a   : > { %v6981_v44 = vpack.c.bf16 %v4826_v12, %v4825_v17  ;;  %v2914_v61 = vadd.f32 %v2530_v6, %v8740_v50  ;;  %v2916_v20 = vadd.f32 %v2532_v26, %v8742_v13  ;;  %v2533_v42 = vmul.f32 0.044715, %v2149_v56  ;;  %11610 = vst [vmem:[#allocation5_spill] sm:$0xff] %v9007_v11  ;;  %1105 = vmatprep.mubr.bf16.mxu0 %v11609_v53 }
 0x16b   : > { %v7378_v9 = vpop.eup %7377  ;;  %v6982_v51 = vpack.c.bf16 %v4828_v60, %v4827_v54  ;;  %v2535_v62 = vmul.f32 0.044715, %v2151_v27  ;;  %v2534_v34 = vmul.f32 0.044715, %v2150_v47  ;;  %v2536_v35 = vmul.f32 0.044715, %v2152_v1  ;;  %1618 = vmatprep.mubr.bf16.mxu1 %v11609_v53 }
 0x16c   : > { %v7380_v17 = vpop.eup %7379  ;;  %6339 = vst [vmem:[%s8604_s12 + $0xb0] sm:$0xff] %v6981_v44  ;;  %v4061_v22 = vadd.f32 1.0, %v7378_v9  ;;  %v3298_v52 = vmul.f32 0.7978846, %v2914_v61  ;;  %v3300_v25 = vmul.f32 0.7978846, %v2916_v20  ;;  %v2917_v12 = vadd.f32 %v2533_v42, %v8755_v2 }
 0x16d   : > { %v7382_v54 = vpop.eup %7381  ;;  %6340 = vst [vmem:[%s8604_s12 + $0xb8] sm:$0xff] %v6982_v51  ;;  %v4063_v6 = vadd.f32 1.0, %v7380_v17  ;;  %v2919_v26 = vadd.f32 %v2535_v62, %v8757_v59  ;;  %v2918_v56 = vadd.f32 %v2534_v34, %v8778_v55  ;;  %v2920_v60 = vadd.f32 %v2536_v35, %v8780_v38 }
 0x16e   : > { %v7384_v27 = vpop.eup %7383  ;;  %v4445_v47 = vmul.f32 0.5, %v4061_v22  ;;  %v4062_v1 = vadd.f32 1.0, %v7382_v54  ;;  %7389 = vtanh.f32 %v3298_v52  ;;  %v3301_v8 = vmul.f32 0.7978846, %v2917_v12  ;;  %v9024_v12 = vpop.f32.mrf.mxu0 }
 0x16f   : > { %v4447_v44 = vmul.f32 0.5, %v4063_v6  ;;  %v4064_v61 = vadd.f32 1.0, %v7384_v27  ;;  %7391 = vtanh.f32 %v3300_v25  ;;  %v3303_v20 = vmul.f32 0.7978846, %v2919_v26 }
 0x170   : > { %v4829_v42 = vmul.f32 %v4445_v47, %v8690_v28  ;;  %v4446_v9 = vmul.f32 0.5, %v4062_v1  ;;  %7393 = vtanh.f32 %v3301_v8  ;;  %v3302_v51 = vmul.f32 0.7978846, %v2918_v56  ;;  %v9026_v28 = vpop.f32.mrf.mxu1 }
 0x171   : > { %v7386_v17 = vpop.eup %7385  ;;  %v4831_v62 = vmul.f32 %v4447_v44, %v8692_v31  ;;  %v4448_v34 = vmul.f32 0.5, %v4064_v61  ;;  %7395 = vtanh.f32 %v3303_v20  ;;  %v3304_v35 = vmul.f32 0.7978846, %v2920_v60  ;;  %v9044_v20 = vpop.f32.mrf.mxu0 }
 0x172   : > { %v7388_v11 = vpop.eup %7387  ;;  %v4830_v22 = vmul.f32 %v4446_v9, %v8706_v5  ;;  %v4065_v52 = vadd.f32 1.0, %v7386_v17  ;;  %7397 = vtanh.f32 %v3302_v51  ;;  %v1769_v25 = vmul.f32 %v8790_v14, %v8790_v14 }
 0x173   : > { %v4832_v54 = vmul.f32 %v4448_v34, %v8708_v24  ;;  %v4067_v6 = vadd.f32 1.0, %v7388_v11  ;;  %7399 = vtanh.f32 %v3304_v35  ;;  %v1771_v31 = vmul.f32 %v8792_v45, %v8792_v45 }
 0x174   : > { %v6983_v26 = vpack.c.bf16 %v4830_v22, %v4829_v42  ;;  %v4449_v5 = vmul.f32 0.5, %v4065_v52  ;;  %v2153_v56 = vmul.f32 %v1769_v25, %v8790_v14  ;;  %v1770_v60 = vmul.f32 %v8803_v32, %v8803_v32  ;;  %v9046_v42 = vpop.f32.mrf.mxu1 }
 0x175   : > { %v6984_v27 = vpack.c.bf16 %v4832_v54, %v4831_v62  ;;  %v4451_v47 = vmul.f32 0.5, %v4067_v6  ;;  %v2155_v1 = vmul.f32 %v1771_v31, %v8792_v45  ;;  %v1772_v24 = vmul.f32 %v8805_v0, %v8805_v0 }
 0x176   : > { %6341 = vst [vmem:[%s8604_s12 + $0xc0] sm:$0xff] %v6983_v26  ;;  %v9039_v11 = vmul.f32 %v4449_v5, %v8725_v37  ;;  %v2537_v8 = vmul.f32 0.044715, %v2153_v56  ;;  %v2154_v44 = vmul.f32 %v1770_v60, %v8803_v32  ;;  %v1773_v61 = vmul.f32 %v8825_v7, %v8825_v7  ;;  %v9065_v56 = vpop.f32.mrf.mxu0  ;;  %v9067_v60 = vpop.f32.mrf.mxu1 }
 0x177   : > { %6342 = vst [vmem:[%s8604_s12 + $0xc8] sm:$0xff] %v6984_v27  ;;  %v9050_v9 = vmul.f32 %v4451_v47, %v8727_v33  ;;  %v2539_v51 = vmul.f32 0.044715, %v2155_v1  ;;  %v2156_v17 = vmul.f32 %v1772_v24, %v8805_v0  ;;  %v1775_v37 = vmul.f32 %v8827_v4, %v8827_v4 }
 0x178   : > { %v2921_v62 = vadd.f32 %v2537_v8, %v8790_v14  ;;  %v2538_v34 = vmul.f32 0.044715, %v2154_v44  ;;  %v2157_v35 = vmul.f32 %v1773_v61, %v8825_v7  ;;  %v1774_v22 = vmul.f32 %v8840_v23, %v8840_v23 }
 0x179   : > { %v2923_v52 = vadd.f32 %v2539_v51, %v8792_v45  ;;  %v2540_v25 = vmul.f32 0.044715, %v2156_v17  ;;  %v2159_v33 = vmul.f32 %v1775_v37, %v8827_v4  ;;  %v1776_v54 = vmul.f32 %v8842_v15, %v8842_v15  ;;  %v7272_v37 = vld [vmem:[%s11596_s1 + $0x138] sm:$0xff]  }
 0x17a   : > { %v3305_v6 = vmul.f32 0.7978846, %v2921_v62  ;;  %v2922_v31 = vadd.f32 %v2538_v34, %v8803_v32  ;;  %v2541_v26 = vmul.f32 0.044715, %v2157_v35  ;;  %v2158_v5 = vmul.f32 %v1774_v22, %v8840_v23 }
 0x17b   : > { %v7390_v27 = vpop.eup %7389  ;;  %v3307_v47 = vmul.f32 0.7978846, %v2923_v52  ;;  %v2924_v1 = vadd.f32 %v2540_v25, %v8805_v0  ;;  %v2543_v24 = vmul.f32 0.044715, %v2159_v33  ;;  %v2160_v8 = vmul.f32 %v1776_v54, %v8842_v15 }
 0x17c   : > { %v7392_v44 = vpop.eup %7391  ;;  %v4066_v61 = vadd.f32 1.0, %v7390_v27  ;;  %7401 = vtanh.f32 %v3305_v6  ;;  %v3306_v51 = vmul.f32 0.7978846, %v2922_v31  ;;  %v2925_v17 = vadd.f32 %v2541_v26, %v8825_v7  ;;  %v9076_v27 = vpop.f32.mrf.mxu0  ;;  %6706 = vmatmul.mubr.msk.bf16.gmra.mxu0 %vm522_vm2, %v7272_v37 }
 0x17d   : > { %v7394_v62 = vpop.eup %7393  ;;  %v4068_v34 = vadd.f32 1.0, %v7392_v44  ;;  %7403 = vtanh.f32 %v3307_v47  ;;  %v3308_v35 = vmul.f32 0.7978846, %v2924_v1  ;;  %v2927_v22 = vadd.f32 %v2543_v24, %v8827_v4  ;;  %v9078_v6 = vpop.f32.mrf.mxu1  ;;  %6754 = vmatmul.mubr.msk.bf16.gmra.mxu1 %vm522_vm2, %v7272_v37  ;;  %1115 = vmatprep.mubr.bf16.mxu0 %v11609_v53 }
 0x17e   : > { %v7396_v52 = vpop.eup %7395  ;;  %v4450_v25 = vmul.f32 0.5, %v4066_v61  ;;  %v4069_v33 = vadd.f32 1.0, %v7394_v62  ;;  %7405 = vtanh.f32 %v3306_v51  ;;  %v3309_v54 = vmul.f32 0.7978846, %v2925_v17  ;;  %11611 = vst [vmem:[#allocation6_spill] sm:$0xff] %v9078_v6  ;;  %1628 = vmatprep.mubr.bf16.mxu1 %v11609_v53 }
 0x17f   : > { %v7398_v31 = vpop.eup %7397  ;;  %v4452_v26 = vmul.f32 0.5, %v4068_v34  ;;  %v4071_v44 = vadd.f32 1.0, %v7396_v52  ;;  %7407 = vtanh.f32 %v3308_v35  ;;  %v3311_v47 = vmul.f32 0.7978846, %v2927_v22 }
 0x180   : > { %v7400_v1 = vpop.eup %7399  ;;  %v4834_v24 = vmul.f32 %v4450_v25, %v8740_v50  ;;  %v4453_v61 = vmul.f32 0.5, %v4069_v33  ;;  %v4070_v51 = vadd.f32 1.0, %v7398_v31  ;;  %7409 = vtanh.f32 %v3309_v54 }
 0x181   : > { %v4836_v17 = vmul.f32 %v4452_v26, %v8742_v13  ;;  %v4455_v62 = vmul.f32 0.5, %v4071_v44  ;;  %v4072_v37 = vadd.f32 1.0, %v7400_v1  ;;  %7411 = vtanh.f32 %v3311_v47 }
 0x182   : > { %v6985_v34 = vpack.c.bf16 %v4834_v24, %v9039_v11  ;;  %v4837_v35 = vmul.f32 %v4453_v61, %v8755_v2  ;;  %v4454_v22 = vmul.f32 0.5, %v4070_v51  ;;  %v2542_v52 = vmul.f32 0.044715, %v2158_v5  ;;  %v9097_v2 = vpop.f32.mrf.mxu0  ;;  %v9099_v5 = vpop.f32.mrf.mxu1 }
 0x183   : > { %v6986_v6 = vpack.c.bf16 %v4836_v17, %v9050_v9  ;;  %v4839_v50 = vmul.f32 %v4455_v62, %v8757_v59  ;;  %v4456_v25 = vmul.f32 0.5, %v4072_v37  ;;  %v2544_v33 = vmul.f32 0.044715, %v2160_v8 }
 0x184   : > { %6343 = vst [vmem:[%s8604_s12 + $0xd0] sm:$0xff] %v6985_v34  ;;  %v4838_v54 = vmul.f32 %v4454_v22, %v8778_v55  ;;  %v2926_v13 = vadd.f32 %v2542_v52, %v8840_v23  ;;  %v1777_v31 = vmul.f32 %v8858_v10, %v8858_v10  ;;  %v1779_v11 = vmul.f32 %v8860_v46, %v8860_v46  ;;  %v9115_v37 = vpop.f32.mrf.mxu0  ;;  %v9117_v34 = vpop.f32.mrf.mxu1 }
 0x185   : > { %6344 = vst [vmem:[%s8604_s12 + $0xd8] sm:$0xff] %v6986_v6  ;;  %v4840_v59 = vmul.f32 %v4456_v25, %v8780_v38  ;;  %v2928_v9 = vadd.f32 %v2544_v33, %v8842_v15  ;;  %v1778_v55 = vmul.f32 %v8877_v48, %v8877_v48  ;;  %v1780_v8 = vmul.f32 %v8879_v16, %v8879_v16 }
 0x186   : > { %v6987_v26 = vpack.c.bf16 %v4838_v54, %v4837_v35  ;;  %v3310_v44 = vmul.f32 0.7978846, %v2926_v13  ;;  %v2161_v47 = vmul.f32 %v1777_v31, %v8858_v10  ;;  %v2163_v1 = vmul.f32 %v1779_v11, %v8860_v46  ;;  %11612 = vst [vmem:[#allocation7_spill] sm:$0xff] %v9117_v34 }
 0x187   : > { %v6988_v24 = vpack.c.bf16 %v4840_v59, %v4839_v50  ;;  %v3312_v61 = vmul.f32 0.7978846, %v2928_v9  ;;  %v2162_v6 = vmul.f32 %v1778_v55, %v8877_v48  ;;  %v2164_v38 = vmul.f32 %v1780_v8, %v8879_v16 }
 0x188   : > { %6345 = vst [vmem:[%s8604_s12 + $0xe0] sm:$0xff] %v6987_v26  ;;  %7413 = vtanh.f32 %v3310_v44  ;;  %v2545_v51 = vmul.f32 0.044715, %v2161_v47  ;;  %v2547_v17 = vmul.f32 0.044715, %v2163_v1  ;;  %v1781_v62 = vmul.f32 %v8891_v58, %v8891_v58 }
 0x189   : > { %v7402_v35 = vpop.eup %7401  ;;  %6346 = vst [vmem:[%s8604_s12 + $0xe8] sm:$0xff] %v6988_v24  ;;  %7415 = vtanh.f32 %v3312_v61  ;;  %v2546_v22 = vmul.f32 0.044715, %v2162_v6  ;;  %v2548_v52 = vmul.f32 0.044715, %v2164_v38  ;;  %v1783_v50 = vmul.f32 %v8893_v43, %v8893_v43  ;;  %v9128_v61 = vpop.f32.mrf.mxu0 }
 0x18a   : > { %v7404_v25 = vpop.eup %7403  ;;  %v4073_v33 = vadd.f32 1.0, %v7402_v35  ;;  %v2929_v54 = vadd.f32 %v2545_v51, %v8858_v10  ;;  %v2931_v13 = vadd.f32 %v2547_v17, %v8860_v46  ;;  %v2165_v31 = vmul.f32 %v1781_v62, %v8891_v58  ;;  %v9130_v6 = vpop.f32.mrf.mxu1 }
 0x18b   : > { %v7406_v11 = vpop.eup %7405  ;;  %v4075_v59 = vadd.f32 1.0, %v7404_v25  ;;  %v2930_v9 = vadd.f32 %v2546_v22, %v8877_v48  ;;  %v2932_v55 = vadd.f32 %v2548_v52, %v8879_v16  ;;  %v2167_v8 = vmul.f32 %v1783_v50, %v8893_v43  ;;  %v7273_v50 = vld [vmem:[%s11596_s1 + $0x140] sm:$0xff]  }
 0x18c   : > { %v7408_v26 = vpop.eup %7407  ;;  %v4457_v44 = vmul.f32 0.5, %v4073_v33  ;;  %v4074_v47 = vadd.f32 1.0, %v7406_v11  ;;  %v3313_v1 = vmul.f32 0.7978846, %v2929_v54  ;;  %v3315_v24 = vmul.f32 0.7978846, %v2931_v13 }
 0x18d   : > { %v7410_v38 = vpop.eup %7409  ;;  %v4459_v51 = vmul.f32 0.5, %v4075_v59  ;;  %v4076_v17 = vadd.f32 1.0, %v7408_v26  ;;  %v3314_v62 = vmul.f32 0.7978846, %v2930_v9  ;;  %v3316_v35 = vmul.f32 0.7978846, %v2932_v55  ;;  %v9138_v55 = vpop.f32.mrf.mxu0  ;;  %6707 = vmatmul.mubr.msk.bf16.gmra.mxu0 %vm522_vm2, %v7273_v50 }
 0x18e   : > { %v7412_v25 = vpop.eup %7411  ;;  %v4841_v22 = vmul.f32 %v4457_v44, %v8790_v14  ;;  %v4458_v52 = vmul.f32 0.5, %v4074_v47  ;;  %v4077_v34 = vadd.f32 1.0, %v7410_v38  ;;  %7417 = vtanh.f32 %v3313_v1  ;;  %v9140_v14 = vpop.f32.mrf.mxu1  ;;  %6755 = vmatmul.mubr.msk.bf16.gmra.mxu1 %vm522_vm2, %v7273_v50  ;;  %1125 = vmatprep.mubr.bf16.mxu0 %v11609_v53 }
 0x18f   : > { %v4843_v33 = vmul.f32 %v4459_v51, %v8792_v45  ;;  %v4460_v54 = vmul.f32 0.5, %v4076_v17  ;;  %v4079_v13 = vadd.f32 1.0, %v7412_v25  ;;  %7419 = vtanh.f32 %v3315_v24  ;;  %1638 = vmatprep.mubr.bf16.mxu1 %v11609_v53 }
 0x190   : > { %v4842_v11 = vmul.f32 %v4458_v52, %v8803_v32  ;;  %v4461_v59 = vmul.f32 0.5, %v4077_v34  ;;  %7421 = vtanh.f32 %v3314_v62  ;;  %v2549_v9 = vmul.f32 0.044715, %v2165_v31 }
 0x191   : > { %v4844_v26 = vmul.f32 %v4460_v54, %v8805_v0  ;;  %v4463_v45 = vmul.f32 0.5, %v4079_v13  ;;  %7423 = vtanh.f32 %v3316_v35  ;;  %v2551_v44 = vmul.f32 0.044715, %v2167_v8 }
 0x192   : > { %v6989_v32 = vpack.c.bf16 %v4842_v11, %v4841_v22  ;;  %v4845_v34 = vmul.f32 %v4461_v59, %v8825_v7  ;;  %v2933_v31 = vadd.f32 %v2549_v9, %v8891_v58  ;;  %v1782_v47 = vmul.f32 %v8907_v30, %v8907_v30  ;;  %v9169_v9 = vpop.f32.mrf.mxu0 }
 0x193   : > { %v6990_v1 = vpack.c.bf16 %v4844_v26, %v4843_v33  ;;  %v4847_v24 = vmul.f32 %v4463_v45, %v8827_v4  ;;  %v2935_v0 = vadd.f32 %v2551_v44, %v8893_v43  ;;  %v1784_v8 = vmul.f32 %v8909_v21, %v8909_v21  ;;  %v9171_v26 = vpop.f32.mrf.mxu1 }
 0x194   : > { %6347 = vst [vmem:[%s8604_s12 + $0xf0] sm:$0xff] %v6989_v32  ;;  %v3317_v38 = vmul.f32 0.7978846, %v2933_v31  ;;  %v2166_v51 = vmul.f32 %v1782_v47, %v8907_v30  ;;  %v1785_v7 = vmul.f32 %v8915_v49, %v8915_v49  ;;  %v1787_v17 = vmul.f32 %v8917_v18, %v8917_v18 }
 0x195   : > { %v7414_v62 = vpop.eup %7413  ;;  %6348 = vst [vmem:[%s8604_s12 + $0xf8] sm:$0xff] %v6990_v1  ;;  %v3319_v35 = vmul.f32 0.7978846, %v2935_v0  ;;  %v2168_v4 = vmul.f32 %v1784_v8, %v8909_v21  ;;  %v1786_v25 = vmul.f32 %v8936_v29, %v8936_v29  ;;  %v1788_v22 = vmul.f32 %v8938_v63, %v8938_v63 }
 0x196   : > { %v7416_v52 = vpop.eup %7415  ;;  %v4078_v50 = vadd.f32 1.0, %v7414_v62  ;;  %7425 = vtanh.f32 %v3317_v38  ;;  %v2550_v33 = vmul.f32 0.044715, %v2166_v51  ;;  %v2169_v54 = vmul.f32 %v1785_v7, %v8915_v49 }
 0x197   : > { %v4080_v13 = vadd.f32 1.0, %v7416_v52  ;;  %7427 = vtanh.f32 %v3319_v35  ;;  %v2552_v11 = vmul.f32 0.044715, %v2168_v4  ;;  %v2171_v59 = vmul.f32 %v1787_v17, %v8917_v18 }
 0x198   : > { %v4462_v45 = vmul.f32 0.5, %v4078_v50  ;;  %v2934_v44 = vadd.f32 %v2550_v33, %v8907_v30  ;;  %v2553_v32 = vmul.f32 0.044715, %v2169_v54  ;;  %v2170_v31 = vmul.f32 %v1786_v25, %v8936_v29  ;;  %v9181_v50 = vpop.f32.mrf.mxu0  ;;  %v9183_v33 = vpop.f32.mrf.mxu1 }
 0x199   : > { %v4464_v47 = vmul.f32 0.5, %v4080_v13  ;;  %v2936_v1 = vadd.f32 %v2552_v11, %v8909_v21  ;;  %v2555_v0 = vmul.f32 0.044715, %v2171_v59  ;;  %v2172_v8 = vmul.f32 %v1788_v22, %v8938_v63 }
 0x19a   : > { %v4846_v38 = vmul.f32 %v4462_v45, %v8840_v23  ;;  %v3318_v51 = vmul.f32 0.7978846, %v2934_v44  ;;  %v2937_v7 = vadd.f32 %v2553_v32, %v8915_v49  ;;  %v2554_v17 = vmul.f32 0.044715, %v2170_v31 }
 0x19b   : > { %v7418_v62 = vpop.eup %7417  ;;  %v4848_v35 = vmul.f32 %v4464_v47, %v8842_v15  ;;  %v3320_v4 = vmul.f32 0.7978846, %v2936_v1  ;;  %v2939_v52 = vadd.f32 %v2555_v0, %v8917_v18  ;;  %v2556_v25 = vmul.f32 0.044715, %v2172_v8  ;;  %v9189_v8 = vpop.f32.mrf.mxu0 }
 0x19c   : > { %v7420_v54 = vpop.eup %7419  ;;  %v6991_v22 = vpack.c.bf16 %v4846_v38, %v4845_v34  ;;  %v4081_v23 = vadd.f32 1.0, %v7418_v62  ;;  %7429 = vtanh.f32 %v3318_v51  ;;  %v3321_v13 = vmul.f32 0.7978846, %v2937_v7  ;;  %v9191_v38 = vpop.f32.mrf.mxu1 }
 0x19d   : > { %v7422_v11 = vpop.eup %7421  ;;  %v6992_v59 = vpack.c.bf16 %v4848_v35, %v4847_v24  ;;  %v4083_v45 = vadd.f32 1.0, %v7420_v54  ;;  %7431 = vtanh.f32 %v3320_v4  ;;  %v3323_v15 = vmul.f32 0.7978846, %v2939_v52 }
 0x19e   : > { %v7424_v44 = vpop.eup %7423  ;;  %6349 = vst [vmem:[%s8604_s12 + $0x100] sm:$0xff] %v6991_v22  ;;  %v4465_v32 = vmul.f32 0.5, %v4081_v23  ;;  %v4082_v31 = vadd.f32 1.0, %v7422_v11  ;;  %7433 = vtanh.f32 %v3321_v13  ;;  %v2938_v47 = vadd.f32 %v2554_v17, %v8936_v29 }
 0x19f   : > { %6350 = vst [vmem:[%s8604_s12 + $0x108] sm:$0xff] %v6992_v59  ;;  %v4467_v1 = vmul.f32 0.5, %v4083_v45  ;;  %v4084_v0 = vadd.f32 1.0, %v7424_v44  ;;  %7435 = vtanh.f32 %v3323_v15  ;;  %v2940_v34 = vadd.f32 %v2556_v25, %v8938_v63  ;;  %v7274_v25 = vld [vmem:[%s11596_s1 + $0x148] sm:$0xff]   ;;  %v9210_v59 = vpop.f32.mrf.mxu0  ;;  %v9212_v45 = vpop.f32.mrf.mxu1 }
 0x1a0   : > { %v4849_v24 = vmul.f32 %v4465_v32, %v8858_v10  ;;  %v4466_v51 = vmul.f32 0.5, %v4082_v31  ;;  %v3322_v7 = vmul.f32 0.7978846, %v2938_v47  ;;  %v1789_v62 = vmul.f32 %v8960_v57, %v8960_v57  ;;  %6708 = vmatmul.mubr.msk.bf16.gmra.mxu0 %vm522_vm2, %v7274_v25  ;;  %6756 = vmatmul.mubr.msk.bf16.gmra.mxu1 %vm522_vm2, %v7274_v25 }
 0x1a1   : > { %v4851_v35 = vmul.f32 %v4467_v1, %v8860_v46  ;;  %v4468_v17 = vmul.f32 0.5, %v4084_v0  ;;  %v3324_v4 = vmul.f32 0.7978846, %v2940_v34  ;;  %v1791_v52 = vmul.f32 %v8962_v40, %v8962_v40  ;;  %1135 = vmatprep.mubr.bf16.mxu0 %v11609_v53  ;;  %1648 = vmatprep.mubr.bf16.mxu1 %v11609_v53 }
 0x1a2   : > { %v4850_v54 = vmul.f32 %v4466_v51, %v8877_v48  ;;  %7437 = vtanh.f32 %v3322_v7  ;;  %v2173_v10 = vmul.f32 %v1789_v62, %v8960_v57  ;;  %v1790_v22 = vmul.f32 %v8972_v41, %v8972_v41 }
 0x1a3   : > { %v7426_v23 = vpop.eup %7425  ;;  %v4852_v46 = vmul.f32 %v4468_v17, %v8879_v16  ;;  %7439 = vtanh.f32 %v3324_v4  ;;  %v2175_v13 = vmul.f32 %v1791_v52, %v8962_v40  ;;  %v1792_v11 = vmul.f32 %v8974_v3, %v8974_v3 }
 0x1a4   : > { %v7428_v48 = vpop.eup %7427  ;;  %v6993_v15 = vpack.c.bf16 %v4850_v54, %v4849_v24  ;;  %v4085_v44 = vadd.f32 1.0, %v7426_v23  ;;  %v2557_v16 = vmul.f32 0.044715, %v2173_v10  ;;  %v2174_v32 = vmul.f32 %v1790_v22, %v8972_v41 }
 0x1a5   : > { %v6994_v31 = vpack.c.bf16 %v4852_v46, %v4851_v35  ;;  %v4087_v47 = vadd.f32 1.0, %v7428_v48  ;;  %v2559_v1 = vmul.f32 0.044715, %v2175_v13  ;;  %v2176_v0 = vmul.f32 %v1792_v11, %v8974_v3 }
 0x1a6   : > { %6351 = vst [vmem:[%s8604_s12 + $0x110] sm:$0xff] %v6993_v15  ;;  %v4469_v34 = vmul.f32 0.5, %v4085_v44  ;;  %v2941_v51 = vadd.f32 %v2557_v16, %v8960_v57  ;;  %v2558_v7 = vmul.f32 0.044715, %v2174_v32  ;;  %v1793_v24 = vmul.f32 %v8990_v36, %v8990_v36 }
 0x1a7   : > { %6352 = vst [vmem:[%s8604_s12 + $0x118] sm:$0xff] %v6994_v31  ;;  %v4471_v62 = vmul.f32 0.5, %v4087_v47  ;;  %v2943_v17 = vadd.f32 %v2559_v1, %v8962_v40  ;;  %v2560_v4 = vmul.f32 0.044715, %v2176_v0  ;;  %v1795_v35 = vmul.f32 %v8992_v39, %v8992_v39  ;;  %v9234_v1 = vpop.f32.mrf.mxu0  ;;  %v9236_v0 = vpop.f32.mrf.mxu1 }
 0x1a8   : > { %v4853_v52 = vmul.f32 %v4469_v34, %v8891_v58  ;;  %v3325_v25 = vmul.f32 0.7978846, %v2941_v51  ;;  %v2942_v54 = vadd.f32 %v2558_v7, %v8972_v41  ;;  %v2177_v10 = vmul.f32 %v1793_v24, %v8990_v36 }
 0x1a9   : > { %v7430_v22 = vpop.eup %7429  ;;  %v4855_v23 = vmul.f32 %v4471_v62, %v8893_v43  ;;  %v3327_v46 = vmul.f32 0.7978846, %v2943_v17  ;;  %v2944_v13 = vadd.f32 %v2560_v4, %v8974_v3  ;;  %v2179_v11 = vmul.f32 %v1795_v35, %v8992_v39 }
 0x1aa   : > { %v7432_v48 = vpop.eup %7431  ;;  %v4086_v15 = vadd.f32 1.0, %v7430_v22  ;;  %7441 = vtanh.f32 %v3325_v25  ;;  %v3326_v44 = vmul.f32 0.7978846, %v2942_v54  ;;  %v2561_v16 = vmul.f32 0.044715, %v2177_v10 }
 0x1ab   : > { %v7434_v32 = vpop.eup %7433  ;;  %v4088_v58 = vadd.f32 1.0, %v7432_v48  ;;  %7443 = vtanh.f32 %v3327_v46  ;;  %v3328_v31 = vmul.f32 0.7978846, %v2944_v13  ;;  %v2563_v47 = vmul.f32 0.044715, %v2179_v11  ;;  %v11613_v11 = vld [vmem:[#allocation5_spill] sm:$0xff] }
 0x1ac   : > { %v7436_v43 = vpop.eup %7435  ;;  %v4470_v34 = vmul.f32 0.5, %v4086_v15  ;;  %v4089_v51 = vadd.f32 1.0, %v7434_v32  ;;  %7445 = vtanh.f32 %v3326_v44  ;;  %v2945_v7 = vadd.f32 %v2561_v16, %v8990_v36  ;;  %v9246_v15 = vpop.f32.mrf.mxu0 }
 0x1ad   : > { %v4472_v24 = vmul.f32 0.5, %v4088_v58  ;;  %v4091_v62 = vadd.f32 1.0, %v7436_v43  ;;  %7447 = vtanh.f32 %v3328_v31  ;;  %v2947_v17 = vadd.f32 %v2563_v47, %v8992_v39  ;;  %v9248_v44 = vpop.f32.mrf.mxu1 }
 0x1ae   : > { %v4854_v4 = vmul.f32 %v4470_v34, %v8907_v30  ;;  %v4473_v35 = vmul.f32 0.5, %v4089_v51  ;;  %v3329_v25 = vmul.f32 0.7978846, %v2945_v7  ;;  %v1794_v54 = vmul.f32 %v9005_v19, %v9005_v19 }
 0x1af   : > { %v7438_v10 = vpop.eup %7437  ;;  %v4856_v22 = vmul.f32 %v4472_v24, %v8909_v21  ;;  %v4475_v46 = vmul.f32 0.5, %v4091_v62  ;;  %v3331_v13 = vmul.f32 0.7978846, %v2947_v17  ;;  %v1796_v48 = vmul.f32 %v11613_v11, %v11613_v11  ;;  %v9264_v24 = vpop.f32.mrf.mxu0 }
 0x1b0   : > { %v7440_v30 = vpop.eup %7439  ;;  %v6995_v16 = vpack.c.bf16 %v4854_v4, %v4853_v52  ;;  %v4857_v32 = vmul.f32 %v4473_v35, %v8915_v49  ;;  %v4090_v58 = vadd.f32 1.0, %v7438_v10  ;;  %7449 = vtanh.f32 %v3329_v25  ;;  %v9266_v62 = vpop.f32.mrf.mxu1 }
 0x1b1   : > { %v6996_v31 = vpack.c.bf16 %v4856_v22, %v4855_v23  ;;  %v4859_v47 = vmul.f32 %v4475_v46, %v8917_v18  ;;  %v4092_v21 = vadd.f32 1.0, %v7440_v30  ;;  %7451 = vtanh.f32 %v3331_v13  ;;  %v7275_v13 = vld [vmem:[%s11596_s1 + $0x150] sm:$0xff]  }
 0x1b2   : > { %6353 = vst [vmem:[%s8604_s12 + $0x120] sm:$0xff] %v6995_v16  ;;  %v4474_v43 = vmul.f32 0.5, %v4090_v58  ;;  %v2178_v34 = vmul.f32 %v1794_v54, %v9005_v19  ;;  %v2180_v51 = vmul.f32 %v1796_v48, %v11613_v11  ;;  %v1797_v7 = vmul.f32 %v9024_v12, %v9024_v12 }
 0x1b3   : > { %6354 = vst [vmem:[%s8604_s12 + $0x128] sm:$0xff] %v6996_v31  ;;  %v4476_v52 = vmul.f32 0.5, %v4092_v21  ;;  %v1799_v49 = vmul.f32 %v9026_v28, %v9026_v28  ;;  %v1798_v23 = vmul.f32 %v9044_v20, %v9044_v20  ;;  %v1800_v18 = vmul.f32 %v9046_v42, %v9046_v42 }
 0x1b4   : > { %v4858_v17 = vmul.f32 %v4474_v43, %v8936_v29  ;;  %v2562_v4 = vmul.f32 0.044715, %v2178_v34  ;;  %v2564_v35 = vmul.f32 0.044715, %v2180_v51  ;;  %v2181_v25 = vmul.f32 %v1797_v7, %v9024_v12  ;;  %v9279_v34 = vpop.f32.mrf.mxu0  ;;  %v9281_v51 = vpop.f32.mrf.mxu1  ;;  %6709 = vmatmul.mubr.msk.bf16.gmra.mxu0 %vm522_vm2, %v7275_v13  ;;  %6757 = vmatmul.mubr.msk.bf16.gmra.mxu1 %vm522_vm2, %v7275_v13 }
 0x1b5   : > { %v4860_v54 = vmul.f32 %v4476_v52, %v8938_v63  ;;  %v2183_v10 = vmul.f32 %v1799_v49, %v9026_v28  ;;  %v2182_v22 = vmul.f32 %v1798_v23, %v9044_v20  ;;  %v2184_v46 = vmul.f32 %v1800_v18, %v9046_v42  ;;  %1145 = vmatprep.mubr.bf16.mxu0 %v11609_v53 }
 0x1b6   : > { %v6997_v48 = vpack.c.bf16 %v4858_v17, %v4857_v32  ;;  %v2946_v29 = vadd.f32 %v2562_v4, %v9005_v19  ;;  %v2948_v30 = vadd.f32 %v2564_v35, %v11613_v11  ;;  %v2565_v16 = vmul.f32 0.044715, %v2181_v25  ;;  %1658 = vmatprep.mubr.bf16.mxu1 %v11609_v53 }
 0x1b7   : > { %v7442_v58 = vpop.eup %7441  ;;  %v6998_v31 = vpack.c.bf16 %v4860_v54, %v4859_v47  ;;  %v2567_v63 = vmul.f32 0.044715, %v2183_v10  ;;  %v2566_v21 = vmul.f32 0.044715, %v2182_v22  ;;  %v2568_v43 = vmul.f32 0.044715, %v2184_v46 }
 0x1b8   : > { %v7444_v32 = vpop.eup %7443  ;;  %6355 = vst [vmem:[%s8604_s12 + $0x130] sm:$0xff] %v6997_v48  ;;  %v4093_v7 = vadd.f32 1.0, %v7442_v58  ;;  %v3330_v52 = vmul.f32 0.7978846, %v2946_v29  ;;  %v3332_v49 = vmul.f32 0.7978846, %v2948_v30  ;;  %v2949_v23 = vadd.f32 %v2565_v16, %v9024_v12 }
 0x1b9   : > { %v7446_v47 = vpop.eup %7445  ;;  %6356 = vst [vmem:[%s8604_s12 + $0x138] sm:$0xff] %v6998_v31  ;;  %v4095_v18 = vadd.f32 1.0, %v7444_v32  ;;  %v2951_v17 = vadd.f32 %v2567_v63, %v9026_v28  ;;  %v2950_v4 = vadd.f32 %v2566_v21, %v9044_v20  ;;  %v2952_v35 = vadd.f32 %v2568_v43, %v9046_v42 }
 0x1ba   : > { %v7448_v25 = vpop.eup %7447  ;;  %v4477_v54 = vmul.f32 0.5, %v4093_v7  ;;  %v4094_v10 = vadd.f32 1.0, %v7446_v47  ;;  %7453 = vtanh.f32 %v3330_v52  ;;  %v3333_v22 = vmul.f32 0.7978846, %v2949_v23 }
 0x1bb   : > { %v4479_v46 = vmul.f32 0.5, %v4095_v18  ;;  %v4096_v13 = vadd.f32 1.0, %v7448_v25  ;;  %7455 = vtanh.f32 %v3332_v49  ;;  %v3335_v48 = vmul.f32 0.7978846, %v2951_v17  ;;  %v9298_v49 = vpop.f32.mrf.mxu0 }
 0x1bc   : > { %v4861_v29 = vmul.f32 %v4477_v54, %v8960_v57  ;;  %v4478_v30 = vmul.f32 0.5, %v4094_v10  ;;  %7457 = vtanh.f32 %v3333_v22  ;;  %v3334_v16 = vmul.f32 0.7978846, %v2950_v4  ;;  %v9300_v57 = vpop.f32.mrf.mxu1  ;;  %v11614_v10 = vld [vmem:[#allocation6_spill] sm:$0xff] }
 0x1bd   : > { %v7450_v58 = vpop.eup %7449  ;;  %v4863_v31 = vmul.f32 %v4479_v46, %v8962_v40  ;;  %v4480_v63 = vmul.f32 0.5, %v4096_v13  ;;  %7459 = vtanh.f32 %v3335_v48  ;;  %v3336_v21 = vmul.f32 0.7978846, %v2952_v35 }
 0x1be   : > { %v7452_v43 = vpop.eup %7451  ;;  %v4862_v32 = vmul.f32 %v4478_v30, %v8972_v41  ;;  %v4097_v7 = vadd.f32 1.0, %v7450_v58  ;;  %7461 = vtanh.f32 %v3334_v16  ;;  %v1801_v52 = vmul.f32 %v9065_v56, %v9065_v56  ;;  %v9320_v30 = vpop.f32.mrf.mxu1 }
 0x1bf   : > { %v4864_v23 = vmul.f32 %v4480_v63, %v8974_v3  ;;  %v4099_v47 = vadd.f32 1.0, %v7452_v43  ;;  %7463 = vtanh.f32 %v3336_v21  ;;  %v1803_v40 = vmul.f32 %v9067_v60, %v9067_v60 }
 0x1c0   : > { %v6999_v18 = vpack.c.bf16 %v4862_v32, %v4861_v29  ;;  %v4481_v41 = vmul.f32 0.5, %v4097_v7  ;;  %v2185_v17 = vmul.f32 %v1801_v52, %v9065_v56  ;;  %v1802_v4 = vmul.f32 %v9076_v27, %v9076_v27  ;;  %v9318_v29 = vpop.f32.mrf.mxu0 }
 0x1c1   : > { %v7000_v35 = vpack.c.bf16 %v4864_v23, %v4863_v31  ;;  %v4483_v25 = vmul.f32 0.5, %v4099_v47  ;;  %v2187_v54 = vmul.f32 %v1803_v40, %v9067_v60  ;;  %v1804_v3 = vmul.f32 %v11614_v10, %v11614_v10  ;;  %v11615_v23 = vld [vmem:[#allocation7_spill] sm:$0xff] }
 0x1c2   : > { %6357 = vst [vmem:[%s8604_s12 + $0x140] sm:$0xff] %v6999_v18  ;;  %v9313_v22 = vmul.f32 %v4481_v41, %v8990_v36  ;;  %v2569_v46 = vmul.f32 0.044715, %v2185_v17  ;;  %v2186_v13 = vmul.f32 %v1802_v4, %v9076_v27  ;;  %v1805_v48 = vmul.f32 %v9097_v2, %v9097_v2  ;;  %v9339_v4 = vpop.f32.mrf.mxu0 }
 0x1c3   : > { %6358 = vst [vmem:[%s8604_s12 + $0x148] sm:$0xff] %v7000_v35  ;;  %v9324_v16 = vmul.f32 %v4483_v25, %v8992_v39  ;;  %v2571_v58 = vmul.f32 0.044715, %v2187_v54  ;;  %v2188_v31 = vmul.f32 %v1804_v3, %v11614_v10  ;;  %v1807_v36 = vmul.f32 %v9099_v5, %v9099_v5  ;;  %v9341_v35 = vpop.f32.mrf.mxu1 }
 0x1c4   : > { %v2953_v63 = vadd.f32 %v2569_v46, %v9065_v56  ;;  %v2570_v21 = vmul.f32 0.044715, %v2186_v13  ;;  %v2189_v43 = vmul.f32 %v1805_v48, %v9097_v2  ;;  %v1806_v32 = vmul.f32 %v9115_v37, %v9115_v37  ;;  %11616 = vst [vmem:[#allocation5_spill] sm:$0xff] %v9341_v35 }
 0x1c5   : > { %v2955_v7 = vadd.f32 %v2571_v58, %v9067_v60  ;;  %v2572_v52 = vmul.f32 0.044715, %v2188_v31  ;;  %v2191_v39 = vmul.f32 %v1807_v36, %v9099_v5  ;;  %v1808_v47 = vmul.f32 %v11615_v23, %v11615_v23 }
 0x1c6   : > { %v3337_v40 = vmul.f32 0.7978846, %v2953_v63  ;;  %v2954_v18 = vadd.f32 %v2570_v21, %v9076_v27  ;;  %v2573_v41 = vmul.f32 0.044715, %v2189_v43  ;;  %v2190_v17 = vmul.f32 %v1806_v32, %v9115_v37  ;;  %v7276_v63 = vld [vmem:[%s11596_s1 + $0x158] sm:$0xff]  }
 0x1c7   : > { %v7454_v25 = vpop.eup %7453  ;;  %v3339_v54 = vmul.f32 0.7978846, %v2955_v7  ;;  %v2956_v3 = vadd.f32 %v2572_v52, %v11614_v10  ;;  %v2575_v46 = vmul.f32 0.044715, %v2191_v39  ;;  %v2192_v13 = vmul.f32 %v1808_v47, %v11615_v23 }
 0x1c8   : > { %v7456_v48 = vpop.eup %7455  ;;  %v4098_v58 = vadd.f32 1.0, %v7454_v25  ;;  %7465 = vtanh.f32 %v3337_v40  ;;  %v3338_v31 = vmul.f32 0.7978846, %v2954_v18  ;;  %v2957_v36 = vadd.f32 %v2573_v41, %v9097_v2  ;;  %v9350_v25 = vpop.f32.mrf.mxu0  ;;  %6710 = vmatmul.mubr.msk.bf16.gmra.mxu0 %vm522_vm2, %v7276_v63 }
 0x1c9   : > { %v7458_v21 = vpop.eup %7457  ;;  %v4100_v43 = vadd.f32 1.0, %v7456_v48  ;;  %7467 = vtanh.f32 %v3339_v54  ;;  %v3340_v32 = vmul.f32 0.7978846, %v2956_v3  ;;  %v2959_v7 = vadd.f32 %v2575_v46, %v9099_v5  ;;  %v9352_v40 = vpop.f32.mrf.mxu1  ;;  %6758 = vmatmul.mubr.msk.bf16.gmra.mxu1 %vm522_vm2, %v7276_v63  ;;  %1155 = vmatprep.mubr.bf16.mxu0 %v11609_v53 }
 0x1ca   : > { %v7460_v52 = vpop.eup %7459  ;;  %v4482_v39 = vmul.f32 0.5, %v4098_v58  ;;  %v4101_v35 = vadd.f32 1.0, %v7458_v21  ;;  %7469 = vtanh.f32 %v3338_v31  ;;  %v3341_v47 = vmul.f32 0.7978846, %v2957_v36  ;;  %11617 = vst [vmem:[#allocation6_spill] sm:$0xff] %v9352_v40  ;;  %1668 = vmatprep.mubr.bf16.mxu1 %v11609_v53 }
 0x1cb   : > { %v7462_v18 = vpop.eup %7461  ;;  %v4484_v41 = vmul.f32 0.5, %v4100_v43  ;;  %v4103_v48 = vadd.f32 1.0, %v7460_v52  ;;  %7471 = vtanh.f32 %v3340_v32  ;;  %v3343_v54 = vmul.f32 0.7978846, %v2959_v7 }
 0x1cc   : > { %v7464_v3 = vpop.eup %7463  ;;  %v4866_v46 = vmul.f32 %v4482_v39, %v9005_v19  ;;  %v4485_v58 = vmul.f32 0.5, %v4101_v35  ;;  %v4102_v31 = vadd.f32 1.0, %v7462_v18  ;;  %7473 = vtanh.f32 %v3341_v47 }
 0x1cd   : > { %v4868_v36 = vmul.f32 %v4484_v41, %v11613_v11  ;;  %v4487_v21 = vmul.f32 0.5, %v4103_v48  ;;  %v4104_v63 = vadd.f32 1.0, %v7464_v3  ;;  %7475 = vtanh.f32 %v3343_v54 }
 0x1ce   : > { %v7001_v43 = vpack.c.bf16 %v4866_v46, %v9313_v22  ;;  %v4869_v32 = vmul.f32 %v4485_v58, %v9024_v12  ;;  %v4486_v7 = vmul.f32 0.5, %v4102_v31  ;;  %v2574_v52 = vmul.f32 0.044715, %v2190_v17  ;;  %v9371_v12 = vpop.f32.mrf.mxu0  ;;  %v9373_v17 = vpop.f32.mrf.mxu1 }
 0x1cf   : > { %v7002_v40 = vpack.c.bf16 %v4868_v36, %v9324_v16  ;;  %v4871_v19 = vmul.f32 %v4487_v21, %v9026_v28  ;;  %v4488_v39 = vmul.f32 0.5, %v4104_v63  ;;  %v2576_v35 = vmul.f32 0.044715, %v2192_v13 }
 0x1d0   : > { %6359 = vst [vmem:[%s8604_s12 + $0x150] sm:$0xff] %v7001_v43  ;;  %v4870_v47 = vmul.f32 %v4486_v7, %v9044_v20  ;;  %v2958_v11 = vadd.f32 %v2574_v52, %v9115_v37  ;;  %v1809_v18 = vmul.f32 %v9128_v61, %v9128_v61  ;;  %v1811_v22 = vmul.f32 %v9130_v6, %v9130_v6  ;;  %v9389_v63 = vpop.f32.mrf.mxu0  ;;  %v9391_v43 = vpop.f32.mrf.mxu1 }
 0x1d1   : > { %6360 = vst [vmem:[%s8604_s12 + $0x158] sm:$0xff] %v7002_v40  ;;  %v4872_v28 = vmul.f32 %v4488_v39, %v9046_v42  ;;  %v2960_v16 = vadd.f32 %v2576_v35, %v11615_v23  ;;  %v1810_v20 = vmul.f32 %v9138_v55, %v9138_v55  ;;  %v1812_v13 = vmul.f32 %v9140_v14, %v9140_v14 }
 0x1d2   : > { %v7003_v41 = vpack.c.bf16 %v4870_v47, %v4869_v32  ;;  %v3342_v48 = vmul.f32 0.7978846, %v2958_v11  ;;  %v2193_v54 = vmul.f32 %v1809_v18, %v9128_v61  ;;  %v2195_v3 = vmul.f32 %v1811_v22, %v9130_v6  ;;  %11618 = vst [vmem:[#allocation7_spill] sm:$0xff] %v9391_v43 }
 0x1d3   : > { %v7004_v46 = vpack.c.bf16 %v4872_v28, %v4871_v19  ;;  %v3344_v58 = vmul.f32 0.7978846, %v2960_v16  ;;  %v2194_v40 = vmul.f32 %v1810_v20, %v9138_v55  ;;  %v2196_v42 = vmul.f32 %v1812_v13, %v9140_v14 }
 0x1d4   : > { %6361 = vst [vmem:[%s8604_s12 + $0x160] sm:$0xff] %v7003_v41  ;;  %7477 = vtanh.f32 %v3342_v48  ;;  %v2577_v31 = vmul.f32 0.044715, %v2193_v54  ;;  %v2579_v36 = vmul.f32 0.044715, %v2195_v3  ;;  %v1813_v21 = vmul.f32 %v9169_v9, %v9169_v9 }
 0x1d5   : > { %v7466_v32 = vpop.eup %7465  ;;  %6362 = vst [vmem:[%s8604_s12 + $0x168] sm:$0xff] %v7004_v46  ;;  %7479 = vtanh.f32 %v3344_v58  ;;  %v2578_v7 = vmul.f32 0.044715, %v2194_v40  ;;  %v2580_v52 = vmul.f32 0.044715, %v2196_v42  ;;  %v1815_v19 = vmul.f32 %v9171_v26, %v9171_v26  ;;  %v9402_v58 = vpop.f32.mrf.mxu0 }
 0x1d6   : > { %v7468_v39 = vpop.eup %7467  ;;  %v4105_v35 = vadd.f32 1.0, %v7466_v32  ;;  %v2961_v47 = vadd.f32 %v2577_v31, %v9128_v61  ;;  %v2963_v11 = vadd.f32 %v2579_v36, %v9130_v6  ;;  %v2197_v18 = vmul.f32 %v1813_v21, %v9169_v9  ;;  %v9404_v40 = vpop.f32.mrf.mxu1 }
 0x1d7   : > { %v7470_v22 = vpop.eup %7469  ;;  %v4107_v28 = vadd.f32 1.0, %v7468_v39  ;;  %v2962_v16 = vadd.f32 %v2578_v7, %v9138_v55  ;;  %v2964_v20 = vadd.f32 %v2580_v52, %v9140_v14  ;;  %v2199_v13 = vmul.f32 %v1815_v19, %v9171_v26  ;;  %v7277_v19 = vld [vmem:[%s11596_s1 + $0x160] sm:$0xff]  }
 0x1d8   : > { %v7472_v41 = vpop.eup %7471  ;;  %v4489_v48 = vmul.f32 0.5, %v4105_v35  ;;  %v4106_v54 = vadd.f32 1.0, %v7470_v22  ;;  %v3345_v3 = vmul.f32 0.7978846, %v2961_v47  ;;  %v3347_v46 = vmul.f32 0.7978846, %v2963_v11 }
 0x1d9   : > { %v7474_v42 = vpop.eup %7473  ;;  %v4491_v31 = vmul.f32 0.5, %v4107_v28  ;;  %v4108_v36 = vadd.f32 1.0, %v7472_v41  ;;  %v3346_v21 = vmul.f32 0.7978846, %v2962_v16  ;;  %v3348_v32 = vmul.f32 0.7978846, %v2964_v20  ;;  %v9412_v20 = vpop.f32.mrf.mxu0  ;;  %6711 = vmatmul.mubr.msk.bf16.gmra.mxu0 %vm522_vm2, %v7277_v19 }
 0x1da   : > { %v7476_v39 = vpop.eup %7475  ;;  %v4873_v7 = vmul.f32 %v4489_v48, %v9065_v56  ;;  %v4490_v52 = vmul.f32 0.5, %v4106_v54  ;;  %v4109_v43 = vadd.f32 1.0, %v7474_v42  ;;  %7481 = vtanh.f32 %v3345_v3  ;;  %v9414_v56 = vpop.f32.mrf.mxu1  ;;  %6759 = vmatmul.mubr.msk.bf16.gmra.mxu1 %vm522_vm2, %v7277_v19  ;;  %1165 = vmatprep.mubr.bf16.mxu0 %v11609_v53 }
 0x1db   : > { %v4875_v35 = vmul.f32 %v4491_v31, %v9067_v60  ;;  %v4492_v47 = vmul.f32 0.5, %v4108_v36  ;;  %v4111_v11 = vadd.f32 1.0, %v7476_v39  ;;  %7483 = vtanh.f32 %v3347_v46  ;;  %1678 = vmatprep.mubr.bf16.mxu1 %v11609_v53 }
 0x1dc   : > { %v4874_v22 = vmul.f32 %v4490_v52, %v9076_v27  ;;  %v4493_v28 = vmul.f32 0.5, %v4109_v43  ;;  %7485 = vtanh.f32 %v3346_v21  ;;  %v2581_v16 = vmul.f32 0.044715, %v2197_v18 }
 0x1dd   : > { %v4876_v41 = vmul.f32 %v4492_v47, %v11614_v10  ;;  %v4495_v60 = vmul.f32 0.5, %v4111_v11  ;;  %7487 = vtanh.f32 %v3348_v32  ;;  %v2583_v48 = vmul.f32 0.044715, %v2199_v13 }
 0x1de   : > { %v7005_v27 = vpack.c.bf16 %v4874_v22, %v4873_v7  ;;  %v4877_v43 = vmul.f32 %v4493_v28, %v9097_v2  ;;  %v2965_v18 = vadd.f32 %v2581_v16, %v9169_v9  ;;  %v1814_v54 = vmul.f32 %v9181_v50, %v9181_v50  ;;  %v9443_v16 = vpop.f32.mrf.mxu0 }
 0x1df   : > { %v7006_v3 = vpack.c.bf16 %v4876_v41, %v4875_v35  ;;  %v4879_v46 = vmul.f32 %v4495_v60, %v9099_v5  ;;  %v2967_v10 = vadd.f32 %v2583_v48, %v9171_v26  ;;  %v1816_v13 = vmul.f32 %v9183_v33, %v9183_v33  ;;  %v9445_v41 = vpop.f32.mrf.mxu1 }
 0x1e0   : > { %6363 = vst [vmem:[%s8604_s12 + $0x170] sm:$0xff] %v7005_v27  ;;  %v3349_v42 = vmul.f32 0.7978846, %v2965_v18  ;;  %v2198_v31 = vmul.f32 %v1814_v54, %v9181_v50  ;;  %v1817_v2 = vmul.f32 %v9189_v8, %v9189_v8  ;;  %v1819_v36 = vmul.f32 %v9191_v38, %v9191_v38 }
 0x1e1   : > { %v7478_v21 = vpop.eup %7477  ;;  %6364 = vst [vmem:[%s8604_s12 + $0x178] sm:$0xff] %v7006_v3  ;;  %v3351_v32 = vmul.f32 0.7978846, %v2967_v10  ;;  %v2200_v5 = vmul.f32 %v1816_v13, %v9183_v33  ;;  %v1818_v39 = vmul.f32 %v9210_v59, %v9210_v59  ;;  %v1820_v7 = vmul.f32 %v9212_v45, %v9212_v45 }
 0x1e2   : > { %v7480_v52 = vpop.eup %7479  ;;  %v4110_v19 = vadd.f32 1.0, %v7478_v21  ;;  %7489 = vtanh.f32 %v3349_v42  ;;  %v2582_v35 = vmul.f32 0.044715, %v2198_v31  ;;  %v2201_v47 = vmul.f32 %v1817_v2, %v9189_v8 }
 0x1e3   : > { %v4112_v11 = vadd.f32 1.0, %v7480_v52  ;;  %7491 = vtanh.f32 %v3351_v32  ;;  %v2584_v22 = vmul.f32 0.044715, %v2200_v5  ;;  %v2203_v28 = vmul.f32 %v1819_v36, %v9191_v38 }
 0x1e4   : > { %v4494_v60 = vmul.f32 0.5, %v4110_v19  ;;  %v2966_v48 = vadd.f32 %v2582_v35, %v9181_v50  ;;  %v2585_v27 = vmul.f32 0.044715, %v2201_v47  ;;  %v2202_v18 = vmul.f32 %v1818_v39, %v9210_v59  ;;  %v9455_v19 = vpop.f32.mrf.mxu0  ;;  %v9457_v35 = vpop.f32.mrf.mxu1 }
 0x1e5   : > { %v4496_v54 = vmul.f32 0.5, %v4112_v11  ;;  %v2968_v3 = vadd.f32 %v2584_v22, %v9183_v33  ;;  %v2587_v10 = vmul.f32 0.044715, %v2203_v28  ;;  %v2204_v13 = vmul.f32 %v1820_v7, %v9212_v45 }
 0x1e6   : > { %v4878_v42 = vmul.f32 %v4494_v60, %v9115_v37  ;;  %v3350_v31 = vmul.f32 0.7978846, %v2966_v48  ;;  %v2969_v2 = vadd.f32 %v2585_v27, %v9189_v8  ;;  %v2586_v36 = vmul.f32 0.044715, %v2202_v18 }
 0x1e7   : > { %v7482_v21 = vpop.eup %7481  ;;  %v4880_v32 = vmul.f32 %v4496_v54, %v11615_v23  ;;  %v3352_v5 = vmul.f32 0.7978846, %v2968_v3  ;;  %v2971_v52 = vadd.f32 %v2587_v10, %v9191_v38  ;;  %v2588_v39 = vmul.f32 0.044715, %v2204_v13  ;;  %v9463_v13 = vpop.f32.mrf.mxu0 }
 0x1e8   : > { %v7484_v47 = vpop.eup %7483  ;;  %v7007_v7 = vpack.c.bf16 %v4878_v42, %v4877_v43  ;;  %v4113_v37 = vadd.f32 1.0, %v7482_v21  ;;  %7493 = vtanh.f32 %v3350_v31  ;;  %v3353_v11 = vmul.f32 0.7978846, %v2969_v2  ;;  %v9465_v42 = vpop.f32.mrf.mxu1 }
 0x1e9   : > { %v7486_v22 = vpop.eup %7485  ;;  %v7008_v28 = vpack.c.bf16 %v4880_v32, %v4879_v46  ;;  %v4115_v60 = vadd.f32 1.0, %v7484_v47  ;;  %7495 = vtanh.f32 %v3352_v5  ;;  %v3355_v23 = vmul.f32 0.7978846, %v2971_v52 }
 0x1ea   : > { %v7488_v48 = vpop.eup %7487  ;;  %6365 = vst [vmem:[%s8604_s12 + $0x180] sm:$0xff] %v7007_v7  ;;  %v4497_v27 = vmul.f32 0.5, %v4113_v37  ;;  %v4114_v18 = vadd.f32 1.0, %v7486_v22  ;;  %7497 = vtanh.f32 %v3353_v11  ;;  %v2970_v54 = vadd.f32 %v2586_v36, %v9210_v59 }
 0x1eb   : > { %6366 = vst [vmem:[%s8604_s12 + $0x188] sm:$0xff] %v7008_v28  ;;  %v4499_v3 = vmul.f32 0.5, %v4115_v60  ;;  %v4116_v10 = vadd.f32 1.0, %v7488_v48  ;;  %7499 = vtanh.f32 %v3355_v23  ;;  %v2972_v43 = vadd.f32 %v2588_v39, %v9212_v45  ;;  %v7278_v39 = vld [vmem:[%s11596_s1 + $0x168] sm:$0xff]   ;;  %v9484_v28 = vpop.f32.mrf.mxu0  ;;  %v9486_v60 = vpop.f32.mrf.mxu1 }
 0x1ec   : > { %v4881_v46 = vmul.f32 %v4497_v27, %v9128_v61  ;;  %v4498_v31 = vmul.f32 0.5, %v4114_v18  ;;  %v3354_v2 = vmul.f32 0.7978846, %v2970_v54  ;;  %v1821_v21 = vmul.f32 %v9234_v1, %v9234_v1  ;;  %6712 = vmatmul.mubr.msk.bf16.gmra.mxu0 %vm522_vm2, %v7278_v39  ;;  %6760 = vmatmul.mubr.msk.bf16.gmra.mxu1 %vm522_vm2, %v7278_v39 }
 0x1ed   : > { %v4883_v32 = vmul.f32 %v4499_v3, %v9130_v6  ;;  %v4500_v36 = vmul.f32 0.5, %v4116_v10  ;;  %v3356_v5 = vmul.f32 0.7978846, %v2972_v43  ;;  %v1823_v52 = vmul.f32 %v9236_v0, %v9236_v0  ;;  %1175 = vmatprep.mubr.bf16.mxu0 %v11609_v53  ;;  %1688 = vmatprep.mubr.bf16.mxu1 %v11609_v53 }
 0x1ee   : > { %v4882_v47 = vmul.f32 %v4498_v31, %v9138_v55  ;;  %7501 = vtanh.f32 %v3354_v2  ;;  %v2205_v61 = vmul.f32 %v1821_v21, %v9234_v1  ;;  %v1822_v7 = vmul.f32 %v9246_v15, %v9246_v15 }
 0x1ef   : > { %v7490_v37 = vpop.eup %7489  ;;  %v4884_v6 = vmul.f32 %v4500_v36, %v9140_v14  ;;  %7503 = vtanh.f32 %v3356_v5  ;;  %v2207_v11 = vmul.f32 %v1823_v52, %v9236_v0  ;;  %v1824_v22 = vmul.f32 %v9248_v44, %v9248_v44 }
 0x1f0   : > { %v7492_v55 = vpop.eup %7491  ;;  %v7009_v23 = vpack.c.bf16 %v4882_v47, %v4881_v46  ;;  %v4117_v48 = vadd.f32 1.0, %v7490_v37  ;;  %v2589_v14 = vmul.f32 0.044715, %v2205_v61  ;;  %v2206_v27 = vmul.f32 %v1822_v7, %v9246_v15 }
 0x1f1   : > { %v7010_v18 = vpack.c.bf16 %v4884_v6, %v4883_v32  ;;  %v4119_v54 = vadd.f32 1.0, %v7492_v55  ;;  %v2591_v3 = vmul.f32 0.044715, %v2207_v11  ;;  %v2208_v10 = vmul.f32 %v1824_v22, %v9248_v44 }
 0x1f2   : > { %6367 = vst [vmem:[%s8604_s12 + $0x190] sm:$0xff] %v7009_v23  ;;  %v4501_v43 = vmul.f32 0.5, %v4117_v48  ;;  %v2973_v31 = vadd.f32 %v2589_v14, %v9234_v1  ;;  %v2590_v2 = vmul.f32 0.044715, %v2206_v27  ;;  %v1825_v46 = vmul.f32 %v9264_v24, %v9264_v24 }
 0x1f3   : > { %6368 = vst [vmem:[%s8604_s12 + $0x198] sm:$0xff] %v7010_v18  ;;  %v4503_v21 = vmul.f32 0.5, %v4119_v54  ;;  %v2975_v36 = vadd.f32 %v2591_v3, %v9236_v0  ;;  %v2592_v5 = vmul.f32 0.044715, %v2208_v10  ;;  %v1827_v32 = vmul.f32 %v9266_v62, %v9266_v62  ;;  %v9508_v3 = vpop.f32.mrf.mxu0  ;;  %v9510_v10 = vpop.f32.mrf.mxu1 }
 0x1f4   : > { %v4885_v52 = vmul.f32 %v4501_v43, %v9169_v9  ;;  %v3357_v39 = vmul.f32 0.7978846, %v2973_v31  ;;  %v2974_v47 = vadd.f32 %v2590_v2, %v9246_v15  ;;  %v2209_v61 = vmul.f32 %v1825_v46, %v9264_v24 }
 0x1f5   : > { %v7494_v7 = vpop.eup %7493  ;;  %v4887_v37 = vmul.f32 %v4503_v21, %v9171_v26  ;;  %v3359_v6 = vmul.f32 0.7978846, %v2975_v36  ;;  %v2976_v11 = vadd.f32 %v2592_v5, %v9248_v44  ;;  %v2211_v22 = vmul.f32 %v1827_v32, %v9266_v62 }
 0x1f6   : > { %v7496_v55 = vpop.eup %7495  ;;  %v4118_v23 = vadd.f32 1.0, %v7494_v7  ;;  %7505 = vtanh.f32 %v3357_v39  ;;  %v3358_v48 = vmul.f32 0.7978846, %v2974_v47  ;;  %v2593_v14 = vmul.f32 0.044715, %v2209_v61 }
 0x1f7   : > { %v7498_v27 = vpop.eup %7497  ;;  %v4120_v9 = vadd.f32 1.0, %v7496_v55  ;;  %7507 = vtanh.f32 %v3359_v6  ;;  %v3360_v18 = vmul.f32 0.7978846, %v2976_v11  ;;  %v2595_v54 = vmul.f32 0.044715, %v2211_v22  ;;  %v9520_v55 = vpop.f32.mrf.mxu0 }
 0x1f8   : > { %v7500_v26 = vpop.eup %7499  ;;  %v4502_v43 = vmul.f32 0.5, %v4118_v23  ;;  %v4121_v31 = vadd.f32 1.0, %v7498_v27  ;;  %7509 = vtanh.f32 %v3358_v48  ;;  %v2977_v2 = vadd.f32 %v2593_v14, %v9264_v24  ;;  %v9522_v23 = vpop.f32.mrf.mxu1 }
 0x1f9   : > { %v4504_v46 = vmul.f32 0.5, %v4120_v9  ;;  %v4123_v21 = vadd.f32 1.0, %v7500_v26  ;;  %7511 = vtanh.f32 %v3360_v18  ;;  %v2979_v36 = vadd.f32 %v2595_v54, %v9266_v62 }
 0x1fa   : > { %v4886_v5 = vmul.f32 %v4502_v43, %v9181_v50  ;;  %v4505_v32 = vmul.f32 0.5, %v4121_v31  ;;  %v3361_v39 = vmul.f32 0.7978846, %v2977_v2  ;;  %v1826_v47 = vmul.f32 %v9279_v34, %v9279_v34  ;;  %v9538_v2 = vpop.f32.mrf.mxu0 }
 0x1fb   : > { %v7502_v61 = vpop.eup %7501  ;;  %v4888_v7 = vmul.f32 %v4504_v46, %v9183_v33  ;;  %v4507_v6 = vmul.f32 0.5, %v4123_v21  ;;  %v3363_v11 = vmul.f32 0.7978846, %v2979_v36  ;;  %v1828_v22 = vmul.f32 %v9281_v51, %v9281_v51  ;;  %v9540_v46 = vpop.f32.mrf.mxu1 }
 0x1fc   : > { %v7504_v50 = vpop.eup %7503  ;;  %v7011_v48 = vpack.c.bf16 %v4886_v5, %v4885_v52  ;;  %v4889_v14 = vmul.f32 %v4505_v32, %v9189_v8  ;;  %v4122_v27 = vadd.f32 1.0, %v7502_v61  ;;  %7513 = vtanh.f32 %v3361_v39 }
 0x1fd   : > { %v7012_v9 = vpack.c.bf16 %v4888_v7, %v4887_v37  ;;  %v4891_v18 = vmul.f32 %v4507_v6, %v9191_v38  ;;  %v4124_v33 = vadd.f32 1.0, %v7504_v50  ;;  %7515 = vtanh.f32 %v3363_v11  ;;  %v7279_v6 = vld [vmem:[%s11596_s1 + $0x170] sm:$0xff]  }
 0x1fe   : > { %6369 = vst [vmem:[%s8604_s12 + $0x1a0] sm:$0xff] %v7011_v48  ;;  %v4506_v54 = vmul.f32 0.5, %v4122_v27  ;;  %v2210_v26 = vmul.f32 %v1826_v47, %v9279_v34  ;;  %v2212_v43 = vmul.f32 %v1828_v22, %v9281_v51  ;;  %v1829_v31 = vmul.f32 %v9298_v49, %v9298_v49 }
 0x1ff   : > { %6370 = vst [vmem:[%s8604_s12 + $0x1a8] sm:$0xff] %v7012_v9  ;;  %v4508_v52 = vmul.f32 0.5, %v4124_v33  ;;  %v1831_v8 = vmul.f32 %v9300_v57, %v9300_v57  ;;  %v1830_v37 = vmul.f32 %v9318_v29, %v9318_v29  ;;  %v1832_v38 = vmul.f32 %v9320_v30, %v9320_v30 }
 0x200   : > { %v4890_v21 = vmul.f32 %v4506_v54, %v9210_v59  ;;  %v2594_v36 = vmul.f32 0.044715, %v2210_v26  ;;  %v2596_v5 = vmul.f32 0.044715, %v2212_v43  ;;  %v2213_v32 = vmul.f32 %v1829_v31, %v9298_v49  ;;  %v9553_v54 = vpop.f32.mrf.mxu0  ;;  %v9555_v26 = vpop.f32.mrf.mxu1  ;;  %6713 = vmatmul.mubr.msk.bf16.gmra.mxu0 %vm522_vm2, %v7279_v6  ;;  %6761 = vmatmul.mubr.msk.bf16.gmra.mxu1 %vm522_vm2, %v7279_v6 }
 0x201   : > { %v4892_v39 = vmul.f32 %v4508_v52, %v9212_v45  ;;  %v2215_v47 = vmul.f32 %v1831_v8, %v9300_v57  ;;  %v2214_v61 = vmul.f32 %v1830_v37, %v9318_v29  ;;  %v2216_v7 = vmul.f32 %v1832_v38, %v9320_v30  ;;  %1185 = vmatprep.mubr.bf16.mxu0 %v11609_v53 }
 0x202   : > { %v7013_v11 = vpack.c.bf16 %v4890_v21, %v4889_v14  ;;  %v2978_v59 = vadd.f32 %v2594_v36, %v9279_v34  ;;  %v2980_v22 = vadd.f32 %v2596_v5, %v9281_v51  ;;  %v2597_v50 = vmul.f32 0.044715, %v2213_v32  ;;  %1698 = vmatprep.mubr.bf16.mxu1 %v11609_v53 }
 0x203   : > { %v7506_v48 = vpop.eup %7505  ;;  %v7014_v27 = vpack.c.bf16 %v4892_v39, %v4891_v18  ;;  %v2599_v45 = vmul.f32 0.044715, %v2215_v47  ;;  %v2598_v9 = vmul.f32 0.044715, %v2214_v61  ;;  %v2600_v33 = vmul.f32 0.044715, %v2216_v7 }
 0x204   : > { %v7508_v14 = vpop.eup %7507  ;;  %6371 = vst [vmem:[%s8604_s12 + $0x1b0] sm:$0xff] %v7013_v11  ;;  %v4125_v43 = vadd.f32 1.0, %v7506_v48  ;;  %v3362_v31 = vmul.f32 0.7978846, %v2978_v59  ;;  %v3364_v52 = vmul.f32 0.7978846, %v2980_v22  ;;  %v2981_v8 = vadd.f32 %v2597_v50, %v9298_v49 }
 0x205   : > { %v7510_v18 = vpop.eup %7509  ;;  %6372 = vst [vmem:[%s8604_s12 + $0x1b8] sm:$0xff] %v7014_v27  ;;  %v4127_v37 = vadd.f32 1.0, %v7508_v14  ;;  %v2983_v38 = vadd.f32 %v2599_v45, %v9300_v57  ;;  %v2982_v21 = vadd.f32 %v2598_v9, %v9318_v29  ;;  %v2984_v36 = vadd.f32 %v2600_v33, %v9320_v30 }
 0x206   : > { %v7512_v5 = vpop.eup %7511  ;;  %v4509_v32 = vmul.f32 0.5, %v4125_v43  ;;  %v4126_v39 = vadd.f32 1.0, %v7510_v18  ;;  %7517 = vtanh.f32 %v3362_v31  ;;  %v3365_v47 = vmul.f32 0.7978846, %v2981_v8  ;;  %v9572_v43 = vpop.f32.mrf.mxu0 }
 0x207   : > { %v4511_v61 = vmul.f32 0.5, %v4127_v37  ;;  %v4128_v7 = vadd.f32 1.0, %v7512_v5  ;;  %7519 = vtanh.f32 %v3364_v52  ;;  %v3367_v6 = vmul.f32 0.7978846, %v2983_v38 }
 0x208   : > { %v4893_v53 = vmul.f32 %v4509_v32, %v9234_v1  ;;  %v4510_v11 = vmul.f32 0.5, %v4126_v39  ;;  %7521 = vtanh.f32 %v3365_v47  ;;  %v3366_v59 = vmul.f32 0.7978846, %v2982_v21  ;;  %v9574_v1 = vpop.f32.mrf.mxu1  ;;  %v11620_v32 = vld [vmem:[#allocation6_spill] sm:$0xff] }
 0x209   : > { %v7514_v22 = vpop.eup %7513  ;;  %v4895_v50 = vmul.f32 %v4511_v61, %v9236_v0  ;;  %v4512_v48 = vmul.f32 0.5, %v4128_v7  ;;  %7523 = vtanh.f32 %v3367_v6  ;;  %v3368_v27 = vmul.f32 0.7978846, %v2984_v36  ;;  %v11619_v0 = vld [vmem:[#allocation5_spill] sm:$0xff]  ;;  %v9592_v6 = vpop.f32.mrf.mxu0 }
 0x20a   : > { %v7516_v45 = vpop.eup %7515  ;;  %v4894_v9 = vmul.f32 %v4510_v11, %v9246_v15  ;;  %v4129_v33 = vadd.f32 1.0, %v7514_v22  ;;  %7525 = vtanh.f32 %v3366_v59  ;;  %v1833_v14 = vmul.f32 %v9339_v4, %v9339_v4 }
 0x20b   : > { %v4896_v31 = vmul.f32 %v4512_v48, %v9248_v44  ;;  %v4131_v52 = vadd.f32 1.0, %v7516_v45  ;;  %7527 = vtanh.f32 %v3368_v27  ;;  %v1835_v8 = vmul.f32 %v11619_v0, %v11619_v0 }
 0x20c   : > { %v7015_v18 = vpack.c.bf16 %v4894_v9, %v4893_v53  ;;  %v4513_v15 = vmul.f32 0.5, %v4129_v33  ;;  %v2217_v37 = vmul.f32 %v1833_v14, %v9339_v4  ;;  %v1834_v38 = vmul.f32 %v9350_v25, %v9350_v25  ;;  %v9594_v53 = vpop.f32.mrf.mxu1  ;;  %v11621_v14 = vld [vmem:[#allocation7_spill] sm:$0xff] }
 0x20d   : > { %v7016_v21 = vpack.c.bf16 %v4896_v31, %v4895_v50  ;;  %v4515_v36 = vmul.f32 0.5, %v4131_v52  ;;  %v2219_v5 = vmul.f32 %v1835_v8, %v11619_v0  ;;  %v1836_v44 = vmul.f32 %v11620_v32, %v11620_v32 }
 0x20e   : > { %6373 = vst [vmem:[%s8604_s12 + $0x1c0] sm:$0xff] %v7015_v18  ;;  %v9587_v39 = vmul.f32 %v4513_v15, %v9264_v24  ;;  %v2601_v47 = vmul.f32 0.044715, %v2217_v37  ;;  %v2218_v61 = vmul.f32 %v1834_v38, %v9350_v25  ;;  %v1837_v7 = vmul.f32 %v9371_v12, %v9371_v12  ;;  %v9613_v37 = vpop.f32.mrf.mxu0  ;;  %v9615_v38 = vpop.f32.mrf.mxu1 }
 0x20f   : > { %6374 = vst [vmem:[%s8604_s12 + $0x1c8] sm:$0xff] %v7016_v21  ;;  %v9598_v11 = vmul.f32 %v4515_v36, %v9266_v62  ;;  %v2603_v59 = vmul.f32 0.044715, %v2219_v5  ;;  %v2220_v22 = vmul.f32 %v1836_v44, %v11620_v32  ;;  %v1839_v24 = vmul.f32 %v9373_v17, %v9373_v17 }
 0x210   : > { %v2985_v50 = vadd.f32 %v2601_v47, %v9339_v4  ;;  %v2602_v48 = vmul.f32 0.044715, %v2218_v61  ;;  %v2221_v27 = vmul.f32 %v1837_v7, %v9371_v12  ;;  %v1838_v45 = vmul.f32 %v9389_v63, %v9389_v63 }
 0x211   : > { %v2987_v9 = vadd.f32 %v2603_v59, %v11619_v0  ;;  %v2604_v33 = vmul.f32 0.044715, %v2220_v22  ;;  %v2223_v62 = vmul.f32 %v1839_v24, %v9373_v17  ;;  %v1840_v31 = vmul.f32 %v11621_v14, %v11621_v14  ;;  %v7280_v24 = vld [vmem:[%s11596_s1 + $0x178] sm:$0xff]  }
 0x212   : > { %v3369_v52 = vmul.f32 0.7978846, %v2985_v50  ;;  %v2986_v8 = vadd.f32 %v2602_v48, %v9350_v25  ;;  %v2605_v18 = vmul.f32 0.044715, %v2221_v27  ;;  %v2222_v15 = vmul.f32 %v1838_v45, %v9389_v63 }
 0x213   : > { %v7518_v21 = vpop.eup %7517  ;;  %v3371_v36 = vmul.f32 0.7978846, %v2987_v9  ;;  %v2988_v5 = vadd.f32 %v2604_v33, %v11620_v32  ;;  %v2607_v44 = vmul.f32 0.044715, %v2223_v62  ;;  %v2224_v47 = vmul.f32 %v1840_v31, %v11621_v14 }
 0x214   : > { %v7520_v61 = vpop.eup %7519  ;;  %v4130_v7 = vadd.f32 1.0, %v7518_v21  ;;  %7529 = vtanh.f32 %v3369_v52  ;;  %v3370_v59 = vmul.f32 0.7978846, %v2986_v8  ;;  %v2989_v22 = vadd.f32 %v2605_v18, %v9371_v12  ;;  %v9624_v21 = vpop.f32.mrf.mxu0  ;;  %6714 = vmatmul.mubr.msk.bf16.gmra.mxu0 %vm522_vm2, %v7280_v24 }
 0x215   : > { %v7522_v50 = vpop.eup %7521  ;;  %v4132_v48 = vadd.f32 1.0, %v7520_v61  ;;  %7531 = vtanh.f32 %v3371_v36  ;;  %v3372_v27 = vmul.f32 0.7978846, %v2988_v5  ;;  %v2991_v45 = vadd.f32 %v2607_v44, %v9373_v17  ;;  %v9626_v52 = vpop.f32.mrf.mxu1  ;;  %6762 = vmatmul.mubr.msk.bf16.gmra.mxu1 %vm522_vm2, %v7280_v24 }
 0x216   : > { %v7524_v9 = vpop.eup %7523  ;;  %v4514_v33 = vmul.f32 0.5, %v4130_v7  ;;  %v4133_v62 = vadd.f32 1.0, %v7522_v50  ;;  %7533 = vtanh.f32 %v3370_v59  ;;  %v3373_v31 = vmul.f32 0.7978846, %v2989_v22  ;;  %11622 = vst [vmem:[#allocation5_spill] sm:$0xff] %v9626_v52 }
 0x217   : > { %v7526_v8 = vpop.eup %7525  ;;  %v4516_v18 = vmul.f32 0.5, %v4132_v48  ;;  %v4135_v61 = vadd.f32 1.0, %v7524_v9  ;;  %7535 = vtanh.f32 %v3372_v27  ;;  %v3375_v36 = vmul.f32 0.7978846, %v2991_v45 }
 0x218   : > { %v7528_v5 = vpop.eup %7527  ;;  %v4898_v44 = vmul.f32 %v4514_v33, %v9279_v34  ;;  %v4517_v7 = vmul.f32 0.5, %v4133_v62  ;;  %v4134_v59 = vadd.f32 1.0, %v7526_v8  ;;  %7537 = vtanh.f32 %v3373_v31 }
 0x219   : > { %v4900_v22 = vmul.f32 %v4516_v18, %v9281_v51  ;;  %v4519_v50 = vmul.f32 0.5, %v4135_v61  ;;  %v4136_v52 = vadd.f32 1.0, %v7528_v5  ;;  %7539 = vtanh.f32 %v3375_v36 }
 0x21a   : > { %v7017_v24 = vpack.c.bf16 %v4898_v44, %v9587_v39  ;;  %v4901_v48 = vmul.f32 %v4517_v7, %v9298_v49  ;;  %v4518_v9 = vmul.f32 0.5, %v4134_v59  ;;  %v2606_v27 = vmul.f32 0.044715, %v2222_v15 }
 0x21b   : > { %v7018_v45 = vpack.c.bf16 %v4900_v22, %v9598_v11  ;;  %v4903_v34 = vmul.f32 %v4519_v50, %v9300_v57  ;;  %v4520_v33 = vmul.f32 0.5, %v4136_v52  ;;  %v2608_v62 = vmul.f32 0.044715, %v2224_v47 }
 0x21c   : > { %6375 = vst [vmem:[%s8604_s12 + $0x1d0] sm:$0xff] %v7017_v24  ;;  %v4902_v31 = vmul.f32 %v4518_v9, %v9318_v29  ;;  %v2990_v51 = vadd.f32 %v2606_v27, %v9389_v63  ;;  %v1841_v8 = vmul.f32 %v9402_v58, %v9402_v58  ;;  %v1843_v49 = vmul.f32 %v9404_v40, %v9404_v40 }
 0x21d   : > { %6376 = vst [vmem:[%s8604_s12 + $0x1d8] sm:$0xff] %v7018_v45  ;;  %v4904_v39 = vmul.f32 %v4520_v33, %v9320_v30  ;;  %v2992_v11 = vadd.f32 %v2608_v62, %v11621_v14  ;;  %v1842_v57 = vmul.f32 %v9412_v20, %v9412_v20  ;;  %v1844_v29 = vmul.f32 %v9414_v56, %v9414_v56 }
 0x21e   : > { %v7019_v15 = vpack.c.bf16 %v4902_v31, %v4901_v48  ;;  %v3374_v47 = vmul.f32 0.7978846, %v2990_v51  ;;  %v2225_v52 = vmul.f32 %v1841_v8, %v9402_v58  ;;  %v2227_v18 = vmul.f32 %v1843_v49, %v9404_v40 }
 0x21f   : > { %v7020_v61 = vpack.c.bf16 %v4904_v39, %v4903_v34  ;;  %v3376_v36 = vmul.f32 0.7978846, %v2992_v11  ;;  %v2226_v5 = vmul.f32 %v1842_v57, %v9412_v20  ;;  %v2228_v30 = vmul.f32 %v1844_v29, %v9414_v56 }
 0x220   : > { %6377 = vst [vmem:[%s8604_s12 + $0x1e0] sm:$0xff] %v7019_v15  ;;  %7541 = vtanh.f32 %v3374_v47  ;;  %v2609_v44 = vmul.f32 0.044715, %v2225_v52  ;;  %v2611_v7 = vmul.f32 0.044715, %v2227_v18  ;;  %v1845_v59 = vmul.f32 %v9443_v16, %v9443_v16 }
 0x221   : > { %v7530_v22 = vpop.eup %7529  ;;  %6378 = vst [vmem:[%s8604_s12 + $0x1e8] sm:$0xff] %v7020_v61  ;;  %7543 = vtanh.f32 %v3376_v36  ;;  %v2610_v50 = vmul.f32 0.044715, %v2226_v5  ;;  %v2612_v24 = vmul.f32 0.044715, %v2228_v30  ;;  %v1847_v48 = vmul.f32 %v9445_v41, %v9445_v41 }
 0x222   : > { %v7532_v9 = vpop.eup %7531  ;;  %v4137_v27 = vadd.f32 1.0, %v7530_v22  ;;  %v2993_v45 = vadd.f32 %v2609_v44, %v9402_v58  ;;  %v2995_v34 = vadd.f32 %v2611_v7, %v9404_v40  ;;  %v2229_v33 = vmul.f32 %v1845_v59, %v9443_v16 }
 0x223   : > { %v7534_v62 = vpop.eup %7533  ;;  %v4139_v31 = vadd.f32 1.0, %v7532_v9  ;;  %v2994_v51 = vadd.f32 %v2610_v50, %v9412_v20  ;;  %v2996_v8 = vadd.f32 %v2612_v24, %v9414_v56  ;;  %v2231_v49 = vmul.f32 %v1847_v48, %v9445_v41 }
 0x224   : > { %v7536_v39 = vpop.eup %7535  ;;  %v4521_v11 = vmul.f32 0.5, %v4137_v27  ;;  %v4138_v57 = vadd.f32 1.0, %v7534_v62  ;;  %v3377_v29 = vmul.f32 0.7978846, %v2993_v45  ;;  %v3379_v15 = vmul.f32 0.7978846, %v2995_v34 }
 0x225   : > { %v7538_v47 = vpop.eup %7537  ;;  %v4523_v52 = vmul.f32 0.5, %v4139_v31  ;;  %v4140_v18 = vadd.f32 1.0, %v7536_v39  ;;  %v3378_v61 = vmul.f32 0.7978846, %v2994_v51  ;;  %v3380_v36 = vmul.f32 0.7978846, %v2996_v8 }
 0x226   : > { %v7540_v5 = vpop.eup %7539  ;;  %v4905_v30 = vmul.f32 %v4521_v11, %v9339_v4  ;;  %v4522_v44 = vmul.f32 0.5, %v4138_v57  ;;  %v4141_v7 = vadd.f32 1.0, %v7538_v47  ;;  %7545 = vtanh.f32 %v3377_v29 }
 0x227   : > { %v4907_v59 = vmul.f32 %v4523_v52, %v11619_v0  ;;  %v4524_v22 = vmul.f32 0.5, %v4140_v18  ;;  %v4143_v50 = vadd.f32 1.0, %v7540_v5  ;;  %7547 = vtanh.f32 %v3379_v15 }
 0x228   : > { %v4906_v24 = vmul.f32 %v4522_v44, %v9350_v25  ;;  %v4525_v48 = vmul.f32 0.5, %v4141_v7  ;;  %7549 = vtanh.f32 %v3378_v61  ;;  %v2613_v9 = vmul.f32 0.044715, %v2229_v33 }
 0x229   : > { %v4908_v27 = vmul.f32 %v4524_v22, %v11620_v32  ;;  %v4527_v45 = vmul.f32 0.5, %v4143_v50  ;;  %7551 = vtanh.f32 %v3380_v36  ;;  %v2615_v4 = vmul.f32 0.044715, %v2231_v49 }
 0x22a   : > { %v7021_v34 = vpack.c.bf16 %v4906_v24, %v4905_v30  ;;  %v4909_v62 = vmul.f32 %v4525_v48, %v9371_v12  ;;  %v2997_v0 = vadd.f32 %v2613_v9, %v9443_v16  ;;  %v1846_v31 = vmul.f32 %v9455_v19, %v9455_v19 }
 0x22b   : > { %v7022_v51 = vpack.c.bf16 %v4908_v27, %v4907_v59  ;;  %v4911_v25 = vmul.f32 %v4527_v45, %v9373_v17  ;;  %v2999_v8 = vadd.f32 %v2615_v4, %v9445_v41  ;;  %v1848_v32 = vmul.f32 %v9457_v35, %v9457_v35 }
 0x22c   : > { %6379 = vst [vmem:[%s8604_s12 + $0x1f0] sm:$0xff] %v7021_v34  ;;  %v3381_v33 = vmul.f32 0.7978846, %v2997_v0  ;;  %v2230_v49 = vmul.f32 %v1846_v31, %v9455_v19  ;;  %v1849_v12 = vmul.f32 %v9463_v13, %v9463_v13  ;;  %v1851_v39 = vmul.f32 %v9465_v42, %v9465_v42 }
 0x22d   : > { %v7542_v11 = vpop.eup %7541  ;;  %6380 = vst [vmem:[%s8604_s12 + $0x1f8] sm:$0xff] %v7022_v51  ;;  %v3383_v57 = vmul.f32 0.7978846, %v2999_v8  ;;  %v2232_v17 = vmul.f32 %v1848_v32, %v9457_v35  ;;  %v1850_v29 = vmul.f32 %v9484_v28, %v9484_v28  ;;  %v1852_v15 = vmul.f32 %v9486_v60, %v9486_v60 }
 0x22e   : > { %v7544_v47 = vpop.eup %7543  ;;  %v4142_v52 = vadd.f32 1.0, %v7542_v11  ;;  %7553 = vtanh.f32 %v3381_v33  ;;  %v2614_v18 = vmul.f32 0.044715, %v2230_v49  ;;  %v2233_v61 = vmul.f32 %v1849_v12, %v9463_v13 }
 0x22f   : > { %v4144_v36 = vadd.f32 1.0, %v7544_v47  ;;  %7555 = vtanh.f32 %v3383_v57  ;;  %v2616_v5 = vmul.f32 0.044715, %v2232_v17  ;;  %v2235_v30 = vmul.f32 %v1851_v39, %v9465_v42 }
 0x230   : > { %v4526_v44 = vmul.f32 0.5, %v4142_v52  ;;  %v2998_v7 = vadd.f32 %v2614_v18, %v9455_v19  ;;  %v2617_v59 = vmul.f32 0.044715, %v2233_v61  ;;  %v2234_v22 = vmul.f32 %v1850_v29, %v9484_v28 }
 0x231   : > { %v4528_v50 = vmul.f32 0.5, %v4144_v36  ;;  %v3000_v24 = vadd.f32 %v2616_v5, %v9457_v35  ;;  %v2619_v48 = vmul.f32 0.044715, %v2235_v30  ;;  %v2236_v9 = vmul.f32 %v1852_v15, %v9486_v60 }
 0x232   : > { %v4910_v27 = vmul.f32 %v4526_v44, %v9389_v63  ;;  %v3382_v45 = vmul.f32 0.7978846, %v2998_v7  ;;  %v3001_v4 = vadd.f32 %v2617_v59, %v9463_v13  ;;  %v2618_v34 = vmul.f32 0.044715, %v2234_v22 }
 0x233   : > { %v7546_v0 = vpop.eup %7545  ;;  %v4912_v31 = vmul.f32 %v4528_v50, %v11621_v14  ;;  %v3384_v51 = vmul.f32 0.7978846, %v3000_v24  ;;  %v3003_v8 = vadd.f32 %v2619_v48, %v9465_v42  ;;  %v2620_v32 = vmul.f32 0.044715, %v2236_v9 }
 0x234   : > { %v7548_v33 = vpop.eup %7547  ;;  %v7023_v49 = vpack.c.bf16 %v4910_v27, %v4909_v62  ;;  %v4145_v12 = vadd.f32 1.0, %v7546_v0  ;;  %7557 = vtanh.f32 %v3382_v45  ;;  %v3385_v39 = vmul.f32 0.7978846, %v3001_v4 }
 0x235   : > { %v7550_v11 = vpop.eup %7549  ;;  %v7024_v63 = vpack.c.bf16 %v4912_v31, %v4911_v25  ;;  %v4147_v57 = vadd.f32 1.0, %v7548_v33  ;;  %7559 = vtanh.f32 %v3384_v51  ;;  %v3387_v17 = vmul.f32 0.7978846, %v3003_v8 }
 0x236   : > { %v7552_v29 = vpop.eup %7551  ;;  %6381 = vst [vmem:[%s8604_s12 + $0x200] sm:$0xff] %v7023_v49  ;;  %v4529_v15 = vmul.f32 0.5, %v4145_v12  ;;  %v4146_v47 = vadd.f32 1.0, %v7550_v11  ;;  %7561 = vtanh.f32 %v3385_v39  ;;  %v3002_v14 = vadd.f32 %v2618_v34, %v9484_v28 }
 0x237   : > { %6382 = vst [vmem:[%s8604_s12 + $0x208] sm:$0xff] %v7024_v63  ;;  %v4531_v52 = vmul.f32 0.5, %v4147_v57  ;;  %v4148_v18 = vadd.f32 1.0, %v7552_v29  ;;  %7563 = vtanh.f32 %v3387_v17  ;;  %v3004_v62 = vadd.f32 %v2620_v32, %v9486_v60 }
 0x238   : > { %v4913_v61 = vmul.f32 %v4529_v15, %v9402_v58  ;;  %v4530_v36 = vmul.f32 0.5, %v4146_v47  ;;  %v3386_v25 = vmul.f32 0.7978846, %v3002_v14  ;;  %v1853_v5 = vmul.f32 %v9508_v3, %v9508_v3 }
 0x239   : > { %v4915_v30 = vmul.f32 %v4531_v52, %v9404_v40  ;;  %v4532_v44 = vmul.f32 0.5, %v4148_v18  ;;  %v3388_v7 = vmul.f32 0.7978846, %v3004_v62  ;;  %v1855_v59 = vmul.f32 %v9510_v10, %v9510_v10 }
 0x23a   : > { %v4914_v22 = vmul.f32 %v4530_v36, %v9412_v20  ;;  %7565 = vtanh.f32 %v3386_v25  ;;  %v2237_v50 = vmul.f32 %v1853_v5, %v9508_v3  ;;  %v1854_v58 = vmul.f32 %v9520_v55, %v9520_v55 }
 0x23b   : > { %v7554_v24 = vpop.eup %7553  ;;  %v4916_v48 = vmul.f32 %v4532_v44, %v9414_v56  ;;  %7567 = vtanh.f32 %v3388_v7  ;;  %v2239_v40 = vmul.f32 %v1855_v59, %v9510_v10  ;;  %v1856_v9 = vmul.f32 %v9522_v23, %v9522_v23 }
 0x23c   : > { %v7556_v27 = vpop.eup %7555  ;;  %v7025_v45 = vpack.c.bf16 %v4914_v22, %v4913_v61  ;;  %v4149_v20 = vadd.f32 1.0, %v7554_v24  ;;  %v2621_v4 = vmul.f32 0.044715, %v2237_v50  ;;  %v2238_v34 = vmul.f32 %v1854_v58, %v9520_v55 }
 0x23d   : > { %v7026_v0 = vpack.c.bf16 %v4916_v48, %v4915_v30  ;;  %v4151_v31 = vadd.f32 1.0, %v7556_v27  ;;  %v2623_v51 = vmul.f32 0.044715, %v2239_v40  ;;  %v2240_v8 = vmul.f32 %v1856_v9, %v9522_v23 }
 0x23e   : > { %6383 = vst [vmem:[%s8604_s12 + $0x210] sm:$0xff] %v7025_v45  ;;  %v4533_v56 = vmul.f32 0.5, %v4149_v20  ;;  %v3005_v32 = vadd.f32 %v2621_v4, %v9508_v3  ;;  %v2622_v33 = vmul.f32 0.044715, %v2238_v34  ;;  %v1857_v49 = vmul.f32 %v9538_v2, %v9538_v2 }
 0x23f   : > { %6384 = vst [vmem:[%s8604_s12 + $0x218] sm:$0xff] %v7026_v0  ;;  %v4535_v12 = vmul.f32 0.5, %v4151_v31  ;;  %v3007_v39 = vadd.f32 %v2623_v51, %v9510_v10  ;;  %v2624_v11 = vmul.f32 0.044715, %v2240_v8  ;;  %v1859_v63 = vmul.f32 %v9540_v46, %v9540_v46 }
 0x240   : > { %v4917_v57 = vmul.f32 %v4533_v56, %v9443_v16  ;;  %v3389_v17 = vmul.f32 0.7978846, %v3005_v32  ;;  %v3006_v29 = vadd.f32 %v2622_v33, %v9520_v55  ;;  %v2241_v15 = vmul.f32 %v1857_v49, %v9538_v2 }
 0x241   : > { %v7558_v47 = vpop.eup %7557  ;;  %v4919_v14 = vmul.f32 %v4535_v12, %v9445_v41  ;;  %v3391_v52 = vmul.f32 0.7978846, %v3007_v39  ;;  %v3008_v18 = vadd.f32 %v2624_v11, %v9522_v23  ;;  %v2243_v62 = vmul.f32 %v1859_v63, %v9540_v46 }
 0x242   : > { %v7560_v61 = vpop.eup %7559  ;;  %v4150_v36 = vadd.f32 1.0, %v7558_v47  ;;  %7569 = vtanh.f32 %v3389_v17  ;;  %v3390_v25 = vmul.f32 0.7978846, %v3006_v29  ;;  %v2625_v5 = vmul.f32 0.044715, %v2241_v15 }
 0x243   : > { %v7562_v30 = vpop.eup %7561  ;;  %v4152_v16 = vadd.f32 1.0, %v7560_v61  ;;  %7571 = vtanh.f32 %v3391_v52  ;;  %v3392_v44 = vmul.f32 0.7978846, %v3008_v18  ;;  %v2627_v7 = vmul.f32 0.044715, %v2243_v62 }
 0x244   : > { %v7564_v59 = vpop.eup %7563  ;;  %v4534_v22 = vmul.f32 0.5, %v4150_v36  ;;  %v4153_v50 = vadd.f32 1.0, %v7562_v30  ;;  %7573 = vtanh.f32 %v3390_v25  ;;  %v3009_v41 = vadd.f32 %v2625_v5, %v9538_v2 }
 0x245   : > { %v4536_v58 = vmul.f32 0.5, %v4152_v16  ;;  %v4155_v24 = vadd.f32 1.0, %v7564_v59  ;;  %7575 = vtanh.f32 %v3392_v44  ;;  %v3011_v48 = vadd.f32 %v2627_v7, %v9540_v46 }
 0x246   : > { %v4918_v40 = vmul.f32 %v4534_v22, %v9455_v19  ;;  %v4537_v9 = vmul.f32 0.5, %v4153_v50  ;;  %v3393_v27 = vmul.f32 0.7978846, %v3009_v41  ;;  %v1858_v45 = vmul.f32 %v9553_v54, %v9553_v54 }
 0x247   : > { %v7566_v20 = vpop.eup %7565  ;;  %v4920_v4 = vmul.f32 %v4536_v58, %v9457_v35  ;;  %v4539_v34 = vmul.f32 0.5, %v4155_v24  ;;  %v3395_v0 = vmul.f32 0.7978846, %v3011_v48  ;;  %v1860_v31 = vmul.f32 %v9555_v26, %v9555_v26 }
 0x248   : > { %v7568_v51 = vpop.eup %7567  ;;  %v7027_v8 = vpack.c.bf16 %v4918_v40, %v4917_v57  ;;  %v4921_v56 = vmul.f32 %v4537_v9, %v9463_v13  ;;  %v4154_v19 = vadd.f32 1.0, %v7566_v20  ;;  %7577 = vtanh.f32 %v3393_v27 }
 0x249   : > { %v7028_v32 = vpack.c.bf16 %v4920_v4, %v4919_v14  ;;  %v4923_v33 = vmul.f32 %v4539_v34, %v9465_v42  ;;  %v4156_v49 = vadd.f32 1.0, %v7568_v51  ;;  %7579 = vtanh.f32 %v3395_v0 }
 0x24a   : > { %6385 = vst [vmem:[%s8604_s12 + $0x220] sm:$0xff] %v7027_v8  ;;  %v4538_v12 = vmul.f32 0.5, %v4154_v19  ;;  %v2242_v35 = vmul.f32 %v1858_v45, %v9553_v54  ;;  %v2244_v39 = vmul.f32 %v1860_v31, %v9555_v26  ;;  %v1861_v11 = vmul.f32 %v9572_v43, %v9572_v43 }
 0x24b   : > { %6386 = vst [vmem:[%s8604_s12 + $0x228] sm:$0xff] %v7028_v32  ;;  %v4540_v63 = vmul.f32 0.5, %v4156_v49  ;;  %v1863_v13 = vmul.f32 %v9574_v1, %v9574_v1  ;;  %v1862_v57 = vmul.f32 %v9592_v6, %v9592_v6  ;;  %v1864_v42 = vmul.f32 %v9594_v53, %v9594_v53 }
 0x24c   : > { %v4922_v17 = vmul.f32 %v4538_v12, %v9484_v28  ;;  %v2626_v29 = vmul.f32 0.044715, %v2242_v35  ;;  %v2628_v15 = vmul.f32 0.044715, %v2244_v39  ;;  %v2245_v47 = vmul.f32 %v1861_v11, %v9572_v43  ;;  %v9772_v12 = vpop.f32.mrf.mxu0 }
 0x24d   : > { %v4924_v14 = vmul.f32 %v4540_v63, %v9486_v60  ;;  %v2247_v52 = vmul.f32 %v1863_v13, %v9574_v1  ;;  %v2246_v18 = vmul.f32 %v1862_v57, %v9592_v6  ;;  %v2248_v62 = vmul.f32 %v1864_v42, %v9594_v53  ;;  %v9777_v63 = vpop.f32.mrf.mxu1 }
 0x24e   : > { %v7029_v61 = vpack.c.bf16 %v4922_v17, %v4921_v56  ;;  %v3010_v36 = vadd.f32 %v2626_v29, %v9553_v54  ;;  %v3012_v25 = vadd.f32 %v2628_v15, %v9555_v26  ;;  %v2629_v28 = vmul.f32 0.044715, %v2245_v47 }
 0x24f   : > { %v7570_v5 = vpop.eup %7569  ;;  %v7030_v30 = vpack.c.bf16 %v4924_v14, %v4923_v33  ;;  %v2631_v16 = vmul.f32 0.044715, %v2247_v52  ;;  %v2630_v44 = vmul.f32 0.044715, %v2246_v18  ;;  %v2632_v7 = vmul.f32 0.044715, %v2248_v62  ;;  %v9788_v18 = vpop.f32.mrf.mxu0 }
 0x250   : > { %v7572_v59 = vpop.eup %7571  ;;  %6387 = vst [vmem:[%s8604_s12 + $0x230] sm:$0xff] %v7029_v61  ;;  %v4157_v60 = vadd.f32 1.0, %v7570_v5  ;;  %v3394_v22 = vmul.f32 0.7978846, %v3010_v36  ;;  %v3396_v50 = vmul.f32 0.7978846, %v3012_v25  ;;  %v3013_v41 = vadd.f32 %v2629_v28, %v9572_v43  ;;  %v9797_v28 = vpop.f32.mrf.mxu1 }
 0x251   : > { %v7574_v58 = vpop.eup %7573  ;;  %6388 = vst [vmem:[%s8604_s12 + $0x238] sm:$0xff] %v7030_v30  ;;  %v4159_v24 = vadd.f32 1.0, %v7572_v59  ;;  %v3015_v48 = vadd.f32 %v2631_v16, %v9574_v1  ;;  %v3014_v40 = vadd.f32 %v2630_v44, %v9592_v6  ;;  %v3016_v9 = vadd.f32 %v2632_v7, %v9594_v53  ;;  %v11623_v52 = vld [vmem:[#allocation5_spill] sm:$0xff] }
 0x252   : > { %v7576_v27 = vpop.eup %7575  ;;  %v4541_v45 = vmul.f32 0.5, %v4157_v60  ;;  %v4158_v20 = vadd.f32 1.0, %v7574_v58  ;;  %7581 = vtanh.f32 %v3394_v22  ;;  %v3397_v4 = vmul.f32 0.7978846, %v3013_v41 }
 0x253   : > { %v4543_v34 = vmul.f32 0.5, %v4159_v24  ;;  %v4160_v0 = vadd.f32 1.0, %v7576_v27  ;;  %7583 = vtanh.f32 %v3396_v50  ;;  %v3399_v31 = vmul.f32 0.7978846, %v3015_v48 }
 0x254   : > { %v4925_v51 = vmul.f32 %v4541_v45, %v9508_v3  ;;  %v4542_v8 = vmul.f32 0.5, %v4158_v20  ;;  %7585 = vtanh.f32 %v3397_v4  ;;  %v3398_v56 = vmul.f32 0.7978846, %v3014_v40 }
 0x255   : > { %v7578_v19 = vpop.eup %7577  ;;  %v4927_v32 = vmul.f32 %v4543_v34, %v9510_v10  ;;  %v4544_v33 = vmul.f32 0.5, %v4160_v0  ;;  %7587 = vtanh.f32 %v3399_v31  ;;  %v3400_v49 = vmul.f32 0.7978846, %v3016_v9 }
 0x256   : > { %v7580_v35 = vpop.eup %7579  ;;  %v4926_v39 = vmul.f32 %v4542_v8, %v9520_v55  ;;  %v4161_v11 = vadd.f32 1.0, %v7578_v19  ;;  %7589 = vtanh.f32 %v3398_v56  ;;  %v1865_v3 = vmul.f32 %v9613_v37, %v9613_v37 }
 0x257   : > { %v4928_v13 = vmul.f32 %v4544_v33, %v9522_v23  ;;  %v4163_v57 = vadd.f32 1.0, %v7580_v35  ;;  %7591 = vtanh.f32 %v3400_v49  ;;  %v1867_v10 = vmul.f32 %v9615_v38, %v9615_v38  ;;  %v9820_v33 = vpop.f32.mrf.mxu0 }
 0x258   : > { %v7031_v42 = vpack.c.bf16 %v4926_v39, %v4925_v51  ;;  %v4545_v17 = vmul.f32 0.5, %v4161_v11  ;;  %v2249_v55 = vmul.f32 %v1865_v3, %v9613_v37  ;;  %v1866_v29 = vmul.f32 %v9624_v21, %v9624_v21  ;;  %v9822_v3 = vpop.f32.mrf.mxu1 }
 0x259   : > { %v7032_v15 = vpack.c.bf16 %v4928_v13, %v4927_v32  ;;  %v4547_v47 = vmul.f32 0.5, %v4163_v57  ;;  %v2251_v14 = vmul.f32 %v1867_v10, %v9615_v38  ;;  %v1868_v23 = vmul.f32 %v11623_v52, %v11623_v52 }
 0x25a   : > { %6389 = vst [vmem:[%s8604_s12 + $0x240] sm:$0xff] %v7031_v42  ;;  %v9792_v62 = vmul.f32 %v4545_v17, %v9538_v2  ;;  %v2633_v61 = vmul.f32 0.044715, %v2249_v55  ;;  %v2250_v36 = vmul.f32 %v1866_v29, %v9624_v21  ;;  %v1869_v25 = vmul.f32 %v9772_v12, %v9772_v12 }
 0x25b   : > { %6390 = vst [vmem:[%s8604_s12 + $0x248] sm:$0xff] %v7032_v15  ;;  %v9801_v5 = vmul.f32 %v4547_v47, %v9540_v46  ;;  %v2635_v30 = vmul.f32 0.044715, %v2251_v14  ;;  %v2252_v16 = vmul.f32 %v1868_v23, %v11623_v52  ;;  %v1871_v44 = vmul.f32 %v9777_v63, %v9777_v63 }
 0x25c   : > { %v3017_v2 = vadd.f32 %v2633_v61, %v9613_v37  ;;  %v2634_v7 = vmul.f32 0.044715, %v2250_v36  ;;  %v2253_v59 = vmul.f32 %v1869_v25, %v9772_v12  ;;  %v1870_v60 = vmul.f32 %v9788_v18, %v9788_v18  ;;  %v9826_v61 = vpop.f32.mrf.mxu0 }
 0x25d   : > { %v3019_v22 = vadd.f32 %v2635_v30, %v9615_v38  ;;  %v2636_v50 = vmul.f32 0.044715, %v2252_v16  ;;  %v2255_v46 = vmul.f32 %v1871_v44, %v9777_v63  ;;  %v1872_v41 = vmul.f32 %v9797_v28, %v9797_v28  ;;  %v9830_v44 = vpop.f32.mrf.mxu1 }
 0x25e   : > { %v3401_v58 = vmul.f32 0.7978846, %v3017_v2  ;;  %v3018_v24 = vadd.f32 %v2634_v7, %v9624_v21  ;;  %v2637_v48 = vmul.f32 0.044715, %v2253_v59  ;;  %v2254_v40 = vmul.f32 %v1870_v60, %v9788_v18 }
 0x25f   : > { %v7582_v9 = vpop.eup %7581  ;;  %v3403_v27 = vmul.f32 0.7978846, %v3019_v22  ;;  %v3020_v45 = vadd.f32 %v2636_v50, %v11623_v52  ;;  %v2639_v20 = vmul.f32 0.044715, %v2255_v46  ;;  %v2256_v4 = vmul.f32 %v1872_v41, %v9797_v28  ;;  %v9848_v50 = vpop.f32.mrf.mxu0 }
 0x260   : > { %v7584_v34 = vpop.eup %7583  ;;  %v4162_v0 = vadd.f32 1.0, %v7582_v9  ;;  %7593 = vtanh.f32 %v3401_v58  ;;  %v3402_v31 = vmul.f32 0.7978846, %v3018_v24  ;;  %v3021_v51 = vadd.f32 %v2637_v48, %v9772_v12  ;;  %v9852_v48 = vpop.f32.mrf.mxu1 }
 0x261   : > { %v7586_v8 = vpop.eup %7585  ;;  %v4164_v56 = vadd.f32 1.0, %v7584_v34  ;;  %7595 = vtanh.f32 %v3403_v27  ;;  %v3404_v19 = vmul.f32 0.7978846, %v3020_v45  ;;  %v3023_v32 = vadd.f32 %v2639_v20, %v9777_v63 }
 0x262   : > { %v7588_v49 = vpop.eup %7587  ;;  %v4546_v35 = vmul.f32 0.5, %v4162_v0  ;;  %v4165_v39 = vadd.f32 1.0, %v7586_v8  ;;  %7597 = vtanh.f32 %v3402_v31  ;;  %v3405_v11 = vmul.f32 0.7978846, %v3021_v51 }
 0x263   : > { %v7590_v13 = vpop.eup %7589  ;;  %v4548_v57 = vmul.f32 0.5, %v4164_v56  ;;  %v4167_v10 = vadd.f32 1.0, %v7588_v49  ;;  %7599 = vtanh.f32 %v3404_v19  ;;  %v3407_v42 = vmul.f32 0.7978846, %v3023_v32 }
 0x264   : > { %v7592_v17 = vpop.eup %7591  ;;  %v4930_v55 = vmul.f32 %v4546_v35, %v9553_v54  ;;  %v4549_v29 = vmul.f32 0.5, %v4165_v39  ;;  %v4166_v15 = vadd.f32 1.0, %v7590_v13  ;;  %7601 = vtanh.f32 %v3405_v11  ;;  %v9865_v35 = vpop.f32.mrf.mxu0 }
 0x265   : > { %v4932_v47 = vmul.f32 %v4548_v57, %v9555_v26  ;;  %v4551_v14 = vmul.f32 0.5, %v4167_v10  ;;  %v4168_v23 = vadd.f32 1.0, %v7592_v17  ;;  %7603 = vtanh.f32 %v3407_v42  ;;  %v9867_v39 = vpop.f32.mrf.mxu1 }
 0x266   : > { %v7033_v36 = vpack.c.bf16 %v4930_v55, %v9792_v62  ;;  %v4933_v25 = vmul.f32 %v4549_v29, %v9572_v43  ;;  %v4550_v30 = vmul.f32 0.5, %v4166_v15  ;;  %v2638_v16 = vmul.f32 0.044715, %v2254_v40 }
 0x267   : > { %v7034_v54 = vpack.c.bf16 %v4932_v47, %v9801_v5  ;;  %v4935_v2 = vmul.f32 %v4551_v14, %v9574_v1  ;;  %v4552_v7 = vmul.f32 0.5, %v4168_v23  ;;  %v2640_v26 = vmul.f32 0.044715, %v2256_v4 }
 0x268   : > { %6391 = vst [vmem:[%s8604_s12 + $0x250] sm:$0xff] %v7033_v36  ;;  %v4934_v59 = vmul.f32 %v4550_v30, %v9592_v6  ;;  %v3022_v60 = vadd.f32 %v2638_v16, %v9788_v18  ;;  %v1873_v62 = vmul.f32 %v9820_v33, %v9820_v33  ;;  %v1875_v43 = vmul.f32 %v9822_v3, %v9822_v3 }
 0x269   : > { %6392 = vst [vmem:[%s8604_s12 + $0x258] sm:$0xff] %v7034_v54  ;;  %v4936_v22 = vmul.f32 %v4552_v7, %v9594_v53  ;;  %v3024_v5 = vadd.f32 %v2640_v26, %v9797_v28  ;;  %v1874_v1 = vmul.f32 %v9826_v61, %v9826_v61  ;;  %v1876_v6 = vmul.f32 %v9830_v44, %v9830_v44  ;;  %v9873_v26 = vpop.f32.mrf.mxu0 }
 0x26a   : > { %v7035_v46 = vpack.c.bf16 %v4934_v59, %v4933_v25  ;;  %v3406_v41 = vmul.f32 0.7978846, %v3022_v60  ;;  %v2257_v58 = vmul.f32 %v1873_v62, %v9820_v33  ;;  %v2259_v24 = vmul.f32 %v1875_v43, %v9822_v3  ;;  %v9875_v59 = vpop.f32.mrf.mxu1 }
 0x26b   : > { %v7036_v53 = vpack.c.bf16 %v4936_v22, %v4935_v2  ;;  %v3408_v40 = vmul.f32 0.7978846, %v3024_v5  ;;  %v2258_v9 = vmul.f32 %v1874_v1, %v9826_v61  ;;  %v2260_v27 = vmul.f32 %v1876_v6, %v9830_v44 }
 0x26c   : > { %6393 = vst [vmem:[%s8604_s12 + $0x260] sm:$0xff] %v7035_v46  ;;  %7605 = vtanh.f32 %v3406_v41  ;;  %v2641_v45 = vmul.f32 0.044715, %v2257_v58  ;;  %v2643_v20 = vmul.f32 0.044715, %v2259_v24  ;;  %v1877_v4 = vmul.f32 %v9848_v50, %v9848_v50 }
 0x26d   : > { %v7594_v34 = vpop.eup %7593  ;;  %6394 = vst [vmem:[%s8604_s12 + $0x268] sm:$0xff] %v7036_v53  ;;  %7607 = vtanh.f32 %v3408_v40  ;;  %v2642_v0 = vmul.f32 0.044715, %v2258_v9  ;;  %v2644_v31 = vmul.f32 0.044715, %v2260_v27  ;;  %v1879_v51 = vmul.f32 %v9852_v48, %v9852_v48  ;;  %v9884_v53 = vpop.f32.mrf.mxu0 }
 0x26e   : > { %v7596_v8 = vpop.eup %7595  ;;  %v4169_v56 = vadd.f32 1.0, %v7594_v34  ;;  %v3025_v19 = vadd.f32 %v2641_v45, %v9820_v33  ;;  %v3027_v32 = vadd.f32 %v2643_v20, %v9822_v3  ;;  %v2261_v49 = vmul.f32 %v1877_v4, %v9848_v50 }
 0x26f   : > { %v7598_v11 = vpop.eup %7597  ;;  %v4171_v13 = vadd.f32 1.0, %v7596_v8  ;;  %v3026_v57 = vadd.f32 %v2642_v0, %v9826_v61  ;;  %v3028_v10 = vadd.f32 %v2644_v31, %v9830_v44  ;;  %v2263_v42 = vmul.f32 %v1879_v51, %v9852_v48 }
 0x270   : > { %v7600_v17 = vpop.eup %7599  ;;  %v4553_v55 = vmul.f32 0.5, %v4169_v56  ;;  %v4170_v29 = vadd.f32 1.0, %v7598_v11  ;;  %v3409_v15 = vmul.f32 0.7978846, %v3025_v19  ;;  %v3411_v47 = vmul.f32 0.7978846, %v3027_v32 }
 0x271   : > { %v7602_v14 = vpop.eup %7601  ;;  %v4555_v23 = vmul.f32 0.5, %v4171_v13  ;;  %v4172_v36 = vadd.f32 1.0, %v7600_v17  ;;  %v3410_v25 = vmul.f32 0.7978846, %v3026_v57  ;;  %v3412_v30 = vmul.f32 0.7978846, %v3028_v10 }
 0x272   : > { %v7604_v16 = vpop.eup %7603  ;;  %v4937_v54 = vmul.f32 %v4553_v55, %v9613_v37  ;;  %v4554_v2 = vmul.f32 0.5, %v4170_v29  ;;  %v4173_v7 = vadd.f32 1.0, %v7602_v14  ;;  %7609 = vtanh.f32 %v3409_v15 }
 0x273   : > { %v4939_v60 = vmul.f32 %v4555_v23, %v9615_v38  ;;  %v4556_v62 = vmul.f32 0.5, %v4172_v36  ;;  %v4175_v43 = vadd.f32 1.0, %v7604_v16  ;;  %7611 = vtanh.f32 %v3411_v47 }
 0x274   : > { %v4938_v22 = vmul.f32 %v4554_v2, %v9624_v21  ;;  %v4557_v5 = vmul.f32 0.5, %v4173_v7  ;;  %7613 = vtanh.f32 %v3410_v25  ;;  %v2645_v1 = vmul.f32 0.044715, %v2261_v49  ;;  %v9886_v21 = vpop.f32.mrf.mxu1 }
 0x275   : > { %v4940_v37 = vmul.f32 %v4556_v62, %v11623_v52  ;;  %v4559_v6 = vmul.f32 0.5, %v4175_v43  ;;  %7615 = vtanh.f32 %v3412_v30  ;;  %v2647_v46 = vmul.f32 0.044715, %v2263_v42 }
 0x276   : > { %v7037_v41 = vpack.c.bf16 %v4938_v22, %v4937_v54  ;;  %v4941_v58 = vmul.f32 %v4557_v5, %v9772_v12  ;;  %v3029_v38 = vadd.f32 %v2645_v1, %v9848_v50  ;;  %v1878_v24 = vmul.f32 %v9865_v35, %v9865_v35  ;;  %v9916_v5 = vpop.f32.mrf.mxu1 }
 0x277   : > { %v7038_v40 = vpack.c.bf16 %v4940_v37, %v4939_v60  ;;  %v4943_v9 = vmul.f32 %v4559_v6, %v9777_v63  ;;  %v3031_v52 = vadd.f32 %v2647_v46, %v9852_v48  ;;  %v1880_v27 = vmul.f32 %v9867_v39, %v9867_v39  ;;  %v9914_v60 = vpop.f32.mrf.mxu0 }
 0x278   : > { %6395 = vst [vmem:[%s8604_s12 + $0x270] sm:$0xff] %v7037_v41  ;;  %v3413_v45 = vmul.f32 0.7978846, %v3029_v38  ;;  %v2262_v12 = vmul.f32 %v1878_v24, %v9865_v35  ;;  %v1881_v20 = vmul.f32 %v9873_v26, %v9873_v26  ;;  %v1883_v4 = vmul.f32 %v9875_v59, %v9875_v59 }
 0x279   : > { %v7606_v34 = vpop.eup %7605  ;;  %6396 = vst [vmem:[%s8604_s12 + $0x278] sm:$0xff] %v7038_v40  ;;  %v3415_v0 = vmul.f32 0.7978846, %v3031_v52  ;;  %v2264_v63 = vmul.f32 %v1880_v27, %v9867_v39  ;;  %v1882_v31 = vmul.f32 %v9884_v53, %v9884_v53  ;;  %v1884_v51 = vmul.f32 %v9886_v21, %v9886_v21  ;;  %v9922_v27 = vpop.f32.mrf.mxu0 }
 0x27a   : > { %v7608_v8 = vpop.eup %7607  ;;  %v4174_v56 = vadd.f32 1.0, %v7606_v34  ;;  %7617 = vtanh.f32 %v3413_v45  ;;  %v2646_v19 = vmul.f32 0.044715, %v2262_v12  ;;  %v2265_v32 = vmul.f32 %v1881_v20, %v9873_v26 }
 0x27b   : > { %v4176_v49 = vadd.f32 1.0, %v7608_v8  ;;  %7619 = vtanh.f32 %v3415_v0  ;;  %v2648_v11 = vmul.f32 0.044715, %v2264_v63  ;;  %v2267_v13 = vmul.f32 %v1883_v4, %v9875_v59  ;;  %v9927_v4 = vpop.f32.mrf.mxu1 }
 0x27c   : > { %v4558_v57 = vmul.f32 0.5, %v4174_v56  ;;  %v3030_v10 = vadd.f32 %v2646_v19, %v9865_v35  ;;  %v2649_v42 = vmul.f32 0.044715, %v2265_v32  ;;  %v2266_v17 = vmul.f32 %v1882_v31, %v9884_v53 }
 0x27d   : > { %v4560_v55 = vmul.f32 0.5, %v4176_v49  ;;  %v3032_v29 = vadd.f32 %v2648_v11, %v9867_v39  ;;  %v2651_v15 = vmul.f32 0.044715, %v2267_v13  ;;  %v2268_v47 = vmul.f32 %v1884_v51, %v9886_v21  ;;  %v9940_v49 = vpop.f32.mrf.mxu0 }
 0x27e   : > { %v4942_v14 = vmul.f32 %v4558_v57, %v9788_v18  ;;  %v3414_v23 = vmul.f32 0.7978846, %v3030_v10  ;;  %v3033_v36 = vadd.f32 %v2649_v42, %v9873_v26  ;;  %v2650_v25 = vmul.f32 0.044715, %v2266_v17  ;;  %v9943_v42 = vpop.f32.mrf.mxu1 }
 0x27f   : > { %v7610_v30 = vpop.eup %7609  ;;  %v4944_v16 = vmul.f32 %v4560_v55, %v9797_v28  ;;  %v3416_v54 = vmul.f32 0.7978846, %v3032_v29  ;;  %v3035_v2 = vadd.f32 %v2651_v15, %v9875_v59  ;;  %v2652_v7 = vmul.f32 0.044715, %v2268_v47 }
 0x280   : > { %v7612_v62 = vpop.eup %7611  ;;  %v7039_v43 = vpack.c.bf16 %v4942_v14, %v4941_v58  ;;  %v4177_v22 = vadd.f32 1.0, %v7610_v30  ;;  %7621 = vtanh.f32 %v3414_v23  ;;  %v3417_v18 = vmul.f32 0.7978846, %v3033_v36 }
 0x281   : > { %v7614_v1 = vpop.eup %7613  ;;  %v7040_v37 = vpack.c.bf16 %v4944_v16, %v4943_v9  ;;  %v4179_v6 = vadd.f32 1.0, %v7612_v62  ;;  %7623 = vtanh.f32 %v3416_v54  ;;  %v3419_v28 = vmul.f32 0.7978846, %v3035_v2 }
 0x282   : > { %v7616_v46 = vpop.eup %7615  ;;  %6397 = vst [vmem:[%s8604_s12 + $0x280] sm:$0xff] %v7039_v43  ;;  %v4561_v41 = vmul.f32 0.5, %v4177_v22  ;;  %v4178_v38 = vadd.f32 1.0, %v7614_v1  ;;  %7625 = vtanh.f32 %v3417_v18  ;;  %v3034_v24 = vadd.f32 %v2650_v25, %v9884_v53  ;;  %v9957_v43 = vpop.f32.mrf.mxu0 }
 0x283   : > { %6398 = vst [vmem:[%s8604_s12 + $0x288] sm:$0xff] %v7040_v37  ;;  %v4563_v58 = vmul.f32 0.5, %v4179_v6  ;;  %v4180_v40 = vadd.f32 1.0, %v7616_v46  ;;  %7627 = vtanh.f32 %v3419_v28  ;;  %v3036_v52 = vadd.f32 %v2652_v7, %v9886_v21  ;;  %v9959_v22 = vpop.f32.mrf.mxu1 }
 0x284   : > { %v4945_v9 = vmul.f32 %v4561_v41, %v9820_v33  ;;  %v4562_v45 = vmul.f32 0.5, %v4178_v38  ;;  %v3418_v12 = vmul.f32 0.7978846, %v3034_v24  ;;  %v1885_v20 = vmul.f32 %v9914_v60, %v9914_v60 }
 0x285   : > { %v4947_v34 = vmul.f32 %v4563_v58, %v9822_v3  ;;  %v4564_v0 = vmul.f32 0.5, %v4180_v40  ;;  %v3420_v63 = vmul.f32 0.7978846, %v3036_v52  ;;  %v1887_v31 = vmul.f32 %v9916_v5, %v9916_v5 }
 0x286   : > { %v4946_v51 = vmul.f32 %v4562_v45, %v9826_v61  ;;  %7629 = vtanh.f32 %v3418_v12  ;;  %v2269_v8 = vmul.f32 %v1885_v20, %v9914_v60  ;;  %v1886_v33 = vmul.f32 %v9922_v27, %v9922_v27  ;;  %v9965_v20 = vpop.f32.mrf.mxu0 }
 0x287   : > { %v7618_v56 = vpop.eup %7617  ;;  %v4948_v19 = vmul.f32 %v4564_v0, %v9830_v44  ;;  %7631 = vtanh.f32 %v3420_v63  ;;  %v2271_v3 = vmul.f32 %v1887_v31, %v9916_v5  ;;  %v1888_v32 = vmul.f32 %v9927_v4, %v9927_v4 }
 0x288   : > { %v7620_v61 = vpop.eup %7619  ;;  %v7041_v11 = vpack.c.bf16 %v4946_v51, %v4945_v9  ;;  %v4181_v13 = vadd.f32 1.0, %v7618_v56  ;;  %v2653_v57 = vmul.f32 0.044715, %v2269_v8  ;;  %v2270_v10 = vmul.f32 %v1886_v33, %v9922_v27 }
 0x289   : > { %v7042_v17 = vpack.c.bf16 %v4948_v19, %v4947_v34  ;;  %v4183_v55 = vadd.f32 1.0, %v7620_v61  ;;  %v2655_v44 = vmul.f32 0.044715, %v2271_v3  ;;  %v2272_v29 = vmul.f32 %v1888_v32, %v9927_v4  ;;  %v9967_v34 = vpop.f32.mrf.mxu1 }
 0x28a   : > { %6399 = vst [vmem:[%s8604_s12 + $0x290] sm:$0xff] %v7041_v11  ;;  %v4565_v15 = vmul.f32 0.5, %v4181_v13  ;;  %v3037_v47 = vadd.f32 %v2653_v57, %v9914_v60  ;;  %v2654_v14 = vmul.f32 0.044715, %v2270_v10  ;;  %v1889_v23 = vmul.f32 %v9940_v49, %v9940_v49 }
 0x28b   : > { %6400 = vst [vmem:[%s8604_s12 + $0x298] sm:$0xff] %v7042_v17  ;;  %v4567_v36 = vmul.f32 0.5, %v4183_v55  ;;  %v3039_v25 = vadd.f32 %v2655_v44, %v9916_v5  ;;  %v2656_v30 = vmul.f32 0.044715, %v2272_v29  ;;  %v1891_v16 = vmul.f32 %v9943_v42, %v9943_v42  ;;  %v9977_v17 = vpop.f32.mrf.mxu0  ;;  %v9979_v55 = vpop.f32.mrf.mxu1 }
 0x28c   : > { %v4949_v54 = vmul.f32 %v4565_v15, %v9848_v50  ;;  %v3421_v2 = vmul.f32 0.7978846, %v3037_v47  ;;  %v3038_v7 = vadd.f32 %v2654_v14, %v9922_v27  ;;  %v2273_v62 = vmul.f32 %v1889_v23, %v9940_v49 }
 0x28d   : > { %v7622_v18 = vpop.eup %7621  ;;  %v4951_v1 = vmul.f32 %v4567_v36, %v9852_v48  ;;  %v3423_v37 = vmul.f32 0.7978846, %v3039_v25  ;;  %v3040_v6 = vadd.f32 %v2656_v30, %v9927_v4  ;;  %v2275_v28 = vmul.f32 %v1891_v16, %v9943_v42 }
 0x28e   : > { %v7624_v46 = vpop.eup %7623  ;;  %v4182_v41 = vadd.f32 1.0, %v7622_v18  ;;  %7633 = vtanh.f32 %v3421_v2  ;;  %v3422_v50 = vmul.f32 0.7978846, %v3038_v7  ;;  %v2657_v38 = vmul.f32 0.044715, %v2273_v62 }
 0x28f   : > { %v7626_v24 = vpop.eup %7625  ;;  %v4184_v58 = vadd.f32 1.0, %v7624_v46  ;;  %7635 = vtanh.f32 %v3423_v37  ;;  %v3424_v40 = vmul.f32 0.7978846, %v3040_v6  ;;  %v2659_v52 = vmul.f32 0.044715, %v2275_v28  ;;  %v10000_v37 = vpop.f32.mrf.mxu0 }
 0x290   : > { %v7628_v9 = vpop.eup %7627  ;;  %v4566_v45 = vmul.f32 0.5, %v4182_v41  ;;  %v4185_v12 = vadd.f32 1.0, %v7626_v24  ;;  %7637 = vtanh.f32 %v3422_v50  ;;  %v3041_v48 = vadd.f32 %v2657_v38, %v9940_v49  ;;  %v10004_v41 = vpop.f32.mrf.mxu1 }
 0x291   : > { %v4568_v0 = vmul.f32 0.5, %v4184_v58  ;;  %v4187_v63 = vadd.f32 1.0, %v7628_v9  ;;  %7639 = vtanh.f32 %v3424_v40  ;;  %v3043_v31 = vadd.f32 %v2659_v52, %v9943_v42 }
 0x292   : > { %v4950_v51 = vmul.f32 %v4566_v45, %v9865_v35  ;;  %v4569_v8 = vmul.f32 0.5, %v4185_v12  ;;  %v3425_v33 = vmul.f32 0.7978846, %v3041_v48  ;;  %v1890_v56 = vmul.f32 %v9957_v43, %v9957_v43 }
 0x293   : > { %v7630_v19 = vpop.eup %7629  ;;  %v4952_v3 = vmul.f32 %v4568_v0, %v9867_v39  ;;  %v4571_v32 = vmul.f32 0.5, %v4187_v63  ;;  %v3427_v61 = vmul.f32 0.7978846, %v3043_v31  ;;  %v1892_v11 = vmul.f32 %v9959_v22, %v9959_v22 }
 0x294   : > { %v7632_v13 = vpop.eup %7631  ;;  %v7043_v57 = vpack.c.bf16 %v4950_v51, %v4949_v54  ;;  %v4953_v10 = vmul.f32 %v4569_v8, %v9873_v26  ;;  %v4186_v35 = vadd.f32 1.0, %v7630_v19  ;;  %7641 = vtanh.f32 %v3425_v33  ;;  %v10012_v8 = vpop.f32.mrf.mxu0 }
 0x295   : > { %v7044_v44 = vpack.c.bf16 %v4952_v3, %v4951_v1  ;;  %v4955_v29 = vmul.f32 %v4571_v32, %v9875_v59  ;;  %v4188_v39 = vadd.f32 1.0, %v7632_v13  ;;  %7643 = vtanh.f32 %v3427_v61  ;;  %v10014_v32 = vpop.f32.mrf.mxu1 }
 0x296   : > { %6401 = vst [vmem:[%s8604_s12 + $0x2a0] sm:$0xff] %v7043_v57  ;;  %v4570_v15 = vmul.f32 0.5, %v4186_v35  ;;  %v2274_v47 = vmul.f32 %v1890_v56, %v9957_v43  ;;  %v2276_v14 = vmul.f32 %v1892_v11, %v9959_v22  ;;  %v1893_v26 = vmul.f32 %v9965_v20, %v9965_v20 }
 0x297   : > { %6402 = vst [vmem:[%s8604_s12 + $0x2a8] sm:$0xff] %v7044_v44  ;;  %v4572_v23 = vmul.f32 0.5, %v4188_v39  ;;  %v1895_v36 = vmul.f32 %v9967_v34, %v9967_v34  ;;  %v1894_v25 = vmul.f32 %v9977_v17, %v9977_v17  ;;  %v1896_v59 = vmul.f32 %v9979_v55, %v9979_v55 }
 0x298   : > { %v4954_v30 = vmul.f32 %v4570_v15, %v9884_v53  ;;  %v2658_v16 = vmul.f32 0.044715, %v2274_v47  ;;  %v2660_v54 = vmul.f32 0.044715, %v2276_v14  ;;  %v2277_v2 = vmul.f32 %v1893_v26, %v9965_v20  ;;  %v10018_v47 = vpop.f32.mrf.mxu0 }
 0x299   : > { %v4956_v7 = vmul.f32 %v4572_v23, %v9886_v21  ;;  %v2279_v62 = vmul.f32 %v1895_v36, %v9967_v34  ;;  %v2278_v18 = vmul.f32 %v1894_v25, %v9977_v17  ;;  %v2280_v1 = vmul.f32 %v1896_v59, %v9979_v55  ;;  %v10023_v36 = vpop.f32.mrf.mxu1 }
 0x29a   : > { %v7045_v6 = vpack.c.bf16 %v4954_v30, %v4953_v10  ;;  %v3042_v28 = vadd.f32 %v2658_v16, %v9957_v43  ;;  %v3044_v53 = vadd.f32 %v2660_v54, %v9959_v22  ;;  %v2661_v46 = vmul.f32 0.044715, %v2277_v2 }
 0x29b   : > { %v7634_v50 = vpop.eup %7633  ;;  %v7046_v21 = vpack.c.bf16 %v4956_v7, %v4955_v29  ;;  %v2663_v38 = vmul.f32 0.044715, %v2279_v62  ;;  %v2662_v24 = vmul.f32 0.044715, %v2278_v18  ;;  %v2664_v58 = vmul.f32 0.044715, %v2280_v1  ;;  %v10034_v18 = vpop.f32.mrf.mxu0 }
 0x29c   : > { %v7636_v40 = vpop.eup %7635  ;;  %6403 = vst [vmem:[%s8604_s12 + $0x2b0] sm:$0xff] %v7045_v6  ;;  %v4189_v52 = vadd.f32 1.0, %v7634_v50  ;;  %v3426_v9 = vmul.f32 0.7978846, %v3042_v28  ;;  %v3428_v45 = vmul.f32 0.7978846, %v3044_v53  ;;  %v3045_v12 = vadd.f32 %v2661_v46, %v9965_v20  ;;  %v10043_v46 = vpop.f32.mrf.mxu1 }
 0x29d   : > { %v7638_v48 = vpop.eup %7637  ;;  %6404 = vst [vmem:[%s8604_s12 + $0x2b8] sm:$0xff] %v7046_v21  ;;  %v4191_v0 = vadd.f32 1.0, %v7636_v40  ;;  %v3047_v63 = vadd.f32 %v2663_v38, %v9967_v34  ;;  %v3046_v31 = vadd.f32 %v2662_v24, %v9977_v17  ;;  %v3048_v51 = vadd.f32 %v2664_v58, %v9979_v55 }
 0x29e   : > { %v7640_v33 = vpop.eup %7639  ;;  %v4573_v56 = vmul.f32 0.5, %v4189_v52  ;;  %v4190_v19 = vadd.f32 1.0, %v7638_v48  ;;  %7645 = vtanh.f32 %v3426_v9  ;;  %v3429_v3 = vmul.f32 0.7978846, %v3045_v12 }
 0x29f   : > { %v4575_v61 = vmul.f32 0.5, %v4191_v0  ;;  %v4192_v11 = vadd.f32 1.0, %v7640_v33  ;;  %7647 = vtanh.f32 %v3428_v45  ;;  %v3431_v13 = vmul.f32 0.7978846, %v3047_v63 }
 0x2a0   : > { %v4957_v57 = vmul.f32 %v4573_v56, %v9914_v60  ;;  %v4574_v10 = vmul.f32 0.5, %v4190_v19  ;;  %7649 = vtanh.f32 %v3429_v3  ;;  %v3430_v35 = vmul.f32 0.7978846, %v3046_v31 }
 0x2a1   : > { %v7642_v44 = vpop.eup %7641  ;;  %v4959_v29 = vmul.f32 %v4575_v61, %v9916_v5  ;;  %v4576_v39 = vmul.f32 0.5, %v4192_v11  ;;  %7651 = vtanh.f32 %v3431_v13  ;;  %v3432_v15 = vmul.f32 0.7978846, %v3048_v51 }
 0x2a2   : > { %v7644_v14 = vpop.eup %7643  ;;  %v4958_v26 = vmul.f32 %v4574_v10, %v9922_v27  ;;  %v4193_v23 = vadd.f32 1.0, %v7642_v44  ;;  %7653 = vtanh.f32 %v3430_v35  ;;  %v1897_v60 = vmul.f32 %v10000_v37, %v10000_v37 }
 0x2a3   : > { %v4960_v25 = vmul.f32 %v4576_v39, %v9927_v4  ;;  %v4195_v59 = vadd.f32 1.0, %v7644_v14  ;;  %7655 = vtanh.f32 %v3432_v15  ;;  %v1899_v5 = vmul.f32 %v10004_v41, %v10004_v41  ;;  %v10066_v39 = vpop.f32.mrf.mxu0 }
 0x2a4   : > { %v7047_v30 = vpack.c.bf16 %v4958_v26, %v4957_v57  ;;  %v4577_v16 = vmul.f32 0.5, %v4193_v23  ;;  %v2281_v27 = vmul.f32 %v1897_v60, %v10000_v37  ;;  %v1898_v54 = vmul.f32 %v10012_v8, %v10012_v8  ;;  %v10068_v60 = vpop.f32.mrf.mxu1 }
 0x2a5   : > { %v7048_v2 = vpack.c.bf16 %v4960_v25, %v4959_v29  ;;  %v4579_v7 = vmul.f32 0.5, %v4195_v59  ;;  %v2283_v62 = vmul.f32 %v1899_v5, %v10004_v41  ;;  %v1900_v4 = vmul.f32 %v10014_v32, %v10014_v32 }
 0x2a6   : > { %6405 = vst [vmem:[%s8604_s12 + $0x2c0] sm:$0xff] %v7047_v30  ;;  %v10038_v1 = vmul.f32 %v4577_v16, %v9940_v49  ;;  %v2665_v6 = vmul.f32 0.044715, %v2281_v27  ;;  %v2282_v28 = vmul.f32 %v1898_v54, %v10012_v8  ;;  %v1901_v53 = vmul.f32 %v10018_v47, %v10018_v47 }
 0x2a7   : > { %6406 = vst [vmem:[%s8604_s12 + $0x2c8] sm:$0xff] %v7048_v2  ;;  %v10047_v50 = vmul.f32 %v4579_v7, %v9943_v42  ;;  %v2667_v21 = vmul.f32 0.044715, %v2283_v62  ;;  %v2284_v38 = vmul.f32 %v1900_v4, %v10014_v32  ;;  %v1903_v24 = vmul.f32 %v10023_v36, %v10023_v36 }
 0x2a8   : > { %v3049_v49 = vadd.f32 %v2665_v6, %v10000_v37  ;;  %v2666_v58 = vmul.f32 0.044715, %v2282_v28  ;;  %v2285_v40 = vmul.f32 %v1901_v53, %v10018_v47  ;;  %v1902_v52 = vmul.f32 %v10034_v18, %v10034_v18  ;;  %v10072_v6 = vpop.f32.mrf.mxu0 }
 0x2a9   : > { %v3051_v9 = vadd.f32 %v2667_v21, %v10004_v41  ;;  %v2668_v45 = vmul.f32 0.044715, %v2284_v38  ;;  %v2287_v42 = vmul.f32 %v1903_v24, %v10023_v36  ;;  %v1904_v12 = vmul.f32 %v10043_v46, %v10043_v46  ;;  %v10076_v24 = vpop.f32.mrf.mxu1 }
 0x2aa   : > { %v3433_v48 = vmul.f32 0.7978846, %v3049_v49  ;;  %v3050_v0 = vadd.f32 %v2666_v58, %v10012_v8  ;;  %v2669_v63 = vmul.f32 0.044715, %v2285_v40  ;;  %v2286_v31 = vmul.f32 %v1902_v52, %v10034_v18 }
 0x2ab   : > { %v7646_v51 = vpop.eup %7645  ;;  %v3435_v33 = vmul.f32 0.7978846, %v3051_v9  ;;  %v3052_v56 = vadd.f32 %v2668_v45, %v10014_v32  ;;  %v2671_v19 = vmul.f32 0.044715, %v2287_v42  ;;  %v2288_v3 = vmul.f32 %v1904_v12, %v10043_v46  ;;  %v10094_v45 = vpop.f32.mrf.mxu0 }
 0x2ac   : > { %v7648_v61 = vpop.eup %7647  ;;  %v4194_v11 = vadd.f32 1.0, %v7646_v51  ;;  %7657 = vtanh.f32 %v3433_v48  ;;  %v3434_v13 = vmul.f32 0.7978846, %v3050_v0  ;;  %v3053_v57 = vadd.f32 %v2669_v63, %v10018_v47  ;;  %v10098_v63 = vpop.f32.mrf.mxu1 }
 0x2ad   : > { %v7650_v10 = vpop.eup %7649  ;;  %v4196_v35 = vadd.f32 1.0, %v7648_v61  ;;  %7659 = vtanh.f32 %v3435_v33  ;;  %v3436_v44 = vmul.f32 0.7978846, %v3052_v56  ;;  %v3055_v29 = vadd.f32 %v2671_v19, %v10023_v36 }
 0x2ae   : > { %v7652_v15 = vpop.eup %7651  ;;  %v4578_v14 = vmul.f32 0.5, %v4194_v11  ;;  %v4197_v26 = vadd.f32 1.0, %v7650_v10  ;;  %7661 = vtanh.f32 %v3434_v13  ;;  %v3437_v23 = vmul.f32 0.7978846, %v3053_v57 }
 0x2af   : > { %v7654_v25 = vpop.eup %7653  ;;  %v4580_v59 = vmul.f32 0.5, %v4196_v35  ;;  %v4199_v5 = vadd.f32 1.0, %v7652_v15  ;;  %7663 = vtanh.f32 %v3436_v44  ;;  %v3439_v30 = vmul.f32 0.7978846, %v3055_v29 }
 0x2b0   : > { %v7656_v16 = vpop.eup %7655  ;;  %v4962_v27 = vmul.f32 %v4578_v14, %v9957_v43  ;;  %v4581_v54 = vmul.f32 0.5, %v4197_v26  ;;  %v4198_v2 = vadd.f32 1.0, %v7654_v25  ;;  %7665 = vtanh.f32 %v3437_v23  ;;  %v10111_v14 = vpop.f32.mrf.mxu0 }
 0x2b1   : > { %v4964_v7 = vmul.f32 %v4580_v59, %v9959_v22  ;;  %v4583_v62 = vmul.f32 0.5, %v4199_v5  ;;  %v4200_v4 = vadd.f32 1.0, %v7656_v16  ;;  %7667 = vtanh.f32 %v3439_v30  ;;  %v10113_v26 = vpop.f32.mrf.mxu1 }
 0x2b2   : > { %v7049_v28 = vpack.c.bf16 %v4962_v27, %v10038_v1  ;;  %v4965_v53 = vmul.f32 %v4581_v54, %v9965_v20  ;;  %v4582_v21 = vmul.f32 0.5, %v4198_v2  ;;  %v2670_v38 = vmul.f32 0.044715, %v2286_v31 }
 0x2b3   : > { %v7050_v43 = vpack.c.bf16 %v4964_v7, %v10047_v50  ;;  %v4967_v49 = vmul.f32 %v4583_v62, %v9967_v34  ;;  %v4584_v58 = vmul.f32 0.5, %v4200_v4  ;;  %v2672_v22 = vmul.f32 0.044715, %v2288_v3 }
 0x2b4   : > { %6407 = vst [vmem:[%s8604_s12 + $0x2d0] sm:$0xff] %v7049_v28  ;;  %v4966_v40 = vmul.f32 %v4582_v21, %v9977_v17  ;;  %v3054_v52 = vadd.f32 %v2670_v38, %v10034_v18  ;;  %v1905_v1 = vmul.f32 %v10066_v39, %v10066_v39  ;;  %v1907_v20 = vmul.f32 %v10068_v60, %v10068_v60 }
 0x2b5   : > { %6408 = vst [vmem:[%s8604_s12 + $0x2d8] sm:$0xff] %v7050_v43  ;;  %v4968_v9 = vmul.f32 %v4584_v58, %v9979_v55  ;;  %v3056_v50 = vadd.f32 %v2672_v22, %v10043_v46  ;;  %v1906_v34 = vmul.f32 %v10072_v6, %v10072_v6  ;;  %v1908_v17 = vmul.f32 %v10076_v24, %v10076_v24  ;;  %v10119_v22 = vpop.f32.mrf.mxu0 }
 0x2b6   : > { %v7051_v42 = vpack.c.bf16 %v4966_v40, %v4965_v53  ;;  %v3438_v12 = vmul.f32 0.7978846, %v3054_v52  ;;  %v2289_v48 = vmul.f32 %v1905_v1, %v10066_v39  ;;  %v2291_v0 = vmul.f32 %v1907_v20, %v10068_v60  ;;  %v10121_v40 = vpop.f32.mrf.mxu1 }
 0x2b7   : > { %v7052_v55 = vpack.c.bf16 %v4968_v9, %v4967_v49  ;;  %v3440_v31 = vmul.f32 0.7978846, %v3056_v50  ;;  %v2290_v51 = vmul.f32 %v1906_v34, %v10072_v6  ;;  %v2292_v33 = vmul.f32 %v1908_v17, %v10076_v24 }
 0x2b8   : > { %6409 = vst [vmem:[%s8604_s12 + $0x2e0] sm:$0xff] %v7051_v42  ;;  %7669 = vtanh.f32 %v3438_v12  ;;  %v2673_v56 = vmul.f32 0.044715, %v2289_v48  ;;  %v2675_v19 = vmul.f32 0.044715, %v2291_v0  ;;  %v1909_v3 = vmul.f32 %v10094_v45, %v10094_v45 }
 0x2b9   : > { %v7658_v61 = vpop.eup %7657  ;;  %6410 = vst [vmem:[%s8604_s12 + $0x2e8] sm:$0xff] %v7052_v55  ;;  %7671 = vtanh.f32 %v3440_v31  ;;  %v2674_v11 = vmul.f32 0.044715, %v2290_v51  ;;  %v2676_v13 = vmul.f32 0.044715, %v2292_v33  ;;  %v1911_v57 = vmul.f32 %v10098_v63, %v10098_v63  ;;  %v10130_v55 = vpop.f32.mrf.mxu0 }
 0x2ba   : > { %v7660_v10 = vpop.eup %7659  ;;  %v4201_v35 = vadd.f32 1.0, %v7658_v61  ;;  %v3057_v44 = vadd.f32 %v2673_v56, %v10066_v39  ;;  %v3059_v29 = vadd.f32 %v2675_v19, %v10068_v60  ;;  %v2293_v15 = vmul.f32 %v1909_v3, %v10094_v45 }
 0x2bb   : > { %v7662_v23 = vpop.eup %7661  ;;  %v4203_v25 = vadd.f32 1.0, %v7660_v10  ;;  %v3058_v59 = vadd.f32 %v2674_v11, %v10072_v6  ;;  %v3060_v5 = vadd.f32 %v2676_v13, %v10076_v24  ;;  %v2295_v30 = vmul.f32 %v1911_v57, %v10098_v63 }
 0x2bc   : > { %v7664_v16 = vpop.eup %7663  ;;  %v4585_v27 = vmul.f32 0.5, %v4201_v35  ;;  %v4202_v54 = vadd.f32 1.0, %v7662_v23  ;;  %v3441_v2 = vmul.f32 0.7978846, %v3057_v44  ;;  %v3443_v7 = vmul.f32 0.7978846, %v3059_v29 }
 0x2bd   : > { %v7666_v62 = vpop.eup %7665  ;;  %v4587_v4 = vmul.f32 0.5, %v4203_v25  ;;  %v4204_v28 = vadd.f32 1.0, %v7664_v16  ;;  %v3442_v53 = vmul.f32 0.7978846, %v3058_v59  ;;  %v3444_v21 = vmul.f32 0.7978846, %v3060_v5 }
 0x2be   : > { %v7668_v38 = vpop.eup %7667  ;;  %v4969_v43 = vmul.f32 %v4585_v27, %v10000_v37  ;;  %v4586_v49 = vmul.f32 0.5, %v4202_v54  ;;  %v4205_v58 = vadd.f32 1.0, %v7666_v62  ;;  %7673 = vtanh.f32 %v3441_v2 }
 0x2bf   : > { %v4971_v52 = vmul.f32 %v4587_v4, %v10004_v41  ;;  %v4588_v1 = vmul.f32 0.5, %v4204_v28  ;;  %v4207_v20 = vadd.f32 1.0, %v7668_v38  ;;  %7675 = vtanh.f32 %v3443_v7 }
 0x2c0   : > { %v4970_v9 = vmul.f32 %v4586_v49, %v10012_v8  ;;  %v4589_v50 = vmul.f32 0.5, %v4205_v58  ;;  %7677 = vtanh.f32 %v3442_v53  ;;  %v2677_v34 = vmul.f32 0.044715, %v2293_v15  ;;  %v10132_v8 = vpop.f32.mrf.mxu1 }
 0x2c1   : > { %v4972_v37 = vmul.f32 %v4588_v1, %v10014_v32  ;;  %v4591_v17 = vmul.f32 0.5, %v4207_v20  ;;  %7679 = vtanh.f32 %v3444_v21  ;;  %v2679_v42 = vmul.f32 0.044715, %v2295_v30 }
 0x2c2   : > { %v7053_v12 = vpack.c.bf16 %v4970_v9, %v4969_v43  ;;  %v4973_v48 = vmul.f32 %v4589_v50, %v10018_v47  ;;  %v3061_v41 = vadd.f32 %v2677_v34, %v10094_v45  ;;  %v1910_v0 = vmul.f32 %v10111_v14, %v10111_v14  ;;  %v10162_v50 = vpop.f32.mrf.mxu1 }
 0x2c3   : > { %v7054_v31 = vpack.c.bf16 %v4972_v37, %v4971_v52  ;;  %v4975_v51 = vmul.f32 %v4591_v17, %v10023_v36  ;;  %v3063_v32 = vadd.f32 %v2679_v42, %v10098_v63  ;;  %v1912_v33 = vmul.f32 %v10113_v26, %v10113_v26  ;;  %v10160_v52 = vpop.f32.mrf.mxu0 }
 0x2c4   : > { %6411 = vst [vmem:[%s8604_s12 + $0x2f0] sm:$0xff] %v7053_v12  ;;  %v3445_v56 = vmul.f32 0.7978846, %v3061_v41  ;;  %v2294_v47 = vmul.f32 %v1910_v0, %v10111_v14  ;;  %v1913_v19 = vmul.f32 %v10119_v22, %v10119_v22  ;;  %v1915_v3 = vmul.f32 %v10121_v40, %v10121_v40 }
 0x2c5   : > { %v7670_v61 = vpop.eup %7669  ;;  %6412 = vst [vmem:[%s8604_s12 + $0x2f8] sm:$0xff] %v7054_v31  ;;  %v3447_v11 = vmul.f32 0.7978846, %v3063_v32  ;;  %v2296_v36 = vmul.f32 %v1912_v33, %v10113_v26  ;;  %v1914_v13 = vmul.f32 %v10130_v55, %v10130_v55  ;;  %v1916_v57 = vmul.f32 %v10132_v8, %v10132_v8  ;;  %v10168_v33 = vpop.f32.mrf.mxu0 }
 0x2c6   : > { %v7672_v10 = vpop.eup %7671  ;;  %v4206_v35 = vadd.f32 1.0, %v7670_v61  ;;  %7681 = vtanh.f32 %v3445_v56  ;;  %v2678_v44 = vmul.f32 0.044715, %v2294_v47  ;;  %v2297_v29 = vmul.f32 %v1913_v19, %v10119_v22 }
 0x2c7   : > { %v4208_v15 = vadd.f32 1.0, %v7672_v10  ;;  %7683 = vtanh.f32 %v3447_v11  ;;  %v2680_v23 = vmul.f32 0.044715, %v2296_v36  ;;  %v2299_v25 = vmul.f32 %v1915_v3, %v10121_v40  ;;  %v10173_v3 = vpop.f32.mrf.mxu1 }
 0x2c8   : > { %v4590_v59 = vmul.f32 0.5, %v4206_v35  ;;  %v3062_v5 = vadd.f32 %v2678_v44, %v10111_v14  ;;  %v2681_v30 = vmul.f32 0.044715, %v2297_v29  ;;  %v2298_v16 = vmul.f32 %v1914_v13, %v10130_v55 }
 0x2c9   : > { %v4592_v27 = vmul.f32 0.5, %v4208_v15  ;;  %v3064_v54 = vadd.f32 %v2680_v23, %v10113_v26  ;;  %v2683_v2 = vmul.f32 0.044715, %v2299_v25  ;;  %v2300_v7 = vmul.f32 %v1916_v57, %v10132_v8  ;;  %v10186_v15 = vpop.f32.mrf.mxu0 }
 0x2ca   : > { %v4974_v62 = vmul.f32 %v4590_v59, %v10034_v18  ;;  %v3446_v4 = vmul.f32 0.7978846, %v3062_v5  ;;  %v3065_v28 = vadd.f32 %v2681_v30, %v10119_v22  ;;  %v2682_v53 = vmul.f32 0.044715, %v2298_v16  ;;  %v10189_v30 = vpop.f32.mrf.mxu1 }
 0x2cb   : > { %v7674_v21 = vpop.eup %7673  ;;  %v4976_v38 = vmul.f32 %v4592_v27, %v10043_v46  ;;  %v3448_v43 = vmul.f32 0.7978846, %v3064_v54  ;;  %v3067_v49 = vadd.f32 %v2683_v2, %v10121_v40  ;;  %v2684_v58 = vmul.f32 0.044715, %v2300_v7 }
 0x2cc   : > { %v7676_v1 = vpop.eup %7675  ;;  %v7055_v20 = vpack.c.bf16 %v4974_v62, %v4973_v48  ;;  %v4209_v9 = vadd.f32 1.0, %v7674_v21  ;;  %7685 = vtanh.f32 %v3446_v4  ;;  %v3449_v18 = vmul.f32 0.7978846, %v3065_v28 }
 0x2cd   : > { %v7678_v34 = vpop.eup %7677  ;;  %v7056_v37 = vpack.c.bf16 %v4976_v38, %v4975_v51  ;;  %v4211_v17 = vadd.f32 1.0, %v7676_v1  ;;  %7687 = vtanh.f32 %v3448_v43  ;;  %v3451_v46 = vmul.f32 0.7978846, %v3067_v49 }
 0x2ce   : > { %v7680_v42 = vpop.eup %7679  ;;  %6413 = vst [vmem:[%s8604_s12 + $0x300] sm:$0xff] %v7055_v20  ;;  %v4593_v12 = vmul.f32 0.5, %v4209_v9  ;;  %v4210_v41 = vadd.f32 1.0, %v7678_v34  ;;  %7689 = vtanh.f32 %v3449_v18  ;;  %v3066_v0 = vadd.f32 %v2682_v53, %v10130_v55  ;;  %v10203_v20 = vpop.f32.mrf.mxu0 }
 0x2cf   : > { %6414 = vst [vmem:[%s8604_s12 + $0x308] sm:$0xff] %v7056_v37  ;;  %v4595_v48 = vmul.f32 0.5, %v4211_v17  ;;  %v4212_v31 = vadd.f32 1.0, %v7680_v42  ;;  %7691 = vtanh.f32 %v3451_v46  ;;  %v3068_v32 = vadd.f32 %v2684_v58, %v10132_v8  ;;  %v10205_v9 = vpop.f32.mrf.mxu1 }
 0x2d0   : > { %v4977_v51 = vmul.f32 %v4593_v12, %v10066_v39  ;;  %v4594_v56 = vmul.f32 0.5, %v4210_v41  ;;  %v3450_v47 = vmul.f32 0.7978846, %v3066_v0  ;;  %v1917_v19 = vmul.f32 %v10160_v52, %v10160_v52 }
 0x2d1   : > { %v4979_v61 = vmul.f32 %v4595_v48, %v10068_v60  ;;  %v4596_v11 = vmul.f32 0.5, %v4212_v31  ;;  %v3452_v36 = vmul.f32 0.7978846, %v3068_v32  ;;  %v1919_v13 = vmul.f32 %v10162_v50, %v10162_v50 }
 0x2d2   : > { %v4978_v57 = vmul.f32 %v4594_v56, %v10072_v6  ;;  %7693 = vtanh.f32 %v3450_v47  ;;  %v2301_v10 = vmul.f32 %v1917_v19, %v10160_v52  ;;  %v1918_v39 = vmul.f32 %v10168_v33, %v10168_v33  ;;  %v10211_v19 = vpop.f32.mrf.mxu0 }
 0x2d3   : > { %v7682_v35 = vpop.eup %7681  ;;  %v4980_v44 = vmul.f32 %v4596_v11, %v10076_v24  ;;  %7695 = vtanh.f32 %v3452_v36  ;;  %v2303_v60 = vmul.f32 %v1919_v13, %v10162_v50  ;;  %v1920_v29 = vmul.f32 %v10173_v3, %v10173_v3 }
 0x2d4   : > { %v7684_v6 = vpop.eup %7683  ;;  %v7057_v23 = vpack.c.bf16 %v4978_v57, %v4977_v51  ;;  %v4213_v25 = vadd.f32 1.0, %v7682_v35  ;;  %v2685_v59 = vmul.f32 0.044715, %v2301_v10  ;;  %v2302_v5 = vmul.f32 %v1918_v39, %v10168_v33 }
 0x2d5   : > { %v7058_v16 = vpack.c.bf16 %v4980_v44, %v4979_v61  ;;  %v4215_v27 = vadd.f32 1.0, %v7684_v6  ;;  %v2687_v24 = vmul.f32 0.044715, %v2303_v60  ;;  %v2304_v54 = vmul.f32 %v1920_v29, %v10173_v3  ;;  %v10213_v61 = vpop.f32.mrf.mxu1 }
 0x2d6   : > { %6415 = vst [vmem:[%s8604_s12 + $0x310] sm:$0xff] %v7057_v23  ;;  %v4597_v2 = vmul.f32 0.5, %v4213_v25  ;;  %v3069_v7 = vadd.f32 %v2685_v59, %v10160_v52  ;;  %v2686_v62 = vmul.f32 0.044715, %v2302_v5  ;;  %v1921_v4 = vmul.f32 %v10186_v15, %v10186_v15 }
 0x2d7   : > { %6416 = vst [vmem:[%s8604_s12 + $0x318] sm:$0xff] %v7058_v16  ;;  %v4599_v28 = vmul.f32 0.5, %v4215_v27  ;;  %v3071_v53 = vadd.f32 %v2687_v24, %v10162_v50  ;;  %v2688_v21 = vmul.f32 0.044715, %v2304_v54  ;;  %v1923_v38 = vmul.f32 %v10189_v30, %v10189_v30  ;;  %v10223_v16 = vpop.f32.mrf.mxu0  ;;  %v10225_v27 = vpop.f32.mrf.mxu1 }
 0x2d8   : > { %v4981_v43 = vmul.f32 %v4597_v2, %v10094_v45  ;;  %v3453_v49 = vmul.f32 0.7978846, %v3069_v7  ;;  %v3070_v58 = vadd.f32 %v2686_v62, %v10168_v33  ;;  %v2305_v1 = vmul.f32 %v1921_v4, %v10186_v15 }
 0x2d9   : > { %v7686_v18 = vpop.eup %7685  ;;  %v4983_v34 = vmul.f32 %v4599_v28, %v10098_v63  ;;  %v3455_v37 = vmul.f32 0.7978846, %v3071_v53  ;;  %v3072_v17 = vadd.f32 %v2688_v21, %v10173_v3  ;;  %v2307_v46 = vmul.f32 %v1923_v38, %v10189_v30 }
 0x2da   : > { %v7688_v42 = vpop.eup %7687  ;;  %v4214_v12 = vadd.f32 1.0, %v7686_v18  ;;  %7697 = vtanh.f32 %v3453_v49  ;;  %v3454_v45 = vmul.f32 0.7978846, %v3070_v58  ;;  %v2689_v41 = vmul.f32 0.044715, %v2305_v1 }
 0x2db   : > { %v7690_v0 = vpop.eup %7689  ;;  %v4216_v48 = vadd.f32 1.0, %v7688_v42  ;;  %7699 = vtanh.f32 %v3455_v37  ;;  %v3456_v31 = vmul.f32 0.7978846, %v3072_v17  ;;  %v2691_v32 = vmul.f32 0.044715, %v2307_v46  ;;  %v10246_v37 = vpop.f32.mrf.mxu0 }
 0x2dc   : > { %v7692_v51 = vpop.eup %7691  ;;  %v4598_v56 = vmul.f32 0.5, %v4214_v12  ;;  %v4217_v47 = vadd.f32 1.0, %v7690_v0  ;;  %7701 = vtanh.f32 %v3454_v45  ;;  %v3073_v63 = vadd.f32 %v2689_v41, %v10186_v15  ;;  %v10250_v12 = vpop.f32.mrf.mxu1 }
 0x2dd   : > { %v4600_v11 = vmul.f32 0.5, %v4216_v48  ;;  %v4219_v36 = vadd.f32 1.0, %v7692_v51  ;;  %7703 = vtanh.f32 %v3456_v31  ;;  %v3075_v13 = vadd.f32 %v2691_v32, %v10189_v30 }
 0x2de   : > { %v4982_v57 = vmul.f32 %v4598_v56, %v10111_v14  ;;  %v4601_v10 = vmul.f32 0.5, %v4217_v47  ;;  %v3457_v39 = vmul.f32 0.7978846, %v3073_v63  ;;  %v1922_v35 = vmul.f32 %v10203_v20, %v10203_v20 }
 0x2df   : > { %v7694_v44 = vpop.eup %7693  ;;  %v4984_v60 = vmul.f32 %v4600_v11, %v10113_v26  ;;  %v4603_v29 = vmul.f32 0.5, %v4219_v36  ;;  %v3459_v6 = vmul.f32 0.7978846, %v3075_v13  ;;  %v1924_v23 = vmul.f32 %v10205_v9, %v10205_v9 }
 0x2e0   : > { %v7696_v25 = vpop.eup %7695  ;;  %v7059_v59 = vpack.c.bf16 %v4982_v57, %v4981_v43  ;;  %v4985_v5 = vmul.f32 %v4601_v10, %v10119_v22  ;;  %v4218_v14 = vadd.f32 1.0, %v7694_v44  ;;  %7705 = vtanh.f32 %v3457_v39  ;;  %v10258_v10 = vpop.f32.mrf.mxu0 }
 0x2e1   : > { %v7060_v24 = vpack.c.bf16 %v4984_v60, %v4983_v34  ;;  %v4987_v54 = vmul.f32 %v4603_v29, %v10121_v40  ;;  %v4220_v26 = vadd.f32 1.0, %v7696_v25  ;;  %7707 = vtanh.f32 %v3459_v6  ;;  %v10260_v29 = vpop.f32.mrf.mxu1 }
 0x2e2   : > { %6417 = vst [vmem:[%s8604_s12 + $0x320] sm:$0xff] %v7059_v59  ;;  %v4602_v2 = vmul.f32 0.5, %v4218_v14  ;;  %v2306_v7 = vmul.f32 %v1922_v35, %v10203_v20  ;;  %v2308_v62 = vmul.f32 %v1924_v23, %v10205_v9  ;;  %v1925_v22 = vmul.f32 %v10211_v19, %v10211_v19 }
 0x2e3   : > { %6418 = vst [vmem:[%s8604_s12 + $0x328] sm:$0xff] %v7060_v24  ;;  %v4604_v4 = vmul.f32 0.5, %v4220_v26  ;;  %v1927_v28 = vmul.f32 %v10213_v61, %v10213_v61  ;;  %v1926_v53 = vmul.f32 %v10223_v16, %v10223_v16  ;;  %v1928_v40 = vmul.f32 %v10225_v27, %v10225_v27 }
 0x2e4   : > { %v4986_v21 = vmul.f32 %v4602_v2, %v10130_v55  ;;  %v2690_v38 = vmul.f32 0.044715, %v2306_v7  ;;  %v2692_v43 = vmul.f32 0.044715, %v2308_v62  ;;  %v2309_v49 = vmul.f32 %v1925_v22, %v10211_v19  ;;  %v10264_v7 = vpop.f32.mrf.mxu0 }
 0x2e5   : > { %v4988_v58 = vmul.f32 %v4604_v4, %v10132_v8  ;;  %v2311_v1 = vmul.f32 %v1927_v28, %v10213_v61  ;;  %v2310_v18 = vmul.f32 %v1926_v53, %v10223_v16  ;;  %v2312_v34 = vmul.f32 %v1928_v40, %v10225_v27  ;;  %v10269_v28 = vpop.f32.mrf.mxu1 }
 0x2e6   : > { %v7061_v17 = vpack.c.bf16 %v4986_v21, %v4985_v5  ;;  %v3074_v46 = vadd.f32 %v2690_v38, %v10203_v20  ;;  %v3076_v55 = vadd.f32 %v2692_v43, %v10205_v9  ;;  %v2693_v42 = vmul.f32 0.044715, %v2309_v49 }
 0x2e7   : > { %v7698_v45 = vpop.eup %7697  ;;  %v7062_v8 = vpack.c.bf16 %v4988_v58, %v4987_v54  ;;  %v2695_v41 = vmul.f32 0.044715, %v2311_v1  ;;  %v2694_v0 = vmul.f32 0.044715, %v2310_v18  ;;  %v2696_v48 = vmul.f32 0.044715, %v2312_v34  ;;  %v10280_v18 = vpop.f32.mrf.mxu0 }
 0x2e8   : > { %v7700_v31 = vpop.eup %7699  ;;  %6419 = vst [vmem:[%s8604_s12 + $0x330] sm:$0xff] %v7061_v17  ;;  %v4221_v32 = vadd.f32 1.0, %v7698_v45  ;;  %v3458_v51 = vmul.f32 0.7978846, %v3074_v46  ;;  %v3460_v56 = vmul.f32 0.7978846, %v3076_v55  ;;  %v3077_v47 = vadd.f32 %v2693_v42, %v10211_v19  ;;  %v10289_v42 = vpop.f32.mrf.mxu1 }
 0x2e9   : > { %v7702_v63 = vpop.eup %7701  ;;  %6420 = vst [vmem:[%s8604_s12 + $0x338] sm:$0xff] %v7062_v8  ;;  %v4223_v11 = vadd.f32 1.0, %v7700_v31  ;;  %v3079_v36 = vadd.f32 %v2695_v41, %v10213_v61  ;;  %v3078_v13 = vadd.f32 %v2694_v0, %v10223_v16  ;;  %v3080_v57 = vadd.f32 %v2696_v48, %v10225_v27 }
 0x2ea   : > { %v7704_v39 = vpop.eup %7703  ;;  %v4605_v35 = vmul.f32 0.5, %v4221_v32  ;;  %v4222_v44 = vadd.f32 1.0, %v7702_v63  ;;  %7709 = vtanh.f32 %v3458_v51  ;;  %v3461_v60 = vmul.f32 0.7978846, %v3077_v47 }
 0x2eb   : > { %v4607_v6 = vmul.f32 0.5, %v4223_v11  ;;  %v4224_v23 = vadd.f32 1.0, %v7704_v39  ;;  %7711 = vtanh.f32 %v3460_v56  ;;  %v3463_v25 = vmul.f32 0.7978846, %v3079_v36 }
 0x2ec   : > { %v4989_v59 = vmul.f32 %v4605_v35, %v10160_v52  ;;  %v4606_v5 = vmul.f32 0.5, %v4222_v44  ;;  %7713 = vtanh.f32 %v3461_v60  ;;  %v3462_v14 = vmul.f32 0.7978846, %v3078_v13 }
 0x2ed   : > { %v7706_v24 = vpop.eup %7705  ;;  %v4991_v54 = vmul.f32 %v4607_v6, %v10162_v50  ;;  %v4608_v26 = vmul.f32 0.5, %v4224_v23  ;;  %7715 = vtanh.f32 %v3463_v25  ;;  %v3464_v2 = vmul.f32 0.7978846, %v3080_v57 }
 0x2ee   : > { %v7708_v62 = vpop.eup %7707  ;;  %v4990_v22 = vmul.f32 %v4606_v5, %v10168_v33  ;;  %v4225_v4 = vadd.f32 1.0, %v7706_v24  ;;  %7717 = vtanh.f32 %v3462_v14  ;;  %v1929_v52 = vmul.f32 %v10246_v37, %v10246_v37 }
 0x2ef   : > { %v4992_v53 = vmul.f32 %v4608_v26, %v10173_v3  ;;  %v4227_v40 = vadd.f32 1.0, %v7708_v62  ;;  %7719 = vtanh.f32 %v3464_v2  ;;  %v1931_v50 = vmul.f32 %v10250_v12, %v10250_v12  ;;  %v10312_v26 = vpop.f32.mrf.mxu0 }
 0x2f0   : > { %v7063_v21 = vpack.c.bf16 %v4990_v22, %v4989_v59  ;;  %v4609_v38 = vmul.f32 0.5, %v4225_v4  ;;  %v2313_v33 = vmul.f32 %v1929_v52, %v10246_v37  ;;  %v1930_v43 = vmul.f32 %v10258_v10, %v10258_v10  ;;  %v10314_v52 = vpop.f32.mrf.mxu1 }
 0x2f1   : > { %v7064_v49 = vpack.c.bf16 %v4992_v53, %v4991_v54  ;;  %v4611_v58 = vmul.f32 0.5, %v4227_v40  ;;  %v2315_v1 = vmul.f32 %v1931_v50, %v10250_v12  ;;  %v1932_v3 = vmul.f32 %v10260_v29, %v10260_v29 }
 0x2f2   : > { %6421 = vst [vmem:[%s8604_s12 + $0x340] sm:$0xff] %v7063_v21  ;;  %v10284_v34 = vmul.f32 %v4609_v38, %v10186_v15  ;;  %v2697_v17 = vmul.f32 0.044715, %v2313_v33  ;;  %v2314_v46 = vmul.f32 %v1930_v43, %v10258_v10  ;;  %v1933_v55 = vmul.f32 %v10264_v7, %v10264_v7 }
 0x2f3   : > { %6422 = vst [vmem:[%s8604_s12 + $0x348] sm:$0xff] %v7064_v49  ;;  %v10293_v45 = vmul.f32 %v4611_v58, %v10189_v30  ;;  %v2699_v8 = vmul.f32 0.044715, %v2315_v1  ;;  %v2316_v41 = vmul.f32 %v1932_v3, %v10260_v29  ;;  %v1935_v0 = vmul.f32 %v10269_v28, %v10269_v28 }
 0x2f4   : > { %v3081_v15 = vadd.f32 %v2697_v17, %v10246_v37  ;;  %v2698_v48 = vmul.f32 0.044715, %v2314_v46  ;;  %v2317_v31 = vmul.f32 %v1933_v55, %v10264_v7  ;;  %v1934_v32 = vmul.f32 %v10280_v18, %v10280_v18  ;;  %v10318_v17 = vpop.f32.mrf.mxu0 }
 0x2f5   : > { %v3083_v51 = vadd.f32 %v2699_v8, %v10250_v12  ;;  %v2700_v56 = vmul.f32 0.044715, %v2316_v41  ;;  %v2319_v30 = vmul.f32 %v1935_v0, %v10269_v28  ;;  %v1936_v47 = vmul.f32 %v10289_v42, %v10289_v42  ;;  %v10322_v0 = vpop.f32.mrf.mxu1 }
 0x2f6   : > { %v3465_v63 = vmul.f32 0.7978846, %v3081_v15  ;;  %v3082_v11 = vadd.f32 %v2698_v48, %v10258_v10  ;;  %v2701_v36 = vmul.f32 0.044715, %v2317_v31  ;;  %v2318_v13 = vmul.f32 %v1934_v32, %v10280_v18 }
 0x2f7   : > { %v7710_v57 = vpop.eup %7709  ;;  %v3467_v39 = vmul.f32 0.7978846, %v3083_v51  ;;  %v3084_v35 = vadd.f32 %v2700_v56, %v10260_v29  ;;  %v2703_v44 = vmul.f32 0.044715, %v2319_v30  ;;  %v2320_v60 = vmul.f32 %v1936_v47, %v10289_v42  ;;  %v10340_v56 = vpop.f32.mrf.mxu0 }
 0x2f8   : > { %v7712_v6 = vpop.eup %7711  ;;  %v4226_v23 = vadd.f32 1.0, %v7710_v57  ;;  %7721 = vtanh.f32 %v3465_v63  ;;  %v3466_v25 = vmul.f32 0.7978846, %v3082_v11  ;;  %v3085_v59 = vadd.f32 %v2701_v36, %v10264_v7  ;;  %v10344_v36 = vpop.f32.mrf.mxu1 }
 0x2f9   : > { %v7714_v5 = vpop.eup %7713  ;;  %v4228_v14 = vadd.f32 1.0, %v7712_v6  ;;  %7723 = vtanh.f32 %v3467_v39  ;;  %v3468_v24 = vmul.f32 0.7978846, %v3084_v35  ;;  %v3087_v54 = vadd.f32 %v2703_v44, %v10269_v28 }
 0x2fa   : > { %v7716_v2 = vpop.eup %7715  ;;  %v4610_v62 = vmul.f32 0.5, %v4226_v23  ;;  %v4229_v22 = vadd.f32 1.0, %v7714_v5  ;;  %7725 = vtanh.f32 %v3466_v25  ;;  %v3469_v4 = vmul.f32 0.7978846, %v3085_v59 }
 0x2fb   : > { %v7718_v53 = vpop.eup %7717  ;;  %v4612_v40 = vmul.f32 0.5, %v4228_v14  ;;  %v4231_v50 = vadd.f32 1.0, %v7716_v2  ;;  %7727 = vtanh.f32 %v3468_v24  ;;  %v3471_v21 = vmul.f32 0.7978846, %v3087_v54 }
 0x2fc   : > { %v7720_v38 = vpop.eup %7719  ;;  %v4994_v33 = vmul.f32 %v4610_v62, %v10203_v20  ;;  %v4613_v43 = vmul.f32 0.5, %v4229_v22  ;;  %v4230_v49 = vadd.f32 1.0, %v7718_v53  ;;  %7729 = vtanh.f32 %v3469_v4  ;;  %v10357_v62 = vpop.f32.mrf.mxu0 }
 0x2fd   : > { %v4996_v58 = vmul.f32 %v4612_v40, %v10205_v9  ;;  %v4615_v1 = vmul.f32 0.5, %v4231_v50  ;;  %v4232_v3 = vadd.f32 1.0, %v7720_v38  ;;  %7731 = vtanh.f32 %v3471_v21  ;;  %v10359_v22 = vpop.f32.mrf.mxu1 }
 0x2fe   : > { %v7065_v46 = vpack.c.bf16 %v4994_v33, %v10284_v34  ;;  %v4997_v55 = vmul.f32 %v4613_v43, %v10211_v19  ;;  %v4614_v8 = vmul.f32 0.5, %v4230_v49  ;;  %v2702_v41 = vmul.f32 0.044715, %v2318_v13 }
 0x2ff   : > { %v7066_v20 = vpack.c.bf16 %v4996_v58, %v10293_v45  ;;  %v4999_v15 = vmul.f32 %v4615_v1, %v10213_v61  ;;  %v4616_v48 = vmul.f32 0.5, %v4232_v3  ;;  %v2704_v9 = vmul.f32 0.044715, %v2320_v60 }
 0x300   : > { %6423 = vst [vmem:[%s8604_s12 + $0x350] sm:$0xff] %v7065_v46  ;;  %v4998_v31 = vmul.f32 %v4614_v8, %v10223_v16  ;;  %v3086_v32 = vadd.f32 %v2702_v41, %v10280_v18  ;;  %v1937_v34 = vmul.f32 %v10312_v26, %v10312_v26  ;;  %v1939_v19 = vmul.f32 %v10314_v52, %v10314_v52 }
 0x301   : > { %6424 = vst [vmem:[%s8604_s12 + $0x358] sm:$0xff] %v7066_v20  ;;  %v5000_v51 = vmul.f32 %v4616_v48, %v10225_v27  ;;  %v3088_v45 = vadd.f32 %v2704_v9, %v10289_v42  ;;  %v1938_v61 = vmul.f32 %v10318_v17, %v10318_v17  ;;  %v1940_v16 = vmul.f32 %v10322_v0, %v10322_v0  ;;  %v10365_v9 = vpop.f32.mrf.mxu0 }
 0x302   : > { %v7067_v30 = vpack.c.bf16 %v4998_v31, %v4997_v55  ;;  %v3470_v47 = vmul.f32 0.7978846, %v3086_v32  ;;  %v2321_v63 = vmul.f32 %v1937_v34, %v10312_v26  ;;  %v2323_v11 = vmul.f32 %v1939_v19, %v10314_v52  ;;  %v10367_v31 = vpop.f32.mrf.mxu1 }
 0x303   : > { %v7068_v27 = vpack.c.bf16 %v5000_v51, %v4999_v15  ;;  %v3472_v13 = vmul.f32 0.7978846, %v3088_v45  ;;  %v2322_v57 = vmul.f32 %v1938_v61, %v10318_v17  ;;  %v2324_v39 = vmul.f32 %v1940_v16, %v10322_v0 }
 0x304   : > { %6425 = vst [vmem:[%s8604_s12 + $0x360] sm:$0xff] %v7067_v30  ;;  %7733 = vtanh.f32 %v3470_v47  ;;  %v2705_v35 = vmul.f32 0.044715, %v2321_v63  ;;  %v2707_v44 = vmul.f32 0.044715, %v2323_v11  ;;  %v1941_v60 = vmul.f32 %v10340_v56, %v10340_v56 }
 0x305   : > { %v7722_v6 = vpop.eup %7721  ;;  %6426 = vst [vmem:[%s8604_s12 + $0x368] sm:$0xff] %v7068_v27  ;;  %7735 = vtanh.f32 %v3472_v13  ;;  %v2706_v23 = vmul.f32 0.044715, %v2322_v57  ;;  %v2708_v25 = vmul.f32 0.044715, %v2324_v39  ;;  %v1943_v59 = vmul.f32 %v10344_v36, %v10344_v36  ;;  %v10376_v27 = vpop.f32.mrf.mxu0 }
 0x306   : > { %v7724_v5 = vpop.eup %7723  ;;  %v4233_v14 = vadd.f32 1.0, %v7722_v6  ;;  %v3089_v24 = vadd.f32 %v2705_v35, %v10312_v26  ;;  %v3091_v54 = vadd.f32 %v2707_v44, %v10314_v52  ;;  %v2325_v2 = vmul.f32 %v1941_v60, %v10340_v56 }
 0x307   : > { %v7726_v4 = vpop.eup %7725  ;;  %v4235_v53 = vadd.f32 1.0, %v7724_v5  ;;  %v3090_v40 = vadd.f32 %v2706_v23, %v10318_v17  ;;  %v3092_v50 = vadd.f32 %v2708_v25, %v10322_v0  ;;  %v2327_v21 = vmul.f32 %v1943_v59, %v10344_v36 }
 0x308   : > { %v7728_v38 = vpop.eup %7727  ;;  %v4617_v33 = vmul.f32 0.5, %v4233_v14  ;;  %v4234_v43 = vadd.f32 1.0, %v7726_v4  ;;  %v3473_v49 = vmul.f32 0.7978846, %v3089_v24  ;;  %v3475_v58 = vmul.f32 0.7978846, %v3091_v54 }
 0x309   : > { %v7730_v1 = vpop.eup %7729  ;;  %v4619_v3 = vmul.f32 0.5, %v4235_v53  ;;  %v4236_v46 = vadd.f32 1.0, %v7728_v38  ;;  %v3474_v55 = vmul.f32 0.7978846, %v3090_v40  ;;  %v3476_v8 = vmul.f32 0.7978846, %v3092_v50 }
 0x30a   : > { %v7732_v41 = vpop.eup %7731  ;;  %v5001_v20 = vmul.f32 %v4617_v33, %v10246_v37  ;;  %v4618_v15 = vmul.f32 0.5, %v4234_v43  ;;  %v4237_v48 = vadd.f32 1.0, %v7730_v1  ;;  %7737 = vtanh.f32 %v3473_v49 }
 0x30b   : > { %v5003_v32 = vmul.f32 %v4619_v3, %v10250_v12  ;;  %v4620_v34 = vmul.f32 0.5, %v4236_v46  ;;  %v4239_v19 = vadd.f32 1.0, %v7732_v41  ;;  %7739 = vtanh.f32 %v3475_v58 }
 0x30c   : > { %v5002_v51 = vmul.f32 %v4618_v15, %v10258_v10  ;;  %v4621_v45 = vmul.f32 0.5, %v4237_v48  ;;  %7741 = vtanh.f32 %v3474_v55  ;;  %v2709_v61 = vmul.f32 0.044715, %v2325_v2  ;;  %v10378_v10 = vpop.f32.mrf.mxu1 }
 0x30d   : > { %v5004_v37 = vmul.f32 %v4620_v34, %v10260_v29  ;;  %v4623_v16 = vmul.f32 0.5, %v4239_v19  ;;  %7743 = vtanh.f32 %v3476_v8  ;;  %v2711_v30 = vmul.f32 0.044715, %v2327_v21 }
 0x30e   : > { %v7069_v47 = vpack.c.bf16 %v5002_v51, %v5001_v20  ;;  %v5005_v63 = vmul.f32 %v4621_v45, %v10264_v7  ;;  %v3093_v12 = vadd.f32 %v2709_v61, %v10340_v56  ;;  %v1942_v11 = vmul.f32 %v10357_v62, %v10357_v62  ;;  %v10408_v45 = vpop.f32.mrf.mxu1 }
 0x30f   : > { %v7070_v13 = vpack.c.bf16 %v5004_v37, %v5003_v32  ;;  %v5007_v57 = vmul.f32 %v4623_v16, %v10269_v28  ;;  %v3095_v29 = vadd.f32 %v2711_v30, %v10344_v36  ;;  %v1944_v39 = vmul.f32 %v10359_v22, %v10359_v22  ;;  %v10406_v32 = vpop.f32.mrf.mxu0 }
 0x310   : > { %6427 = vst [vmem:[%s8604_s12 + $0x370] sm:$0xff] %v7069_v47  ;;  %v3477_v35 = vmul.f32 0.7978846, %v3093_v12  ;;  %v2326_v7 = vmul.f32 %v1942_v11, %v10357_v62  ;;  %v1945_v44 = vmul.f32 %v10365_v9, %v10365_v9  ;;  %v1947_v60 = vmul.f32 %v10367_v31, %v10367_v31 }
 0x311   : > { %v7734_v6 = vpop.eup %7733  ;;  %6428 = vst [vmem:[%s8604_s12 + $0x378] sm:$0xff] %v7070_v13  ;;  %v3479_v23 = vmul.f32 0.7978846, %v3095_v29  ;;  %v2328_v28 = vmul.f32 %v1944_v39, %v10359_v22  ;;  %v1946_v25 = vmul.f32 %v10376_v27, %v10376_v27  ;;  %v1948_v59 = vmul.f32 %v10378_v10, %v10378_v10  ;;  %v10414_v39 = vpop.f32.mrf.mxu0 }
 0x312   : > { %v7736_v5 = vpop.eup %7735  ;;  %v4238_v14 = vadd.f32 1.0, %v7734_v6  ;;  %7745 = vtanh.f32 %v3477_v35  ;;  %v2710_v24 = vmul.f32 0.044715, %v2326_v7  ;;  %v2329_v54 = vmul.f32 %v1945_v44, %v10365_v9 }
 0x313   : > { %v4240_v2 = vadd.f32 1.0, %v7736_v5  ;;  %7747 = vtanh.f32 %v3479_v23  ;;  %v2712_v4 = vmul.f32 0.044715, %v2328_v28  ;;  %v2331_v53 = vmul.f32 %v1947_v60, %v10367_v31  ;;  %v10419_v60 = vpop.f32.mrf.mxu1 }
 0x314   : > { %v4622_v40 = vmul.f32 0.5, %v4238_v14  ;;  %v3094_v50 = vadd.f32 %v2710_v24, %v10357_v62  ;;  %v2713_v21 = vmul.f32 0.044715, %v2329_v54  ;;  %v2330_v38 = vmul.f32 %v1946_v25, %v10376_v27 }
 0x315   : > { %v4624_v33 = vmul.f32 0.5, %v4240_v2  ;;  %v3096_v43 = vadd.f32 %v2712_v4, %v10359_v22  ;;  %v2715_v49 = vmul.f32 0.044715, %v2331_v53  ;;  %v2332_v58 = vmul.f32 %v1948_v59, %v10378_v10  ;;  %v10432_v2 = vpop.f32.mrf.mxu0 }
 0x316   : > { %v5006_v1 = vmul.f32 %v4622_v40, %v10280_v18  ;;  %v3478_v3 = vmul.f32 0.7978846, %v3094_v50  ;;  %v3097_v46 = vadd.f32 %v2713_v21, %v10365_v9  ;;  %v2714_v55 = vmul.f32 0.044715, %v2330_v38  ;;  %v10435_v21 = vpop.f32.mrf.mxu1 }
 0x317   : > { %v7738_v8 = vpop.eup %7737  ;;  %v5008_v41 = vmul.f32 %v4624_v33, %v10289_v42  ;;  %v3480_v20 = vmul.f32 0.7978846, %v3096_v43  ;;  %v3099_v15 = vadd.f32 %v2715_v49, %v10367_v31  ;;  %v2716_v48 = vmul.f32 0.044715, %v2332_v58 }
 0x318   : > { %v7740_v34 = vpop.eup %7739  ;;  %v7071_v19 = vpack.c.bf16 %v5006_v1, %v5005_v63  ;;  %v4241_v51 = vadd.f32 1.0, %v7738_v8  ;;  %7749 = vtanh.f32 %v3478_v3  ;;  %v3481_v18 = vmul.f32 0.7978846, %v3097_v46 }
 0x319   : > { %v7742_v61 = vpop.eup %7741  ;;  %v7072_v37 = vpack.c.bf16 %v5008_v41, %v5007_v57  ;;  %v4243_v16 = vadd.f32 1.0, %v7740_v34  ;;  %7751 = vtanh.f32 %v3480_v20  ;;  %v3483_v42 = vmul.f32 0.7978846, %v3099_v15 }
 0x31a   : > { %v7744_v30 = vpop.eup %7743  ;;  %6429 = vst [vmem:[%s8604_s12 + $0x380] sm:$0xff] %v7071_v19  ;;  %v4625_v47 = vmul.f32 0.5, %v4241_v51  ;;  %v4242_v12 = vadd.f32 1.0, %v7742_v61  ;;  %7753 = vtanh.f32 %v3481_v18  ;;  %v3098_v11 = vadd.f32 %v2714_v55, %v10376_v27  ;;  %v10449_v19 = vpop.f32.mrf.mxu0 }
 0x31b   : > { %6430 = vst [vmem:[%s8604_s12 + $0x388] sm:$0xff] %v7072_v37  ;;  %v4627_v63 = vmul.f32 0.5, %v4243_v16  ;;  %v4244_v13 = vadd.f32 1.0, %v7744_v30  ;;  %7755 = vtanh.f32 %v3483_v42  ;;  %v3100_v29 = vadd.f32 %v2716_v48, %v10378_v10  ;;  %v10451_v51 = vpop.f32.mrf.mxu1 }
 0x31c   : > { %v5009_v57 = vmul.f32 %v4625_v47, %v10312_v26  ;;  %v4626_v35 = vmul.f32 0.5, %v4242_v12  ;;  %v3482_v7 = vmul.f32 0.7978846, %v3098_v11  ;;  %v1949_v44 = vmul.f32 %v10406_v32, %v10406_v32 }
 0x31d   : > { %v5011_v6 = vmul.f32 %v4627_v63, %v10314_v52  ;;  %v4628_v23 = vmul.f32 0.5, %v4244_v13  ;;  %v3484_v28 = vmul.f32 0.7978846, %v3100_v29  ;;  %v1951_v25 = vmul.f32 %v10408_v45, %v10408_v45 }
 0x31e   : > { %v5010_v59 = vmul.f32 %v4626_v35, %v10318_v17  ;;  %7757 = vtanh.f32 %v3482_v7  ;;  %v2333_v5 = vmul.f32 %v1949_v44, %v10406_v32  ;;  %v1950_v26 = vmul.f32 %v10414_v39, %v10414_v39  ;;  %v10457_v44 = vpop.f32.mrf.mxu0 }
 0x31f   : > { %v7746_v14 = vpop.eup %7745  ;;  %v5012_v24 = vmul.f32 %v4628_v23, %v10322_v0  ;;  %7759 = vtanh.f32 %v3484_v28  ;;  %v2335_v52 = vmul.f32 %v1951_v25, %v10408_v45  ;;  %v1952_v54 = vmul.f32 %v10419_v60, %v10419_v60 }
 0x320   : > { %v7748_v17 = vpop.eup %7747  ;;  %v7073_v4 = vpack.c.bf16 %v5010_v59, %v5009_v57  ;;  %v4245_v53 = vadd.f32 1.0, %v7746_v14  ;;  %v2717_v40 = vmul.f32 0.044715, %v2333_v5  ;;  %v2334_v50 = vmul.f32 %v1950_v26, %v10414_v39 }
 0x321   : > { %v7074_v38 = vpack.c.bf16 %v5012_v24, %v5011_v6  ;;  %v4247_v33 = vadd.f32 1.0, %v7748_v17  ;;  %v2719_v0 = vmul.f32 0.044715, %v2335_v52  ;;  %v2336_v43 = vmul.f32 %v1952_v54, %v10419_v60  ;;  %v10459_v6 = vpop.f32.mrf.mxu1 }
 0x322   : > { %6431 = vst [vmem:[%s8604_s12 + $0x390] sm:$0xff] %v7073_v4  ;;  %v4629_v49 = vmul.f32 0.5, %v4245_v53  ;;  %v3101_v58 = vadd.f32 %v2717_v40, %v10406_v32  ;;  %v2718_v1 = vmul.f32 0.044715, %v2334_v50  ;;  %v1953_v3 = vmul.f32 %v10432_v2, %v10432_v2 }
 0x323   : > { %6432 = vst [vmem:[%s8604_s12 + $0x398] sm:$0xff] %v7074_v38  ;;  %v4631_v46 = vmul.f32 0.5, %v4247_v33  ;;  %v3103_v55 = vadd.f32 %v2719_v0, %v10408_v45  ;;  %v2720_v8 = vmul.f32 0.044715, %v2336_v43  ;;  %v1955_v41 = vmul.f32 %v10435_v21, %v10435_v21  ;;  %v10469_v38 = vpop.f32.mrf.mxu0  ;;  %v10471_v33 = vpop.f32.mrf.mxu1 }
 0x324   : > { %v5013_v20 = vmul.f32 %v4629_v49, %v10340_v56  ;;  %v3485_v15 = vmul.f32 0.7978846, %v3101_v58  ;;  %v3102_v48 = vadd.f32 %v2718_v1, %v10414_v39  ;;  %v2337_v34 = vmul.f32 %v1953_v3, %v10432_v2 }
 0x325   : > { %v7750_v18 = vpop.eup %7749  ;;  %v5015_v61 = vmul.f32 %v4631_v46, %v10344_v36  ;;  %v3487_v37 = vmul.f32 0.7978846, %v3103_v55  ;;  %v3104_v16 = vadd.f32 %v2720_v8, %v10419_v60  ;;  %v2339_v42 = vmul.f32 %v1955_v41, %v10435_v21 }
 0x326   : > { %v7752_v30 = vpop.eup %7751  ;;  %v4246_v47 = vadd.f32 1.0, %v7750_v18  ;;  %7761 = vtanh.f32 %v3485_v15  ;;  %v3486_v56 = vmul.f32 0.7978846, %v3102_v48  ;;  %v2721_v12 = vmul.f32 0.044715, %v2337_v34 }
 0x327   : > { %v7754_v11 = vpop.eup %7753  ;;  %v4248_v63 = vadd.f32 1.0, %v7752_v30  ;;  %7763 = vtanh.f32 %v3487_v37  ;;  %v3488_v13 = vmul.f32 0.7978846, %v3104_v16  ;;  %v2723_v29 = vmul.f32 0.044715, %v2339_v42  ;;  %v10492_v37 = vpop.f32.mrf.mxu0 }
 0x328   : > { %v7756_v57 = vpop.eup %7755  ;;  %v4630_v35 = vmul.f32 0.5, %v4246_v47  ;;  %v4249_v7 = vadd.f32 1.0, %v7754_v11  ;;  %7765 = vtanh.f32 %v3486_v56  ;;  %v3105_v36 = vadd.f32 %v2721_v12, %v10432_v2  ;;  %v10496_v47 = vpop.f32.mrf.mxu1 }
 0x329   : > { %v4632_v23 = vmul.f32 0.5, %v4248_v63  ;;  %v4251_v28 = vadd.f32 1.0, %v7756_v57  ;;  %7767 = vtanh.f32 %v3488_v13  ;;  %v3107_v25 = vadd.f32 %v2723_v29, %v10435_v21 }
 0x32a   : > { %v5014_v59 = vmul.f32 %v4630_v35, %v10357_v62  ;;  %v4633_v5 = vmul.f32 0.5, %v4249_v7  ;;  %v3489_v26 = vmul.f32 0.7978846, %v3105_v36  ;;  %v1954_v14 = vmul.f32 %v10449_v19, %v10449_v19 }
 0x32b   : > { %v7758_v24 = vpop.eup %7757  ;;  %v5016_v52 = vmul.f32 %v4632_v23, %v10359_v22  ;;  %v4635_v54 = vmul.f32 0.5, %v4251_v28  ;;  %v3491_v17 = vmul.f32 0.7978846, %v3107_v25  ;;  %v1956_v4 = vmul.f32 %v10451_v51, %v10451_v51 }
 0x32c   : > { %v7760_v53 = vpop.eup %7759  ;;  %v7075_v40 = vpack.c.bf16 %v5014_v59, %v5013_v20  ;;  %v5017_v50 = vmul.f32 %v4633_v5, %v10365_v9  ;;  %v4250_v62 = vadd.f32 1.0, %v7758_v24  ;;  %7769 = vtanh.f32 %v3489_v26  ;;  %v10504_v5 = vpop.f32.mrf.mxu0 }
 0x32d   : > { %v7076_v0 = vpack.c.bf16 %v5016_v52, %v5015_v61  ;;  %v5019_v43 = vmul.f32 %v4635_v54, %v10367_v31  ;;  %v4252_v22 = vadd.f32 1.0, %v7760_v53  ;;  %7771 = vtanh.f32 %v3491_v17  ;;  %v10506_v54 = vpop.f32.mrf.mxu1 }
 0x32e   : > { %6433 = vst [vmem:[%s8604_s12 + $0x3a0] sm:$0xff] %v7075_v40  ;;  %v4634_v49 = vmul.f32 0.5, %v4250_v62  ;;  %v2338_v58 = vmul.f32 %v1954_v14, %v10449_v19  ;;  %v2340_v1 = vmul.f32 %v1956_v4, %v10451_v51  ;;  %v1957_v9 = vmul.f32 %v10457_v44, %v10457_v44 }
 0x32f   : > { %6434 = vst [vmem:[%s8604_s12 + $0x3a8] sm:$0xff] %v7076_v0  ;;  %v4636_v3 = vmul.f32 0.5, %v4252_v22  ;;  %v1959_v46 = vmul.f32 %v10459_v6, %v10459_v6  ;;  %v1958_v55 = vmul.f32 %v10469_v38, %v10469_v38  ;;  %v1960_v31 = vmul.f32 %v10471_v33, %v10471_v33 }
 0x330   : > { %v5018_v8 = vmul.f32 %v4634_v49, %v10376_v27  ;;  %v2722_v41 = vmul.f32 0.044715, %v2338_v58  ;;  %v2724_v20 = vmul.f32 0.044715, %v2340_v1  ;;  %v2341_v15 = vmul.f32 %v1957_v9, %v10457_v44  ;;  %v10510_v58 = vpop.f32.mrf.mxu0 }
 0x331   : > { %v5020_v48 = vmul.f32 %v4636_v3, %v10378_v10  ;;  %v2343_v34 = vmul.f32 %v1959_v46, %v10459_v6  ;;  %v2342_v18 = vmul.f32 %v1958_v55, %v10469_v38  ;;  %v2344_v61 = vmul.f32 %v1960_v31, %v10471_v33  ;;  %v10515_v46 = vpop.f32.mrf.mxu1 }
 0x332   : > { %v7077_v16 = vpack.c.bf16 %v5018_v8, %v5017_v50  ;;  %v3106_v42 = vadd.f32 %v2722_v41, %v10449_v19  ;;  %v3108_v27 = vadd.f32 %v2724_v20, %v10451_v51  ;;  %v2725_v30 = vmul.f32 0.044715, %v2341_v15 }
 0x333   : > { %v7762_v56 = vpop.eup %7761  ;;  %v7078_v10 = vpack.c.bf16 %v5020_v48, %v5019_v43  ;;  %v2727_v12 = vmul.f32 0.044715, %v2343_v34  ;;  %v2726_v11 = vmul.f32 0.044715, %v2342_v18  ;;  %v2728_v63 = vmul.f32 0.044715, %v2344_v61  ;;  %v10526_v18 = vpop.f32.mrf.mxu0 }
 0x334   : > { %v7764_v13 = vpop.eup %7763  ;;  %6435 = vst [vmem:[%s8604_s12 + $0x3b0] sm:$0xff] %v7077_v16  ;;  %v4253_v29 = vadd.f32 1.0, %v7762_v56  ;;  %v3490_v57 = vmul.f32 0.7978846, %v3106_v42  ;;  %v3492_v35 = vmul.f32 0.7978846, %v3108_v27  ;;  %v3109_v7 = vadd.f32 %v2725_v30, %v10457_v44  ;;  %v10535_v30 = vpop.f32.mrf.mxu1 }
 0x335   : > { %v7766_v36 = vpop.eup %7765  ;;  %6436 = vst [vmem:[%s8604_s12 + $0x3b8] sm:$0xff] %v7078_v10  ;;  %v4255_v23 = vadd.f32 1.0, %v7764_v13  ;;  %v3111_v28 = vadd.f32 %v2727_v12, %v10459_v6  ;;  %v3110_v25 = vadd.f32 %v2726_v11, %v10469_v38  ;;  %v3112_v59 = vadd.f32 %v2728_v63, %v10471_v33 }
 0x336   : > { %v7768_v26 = vpop.eup %7767  ;;  %v4637_v14 = vmul.f32 0.5, %v4253_v29  ;;  %v4254_v24 = vadd.f32 1.0, %v7766_v36  ;;  %7773 = vtanh.f32 %v3490_v57  ;;  %v3493_v52 = vmul.f32 0.7978846, %v3109_v7 }
 0x337   : > { %v4639_v17 = vmul.f32 0.5, %v4255_v23  ;;  %v4256_v4 = vadd.f32 1.0, %v7768_v26  ;;  %7775 = vtanh.f32 %v3492_v35  ;;  %v3495_v53 = vmul.f32 0.7978846, %v3111_v28 }
 0x338   : > { %v5021_v40 = vmul.f32 %v4637_v14, %v10406_v32  ;;  %v4638_v50 = vmul.f32 0.5, %v4254_v24  ;;  %7777 = vtanh.f32 %v3493_v52  ;;  %v3494_v62 = vmul.f32 0.7978846, %v3110_v25 }
 0x339   : > { %v7770_v0 = vpop.eup %7769  ;;  %v5023_v43 = vmul.f32 %v4639_v17, %v10408_v45  ;;  %v4640_v22 = vmul.f32 0.5, %v4256_v4  ;;  %7779 = vtanh.f32 %v3495_v53  ;;  %v3496_v49 = vmul.f32 0.7978846, %v3112_v59 }
 0x33a   : > { %v7772_v1 = vpop.eup %7771  ;;  %v5022_v9 = vmul.f32 %v4638_v50, %v10414_v39  ;;  %v4257_v3 = vadd.f32 1.0, %v7770_v0  ;;  %7781 = vtanh.f32 %v3494_v62  ;;  %v1961_v32 = vmul.f32 %v10492_v37, %v10492_v37 }
 0x33b   : > { %v5024_v55 = vmul.f32 %v4640_v22, %v10419_v60  ;;  %v4259_v31 = vadd.f32 1.0, %v7772_v1  ;;  %7783 = vtanh.f32 %v3496_v49  ;;  %v1963_v45 = vmul.f32 %v10496_v47, %v10496_v47  ;;  %v10558_v22 = vpop.f32.mrf.mxu0 }
 0x33c   : > { %v7079_v8 = vpack.c.bf16 %v5022_v9, %v5021_v40  ;;  %v4641_v41 = vmul.f32 0.5, %v4257_v3  ;;  %v2345_v39 = vmul.f32 %v1961_v32, %v10492_v37  ;;  %v1962_v20 = vmul.f32 %v10504_v5, %v10504_v5  ;;  %v10560_v32 = vpop.f32.mrf.mxu1 }
 0x33d   : > { %v7080_v15 = vpack.c.bf16 %v5024_v55, %v5023_v43  ;;  %v4643_v48 = vmul.f32 0.5, %v4259_v31  ;;  %v2347_v34 = vmul.f32 %v1963_v45, %v10496_v47  ;;  %v1964_v60 = vmul.f32 %v10506_v54, %v10506_v54 }
 0x33e   : > { %6437 = vst [vmem:[%s8604_s12 + $0x3c0] sm:$0xff] %v7079_v8  ;;  %v10530_v61 = vmul.f32 %v4641_v41, %v10432_v2  ;;  %v2729_v16 = vmul.f32 0.044715, %v2345_v39  ;;  %v2346_v42 = vmul.f32 %v1962_v20, %v10504_v5  ;;  %v1965_v27 = vmul.f32 %v10510_v58, %v10510_v58 }
 0x33f   : > { %6438 = vst [vmem:[%s8604_s12 + $0x3c8] sm:$0xff] %v7080_v15  ;;  %v10539_v56 = vmul.f32 %v4643_v48, %v10435_v21  ;;  %v2731_v10 = vmul.f32 0.044715, %v2347_v34  ;;  %v2348_v12 = vmul.f32 %v1964_v60, %v10506_v54  ;;  %v1967_v11 = vmul.f32 %v10515_v46, %v10515_v46 }
 0x340   : > { %v3113_v2 = vadd.f32 %v2729_v16, %v10492_v37  ;;  %v2730_v63 = vmul.f32 0.044715, %v2346_v42  ;;  %v2349_v13 = vmul.f32 %v1965_v27, %v10510_v58  ;;  %v1966_v29 = vmul.f32 %v10526_v18, %v10526_v18  ;;  %v10564_v16 = vpop.f32.mrf.mxu0 }
 0x341   : > { %v3115_v57 = vadd.f32 %v2731_v10, %v10496_v47  ;;  %v2732_v35 = vmul.f32 0.044715, %v2348_v12  ;;  %v2351_v21 = vmul.f32 %v1967_v11, %v10515_v46  ;;  %v1968_v7 = vmul.f32 %v10535_v30, %v10535_v30  ;;  %v10568_v11 = vpop.f32.mrf.mxu1 }
 0x342   : > { %v3497_v36 = vmul.f32 0.7978846, %v3113_v2  ;;  %v3114_v23 = vadd.f32 %v2730_v63, %v10504_v5  ;;  %v2733_v28 = vmul.f32 0.044715, %v2349_v13  ;;  %v2350_v25 = vmul.f32 %v1966_v29, %v10526_v18 }
 0x343   : > { %v7774_v59 = vpop.eup %7773  ;;  %v3499_v26 = vmul.f32 0.7978846, %v3115_v57  ;;  %v3116_v14 = vadd.f32 %v2732_v35, %v10506_v54  ;;  %v2735_v24 = vmul.f32 0.044715, %v2351_v21  ;;  %v2352_v52 = vmul.f32 %v1968_v7, %v10535_v30  ;;  %v10586_v35 = vpop.f32.mrf.mxu0 }
 0x344   : > { %v7776_v17 = vpop.eup %7775  ;;  %v4258_v4 = vadd.f32 1.0, %v7774_v59  ;;  %7785 = vtanh.f32 %v3497_v36  ;;  %v3498_v53 = vmul.f32 0.7978846, %v3114_v23  ;;  %v3117_v40 = vadd.f32 %v2733_v28, %v10510_v58  ;;  %v10590_v28 = vpop.f32.mrf.mxu1 }
 0x345   : > { %v7778_v50 = vpop.eup %7777  ;;  %v4260_v62 = vadd.f32 1.0, %v7776_v17  ;;  %7787 = vtanh.f32 %v3499_v26  ;;  %v3500_v0 = vmul.f32 0.7978846, %v3116_v14  ;;  %v3119_v43 = vadd.f32 %v2735_v24, %v10515_v46 }
 0x346   : > { %v7780_v49 = vpop.eup %7779  ;;  %v4642_v1 = vmul.f32 0.5, %v4258_v4  ;;  %v4261_v9 = vadd.f32 1.0, %v7778_v50  ;;  %7789 = vtanh.f32 %v3498_v53  ;;  %v3501_v3 = vmul.f32 0.7978846, %v3117_v40 }
 0x347   : > { %v7782_v55 = vpop.eup %7781  ;;  %v4644_v31 = vmul.f32 0.5, %v4260_v62  ;;  %v4263_v45 = vadd.f32 1.0, %v7780_v49  ;;  %7791 = vtanh.f32 %v3500_v0  ;;  %v3503_v8 = vmul.f32 0.7978846, %v3119_v43 }
 0x348   : > { %v7784_v41 = vpop.eup %7783  ;;  %v5026_v39 = vmul.f32 %v4642_v1, %v10449_v19  ;;  %v4645_v20 = vmul.f32 0.5, %v4261_v9  ;;  %v4262_v15 = vadd.f32 1.0, %v7782_v55  ;;  %7793 = vtanh.f32 %v3501_v3  ;;  %v10603_v1 = vpop.f32.mrf.mxu0 }
 0x349   : > { %v5028_v48 = vmul.f32 %v4644_v31, %v10451_v51  ;;  %v4647_v34 = vmul.f32 0.5, %v4263_v45  ;;  %v4264_v60 = vadd.f32 1.0, %v7784_v41  ;;  %7795 = vtanh.f32 %v3503_v8  ;;  %v10605_v9 = vpop.f32.mrf.mxu1 }
 0x34a   : > { %v7081_v42 = vpack.c.bf16 %v5026_v39, %v10530_v61  ;;  %v5029_v27 = vmul.f32 %v4645_v20, %v10457_v44  ;;  %v4646_v10 = vmul.f32 0.5, %v4262_v15  ;;  %v2734_v12 = vmul.f32 0.044715, %v2350_v25 }
 0x34b   : > { %v7082_v19 = vpack.c.bf16 %v5028_v48, %v10539_v56  ;;  %v5031_v2 = vmul.f32 %v4647_v34, %v10459_v6  ;;  %v4648_v63 = vmul.f32 0.5, %v4264_v60  ;;  %v2736_v51 = vmul.f32 0.044715, %v2352_v52 }
 0x34c   : > { %6439 = vst [vmem:[%s8604_s12 + $0x3d0] sm:$0xff] %v7081_v42  ;;  %v5030_v13 = vmul.f32 %v4646_v10, %v10469_v38  ;;  %v3118_v29 = vadd.f32 %v2734_v12, %v10526_v18  ;;  %v1969_v61 = vmul.f32 %v10558_v22, %v10558_v22  ;;  %v1971_v44 = vmul.f32 %v10560_v32, %v10560_v32 }
 0x34d   : > { %6440 = vst [vmem:[%s8604_s12 + $0x3d8] sm:$0xff] %v7082_v19  ;;  %v5032_v57 = vmul.f32 %v4648_v63, %v10471_v33  ;;  %v3120_v56 = vadd.f32 %v2736_v51, %v10535_v30  ;;  %v1970_v6 = vmul.f32 %v10564_v16, %v10564_v16  ;;  %v1972_v38 = vmul.f32 %v10568_v11, %v10568_v11  ;;  %v10611_v51 = vpop.f32.mrf.mxu0 }
 0x34e   : > { %v7083_v21 = vpack.c.bf16 %v5030_v13, %v5029_v27  ;;  %v3502_v7 = vmul.f32 0.7978846, %v3118_v29  ;;  %v2353_v36 = vmul.f32 %v1969_v61, %v10558_v22  ;;  %v2355_v23 = vmul.f32 %v1971_v44, %v10560_v32  ;;  %v10613_v13 = vpop.f32.mrf.mxu1 }
 0x34f   : > { %v7084_v33 = vpack.c.bf16 %v5032_v57, %v5031_v2  ;;  %v3504_v25 = vmul.f32 0.7978846, %v3120_v56  ;;  %v2354_v59 = vmul.f32 %v1970_v6, %v10564_v16  ;;  %v2356_v26 = vmul.f32 %v1972_v38, %v10568_v11 }
 0x350   : > { %6441 = vst [vmem:[%s8604_s12 + $0x3e0] sm:$0xff] %v7083_v21  ;;  %7797 = vtanh.f32 %v3502_v7  ;;  %v2737_v14 = vmul.f32 0.044715, %v2353_v36  ;;  %v2739_v24 = vmul.f32 0.044715, %v2355_v23  ;;  %v1973_v52 = vmul.f32 %v10586_v35, %v10586_v35 }
 0x351   : > { %v7786_v17 = vpop.eup %7785  ;;  %6442 = vst [vmem:[%s8604_s12 + $0x3e8] sm:$0xff] %v7084_v33  ;;  %7799 = vtanh.f32 %v3504_v25  ;;  %v2738_v4 = vmul.f32 0.044715, %v2354_v59  ;;  %v2740_v53 = vmul.f32 0.044715, %v2356_v26  ;;  %v1975_v40 = vmul.f32 %v10590_v28, %v10590_v28  ;;  %v10622_v33 = vpop.f32.mrf.mxu0 }
 0x352   : > { %v7788_v50 = vpop.eup %7787  ;;  %v4265_v62 = vadd.f32 1.0, %v7786_v17  ;;  %v3121_v0 = vadd.f32 %v2737_v14, %v10558_v22  ;;  %v3123_v43 = vadd.f32 %v2739_v24, %v10560_v32  ;;  %v2357_v49 = vmul.f32 %v1973_v52, %v10586_v35 }
 0x353   : > { %v7790_v3 = vpop.eup %7789  ;;  %v4267_v55 = vadd.f32 1.0, %v7788_v50  ;;  %v3122_v31 = vadd.f32 %v2738_v4, %v10564_v16  ;;  %v3124_v45 = vadd.f32 %v2740_v53, %v10568_v11  ;;  %v2359_v8 = vmul.f32 %v1975_v40, %v10590_v28 }
 0x354   : > { %v7792_v41 = vpop.eup %7791  ;;  %v4649_v39 = vmul.f32 0.5, %v4265_v62  ;;  %v4266_v20 = vadd.f32 1.0, %v7790_v3  ;;  %v3505_v15 = vmul.f32 0.7978846, %v3121_v0  ;;  %v3507_v48 = vmul.f32 0.7978846, %v3123_v43 }
 0x355   : > { %v7794_v34 = vpop.eup %7793  ;;  %v4651_v60 = vmul.f32 0.5, %v4267_v55  ;;  %v4268_v42 = vadd.f32 1.0, %v7792_v41  ;;  %v3506_v27 = vmul.f32 0.7978846, %v3122_v31  ;;  %v3508_v10 = vmul.f32 0.7978846, %v3124_v45 }
 0x356   : > { %v7796_v12 = vpop.eup %7795  ;;  %v5033_v19 = vmul.f32 %v4649_v39, %v10492_v37  ;;  %v4650_v2 = vmul.f32 0.5, %v4266_v20  ;;  %v4269_v63 = vadd.f32 1.0, %v7794_v34  ;;  %7801 = vtanh.f32 %v3505_v15 }
 0x357   : > { %v5035_v29 = vmul.f32 %v4651_v60, %v10496_v47  ;;  %v4652_v61 = vmul.f32 0.5, %v4268_v42  ;;  %v4271_v44 = vadd.f32 1.0, %v7796_v12  ;;  %7803 = vtanh.f32 %v3507_v48 }
 0x358   : > { %v5034_v57 = vmul.f32 %v4650_v2, %v10504_v5  ;;  %v4653_v56 = vmul.f32 0.5, %v4269_v63  ;;  %7805 = vtanh.f32 %v3506_v27  ;;  %v2741_v6 = vmul.f32 0.044715, %v2357_v49  ;;  %v10624_v5 = vpop.f32.mrf.mxu1 }
 0x359   : > { %v5036_v37 = vmul.f32 %v4652_v61, %v10506_v54  ;;  %v4655_v38 = vmul.f32 0.5, %v4271_v44  ;;  %7807 = vtanh.f32 %v3508_v10  ;;  %v2743_v21 = vmul.f32 0.044715, %v2359_v8 }
 0x35a   : > { %v7085_v7 = vpack.c.bf16 %v5034_v57, %v5033_v19  ;;  %v5037_v36 = vmul.f32 %v4653_v56, %v10510_v58  ;;  %v3125_v47 = vadd.f32 %v2741_v6, %v10586_v35  ;;  %v1974_v23 = vmul.f32 %v10603_v1, %v10603_v1  ;;  %v10654_v56 = vpop.f32.mrf.mxu1 }
 0x35b   : > { %v7086_v25 = vpack.c.bf16 %v5036_v37, %v5035_v29  ;;  %v5039_v59 = vmul.f32 %v4655_v38, %v10515_v46  ;;  %v3127_v54 = vadd.f32 %v2743_v21, %v10590_v28  ;;  %v1976_v26 = vmul.f32 %v10605_v9, %v10605_v9  ;;  %v10652_v29 = vpop.f32.mrf.mxu0 }
 0x35c   : > { %6443 = vst [vmem:[%s8604_s12 + $0x3f0] sm:$0xff] %v7085_v7  ;;  %v3509_v14 = vmul.f32 0.7978846, %v3125_v47  ;;  %v2358_v58 = vmul.f32 %v1974_v23, %v10603_v1  ;;  %v1977_v24 = vmul.f32 %v10611_v51, %v10611_v51  ;;  %v1979_v52 = vmul.f32 %v10613_v13, %v10613_v13 }
 0x35d   : > { %v7798_v17 = vpop.eup %7797  ;;  %6444 = vst [vmem:[%s8604_s12 + $0x3f8] sm:$0xff] %v7086_v25  ;;  %v3511_v4 = vmul.f32 0.7978846, %v3127_v54  ;;  %v2360_v46 = vmul.f32 %v1976_v26, %v10605_v9  ;;  %v1978_v53 = vmul.f32 %v10622_v33, %v10622_v33  ;;  %v1980_v40 = vmul.f32 %v10624_v5, %v10624_v5  ;;  %v10660_v26 = vpop.f32.mrf.mxu0 }
 0x35e   : > { %v7800_v50 = vpop.eup %7799  ;;  %v4270_v62 = vadd.f32 1.0, %v7798_v17  ;;  %7809 = vtanh.f32 %v3509_v14  ;;  %v2742_v0 = vmul.f32 0.044715, %v2358_v58  ;;  %v2361_v43 = vmul.f32 %v1977_v24, %v10611_v51 }
 0x35f   : > { %v4272_v49 = vadd.f32 1.0, %v7800_v50  ;;  %7811 = vtanh.f32 %v3511_v4  ;;  %v2744_v3 = vmul.f32 0.044715, %v2360_v46  ;;  %v2363_v55 = vmul.f32 %v1979_v52, %v10613_v13  ;;  %v10665_v52 = vpop.f32.mrf.mxu1 }
 0x360   : > { %v4654_v31 = vmul.f32 0.5, %v4270_v62  ;;  %v3126_v45 = vadd.f32 %v2742_v0, %v10603_v1  ;;  %v2745_v8 = vmul.f32 0.044715, %v2361_v43  ;;  %v2362_v41 = vmul.f32 %v1978_v53, %v10622_v33 }
 0x361   : > { %v4656_v39 = vmul.f32 0.5, %v4272_v49  ;;  %v3128_v20 = vadd.f32 %v2744_v3, %v10605_v9  ;;  %v2747_v15 = vmul.f32 0.044715, %v2363_v55  ;;  %v2364_v48 = vmul.f32 %v1980_v40, %v10624_v5  ;;  %v10678_v49 = vpop.f32.mrf.mxu0 }
 0x362   : > { %v5038_v34 = vmul.f32 %v4654_v31, %v10526_v18  ;;  %v3510_v60 = vmul.f32 0.7978846, %v3126_v45  ;;  %v3129_v42 = vadd.f32 %v2745_v8, %v10611_v51  ;;  %v2746_v27 = vmul.f32 0.044715, %v2362_v41  ;;  %v10681_v8 = vpop.f32.mrf.mxu1 }
 0x363   : > { %v7802_v10 = vpop.eup %7801  ;;  %v5040_v12 = vmul.f32 %v4656_v39, %v10535_v30  ;;  %v3512_v19 = vmul.f32 0.7978846, %v3128_v20  ;;  %v3131_v2 = vadd.f32 %v2747_v15, %v10613_v13  ;;  %v2748_v63 = vmul.f32 0.044715, %v2364_v48 }
 0x364   : > { %v7804_v61 = vpop.eup %7803  ;;  %v7087_v44 = vpack.c.bf16 %v5038_v34, %v5037_v36  ;;  %v4273_v57 = vadd.f32 1.0, %v7802_v10  ;;  %7813 = vtanh.f32 %v3510_v60  ;;  %v3513_v18 = vmul.f32 0.7978846, %v3129_v42 }
 0x365   : > { %v7806_v6 = vpop.eup %7805  ;;  %v7088_v37 = vpack.c.bf16 %v5040_v12, %v5039_v59  ;;  %v4275_v38 = vadd.f32 1.0, %v7804_v61  ;;  %7815 = vtanh.f32 %v3512_v19  ;;  %v3515_v30 = vmul.f32 0.7978846, %v3131_v2 }
 0x366   : > { %v7808_v21 = vpop.eup %7807  ;;  %6445 = vst [vmem:[%s8604_s12 + $0x400] sm:$0xff] %v7087_v44  ;;  %v4657_v7 = vmul.f32 0.5, %v4273_v57  ;;  %v4274_v47 = vadd.f32 1.0, %v7806_v6  ;;  %7817 = vtanh.f32 %v3513_v18  ;;  %v3130_v23 = vadd.f32 %v2746_v27, %v10622_v33  ;;  %v10695_v44 = vpop.f32.mrf.mxu0 }
 0x367   : > { %6446 = vst [vmem:[%s8604_s12 + $0x408] sm:$0xff] %v7088_v37  ;;  %v4659_v36 = vmul.f32 0.5, %v4275_v38  ;;  %v4276_v25 = vadd.f32 1.0, %v7808_v21  ;;  %7819 = vtanh.f32 %v3515_v30  ;;  %v3132_v54 = vadd.f32 %v2748_v63, %v10624_v5  ;;  %v10697_v57 = vpop.f32.mrf.mxu1 }
 0x368   : > { %v5041_v59 = vmul.f32 %v4657_v7, %v10558_v22  ;;  %v4658_v14 = vmul.f32 0.5, %v4274_v47  ;;  %v3514_v58 = vmul.f32 0.7978846, %v3130_v23  ;;  %v1981_v24 = vmul.f32 %v10652_v29, %v10652_v29 }
 0x369   : > { %v5043_v17 = vmul.f32 %v4659_v36, %v10560_v32  ;;  %v4660_v4 = vmul.f32 0.5, %v4276_v25  ;;  %v3516_v46 = vmul.f32 0.7978846, %v3132_v54  ;;  %v1983_v53 = vmul.f32 %v10654_v56, %v10654_v56 }
 0x36a   : > { %v5042_v40 = vmul.f32 %v4658_v14, %v10564_v16  ;;  %7821 = vtanh.f32 %v3514_v58  ;;  %v2365_v50 = vmul.f32 %v1981_v24, %v10652_v29  ;;  %v1982_v22 = vmul.f32 %v10660_v26, %v10660_v26  ;;  %v10703_v24 = vpop.f32.mrf.mxu0 }
 0x36b   : > { %v7810_v62 = vpop.eup %7809  ;;  %v5044_v0 = vmul.f32 %v4660_v4, %v10568_v11  ;;  %7823 = vtanh.f32 %v3516_v46  ;;  %v2367_v32 = vmul.f32 %v1983_v53, %v10654_v56  ;;  %v1984_v43 = vmul.f32 %v10665_v52, %v10665_v52 }
 0x36c   : > { %v7812_v16 = vpop.eup %7811  ;;  %v7089_v3 = vpack.c.bf16 %v5042_v40, %v5041_v59  ;;  %v4277_v55 = vadd.f32 1.0, %v7810_v62  ;;  %v2749_v31 = vmul.f32 0.044715, %v2365_v50  ;;  %v2366_v45 = vmul.f32 %v1982_v22, %v10660_v26 }
 0x36d   : > { %v7090_v41 = vpack.c.bf16 %v5044_v0, %v5043_v17  ;;  %v4279_v39 = vadd.f32 1.0, %v7812_v16  ;;  %v2751_v11 = vmul.f32 0.044715, %v2367_v32  ;;  %v2368_v20 = vmul.f32 %v1984_v43, %v10665_v52  ;;  %v10705_v17 = vpop.f32.mrf.mxu1 }
 0x36e   : > { %6447 = vst [vmem:[%s8604_s12 + $0x410] sm:$0xff] %v7089_v3  ;;  %v4661_v15 = vmul.f32 0.5, %v4277_v55  ;;  %v3133_v48 = vadd.f32 %v2749_v31, %v10652_v29  ;;  %v2750_v34 = vmul.f32 0.044715, %v2366_v45  ;;  %v1985_v60 = vmul.f32 %v10678_v49, %v10678_v49 }
 0x36f   : > { %6448 = vst [vmem:[%s8604_s12 + $0x418] sm:$0xff] %v7090_v41  ;;  %v4663_v42 = vmul.f32 0.5, %v4279_v39  ;;  %v3135_v27 = vadd.f32 %v2751_v11, %v10654_v56  ;;  %v2752_v10 = vmul.f32 0.044715, %v2368_v20  ;;  %v1987_v12 = vmul.f32 %v10681_v8, %v10681_v8  ;;  %v10715_v41 = vpop.f32.mrf.mxu0  ;;  %v10717_v39 = vpop.f32.mrf.mxu1 }
 0x370   : > { %v5045_v19 = vmul.f32 %v4661_v15, %v10586_v35  ;;  %v3517_v2 = vmul.f32 0.7978846, %v3133_v48  ;;  %v3134_v63 = vadd.f32 %v2750_v34, %v10660_v26  ;;  %v2369_v61 = vmul.f32 %v1985_v60, %v10678_v49 }
 0x371   : > { %v7814_v18 = vpop.eup %7813  ;;  %v5047_v6 = vmul.f32 %v4663_v42, %v10590_v28  ;;  %v3519_v37 = vmul.f32 0.7978846, %v3135_v27  ;;  %v3136_v38 = vadd.f32 %v2752_v10, %v10665_v52  ;;  %v2371_v30 = vmul.f32 %v1987_v12, %v10681_v8 }
 0x372   : > { %v7816_v21 = vpop.eup %7815  ;;  %v4278_v7 = vadd.f32 1.0, %v7814_v18  ;;  %7825 = vtanh.f32 %v3517_v2  ;;  %v3518_v35 = vmul.f32 0.7978846, %v3134_v63  ;;  %v2753_v47 = vmul.f32 0.044715, %v2369_v61 }
 0x373   : > { %v7818_v23 = vpop.eup %7817  ;;  %v4280_v36 = vadd.f32 1.0, %v7816_v21  ;;  %7827 = vtanh.f32 %v3519_v37  ;;  %v3520_v25 = vmul.f32 0.7978846, %v3136_v38  ;;  %v2755_v54 = vmul.f32 0.044715, %v2371_v30  ;;  %v10738_v37 = vpop.f32.mrf.mxu0 }
 0x374   : > { %v7820_v59 = vpop.eup %7819  ;;  %v4662_v14 = vmul.f32 0.5, %v4278_v7  ;;  %v4281_v58 = vadd.f32 1.0, %v7818_v23  ;;  %7829 = vtanh.f32 %v3518_v35  ;;  %v3137_v28 = vadd.f32 %v2753_v47, %v10678_v49  ;;  %v10742_v7 = vpop.f32.mrf.mxu1 }
 0x375   : > { %v4664_v4 = vmul.f32 0.5, %v4280_v36  ;;  %v4283_v46 = vadd.f32 1.0, %v7820_v59  ;;  %7831 = vtanh.f32 %v3520_v25  ;;  %v3139_v53 = vadd.f32 %v2755_v54, %v10681_v8 }
 0x376   : > { %v5046_v40 = vmul.f32 %v4662_v14, %v10603_v1  ;;  %v4665_v50 = vmul.f32 0.5, %v4281_v58  ;;  %v3521_v22 = vmul.f32 0.7978846, %v3137_v28  ;;  %v1986_v62 = vmul.f32 %v10695_v44, %v10695_v44 }
 0x377   : > { %v7822_v0 = vpop.eup %7821  ;;  %v5048_v32 = vmul.f32 %v4664_v4, %v10605_v9  ;;  %v4667_v43 = vmul.f32 0.5, %v4283_v46  ;;  %v3523_v16 = vmul.f32 0.7978846, %v3139_v53  ;;  %v1988_v3 = vmul.f32 %v10697_v57, %v10697_v57 }
 0x378   : > { %v7824_v55 = vpop.eup %7823  ;;  %v7091_v31 = vpack.c.bf16 %v5046_v40, %v5045_v19  ;;  %v5049_v45 = vmul.f32 %v4665_v50, %v10611_v51  ;;  %v4282_v1 = vadd.f32 1.0, %v7822_v0  ;;  %7833 = vtanh.f32 %v3521_v22  ;;  %v10750_v50 = vpop.f32.mrf.mxu0 }
 0x379   : > { %v7092_v11 = vpack.c.bf16 %v5048_v32, %v5047_v6  ;;  %v5051_v20 = vmul.f32 %v4667_v43, %v10613_v13  ;;  %v4284_v9 = vadd.f32 1.0, %v7824_v55  ;;  %7835 = vtanh.f32 %v3523_v16  ;;  %v10752_v43 = vpop.f32.mrf.mxu1 }
 0x37a   : > { %6449 = vst [vmem:[%s8604_s12 + $0x420] sm:$0xff] %v7091_v31  ;;  %v4666_v15 = vmul.f32 0.5, %v4282_v1  ;;  %v2370_v48 = vmul.f32 %v1986_v62, %v10695_v44  ;;  %v2372_v34 = vmul.f32 %v1988_v3, %v10697_v57  ;;  %v1989_v51 = vmul.f32 %v10703_v24, %v10703_v24 }
 0x37b   : > { %6450 = vst [vmem:[%s8604_s12 + $0x428] sm:$0xff] %v7092_v11  ;;  %v4668_v60 = vmul.f32 0.5, %v4284_v9  ;;  %v1991_v42 = vmul.f32 %v10705_v17, %v10705_v17  ;;  %v1990_v27 = vmul.f32 %v10715_v41, %v10715_v41  ;;  %v1992_v13 = vmul.f32 %v10717_v39, %v10717_v39 }
 0x37c   : > { %v5050_v10 = vmul.f32 %v4666_v15, %v10622_v33  ;;  %v2754_v12 = vmul.f32 0.044715, %v2370_v48  ;;  %v2756_v19 = vmul.f32 0.044715, %v2372_v34  ;;  %v2373_v2 = vmul.f32 %v1989_v51, %v10703_v24  ;;  %v10756_v48 = vpop.f32.mrf.mxu0 }
 0x37d   : > { %v5052_v63 = vmul.f32 %v4668_v60, %v10624_v5  ;;  %v2375_v61 = vmul.f32 %v1991_v42, %v10705_v17  ;;  %v2374_v18 = vmul.f32 %v1990_v27, %v10715_v41  ;;  %v2376_v6 = vmul.f32 %v1992_v13, %v10717_v39  ;;  %v10761_v42 = vpop.f32.mrf.mxu1 }
 0x37e   : > { %v7093_v38 = vpack.c.bf16 %v5050_v10, %v5049_v45  ;;  %v3138_v30 = vadd.f32 %v2754_v12, %v10695_v44  ;;  %v3140_v33 = vadd.f32 %v2756_v19, %v10697_v57  ;;  %v2757_v21 = vmul.f32 0.044715, %v2373_v2 }
 0x37f   : > { %v7826_v35 = vpop.eup %7825  ;;  %v7094_v5 = vpack.c.bf16 %v5052_v63, %v5051_v20  ;;  %v2759_v47 = vmul.f32 0.044715, %v2375_v61  ;;  %v2758_v23 = vmul.f32 0.044715, %v2374_v18  ;;  %v2760_v36 = vmul.f32 0.044715, %v2376_v6  ;;  %v10772_v18 = vpop.f32.mrf.mxu0 }
 0x380   : > { %v7828_v25 = vpop.eup %7827  ;;  %6451 = vst [vmem:[%s8604_s12 + $0x430] sm:$0xff] %v7093_v38  ;;  %v4285_v54 = vadd.f32 1.0, %v7826_v35  ;;  %v3522_v59 = vmul.f32 0.7978846, %v3138_v30  ;;  %v3524_v14 = vmul.f32 0.7978846, %v3140_v33  ;;  %v3141_v58 = vadd.f32 %v2757_v21, %v10703_v24  ;;  %v10781_v21 = vpop.f32.mrf.mxu1 }
 0x381   : > { %v7830_v28 = vpop.eup %7829  ;;  %6452 = vst [vmem:[%s8604_s12 + $0x438] sm:$0xff] %v7094_v5  ;;  %v4287_v4 = vadd.f32 1.0, %v7828_v25  ;;  %v3143_v46 = vadd.f32 %v2759_v47, %v10705_v17  ;;  %v3142_v53 = vadd.f32 %v2758_v23, %v10715_v41  ;;  %v3144_v40 = vadd.f32 %v2760_v36, %v10717_v39 }
 0x382   : > { %v7832_v22 = vpop.eup %7831  ;;  %v4669_v62 = vmul.f32 0.5, %v4285_v54  ;;  %v4286_v0 = vadd.f32 1.0, %v7830_v28  ;;  %7837 = vtanh.f32 %v3522_v59  ;;  %v3525_v32 = vmul.f32 0.7978846, %v3141_v58 }
 0x383   : > { %v4671_v16 = vmul.f32 0.5, %v4287_v4  ;;  %v4288_v3 = vadd.f32 1.0, %v7832_v22  ;;  %7839 = vtanh.f32 %v3524_v14  ;;  %v3527_v55 = vmul.f32 0.7978846, %v3143_v46 }
 0x384   : > { %v5053_v31 = vmul.f32 %v4669_v62, %v10652_v29  ;;  %v4670_v45 = vmul.f32 0.5, %v4286_v0  ;;  %7841 = vtanh.f32 %v3525_v32  ;;  %v3526_v1 = vmul.f32 0.7978846, %v3142_v53 }
 0x385   : > { %v7834_v11 = vpop.eup %7833  ;;  %v5055_v20 = vmul.f32 %v4671_v16, %v10654_v56  ;;  %v4672_v9 = vmul.f32 0.5, %v4288_v3  ;;  %7843 = vtanh.f32 %v3527_v55  ;;  %v3528_v15 = vmul.f32 0.7978846, %v3144_v40 }
 0x386   : > { %v7836_v34 = vpop.eup %7835  ;;  %v5054_v51 = vmul.f32 %v4670_v45, %v10660_v26  ;;  %v4289_v60 = vadd.f32 1.0, %v7834_v11  ;;  %7845 = vtanh.f32 %v3526_v1  ;;  %v1993_v29 = vmul.f32 %v10738_v37, %v10738_v37 }
 0x387   : > { %v5056_v27 = vmul.f32 %v4672_v9, %v10665_v52  ;;  %v4291_v13 = vadd.f32 1.0, %v7836_v34  ;;  %7847 = vtanh.f32 %v3528_v15  ;;  %v1995_v56 = vmul.f32 %v10742_v7, %v10742_v7  ;;  %v10804_v9 = vpop.f32.mrf.mxu0 }
 0x388   : > { %v7095_v10 = vpack.c.bf16 %v5054_v51, %v5053_v31  ;;  %v4673_v12 = vmul.f32 0.5, %v4289_v60  ;;  %v2377_v26 = vmul.f32 %v1993_v29, %v10738_v37  ;;  %v1994_v19 = vmul.f32 %v10750_v50, %v10750_v50  ;;  %v10806_v29 = vpop.f32.mrf.mxu1 }
 0x389   : > { %v7096_v2 = vpack.c.bf16 %v5056_v27, %v5055_v20  ;;  %v4675_v63 = vmul.f32 0.5, %v4291_v13  ;;  %v2379_v61 = vmul.f32 %v1995_v56, %v10742_v7  ;;  %v1996_v52 = vmul.f32 %v10752_v43, %v10752_v43 }
 0x38a   : > { %6453 = vst [vmem:[%s8604_s12 + $0x440] sm:$0xff] %v7095_v10  ;;  %v10776_v6 = vmul.f32 %v4673_v12, %v10678_v49  ;;  %v2761_v38 = vmul.f32 0.044715, %v2377_v26  ;;  %v2378_v30 = vmul.f32 %v1994_v19, %v10750_v50  ;;  %v1997_v33 = vmul.f32 %v10756_v48, %v10756_v48 }
 0x38b   : > { %6454 = vst [vmem:[%s8604_s12 + $0x448] sm:$0xff] %v7096_v2  ;;  %v10785_v35 = vmul.f32 %v4675_v63, %v10681_v8  ;;  %v2763_v5 = vmul.f32 0.044715, %v2379_v61  ;;  %v2380_v47 = vmul.f32 %v1996_v52, %v10752_v43  ;;  %v1999_v23 = vmul.f32 %v10761_v42, %v10761_v42 }
 0x38c   : > { %v3145_v49 = vadd.f32 %v2761_v38, %v10738_v37  ;;  %v2762_v36 = vmul.f32 0.044715, %v2378_v30  ;;  %v2381_v25 = vmul.f32 %v1997_v33, %v10756_v48  ;;  %v1998_v54 = vmul.f32 %v10772_v18, %v10772_v18  ;;  %v10810_v38 = vpop.f32.mrf.mxu0 }
 0x38d   : > { %v3147_v59 = vadd.f32 %v2763_v5, %v10742_v7  ;;  %v2764_v14 = vmul.f32 0.044715, %v2380_v47  ;;  %v2383_v8 = vmul.f32 %v1999_v23, %v10761_v42  ;;  %v2000_v58 = vmul.f32 %v10781_v21, %v10781_v21  ;;  %v10814_v23 = vpop.f32.mrf.mxu1 }
 0x38e   : > { %v3529_v28 = vmul.f32 0.7978846, %v3145_v49  ;;  %v3146_v4 = vadd.f32 %v2762_v36, %v10750_v50  ;;  %v2765_v46 = vmul.f32 0.044715, %v2381_v25  ;;  %v2382_v53 = vmul.f32 %v1998_v54, %v10772_v18 }
 0x38f   : > { %v7838_v40 = vpop.eup %7837  ;;  %v3531_v22 = vmul.f32 0.7978846, %v3147_v59  ;;  %v3148_v62 = vadd.f32 %v2764_v14, %v10752_v43  ;;  %v2767_v0 = vmul.f32 0.044715, %v2383_v8  ;;  %v2384_v32 = vmul.f32 %v2000_v58, %v10781_v21  ;;  %v10832_v14 = vpop.f32.mrf.mxu0 }
 0x390   : > { %v7840_v16 = vpop.eup %7839  ;;  %v4290_v3 = vadd.f32 1.0, %v7838_v40  ;;  %7849 = vtanh.f32 %v3529_v28  ;;  %v3530_v55 = vmul.f32 0.7978846, %v3146_v4  ;;  %v3149_v31 = vadd.f32 %v2765_v46, %v10756_v48  ;;  %v10836_v46 = vpop.f32.mrf.mxu1 }
 0x391   : > { %v7842_v45 = vpop.eup %7841  ;;  %v4292_v1 = vadd.f32 1.0, %v7840_v16  ;;  %7851 = vtanh.f32 %v3531_v22  ;;  %v3532_v11 = vmul.f32 0.7978846, %v3148_v62  ;;  %v3151_v20 = vadd.f32 %v2767_v0, %v10761_v42 }
 0x392   : > { %v7844_v15 = vpop.eup %7843  ;;  %v4674_v34 = vmul.f32 0.5, %v4290_v3  ;;  %v4293_v51 = vadd.f32 1.0, %v7842_v45  ;;  %7853 = vtanh.f32 %v3530_v55  ;;  %v3533_v60 = vmul.f32 0.7978846, %v3149_v31 }
 0x393   : > { %v7846_v27 = vpop.eup %7845  ;;  %v4676_v13 = vmul.f32 0.5, %v4292_v1  ;;  %v4295_v56 = vadd.f32 1.0, %v7844_v15  ;;  %7855 = vtanh.f32 %v3532_v11  ;;  %v3535_v10 = vmul.f32 0.7978846, %v3151_v20 }
 0x394   : > { %v7848_v12 = vpop.eup %7847  ;;  %v5058_v26 = vmul.f32 %v4674_v34, %v10695_v44  ;;  %v4677_v19 = vmul.f32 0.5, %v4293_v51  ;;  %v4294_v2 = vadd.f32 1.0, %v7846_v27  ;;  %7857 = vtanh.f32 %v3533_v60  ;;  %v10849_v34 = vpop.f32.mrf.mxu0 }
 0x395   : > { %v5060_v63 = vmul.f32 %v4676_v13, %v10697_v57  ;;  %v4679_v61 = vmul.f32 0.5, %v4295_v56  ;;  %v4296_v52 = vadd.f32 1.0, %v7848_v12  ;;  %7859 = vtanh.f32 %v3535_v10  ;;  %v10851_v51 = vpop.f32.mrf.mxu1 }
 0x396   : > { %v7097_v30 = vpack.c.bf16 %v5058_v26, %v10776_v6  ;;  %v5061_v33 = vmul.f32 %v4677_v19, %v10703_v24  ;;  %v4678_v5 = vmul.f32 0.5, %v4294_v2  ;;  %v2766_v47 = vmul.f32 0.044715, %v2382_v53 }
 0x397   : > { %v7098_v44 = vpack.c.bf16 %v5060_v63, %v10785_v35  ;;  %v5063_v49 = vmul.f32 %v4679_v61, %v10705_v17  ;;  %v4680_v36 = vmul.f32 0.5, %v4296_v52  ;;  %v2768_v57 = vmul.f32 0.044715, %v2384_v32 }
 0x398   : > { %6455 = vst [vmem:[%s8604_s12 + $0x450] sm:$0xff] %v7097_v30  ;;  %v5062_v25 = vmul.f32 %v4678_v5, %v10715_v41  ;;  %v3150_v54 = vadd.f32 %v2766_v47, %v10772_v18  ;;  %v2001_v6 = vmul.f32 %v10804_v9, %v10804_v9  ;;  %v2003_v24 = vmul.f32 %v10806_v29, %v10806_v29 }
 0x399   : > { %6456 = vst [vmem:[%s8604_s12 + $0x458] sm:$0xff] %v7098_v44  ;;  %v5064_v59 = vmul.f32 %v4680_v36, %v10717_v39  ;;  %v3152_v35 = vadd.f32 %v2768_v57, %v10781_v21  ;;  %v2002_v17 = vmul.f32 %v10810_v38, %v10810_v38  ;;  %v2004_v41 = vmul.f32 %v10814_v23, %v10814_v23  ;;  %v10857_v57 = vpop.f32.mrf.mxu0 }
 0x39a   : > { %v7099_v8 = vpack.c.bf16 %v5062_v25, %v5061_v33  ;;  %v3534_v58 = vmul.f32 0.7978846, %v3150_v54  ;;  %v2385_v28 = vmul.f32 %v2001_v6, %v10804_v9  ;;  %v2387_v4 = vmul.f32 %v2003_v24, %v10806_v29  ;;  %v10859_v25 = vpop.f32.mrf.mxu1 }
 0x39b   : > { %v7100_v39 = vpack.c.bf16 %v5064_v59, %v5063_v49  ;;  %v3536_v53 = vmul.f32 0.7978846, %v3152_v35  ;;  %v2386_v40 = vmul.f32 %v2002_v17, %v10810_v38  ;;  %v2388_v22 = vmul.f32 %v2004_v41, %v10814_v23 }
 0x39c   : > { %6457 = vst [vmem:[%s8604_s12 + $0x460] sm:$0xff] %v7099_v8  ;;  %7861 = vtanh.f32 %v3534_v58  ;;  %v2769_v62 = vmul.f32 0.044715, %v2385_v28  ;;  %v2771_v0 = vmul.f32 0.044715, %v2387_v4  ;;  %v2005_v32 = vmul.f32 %v10832_v14, %v10832_v14 }
 0x39d   : > { %v7850_v16 = vpop.eup %7849  ;;  %6458 = vst [vmem:[%s8604_s12 + $0x468] sm:$0xff] %v7100_v39  ;;  %7863 = vtanh.f32 %v3536_v53  ;;  %v2770_v3 = vmul.f32 0.044715, %v2386_v40  ;;  %v2772_v55 = vmul.f32 0.044715, %v2388_v22  ;;  %v2007_v31 = vmul.f32 %v10836_v46, %v10836_v46  ;;  %v10868_v39 = vpop.f32.mrf.mxu0 }
 0x39e   : > { %v7852_v45 = vpop.eup %7851  ;;  %v4297_v1 = vadd.f32 1.0, %v7850_v16  ;;  %v3153_v11 = vadd.f32 %v2769_v62, %v10804_v9  ;;  %v3155_v20 = vadd.f32 %v2771_v0, %v10806_v29  ;;  %v2389_v15 = vmul.f32 %v2005_v32, %v10832_v14 }
 0x39f   : > { %v7854_v60 = vpop.eup %7853  ;;  %v4299_v27 = vadd.f32 1.0, %v7852_v45  ;;  %v3154_v13 = vadd.f32 %v2770_v3, %v10810_v38  ;;  %v3156_v56 = vadd.f32 %v2772_v55, %v10814_v23  ;;  %v2391_v10 = vmul.f32 %v2007_v31, %v10836_v46 }
 0x3a0   : > { %v7856_v12 = vpop.eup %7855  ;;  %v4681_v26 = vmul.f32 0.5, %v4297_v1  ;;  %v4298_v19 = vadd.f32 1.0, %v7854_v60  ;;  %v3537_v2 = vmul.f32 0.7978846, %v3153_v11  ;;  %v3539_v63 = vmul.f32 0.7978846, %v3155_v20 }
 0x3a1   : > { %v7858_v61 = vpop.eup %7857  ;;  %v4683_v52 = vmul.f32 0.5, %v4299_v27  ;;  %v4300_v30 = vadd.f32 1.0, %v7856_v12  ;;  %v3538_v33 = vmul.f32 0.7978846, %v3154_v13  ;;  %v3540_v5 = vmul.f32 0.7978846, %v3156_v56 }
 0x3a2   : > { %v7860_v47 = vpop.eup %7859  ;;  %v5065_v44 = vmul.f32 %v4681_v26, %v10738_v37  ;;  %v4682_v49 = vmul.f32 0.5, %v4298_v19  ;;  %v4301_v36 = vadd.f32 1.0, %v7858_v61  ;;  %7865 = vtanh.f32 %v3537_v2 }
 0x3a3   : > { %v5067_v54 = vmul.f32 %v4683_v52, %v10742_v7  ;;  %v4684_v6 = vmul.f32 0.5, %v4300_v30  ;;  %v4303_v24 = vadd.f32 1.0, %v7860_v47  ;;  %7867 = vtanh.f32 %v3539_v63 }
 0x3a4   : > { %v5066_v59 = vmul.f32 %v4682_v49, %v10750_v50  ;;  %v4685_v35 = vmul.f32 0.5, %v4301_v36  ;;  %7869 = vtanh.f32 %v3538_v33  ;;  %v2773_v17 = vmul.f32 0.044715, %v2389_v15  ;;  %v10870_v50 = vpop.f32.mrf.mxu1 }
 0x3a5   : > { %v5068_v37 = vmul.f32 %v4684_v6, %v10752_v43  ;;  %v4687_v41 = vmul.f32 0.5, %v4303_v24  ;;  %7871 = vtanh.f32 %v3540_v5  ;;  %v2775_v8 = vmul.f32 0.044715, %v2391_v10 }
 0x3a6   : > { %v7101_v58 = vpack.c.bf16 %v5066_v59, %v5065_v44  ;;  %v5069_v28 = vmul.f32 %v4685_v35, %v10756_v48  ;;  %v3157_v7 = vadd.f32 %v2773_v17, %v10832_v14  ;;  %v2006_v4 = vmul.f32 %v10849_v34, %v10849_v34  ;;  %v10900_v35 = vpop.f32.mrf.mxu1 }
 0x3a7   : > { %v7102_v53 = vpack.c.bf16 %v5068_v37, %v5067_v54  ;;  %v5071_v40 = vmul.f32 %v4687_v41, %v10761_v42  ;;  %v3159_v43 = vadd.f32 %v2775_v8, %v10836_v46  ;;  %v2008_v22 = vmul.f32 %v10851_v51, %v10851_v51  ;;  %v10898_v54 = vpop.f32.mrf.mxu0 }
 0x3a8   : > { %6459 = vst [vmem:[%s8604_s12 + $0x470] sm:$0xff] %v7101_v58  ;;  %v3541_v62 = vmul.f32 0.7978846, %v3157_v7  ;;  %v2390_v48 = vmul.f32 %v2006_v4, %v10849_v34  ;;  %v2009_v0 = vmul.f32 %v10857_v57, %v10857_v57  ;;  %v2011_v32 = vmul.f32 %v10859_v25, %v10859_v25 }
 0x3a9   : > { %v7862_v16 = vpop.eup %7861  ;;  %6460 = vst [vmem:[%s8604_s12 + $0x478] sm:$0xff] %v7102_v53  ;;  %v3543_v3 = vmul.f32 0.7978846, %v3159_v43  ;;  %v2392_v42 = vmul.f32 %v2008_v22, %v10851_v51  ;;  %v2010_v55 = vmul.f32 %v10868_v39, %v10868_v39  ;;  %v2012_v31 = vmul.f32 %v10870_v50, %v10870_v50  ;;  %v10906_v22 = vpop.f32.mrf.mxu0 }
 0x3aa   : > { %v7864_v45 = vpop.eup %7863  ;;  %v4302_v1 = vadd.f32 1.0, %v7862_v16  ;;  %7873 = vtanh.f32 %v3541_v62  ;;  %v2774_v11 = vmul.f32 0.044715, %v2390_v48  ;;  %v2393_v20 = vmul.f32 %v2009_v0, %v10857_v57 }
 0x3ab   : > { %v4304_v15 = vadd.f32 1.0, %v7864_v45  ;;  %7875 = vtanh.f32 %v3543_v3  ;;  %v2776_v60 = vmul.f32 0.044715, %v2392_v42  ;;  %v2395_v27 = vmul.f32 %v2011_v32, %v10859_v25  ;;  %v10911_v32 = vpop.f32.mrf.mxu1 }
 0x3ac   : > { %v4686_v13 = vmul.f32 0.5, %v4302_v1  ;;  %v3158_v56 = vadd.f32 %v2774_v11, %v10849_v34  ;;  %v2777_v10 = vmul.f32 0.044715, %v2393_v20  ;;  %v2394_v12 = vmul.f32 %v2010_v55, %v10868_v39 }
 0x3ad   : > { %v4688_v26 = vmul.f32 0.5, %v4304_v15  ;;  %v3160_v19 = vadd.f32 %v2776_v60, %v10851_v51  ;;  %v2779_v2 = vmul.f32 0.044715, %v2395_v27  ;;  %v2396_v63 = vmul.f32 %v2012_v31, %v10870_v50  ;;  %v10924_v15 = vpop.f32.mrf.mxu0 }
 0x3ae   : > { %v5070_v61 = vmul.f32 %v4686_v13, %v10772_v18  ;;  %v3542_v52 = vmul.f32 0.7978846, %v3158_v56  ;;  %v3161_v30 = vadd.f32 %v2777_v10, %v10857_v57  ;;  %v2778_v33 = vmul.f32 0.044715, %v2394_v12  ;;  %v10927_v10 = vpop.f32.mrf.mxu1 }
 0x3af   : > { %v7866_v5 = vpop.eup %7865  ;;  %v5072_v47 = vmul.f32 %v4688_v26, %v10781_v21  ;;  %v3544_v44 = vmul.f32 0.7978846, %v3160_v19  ;;  %v3163_v49 = vadd.f32 %v2779_v2, %v10859_v25  ;;  %v2780_v36 = vmul.f32 0.044715, %v2396_v63 }
 0x3b0   : > { %v7868_v6 = vpop.eup %7867  ;;  %v7103_v24 = vpack.c.bf16 %v5070_v61, %v5069_v28  ;;  %v4305_v59 = vadd.f32 1.0, %v7866_v5  ;;  %7877 = vtanh.f32 %v3542_v52  ;;  %v3545_v18 = vmul.f32 0.7978846, %v3161_v30 }
 0x3b1   : > { %v7870_v17 = vpop.eup %7869  ;;  %v7104_v37 = vpack.c.bf16 %v5072_v47, %v5071_v40  ;;  %v4307_v41 = vadd.f32 1.0, %v7868_v6  ;;  %7879 = vtanh.f32 %v3544_v44  ;;  %v3547_v21 = vmul.f32 0.7978846, %v3163_v49 }
 0x3b2   : > { %v7872_v8 = vpop.eup %7871  ;;  %6461 = vst [vmem:[%s8604_s12 + $0x480] sm:$0xff] %v7103_v24  ;;  %v4689_v58 = vmul.f32 0.5, %v4305_v59  ;;  %v4306_v7 = vadd.f32 1.0, %v7870_v17  ;;  %7881 = vtanh.f32 %v3545_v18  ;;  %v3162_v4 = vadd.f32 %v2778_v33, %v10868_v39  ;;  %v10941_v24 = vpop.f32.mrf.mxu0 }
 0x3b3   : > { %6462 = vst [vmem:[%s8604_s12 + $0x488] sm:$0xff] %v7104_v37  ;;  %v4691_v28 = vmul.f32 0.5, %v4307_v41  ;;  %v4308_v53 = vadd.f32 1.0, %v7872_v8  ;;  %7883 = vtanh.f32 %v3547_v21  ;;  %v3164_v43 = vadd.f32 %v2780_v36, %v10870_v50  ;;  %v10943_v59 = vpop.f32.mrf.mxu1 }
 0x3b4   : > { %v5073_v40 = vmul.f32 %v4689_v58, %v10804_v9  ;;  %v4690_v62 = vmul.f32 0.5, %v4306_v7  ;;  %v3546_v48 = vmul.f32 0.7978846, %v3162_v4  ;;  %v2013_v0 = vmul.f32 %v10898_v54, %v10898_v54 }
 0x3b5   : > { %v5075_v16 = vmul.f32 %v4691_v28, %v10806_v29  ;;  %v4692_v3 = vmul.f32 0.5, %v4308_v53  ;;  %v3548_v42 = vmul.f32 0.7978846, %v3164_v43  ;;  %v2015_v55 = vmul.f32 %v10900_v35, %v10900_v35 }
 0x3b6   : > { %v5074_v31 = vmul.f32 %v4690_v62, %v10810_v38  ;;  %7885 = vtanh.f32 %v3546_v48  ;;  %v2397_v45 = vmul.f32 %v2013_v0, %v10898_v54  ;;  %v2014_v9 = vmul.f32 %v10906_v22, %v10906_v22  ;;  %v10949_v0 = vpop.f32.mrf.mxu0 }
 0x3b7   : > { %v7874_v1 = vpop.eup %7873  ;;  %v5076_v11 = vmul.f32 %v4692_v3, %v10814_v23  ;;  %7887 = vtanh.f32 %v3548_v42  ;;  %v2399_v29 = vmul.f32 %v2015_v55, %v10900_v35  ;;  %v2016_v20 = vmul.f32 %v10911_v32, %v10911_v32 }
 0x3b8   : > { %v7876_v38 = vpop.eup %7875  ;;  %v7105_v60 = vpack.c.bf16 %v5074_v31, %v5073_v40  ;;  %v4309_v27 = vadd.f32 1.0, %v7874_v1  ;;  %v2781_v13 = vmul.f32 0.044715, %v2397_v45  ;;  %v2398_v56 = vmul.f32 %v2014_v9, %v10906_v22 }
 0x3b9   : > { %v7106_v12 = vpack.c.bf16 %v5076_v11, %v5075_v16  ;;  %v4311_v26 = vadd.f32 1.0, %v7876_v38  ;;  %v2783_v23 = vmul.f32 0.044715, %v2399_v29  ;;  %v2400_v19 = vmul.f32 %v2016_v20, %v10911_v32  ;;  %v10951_v16 = vpop.f32.mrf.mxu1 }
 0x3ba   : > { %6463 = vst [vmem:[%s8604_s12 + $0x490] sm:$0xff] %v7105_v60  ;;  %v4693_v2 = vmul.f32 0.5, %v4309_v27  ;;  %v3165_v63 = vadd.f32 %v2781_v13, %v10898_v54  ;;  %v2782_v61 = vmul.f32 0.044715, %v2398_v56  ;;  %v2017_v52 = vmul.f32 %v10924_v15, %v10924_v15 }
 0x3bb   : > { %6464 = vst [vmem:[%s8604_s12 + $0x498] sm:$0xff] %v7106_v12  ;;  %v4695_v30 = vmul.f32 0.5, %v4311_v26  ;;  %v3167_v33 = vadd.f32 %v2783_v23, %v10900_v35  ;;  %v2784_v5 = vmul.f32 0.044715, %v2400_v19  ;;  %v2019_v47 = vmul.f32 %v10927_v10, %v10927_v10  ;;  %v10961_v12 = vpop.f32.mrf.mxu0  ;;  %v10963_v26 = vpop.f32.mrf.mxu1 }
 0x3bc   : > { %v5077_v44 = vmul.f32 %v4693_v2, %v10832_v14  ;;  %v3549_v49 = vmul.f32 0.7978846, %v3165_v63  ;;  %v3166_v36 = vadd.f32 %v2782_v61, %v10906_v22  ;;  %v2401_v6 = vmul.f32 %v2017_v52, %v10924_v15 }
 0x3bd   : > { %v7878_v18 = vpop.eup %7877  ;;  %v5079_v17 = vmul.f32 %v4695_v30, %v10836_v46  ;;  %v3551_v37 = vmul.f32 0.7978846, %v3167_v33  ;;  %v3168_v41 = vadd.f32 %v2784_v5, %v10911_v32  ;;  %v2403_v21 = vmul.f32 %v2019_v47, %v10927_v10 }
 0x3be   : > { %v7880_v8 = vpop.eup %7879  ;;  %v4310_v58 = vadd.f32 1.0, %v7878_v18  ;;  %7889 = vtanh.f32 %v3549_v49  ;;  %v3550_v14 = vmul.f32 0.7978846, %v3166_v36  ;;  %v2785_v7 = vmul.f32 0.044715, %v2401_v6 }
 0x3bf   : > { %v7882_v4 = vpop.eup %7881  ;;  %v4312_v28 = vadd.f32 1.0, %v7880_v8  ;;  %7891 = vtanh.f32 %v3551_v37  ;;  %v3552_v53 = vmul.f32 0.7978846, %v3168_v41  ;;  %v2787_v43 = vmul.f32 0.044715, %v2403_v21  ;;  %v10984_v37 = vpop.f32.mrf.mxu0 }
 0x3c0   : > { %v7884_v40 = vpop.eup %7883  ;;  %v4694_v62 = vmul.f32 0.5, %v4310_v58  ;;  %v4313_v48 = vadd.f32 1.0, %v7882_v4  ;;  %7893 = vtanh.f32 %v3550_v14  ;;  %v3169_v46 = vadd.f32 %v2785_v7, %v10924_v15  ;;  %v10988_v58 = vpop.f32.mrf.mxu1 }
 0x3c1   : > { %v4696_v3 = vmul.f32 0.5, %v4312_v28  ;;  %v4315_v42 = vadd.f32 1.0, %v7884_v40  ;;  %7895 = vtanh.f32 %v3552_v53  ;;  %v3171_v55 = vadd.f32 %v2787_v43, %v10927_v10 }
 0x3c2   : > { %v5078_v31 = vmul.f32 %v4694_v62, %v10849_v34  ;;  %v4697_v45 = vmul.f32 0.5, %v4313_v48  ;;  %v3553_v9 = vmul.f32 0.7978846, %v3169_v46  ;;  %v2018_v1 = vmul.f32 %v10941_v24, %v10941_v24 }
 0x3c3   : > { %v7886_v11 = vpop.eup %7885  ;;  %v5080_v29 = vmul.f32 %v4696_v3, %v10851_v51  ;;  %v4699_v20 = vmul.f32 0.5, %v4315_v42  ;;  %v3555_v38 = vmul.f32 0.7978846, %v3171_v55  ;;  %v2020_v60 = vmul.f32 %v10943_v59, %v10943_v59 }
 0x3c4   : > { %v7888_v27 = vpop.eup %7887  ;;  %v7107_v13 = vpack.c.bf16 %v5078_v31, %v5077_v44  ;;  %v5081_v56 = vmul.f32 %v4697_v45, %v10857_v57  ;;  %v4314_v34 = vadd.f32 1.0, %v7886_v11  ;;  %7897 = vtanh.f32 %v3553_v9  ;;  %v10996_v45 = vpop.f32.mrf.mxu0 }
 0x3c5   : > { %v7108_v23 = vpack.c.bf16 %v5080_v29, %v5079_v17  ;;  %v5083_v19 = vmul.f32 %v4699_v20, %v10859_v25  ;;  %v4316_v51 = vadd.f32 1.0, %v7888_v27  ;;  %7899 = vtanh.f32 %v3555_v38  ;;  %v10998_v20 = vpop.f32.mrf.mxu1 }
 0x3c6   : > { %6465 = vst [vmem:[%s8604_s12 + $0x4a0] sm:$0xff] %v7107_v13  ;;  %v4698_v2 = vmul.f32 0.5, %v4314_v34  ;;  %v2402_v63 = vmul.f32 %v2018_v1, %v10941_v24  ;;  %v2404_v61 = vmul.f32 %v2020_v60, %v10943_v59  ;;  %v2021_v57 = vmul.f32 %v10949_v0, %v10949_v0 }
 0x3c7   : > { %6466 = vst [vmem:[%s8604_s12 + $0x4a8] sm:$0xff] %v7108_v23  ;;  %v4700_v52 = vmul.f32 0.5, %v4316_v51  ;;  %v2023_v30 = vmul.f32 %v10951_v16, %v10951_v16  ;;  %v2022_v33 = vmul.f32 %v10961_v12, %v10961_v12  ;;  %v2024_v25 = vmul.f32 %v10963_v26, %v10963_v26 }
 0x3c8   : > { %v5082_v5 = vmul.f32 %v4698_v2, %v10868_v39  ;;  %v2786_v47 = vmul.f32 0.044715, %v2402_v63  ;;  %v2788_v44 = vmul.f32 0.044715, %v2404_v61  ;;  %v2405_v49 = vmul.f32 %v2021_v57, %v10949_v0  ;;  %v11002_v63 = vpop.f32.mrf.mxu0 }
 0x3c9   : > { %v5084_v36 = vmul.f32 %v4700_v52, %v10870_v50  ;;  %v2407_v6 = vmul.f32 %v2023_v30, %v10951_v16  ;;  %v2406_v18 = vmul.f32 %v2022_v33, %v10961_v12  ;;  %v2408_v17 = vmul.f32 %v2024_v25, %v10963_v26  ;;  %v11007_v30 = vpop.f32.mrf.mxu1 }
 0x3ca   : > { %v7109_v41 = vpack.c.bf16 %v5082_v5, %v5081_v56  ;;  %v3170_v21 = vadd.f32 %v2786_v47, %v10941_v24  ;;  %v3172_v39 = vadd.f32 %v2788_v44, %v10943_v59  ;;  %v2789_v8 = vmul.f32 0.044715, %v2405_v49 }
 0x3cb   : > { %v7890_v14 = vpop.eup %7889  ;;  %v7110_v50 = vpack.c.bf16 %v5084_v36, %v5083_v19  ;;  %v2791_v7 = vmul.f32 0.044715, %v2407_v6  ;;  %v2790_v4 = vmul.f32 0.044715, %v2406_v18  ;;  %v2792_v28 = vmul.f32 0.044715, %v2408_v17  ;;  %v11018_v18 = vpop.f32.mrf.mxu0 }
 0x3cc   : > { %v7892_v53 = vpop.eup %7891  ;;  %6467 = vst [vmem:[%s8604_s12 + $0x4b0] sm:$0xff] %v7109_v41  ;;  %v4317_v43 = vadd.f32 1.0, %v7890_v14  ;;  %v3554_v40 = vmul.f32 0.7978846, %v3170_v21  ;;  %v3556_v62 = vmul.f32 0.7978846, %v3172_v39  ;;  %v3173_v48 = vadd.f32 %v2789_v8, %v10949_v0  ;;  %v11027_v8 = vpop.f32.mrf.mxu1 }
 0x3cd   : > { %v7894_v46 = vpop.eup %7893  ;;  %6468 = vst [vmem:[%s8604_s12 + $0x4b8] sm:$0xff] %v7110_v50  ;;  %v4319_v3 = vadd.f32 1.0, %v7892_v53  ;;  %v3175_v42 = vadd.f32 %v2791_v7, %v10951_v16  ;;  %v3174_v55 = vadd.f32 %v2790_v4, %v10961_v12  ;;  %v3176_v31 = vadd.f32 %v2792_v28, %v10963_v26 }
 0x3ce   : > { %v7896_v9 = vpop.eup %7895  ;;  %v4701_v1 = vmul.f32 0.5, %v4317_v43  ;;  %v4318_v11 = vadd.f32 1.0, %v7894_v46  ;;  %7901 = vtanh.f32 %v3554_v40  ;;  %v3557_v29 = vmul.f32 0.7978846, %v3173_v48 }
 0x3cf   : > { %v4703_v38 = vmul.f32 0.5, %v4319_v3  ;;  %v4320_v60 = vadd.f32 1.0, %v7896_v9  ;;  %7903 = vtanh.f32 %v3556_v62  ;;  %v3559_v27 = vmul.f32 0.7978846, %v3175_v42 }
 0x3d0   : > { %v5085_v13 = vmul.f32 %v4701_v1, %v10898_v54  ;;  %v4702_v56 = vmul.f32 0.5, %v4318_v11  ;;  %7905 = vtanh.f32 %v3557_v29  ;;  %v3558_v34 = vmul.f32 0.7978846, %v3174_v55 }
 0x3d1   : > { %v7898_v23 = vpop.eup %7897  ;;  %v5087_v19 = vmul.f32 %v4703_v38, %v10900_v35  ;;  %v4704_v51 = vmul.f32 0.5, %v4320_v60  ;;  %7907 = vtanh.f32 %v3559_v27  ;;  %v3560_v2 = vmul.f32 0.7978846, %v3176_v31 }
 0x3d2   : > { %v7900_v61 = vpop.eup %7899  ;;  %v5086_v57 = vmul.f32 %v4702_v56, %v10906_v22  ;;  %v4321_v52 = vadd.f32 1.0, %v7898_v23  ;;  %7909 = vtanh.f32 %v3558_v34  ;;  %v2025_v54 = vmul.f32 %v10984_v37, %v10984_v37 }
 0x3d3   : > { %v5088_v33 = vmul.f32 %v4704_v51, %v10911_v32  ;;  %v4323_v25 = vadd.f32 1.0, %v7900_v61  ;;  %7911 = vtanh.f32 %v3560_v2  ;;  %v2027_v35 = vmul.f32 %v10988_v58, %v10988_v58  ;;  %v11050_v51 = vpop.f32.mrf.mxu0 }
 0x3d4   : > { %v7111_v5 = vpack.c.bf16 %v5086_v57, %v5085_v13  ;;  %v4705_v47 = vmul.f32 0.5, %v4321_v52  ;;  %v2409_v22 = vmul.f32 %v2025_v54, %v10984_v37  ;;  %v2026_v44 = vmul.f32 %v10996_v45, %v10996_v45  ;;  %v11052_v54 = vpop.f32.mrf.mxu1 }
 0x3d5   : > { %v7112_v49 = vpack.c.bf16 %v5088_v33, %v5087_v19  ;;  %v4707_v36 = vmul.f32 0.5, %v4323_v25  ;;  %v2411_v6 = vmul.f32 %v2027_v35, %v10988_v58  ;;  %v2028_v32 = vmul.f32 %v10998_v20, %v10998_v20 }
 0x3d6   : > { %6469 = vst [vmem:[%s8604_s12 + $0x4c0] sm:$0xff] %v7111_v5  ;;  %v11022_v17 = vmul.f32 %v4705_v47, %v10924_v15  ;;  %v2793_v41 = vmul.f32 0.044715, %v2409_v22  ;;  %v2410_v21 = vmul.f32 %v2026_v44, %v10996_v45  ;;  %v2029_v39 = vmul.f32 %v11002_v63, %v11002_v63 }
 0x3d7   : > { %6470 = vst [vmem:[%s8604_s12 + $0x4c8] sm:$0xff] %v7112_v49  ;;  %v11031_v14 = vmul.f32 %v4707_v36, %v10927_v10  ;;  %v2795_v50 = vmul.f32 0.044715, %v2411_v6  ;;  %v2412_v7 = vmul.f32 %v2028_v32, %v10998_v20  ;;  %v2031_v4 = vmul.f32 %v11007_v30, %v11007_v30 }
 0x3d8   : > { %v3177_v15 = vadd.f32 %v2793_v41, %v10984_v37  ;;  %v2794_v28 = vmul.f32 0.044715, %v2410_v21  ;;  %v2413_v53 = vmul.f32 %v2029_v39, %v11002_v63  ;;  %v2030_v43 = vmul.f32 %v11018_v18, %v11018_v18  ;;  %v11056_v41 = vpop.f32.mrf.mxu0 }
 0x3d9   : > { %v3179_v40 = vadd.f32 %v2795_v50, %v10988_v58  ;;  %v2796_v62 = vmul.f32 0.044715, %v2412_v7  ;;  %v2415_v10 = vmul.f32 %v2031_v4, %v11007_v30  ;;  %v2032_v48 = vmul.f32 %v11027_v8, %v11027_v8  ;;  %v11060_v4 = vpop.f32.mrf.mxu1 }
 0x3da   : > { %v3561_v46 = vmul.f32 0.7978846, %v3177_v15  ;;  %v3178_v3 = vadd.f32 %v2794_v28, %v10996_v45  ;;  %v2797_v42 = vmul.f32 0.044715, %v2413_v53  ;;  %v2414_v55 = vmul.f32 %v2030_v43, %v11018_v18 }
 0x3db   : > { %v7902_v31 = vpop.eup %7901  ;;  %v3563_v9 = vmul.f32 0.7978846, %v3179_v40  ;;  %v3180_v1 = vadd.f32 %v2796_v62, %v10998_v20  ;;  %v2799_v11 = vmul.f32 0.044715, %v2415_v10  ;;  %v2416_v29 = vmul.f32 %v2032_v48, %v11027_v8  ;;  %v11078_v62 = vpop.f32.mrf.mxu0 }
 0x3dc   : > { %v7904_v38 = vpop.eup %7903  ;;  %v4322_v60 = vadd.f32 1.0, %v7902_v31  ;;  %7913 = vtanh.f32 %v3561_v46  ;;  %v3562_v27 = vmul.f32 0.7978846, %v3178_v3  ;;  %v3181_v13 = vadd.f32 %v2797_v42, %v11002_v63  ;;  %v11082_v42 = vpop.f32.mrf.mxu1 }
 0x3dd   : > { %v7906_v56 = vpop.eup %7905  ;;  %v4324_v34 = vadd.f32 1.0, %v7904_v38  ;;  %7915 = vtanh.f32 %v3563_v9  ;;  %v3564_v23 = vmul.f32 0.7978846, %v3180_v1  ;;  %v3183_v19 = vadd.f32 %v2799_v11, %v11007_v30 }
 0x3de   : > { %v7908_v2 = vpop.eup %7907  ;;  %v4706_v61 = vmul.f32 0.5, %v4322_v60  ;;  %v4325_v57 = vadd.f32 1.0, %v7906_v56  ;;  %7917 = vtanh.f32 %v3562_v27  ;;  %v3565_v52 = vmul.f32 0.7978846, %v3181_v13 }
 0x3df   : > { %v7910_v33 = vpop.eup %7909  ;;  %v4708_v25 = vmul.f32 0.5, %v4324_v34  ;;  %v4327_v35 = vadd.f32 1.0, %v7908_v2  ;;  %7919 = vtanh.f32 %v3564_v23  ;;  %v3567_v5 = vmul.f32 0.7978846, %v3183_v19 }
 0x3e0   : > { %v7912_v47 = vpop.eup %7911  ;;  %v5090_v22 = vmul.f32 %v4706_v61, %v10941_v24  ;;  %v4709_v44 = vmul.f32 0.5, %v4325_v57  ;;  %v4326_v49 = vadd.f32 1.0, %v7910_v33  ;;  %7921 = vtanh.f32 %v3565_v52  ;;  %v11095_v61 = vpop.f32.mrf.mxu0 }
 0x3e1   : > { %v5092_v36 = vmul.f32 %v4708_v25, %v10943_v59  ;;  %v4711_v6 = vmul.f32 0.5, %v4327_v35  ;;  %v4328_v32 = vadd.f32 1.0, %v7912_v47  ;;  %7923 = vtanh.f32 %v3567_v5  ;;  %v11097_v57 = vpop.f32.mrf.mxu1 }
 0x3e2   : > { %v7113_v21 = vpack.c.bf16 %v5090_v22, %v11022_v17  ;;  %v5093_v39 = vmul.f32 %v4709_v44, %v10949_v0  ;;  %v4710_v50 = vmul.f32 0.5, %v4326_v49  ;;  %v2798_v7 = vmul.f32 0.044715, %v2414_v55 }
 0x3e3   : > { %v7114_v24 = vpack.c.bf16 %v5092_v36, %v11031_v14  ;;  %v5095_v15 = vmul.f32 %v4711_v6, %v10951_v16  ;;  %v4712_v28 = vmul.f32 0.5, %v4328_v32  ;;  %v2800_v59 = vmul.f32 0.044715, %v2416_v29 }
 0x3e4   : > { %6471 = vst [vmem:[%s8604_s12 + $0x4d0] sm:$0xff] %v7113_v21  ;;  %v5094_v53 = vmul.f32 %v4710_v50, %v10961_v12  ;;  %v3182_v43 = vadd.f32 %v2798_v7, %v11018_v18  ;;  %v2033_v17 = vmul.f32 %v11050_v51, %v11050_v51  ;;  %v2035_v0 = vmul.f32 %v11052_v54, %v11052_v54 }
 0x3e5   : > { %6472 = vst [vmem:[%s8604_s12 + $0x4d8] sm:$0xff] %v7114_v24  ;;  %v5096_v40 = vmul.f32 %v4712_v28, %v10963_v26  ;;  %v3184_v14 = vadd.f32 %v2800_v59, %v11027_v8  ;;  %v2034_v16 = vmul.f32 %v11056_v41, %v11056_v41  ;;  %v2036_v12 = vmul.f32 %v11060_v4, %v11060_v4  ;;  %v11103_v59 = vpop.f32.mrf.mxu0 }
 0x3e6   : > { %v7115_v10 = vpack.c.bf16 %v5094_v53, %v5093_v39  ;;  %v3566_v48 = vmul.f32 0.7978846, %v3182_v43  ;;  %v2417_v46 = vmul.f32 %v2033_v17, %v11050_v51  ;;  %v2419_v3 = vmul.f32 %v2035_v0, %v11052_v54  ;;  %v11105_v53 = vpop.f32.mrf.mxu1 }
 0x3e7   : > { %v7116_v26 = vpack.c.bf16 %v5096_v40, %v5095_v15  ;;  %v3568_v55 = vmul.f32 0.7978846, %v3184_v14  ;;  %v2418_v31 = vmul.f32 %v2034_v16, %v11056_v41  ;;  %v2420_v9 = vmul.f32 %v2036_v12, %v11060_v4 }
 0x3e8   : > { %6473 = vst [vmem:[%s8604_s12 + $0x4e0] sm:$0xff] %v7115_v10  ;;  %7925 = vtanh.f32 %v3566_v48  ;;  %v2801_v1 = vmul.f32 0.044715, %v2417_v46  ;;  %v2803_v11 = vmul.f32 0.044715, %v2419_v3  ;;  %v2037_v29 = vmul.f32 %v11078_v62, %v11078_v62 }
 0x3e9   : > { %v7914_v38 = vpop.eup %7913  ;;  %6474 = vst [vmem:[%s8604_s12 + $0x4e8] sm:$0xff] %v7116_v26  ;;  %7927 = vtanh.f32 %v3568_v55  ;;  %v2802_v60 = vmul.f32 0.044715, %v2418_v31  ;;  %v2804_v27 = vmul.f32 0.044715, %v2420_v9  ;;  %v2039_v13 = vmul.f32 %v11082_v42, %v11082_v42  ;;  %v11114_v26 = vpop.f32.mrf.mxu0 }
 0x3ea   : > { %v7916_v56 = vpop.eup %7915  ;;  %v4329_v34 = vadd.f32 1.0, %v7914_v38  ;;  %v3185_v23 = vadd.f32 %v2801_v1, %v11050_v51  ;;  %v3187_v19 = vadd.f32 %v2803_v11, %v11052_v54  ;;  %v2421_v2 = vmul.f32 %v2037_v29, %v11078_v62 }
 0x3eb   : > { %v7918_v52 = vpop.eup %7917  ;;  %v4331_v33 = vadd.f32 1.0, %v7916_v56  ;;  %v3186_v25 = vadd.f32 %v2802_v60, %v11056_v41  ;;  %v3188_v35 = vadd.f32 %v2804_v27, %v11060_v4  ;;  %v2423_v5 = vmul.f32 %v2039_v13, %v11082_v42 }
 0x3ec   : > { %v7920_v47 = vpop.eup %7919  ;;  %v4713_v22 = vmul.f32 0.5, %v4329_v34  ;;  %v4330_v44 = vadd.f32 1.0, %v7918_v52  ;;  %v3569_v49 = vmul.f32 0.7978846, %v3185_v23  ;;  %v3571_v36 = vmul.f32 0.7978846, %v3187_v19 }
 0x3ed   : > { %v7922_v6 = vpop.eup %7921  ;;  %v4715_v32 = vmul.f32 0.5, %v4331_v33  ;;  %v4332_v21 = vadd.f32 1.0, %v7920_v47  ;;  %v3570_v39 = vmul.f32 0.7978846, %v3186_v25  ;;  %v3572_v50 = vmul.f32 0.7978846, %v3188_v35 }
 0x3ee   : > { %v7924_v7 = vpop.eup %7923  ;;  %v5097_v24 = vmul.f32 %v4713_v22, %v10984_v37  ;;  %v4714_v15 = vmul.f32 0.5, %v4330_v44  ;;  %v4333_v28 = vadd.f32 1.0, %v7922_v6  ;;  %7929 = vtanh.f32 %v3569_v49 }
 0x3ef   : > { %v5099_v43 = vmul.f32 %v4715_v32, %v10988_v58  ;;  %v4716_v17 = vmul.f32 0.5, %v4332_v21  ;;  %v4335_v0 = vadd.f32 1.0, %v7924_v7  ;;  %7931 = vtanh.f32 %v3571_v36 }
 0x3f0   : > { %v5098_v40 = vmul.f32 %v4714_v15, %v10996_v45  ;;  %v4717_v14 = vmul.f32 0.5, %v4333_v28  ;;  %7933 = vtanh.f32 %v3570_v39  ;;  %v2805_v16 = vmul.f32 0.044715, %v2421_v2  ;;  %v11116_v45 = vpop.f32.mrf.mxu1 }
 0x3f1   : > { %v5100_v37 = vmul.f32 %v4716_v17, %v10998_v20  ;;  %v4719_v12 = vmul.f32 0.5, %v4335_v0  ;;  %7935 = vtanh.f32 %v3572_v50  ;;  %v2807_v10 = vmul.f32 0.044715, %v2423_v5 }
 0x3f2   : > { %v7117_v48 = vpack.c.bf16 %v5098_v40, %v5097_v24  ;;  %v5101_v46 = vmul.f32 %v4717_v14, %v11002_v63  ;;  %v3189_v58 = vadd.f32 %v2805_v16, %v11078_v62  ;;  %v2038_v3 = vmul.f32 %v11095_v61, %v11095_v61  ;;  %v11146_v14 = vpop.f32.mrf.mxu1 }
 0x3f3   : > { %v7118_v55 = vpack.c.bf16 %v5100_v37, %v5099_v43  ;;  %v5103_v31 = vmul.f32 %v4719_v12, %v11007_v30  ;;  %v3191_v20 = vadd.f32 %v2807_v10, %v11082_v42  ;;  %v2040_v9 = vmul.f32 %v11097_v57, %v11097_v57  ;;  %v11144_v43 = vpop.f32.mrf.mxu0 }
 0x3f4   : > { %6475 = vst [vmem:[%s8604_s12 + $0x4f0] sm:$0xff] %v7117_v48  ;;  %v3573_v1 = vmul.f32 0.7978846, %v3189_v58  ;;  %v2422_v63 = vmul.f32 %v2038_v3, %v11095_v61  ;;  %v2041_v11 = vmul.f32 %v11103_v59, %v11103_v59  ;;  %v2043_v29 = vmul.f32 %v11105_v53, %v11105_v53 }
 0x3f5   : > { %v7926_v38 = vpop.eup %7925  ;;  %6476 = vst [vmem:[%s8604_s12 + $0x4f8] sm:$0xff] %v7118_v55  ;;  %v3575_v60 = vmul.f32 0.7978846, %v3191_v20  ;;  %v2424_v30 = vmul.f32 %v2040_v9, %v11097_v57  ;;  %v2042_v27 = vmul.f32 %v11114_v26, %v11114_v26  ;;  %v2044_v13 = vmul.f32 %v11116_v45, %v11116_v45  ;;  %v11152_v9 = vpop.f32.mrf.mxu0 }
 0x3f6   : > { %v7928_v56 = vpop.eup %7927  ;;  %v4334_v34 = vadd.f32 1.0, %v7926_v38  ;;  %7937 = vtanh.f32 %v3573_v1  ;;  %v2806_v23 = vmul.f32 0.044715, %v2422_v63  ;;  %v2425_v19 = vmul.f32 %v2041_v11, %v11103_v59 }
 0x3f7   : > { %v4336_v2 = vadd.f32 1.0, %v7928_v56  ;;  %7939 = vtanh.f32 %v3575_v60  ;;  %v2808_v52 = vmul.f32 0.044715, %v2424_v30  ;;  %v2427_v33 = vmul.f32 %v2043_v29, %v11105_v53  ;;  %v11157_v29 = vpop.f32.mrf.mxu1 }
 0x3f8   : > { %v4718_v25 = vmul.f32 0.5, %v4334_v34  ;;  %v3190_v35 = vadd.f32 %v2806_v23, %v11095_v61  ;;  %v2809_v5 = vmul.f32 0.044715, %v2425_v19  ;;  %v2426_v47 = vmul.f32 %v2042_v27, %v11114_v26 }
 0x3f9   : > { %v4720_v22 = vmul.f32 0.5, %v4336_v2  ;;  %v3192_v44 = vadd.f32 %v2808_v52, %v11097_v57  ;;  %v2811_v49 = vmul.f32 0.044715, %v2427_v33  ;;  %v2428_v36 = vmul.f32 %v2044_v13, %v11116_v45  ;;  %v11170_v2 = vpop.f32.mrf.mxu0 }
 0x3fa   : > { %v5102_v6 = vmul.f32 %v4718_v25, %v11018_v18  ;;  %v3574_v32 = vmul.f32 0.7978846, %v3190_v35  ;;  %v3193_v21 = vadd.f32 %v2809_v5, %v11103_v59  ;;  %v2810_v39 = vmul.f32 0.044715, %v2426_v47  ;;  %v11173_v5 = vpop.f32.mrf.mxu1 }
 0x3fb   : > { %v7930_v50 = vpop.eup %7929  ;;  %v5104_v7 = vmul.f32 %v4720_v22, %v11027_v8  ;;  %v3576_v24 = vmul.f32 0.7978846, %v3192_v44  ;;  %v3195_v15 = vadd.f32 %v2811_v49, %v11105_v53  ;;  %v2812_v28 = vmul.f32 0.044715, %v2428_v36 }
 0x3fc   : > { %v7932_v17 = vpop.eup %7931  ;;  %v7119_v0 = vpack.c.bf16 %v5102_v6, %v5101_v46  ;;  %v4337_v40 = vadd.f32 1.0, %v7930_v50  ;;  %7941 = vtanh.f32 %v3574_v32  ;;  %v3577_v18 = vmul.f32 0.7978846, %v3193_v21 }
 0x3fd   : > { %v7934_v16 = vpop.eup %7933  ;;  %v7120_v37 = vpack.c.bf16 %v5104_v7, %v5103_v31  ;;  %v4339_v12 = vadd.f32 1.0, %v7932_v17  ;;  %7943 = vtanh.f32 %v3576_v24  ;;  %v3579_v8 = vmul.f32 0.7978846, %v3195_v15 }
 0x3fe   : > { %v7936_v10 = vpop.eup %7935  ;;  %6477 = vst [vmem:[%s8604_s12 + $0x500] sm:$0xff] %v7119_v0  ;;  %v4721_v48 = vmul.f32 0.5, %v4337_v40  ;;  %v4338_v58 = vadd.f32 1.0, %v7934_v16  ;;  %7945 = vtanh.f32 %v3577_v18  ;;  %v3194_v3 = vadd.f32 %v2810_v39, %v11114_v26  ;;  %v11187_v0 = vpop.f32.mrf.mxu0 }
 0x3ff   : > { %6478 = vst [vmem:[%s8604_s12 + $0x508] sm:$0xff] %v7120_v37  ;;  %v4723_v46 = vmul.f32 0.5, %v4339_v12  ;;  %v4340_v55 = vadd.f32 1.0, %v7936_v10  ;;  %7947 = vtanh.f32 %v3579_v8  ;;  %v3196_v20 = vadd.f32 %v2812_v28, %v11116_v45  ;;  %v11189_v40 = vpop.f32.mrf.mxu1 }
 0x400   : > { %v5105_v31 = vmul.f32 %v4721_v48, %v11050_v51  ;;  %v4722_v1 = vmul.f32 0.5, %v4338_v58  ;;  %v3578_v63 = vmul.f32 0.7978846, %v3194_v3  ;;  %v2045_v11 = vmul.f32 %v11144_v43, %v11144_v43 }
 0x401   : > { %v5107_v38 = vmul.f32 %v4723_v46, %v11052_v54  ;;  %v4724_v60 = vmul.f32 0.5, %v4340_v55  ;;  %v3580_v30 = vmul.f32 0.7978846, %v3196_v20  ;;  %v2047_v27 = vmul.f32 %v11146_v14, %v11146_v14 }
 0x402   : > { %v5106_v13 = vmul.f32 %v4722_v1, %v11056_v41  ;;  %7949 = vtanh.f32 %v3578_v63  ;;  %v2429_v56 = vmul.f32 %v2045_v11, %v11144_v43  ;;  %v2046_v51 = vmul.f32 %v11152_v9, %v11152_v9  ;;  %v11195_v11 = vpop.f32.mrf.mxu0 }
 0x403   : > { %v7938_v34 = vpop.eup %7937  ;;  %v5108_v23 = vmul.f32 %v4724_v60, %v11060_v4  ;;  %7951 = vtanh.f32 %v3580_v30  ;;  %v2431_v54 = vmul.f32 %v2047_v27, %v11146_v14  ;;  %v2048_v19 = vmul.f32 %v11157_v29, %v11157_v29 }
 0x404   : > { %v7940_v41 = vpop.eup %7939  ;;  %v7121_v52 = vpack.c.bf16 %v5106_v13, %v5105_v31  ;;  %v4341_v33 = vadd.f32 1.0, %v7938_v34  ;;  %v2813_v25 = vmul.f32 0.044715, %v2429_v56  ;;  %v2430_v35 = vmul.f32 %v2046_v51, %v11152_v9 }
 0x405   : > { %v7122_v47 = vpack.c.bf16 %v5108_v23, %v5107_v38  ;;  %v4343_v22 = vadd.f32 1.0, %v7940_v41  ;;  %v2815_v4 = vmul.f32 0.044715, %v2431_v54  ;;  %v2432_v44 = vmul.f32 %v2048_v19, %v11157_v29  ;;  %v11197_v38 = vpop.f32.mrf.mxu1 }
 0x406   : > { %6479 = vst [vmem:[%s8604_s12 + $0x510] sm:$0xff] %v7121_v52  ;;  %v4725_v49 = vmul.f32 0.5, %v4341_v33  ;;  %v3197_v36 = vadd.f32 %v2813_v25, %v11144_v43  ;;  %v2814_v6 = vmul.f32 0.044715, %v2430_v35  ;;  %v2049_v32 = vmul.f32 %v11170_v2, %v11170_v2 }
 0x407   : > { %6480 = vst [vmem:[%s8604_s12 + $0x518] sm:$0xff] %v7122_v47  ;;  %v4727_v21 = vmul.f32 0.5, %v4343_v22  ;;  %v3199_v39 = vadd.f32 %v2815_v4, %v11146_v14  ;;  %v2816_v50 = vmul.f32 0.044715, %v2432_v44  ;;  %v2051_v7 = vmul.f32 %v11173_v5, %v11173_v5  ;;  %v11207_v47 = vpop.f32.mrf.mxu0  ;;  %v11209_v22 = vpop.f32.mrf.mxu1 }
 0x408   : > { %v5109_v24 = vmul.f32 %v4725_v49, %v11078_v62  ;;  %v3581_v15 = vmul.f32 0.7978846, %v3197_v36  ;;  %v3198_v28 = vadd.f32 %v2814_v6, %v11152_v9  ;;  %v2433_v17 = vmul.f32 %v2049_v32, %v11170_v2 }
 0x409   : > { %v7942_v18 = vpop.eup %7941  ;;  %v5111_v16 = vmul.f32 %v4727_v21, %v11082_v42  ;;  %v3583_v37 = vmul.f32 0.7978846, %v3199_v39  ;;  %v3200_v12 = vadd.f32 %v2816_v50, %v11157_v29  ;;  %v2435_v8 = vmul.f32 %v2051_v7, %v11173_v5 }
 0x40a   : > { %v7944_v10 = vpop.eup %7943  ;;  %v4342_v48 = vadd.f32 1.0, %v7942_v18  ;;  %7953 = vtanh.f32 %v3581_v15  ;;  %v3582_v62 = vmul.f32 0.7978846, %v3198_v28  ;;  %v2817_v58 = vmul.f32 0.044715, %v2433_v17 }
 0x40b   : > { %v7946_v3 = vpop.eup %7945  ;;  %v4344_v46 = vadd.f32 1.0, %v7944_v10  ;;  %7955 = vtanh.f32 %v3583_v37  ;;  %v3584_v55 = vmul.f32 0.7978846, %v3200_v12  ;;  %v2819_v20 = vmul.f32 0.044715, %v2435_v8  ;;  %v11230_v37 = vpop.f32.mrf.mxu0 }
 0x40c   : > { %v7948_v31 = vpop.eup %7947  ;;  %v4726_v1 = vmul.f32 0.5, %v4342_v48  ;;  %v4345_v63 = vadd.f32 1.0, %v7946_v3  ;;  %7957 = vtanh.f32 %v3582_v62  ;;  %v3201_v42 = vadd.f32 %v2817_v58, %v11170_v2  ;;  %v11234_v48 = vpop.f32.mrf.mxu1 }
 0x40d   : > { %v4728_v60 = vmul.f32 0.5, %v4344_v46  ;;  %v4347_v30 = vadd.f32 1.0, %v7948_v31  ;;  %7959 = vtanh.f32 %v3584_v55  ;;  %v3203_v27 = vadd.f32 %v2819_v20, %v11173_v5 }
 0x40e   : > { %v5110_v13 = vmul.f32 %v4726_v1, %v11095_v61  ;;  %v4729_v56 = vmul.f32 0.5, %v4345_v63  ;;  %v3585_v51 = vmul.f32 0.7978846, %v3201_v42  ;;  %v2050_v34 = vmul.f32 %v11187_v0, %v11187_v0 }
 0x40f   : > { %v7950_v23 = vpop.eup %7949  ;;  %v5112_v54 = vmul.f32 %v4728_v60, %v11097_v57  ;;  %v4731_v19 = vmul.f32 0.5, %v4347_v30  ;;  %v3587_v41 = vmul.f32 0.7978846, %v3203_v27  ;;  %v2052_v52 = vmul.f32 %v11189_v40, %v11189_v40 }
 0x410   : > { %v7952_v33 = vpop.eup %7951  ;;  %v7123_v25 = vpack.c.bf16 %v5110_v13, %v5109_v24  ;;  %v5113_v35 = vmul.f32 %v4729_v56, %v11103_v59  ;;  %v4346_v61 = vadd.f32 1.0, %v7950_v23  ;;  %7961 = vtanh.f32 %v3585_v51  ;;  %v11242_v56 = vpop.f32.mrf.mxu0 }
 0x411   : > { %v7124_v4 = vpack.c.bf16 %v5112_v54, %v5111_v16  ;;  %v5115_v44 = vmul.f32 %v4731_v19, %v11105_v53  ;;  %v4348_v57 = vadd.f32 1.0, %v7952_v33  ;;  %7963 = vtanh.f32 %v3587_v41  ;;  %v11244_v19 = vpop.f32.mrf.mxu1 }
 0x412   : > { %6481 = vst [vmem:[%s8604_s12 + $0x520] sm:$0xff] %v7123_v25  ;;  %v4730_v49 = vmul.f32 0.5, %v4346_v61  ;;  %v2434_v36 = vmul.f32 %v2050_v34, %v11187_v0  ;;  %v2436_v6 = vmul.f32 %v2052_v52, %v11189_v40  ;;  %v2053_v59 = vmul.f32 %v11195_v11, %v11195_v11 }
 0x413   : > { %6482 = vst [vmem:[%s8604_s12 + $0x528] sm:$0xff] %v7124_v4  ;;  %v4732_v32 = vmul.f32 0.5, %v4348_v57  ;;  %v2055_v21 = vmul.f32 %v11197_v38, %v11197_v38  ;;  %v2054_v39 = vmul.f32 %v11207_v47, %v11207_v47  ;;  %v2056_v53 = vmul.f32 %v11209_v22, %v11209_v22 }
 0x414   : > { %v5114_v50 = vmul.f32 %v4730_v49, %v11114_v26  ;;  %v2818_v7 = vmul.f32 0.044715, %v2434_v36  ;;  %v2820_v24 = vmul.f32 0.044715, %v2436_v6  ;;  %v2437_v15 = vmul.f32 %v2053_v59, %v11195_v11  ;;  %v11248_v36 = vpop.f32.mrf.mxu0 }
 0x415   : > { %v5116_v28 = vmul.f32 %v4732_v32, %v11116_v45  ;;  %v2439_v17 = vmul.f32 %v2055_v21, %v11197_v38  ;;  %v2438_v18 = vmul.f32 %v2054_v39, %v11207_v47  ;;  %v2440_v16 = vmul.f32 %v2056_v53, %v11209_v22  ;;  %v11253_v21 = vpop.f32.mrf.mxu1 }
 0x416   : > { %v7125_v12 = vpack.c.bf16 %v5114_v50, %v5113_v35  ;;  %v3202_v8 = vadd.f32 %v2818_v7, %v11187_v0  ;;  %v3204_v26 = vadd.f32 %v2820_v24, %v11189_v40  ;;  %v2821_v10 = vmul.f32 0.044715, %v2437_v15 }
 0x417   : > { %v7954_v62 = vpop.eup %7953  ;;  %v7126_v45 = vpack.c.bf16 %v5116_v28, %v5115_v44  ;;  %v2823_v58 = vmul.f32 0.044715, %v2439_v17  ;;  %v2822_v3 = vmul.f32 0.044715, %v2438_v18  ;;  %v2824_v46 = vmul.f32 0.044715, %v2440_v16  ;;  %v11264_v18 = vpop.f32.mrf.mxu0 }
 0x418   : > { %v7956_v55 = vpop.eup %7955  ;;  %6483 = vst [vmem:[%s8604_s12 + $0x530] sm:$0xff] %v7125_v12  ;;  %v4349_v20 = vadd.f32 1.0, %v7954_v62  ;;  %v3586_v31 = vmul.f32 0.7978846, %v3202_v8  ;;  %v3588_v1 = vmul.f32 0.7978846, %v3204_v26  ;;  %v3205_v63 = vadd.f32 %v2821_v10, %v11195_v11  ;;  %v11273_v10 = vpop.f32.mrf.mxu1 }
 0x419   : > { %v7958_v42 = vpop.eup %7957  ;;  %6484 = vst [vmem:[%s8604_s12 + $0x538] sm:$0xff] %v7126_v45  ;;  %v4351_v60 = vadd.f32 1.0, %v7956_v55  ;;  %v3207_v30 = vadd.f32 %v2823_v58, %v11197_v38  ;;  %v3206_v27 = vadd.f32 %v2822_v3, %v11207_v47  ;;  %v3208_v13 = vadd.f32 %v2824_v46, %v11209_v22 }
 0x41a   : > { %v7960_v51 = vpop.eup %7959  ;;  %v4733_v34 = vmul.f32 0.5, %v4349_v20  ;;  %v4350_v23 = vadd.f32 1.0, %v7958_v42  ;;  %7965 = vtanh.f32 %v3586_v31  ;;  %v3589_v54 = vmul.f32 0.7978846, %v3205_v63 }
 0x41b   : > { %v4735_v41 = vmul.f32 0.5, %v4351_v60  ;;  %v4352_v52 = vadd.f32 1.0, %v7960_v51  ;;  %7967 = vtanh.f32 %v3588_v1  ;;  %v3591_v33 = vmul.f32 0.7978846, %v3207_v30 }
 0x41c   : > { %v5117_v25 = vmul.f32 %v4733_v34, %v11144_v43  ;;  %v4734_v35 = vmul.f32 0.5, %v4350_v23  ;;  %7969 = vtanh.f32 %v3589_v54  ;;  %v3590_v61 = vmul.f32 0.7978846, %v3206_v27 }
 0x41d   : > { %v7962_v4 = vpop.eup %7961  ;;  %v5119_v44 = vmul.f32 %v4735_v41, %v11146_v14  ;;  %v4736_v57 = vmul.f32 0.5, %v4352_v52  ;;  %7971 = vtanh.f32 %v3591_v33  ;;  %v3592_v49 = vmul.f32 0.7978846, %v3208_v13 }
 0x41e   : > { %v7964_v6 = vpop.eup %7963  ;;  %v5118_v59 = vmul.f32 %v4734_v35, %v11152_v9  ;;  %v4353_v32 = vadd.f32 1.0, %v7962_v4  ;;  %7973 = vtanh.f32 %v3590_v61  ;;  %v2057_v43 = vmul.f32 %v11230_v37, %v11230_v37 }
 0x41f   : > { %v5120_v39 = vmul.f32 %v4736_v57, %v11157_v29  ;;  %v4355_v53 = vadd.f32 1.0, %v7964_v6  ;;  %7975 = vtanh.f32 %v3592_v49  ;;  %v2059_v14 = vmul.f32 %v11234_v48, %v11234_v48  ;;  %v11296_v57 = vpop.f32.mrf.mxu0 }
 0x420   : > { %v7127_v50 = vpack.c.bf16 %v5118_v59, %v5117_v25  ;;  %v4737_v7 = vmul.f32 0.5, %v4353_v32  ;;  %v2441_v9 = vmul.f32 %v2057_v43, %v11230_v37  ;;  %v2058_v24 = vmul.f32 %v11242_v56, %v11242_v56  ;;  %v11298_v43 = vpop.f32.mrf.mxu1 }
 0x421   : > { %v7128_v15 = vpack.c.bf16 %v5120_v39, %v5119_v44  ;;  %v4739_v28 = vmul.f32 0.5, %v4355_v53  ;;  %v2443_v17 = vmul.f32 %v2059_v14, %v11234_v48  ;;  %v2060_v29 = vmul.f32 %v11244_v19, %v11244_v19 }
 0x422   : > { %6485 = vst [vmem:[%s8604_s12 + $0x540] sm:$0xff] %v7127_v50  ;;  %v11268_v16 = vmul.f32 %v4737_v7, %v11170_v2  ;;  %v2825_v12 = vmul.f32 0.044715, %v2441_v9  ;;  %v2442_v8 = vmul.f32 %v2058_v24, %v11242_v56  ;;  %v2061_v26 = vmul.f32 %v11248_v36, %v11248_v36 }
 0x423   : > { %6486 = vst [vmem:[%s8604_s12 + $0x548] sm:$0xff] %v7128_v15  ;;  %v11277_v62 = vmul.f32 %v4739_v28, %v11173_v5  ;;  %v2827_v45 = vmul.f32 0.044715, %v2443_v17  ;;  %v2444_v58 = vmul.f32 %v2060_v29, %v11244_v19  ;;  %v2063_v3 = vmul.f32 %v11253_v21, %v11253_v21 }
 0x424   : > { %v3209_v2 = vadd.f32 %v2825_v12, %v11230_v37  ;;  %v2826_v46 = vmul.f32 0.044715, %v2442_v8  ;;  %v2445_v55 = vmul.f32 %v2061_v26, %v11248_v36  ;;  %v2062_v20 = vmul.f32 %v11264_v18, %v11264_v18  ;;  %v11302_v12 = vpop.f32.mrf.mxu0 }
 0x425   : > { %v3211_v31 = vadd.f32 %v2827_v45, %v11234_v48  ;;  %v2828_v1 = vmul.f32 0.044715, %v2444_v58  ;;  %v2447_v5 = vmul.f32 %v2063_v3, %v11253_v21  ;;  %v2064_v63 = vmul.f32 %v11273_v10, %v11273_v10  ;;  %v11306_v3 = vpop.f32.mrf.mxu1 }
 0x426   : > { %v3593_v42 = vmul.f32 0.7978846, %v3209_v2  ;;  %v3210_v60 = vadd.f32 %v2826_v46, %v11242_v56  ;;  %v2829_v30 = vmul.f32 0.044715, %v2445_v55  ;;  %v2446_v27 = vmul.f32 %v2062_v20, %v11264_v18 }
 0x427   : > { %v7966_v13 = vpop.eup %7965  ;;  %v3595_v51 = vmul.f32 0.7978846, %v3211_v31  ;;  %v3212_v34 = vadd.f32 %v2828_v1, %v11244_v19  ;;  %v2831_v23 = vmul.f32 0.044715, %v2447_v5  ;;  %v2448_v54 = vmul.f32 %v2064_v63, %v11273_v10  ;;  %v11324_v1 = vpop.f32.mrf.mxu0 }
 0x428   : > { %v7968_v41 = vpop.eup %7967  ;;  %v4354_v52 = vadd.f32 1.0, %v7966_v13  ;;  %7977 = vtanh.f32 %v3593_v42  ;;  %v3594_v33 = vmul.f32 0.7978846, %v3210_v60  ;;  %v3213_v25 = vadd.f32 %v2829_v30, %v11248_v36  ;;  %v11328_v30 = vpop.f32.mrf.mxu1 }
 0x429   : > { %v7970_v35 = vpop.eup %7969  ;;  %v4356_v61 = vadd.f32 1.0, %v7968_v41  ;;  %7979 = vtanh.f32 %v3595_v51  ;;  %v3596_v4 = vmul.f32 0.7978846, %v3212_v34  ;;  %v3215_v44 = vadd.f32 %v2831_v23, %v11253_v21 }
 0x42a   : > { %v7972_v49 = vpop.eup %7971  ;;  %v4738_v6 = vmul.f32 0.5, %v4354_v52  ;;  %v4357_v59 = vadd.f32 1.0, %v7970_v35  ;;  %7981 = vtanh.f32 %v3594_v33  ;;  %v3597_v32 = vmul.f32 0.7978846, %v3213_v25 }
 0x42b   : > { %v7974_v39 = vpop.eup %7973  ;;  %v4740_v53 = vmul.f32 0.5, %v4356_v61  ;;  %v4359_v14 = vadd.f32 1.0, %v7972_v49  ;;  %7983 = vtanh.f32 %v3596_v4  ;;  %v3599_v50 = vmul.f32 0.7978846, %v3215_v44 }
 0x42c   : > { %v7976_v7 = vpop.eup %7975  ;;  %v5122_v9 = vmul.f32 %v4738_v6, %v11187_v0  ;;  %v4741_v24 = vmul.f32 0.5, %v4357_v59  ;;  %v4358_v15 = vadd.f32 1.0, %v7974_v39  ;;  %7985 = vtanh.f32 %v3597_v32  ;;  %v11341_v6 = vpop.f32.mrf.mxu0 }
 0x42d   : > { %v5124_v28 = vmul.f32 %v4740_v53, %v11189_v40  ;;  %v4743_v17 = vmul.f32 0.5, %v4359_v14  ;;  %v4360_v29 = vadd.f32 1.0, %v7976_v7  ;;  %7987 = vtanh.f32 %v3599_v50  ;;  %v11343_v59 = vpop.f32.mrf.mxu1 }
 0x42e   : > { %v7129_v8 = vpack.c.bf16 %v5122_v9, %v11268_v16  ;;  %v5125_v26 = vmul.f32 %v4741_v24, %v11195_v11  ;;  %v4742_v45 = vmul.f32 0.5, %v4358_v15  ;;  %v2830_v58 = vmul.f32 0.044715, %v2446_v27 }
 0x42f   : > { %v7130_v0 = vpack.c.bf16 %v5124_v28, %v11277_v62  ;;  %v5127_v2 = vmul.f32 %v4743_v17, %v11197_v38  ;;  %v4744_v46 = vmul.f32 0.5, %v4360_v29  ;;  %v2832_v40 = vmul.f32 0.044715, %v2448_v54 }
 0x430   : > { %6487 = vst [vmem:[%s8604_s12 + $0x550] sm:$0xff] %v7129_v8  ;;  %v5126_v55 = vmul.f32 %v4742_v45, %v11207_v47  ;;  %v3214_v20 = vadd.f32 %v2830_v58, %v11264_v18  ;;  %v2065_v16 = vmul.f32 %v11296_v57, %v11296_v57  ;;  %v2067_v11 = vmul.f32 %v11298_v43, %v11298_v43 }
 0x431   : > { %6488 = vst [vmem:[%s8604_s12 + $0x558] sm:$0xff] %v7130_v0  ;;  %v5128_v31 = vmul.f32 %v4744_v46, %v11209_v22  ;;  %v3216_v62 = vadd.f32 %v2832_v40, %v11273_v10  ;;  %v2066_v38 = vmul.f32 %v11302_v12, %v11302_v12  ;;  %v2068_v47 = vmul.f32 %v11306_v3, %v11306_v3  ;;  %v11349_v40 = vpop.f32.mrf.mxu0 }
 0x432   : > { %v7131_v5 = vpack.c.bf16 %v5126_v55, %v5125_v26  ;;  %v3598_v63 = vmul.f32 0.7978846, %v3214_v20  ;;  %v2449_v42 = vmul.f32 %v2065_v16, %v11296_v57  ;;  %v2451_v60 = vmul.f32 %v2067_v11, %v11298_v43  ;;  %v11351_v55 = vpop.f32.mrf.mxu1 }
 0x433   : > { %v7132_v22 = vpack.c.bf16 %v5128_v31, %v5127_v2  ;;  %v3600_v27 = vmul.f32 0.7978846, %v3216_v62  ;;  %v2450_v13 = vmul.f32 %v2066_v38, %v11302_v12  ;;  %v2452_v51 = vmul.f32 %v2068_v47, %v11306_v3 }
 0x434   : > { %6489 = vst [vmem:[%s8604_s12 + $0x560] sm:$0xff] %v7131_v5  ;;  %7989 = vtanh.f32 %v3598_v63  ;;  %v2833_v34 = vmul.f32 0.044715, %v2449_v42  ;;  %v2835_v23 = vmul.f32 0.044715, %v2451_v60  ;;  %v2069_v54 = vmul.f32 %v11324_v1, %v11324_v1 }
 0x435   : > { %v7978_v41 = vpop.eup %7977  ;;  %6490 = vst [vmem:[%s8604_s12 + $0x568] sm:$0xff] %v7132_v22  ;;  %7991 = vtanh.f32 %v3600_v27  ;;  %v2834_v52 = vmul.f32 0.044715, %v2450_v13  ;;  %v2836_v33 = vmul.f32 0.044715, %v2452_v51  ;;  %v2071_v25 = vmul.f32 %v11328_v30, %v11328_v30  ;;  %v11360_v22 = vpop.f32.mrf.mxu0 }
 0x436   : > { %v7980_v35 = vpop.eup %7979  ;;  %v4361_v61 = vadd.f32 1.0, %v7978_v41  ;;  %v3217_v4 = vadd.f32 %v2833_v34, %v11296_v57  ;;  %v3219_v44 = vadd.f32 %v2835_v23, %v11298_v43  ;;  %v2453_v49 = vmul.f32 %v2069_v54, %v11324_v1 }
 0x437   : > { %v7982_v32 = vpop.eup %7981  ;;  %v4363_v39 = vadd.f32 1.0, %v7980_v35  ;;  %v3218_v53 = vadd.f32 %v2834_v52, %v11302_v12  ;;  %v3220_v14 = vadd.f32 %v2836_v33, %v11306_v3  ;;  %v2455_v50 = vmul.f32 %v2071_v25, %v11328_v30 }
 0x438   : > { %v7984_v7 = vpop.eup %7983  ;;  %v4745_v9 = vmul.f32 0.5, %v4361_v61  ;;  %v4362_v24 = vadd.f32 1.0, %v7982_v32  ;;  %v3601_v15 = vmul.f32 0.7978846, %v3217_v4  ;;  %v3603_v28 = vmul.f32 0.7978846, %v3219_v44 }
 0x439   : > { %v7986_v17 = vpop.eup %7985  ;;  %v4747_v29 = vmul.f32 0.5, %v4363_v39  ;;  %v4364_v8 = vadd.f32 1.0, %v7984_v7  ;;  %v3602_v26 = vmul.f32 0.7978846, %v3218_v53  ;;  %v3604_v45 = vmul.f32 0.7978846, %v3220_v14 }
 0x43a   : > { %v7988_v58 = vpop.eup %7987  ;;  %v5129_v0 = vmul.f32 %v4745_v9, %v11230_v37  ;;  %v4746_v2 = vmul.f32 0.5, %v4362_v24  ;;  %v4365_v46 = vadd.f32 1.0, %v7986_v17  ;;  %7993 = vtanh.f32 %v3601_v15 }
 0x43b   : > { %v5131_v20 = vmul.f32 %v4747_v29, %v11234_v48  ;;  %v4748_v16 = vmul.f32 0.5, %v4364_v8  ;;  %v4367_v11 = vadd.f32 1.0, %v7988_v58  ;;  %7995 = vtanh.f32 %v3603_v28 }
 0x43c   : > { %v5130_v31 = vmul.f32 %v4746_v2, %v11242_v56  ;;  %v4749_v62 = vmul.f32 0.5, %v4365_v46  ;;  %7997 = vtanh.f32 %v3602_v26  ;;  %v2837_v38 = vmul.f32 0.044715, %v2453_v49  ;;  %v11362_v56 = vpop.f32.mrf.mxu1 }
 0x43d   : > { %v5132_v37 = vmul.f32 %v4748_v16, %v11244_v19  ;;  %v4751_v47 = vmul.f32 0.5, %v4367_v11  ;;  %7999 = vtanh.f32 %v3604_v45  ;;  %v2839_v5 = vmul.f32 0.044715, %v2455_v50 }
 0x43e   : > { %v7133_v63 = vpack.c.bf16 %v5130_v31, %v5129_v0  ;;  %v5133_v42 = vmul.f32 %v4749_v62, %v11248_v36  ;;  %v3221_v48 = vadd.f32 %v2837_v38, %v11324_v1  ;;  %v2070_v60 = vmul.f32 %v11341_v6, %v11341_v6  ;;  %v11392_v62 = vpop.f32.mrf.mxu1 }
 0x43f   : > { %v7134_v27 = vpack.c.bf16 %v5132_v37, %v5131_v20  ;;  %v5135_v13 = vmul.f32 %v4751_v47, %v11253_v21  ;;  %v3223_v19 = vadd.f32 %v2839_v5, %v11328_v30  ;;  %v2072_v51 = vmul.f32 %v11343_v59, %v11343_v59  ;;  %v11390_v20 = vpop.f32.mrf.mxu0 }
 0x440   : > { %6491 = vst [vmem:[%s8604_s12 + $0x570] sm:$0xff] %v7133_v63  ;;  %v3605_v34 = vmul.f32 0.7978846, %v3221_v48  ;;  %v2454_v36 = vmul.f32 %v2070_v60, %v11341_v6  ;;  %v2073_v23 = vmul.f32 %v11349_v40, %v11349_v40  ;;  %v2075_v54 = vmul.f32 %v11351_v55, %v11351_v55 }
 0x441   : > { %v7990_v41 = vpop.eup %7989  ;;  %6492 = vst [vmem:[%s8604_s12 + $0x578] sm:$0xff] %v7134_v27  ;;  %v3607_v52 = vmul.f32 0.7978846, %v3223_v19  ;;  %v2456_v21 = vmul.f32 %v2072_v51, %v11343_v59  ;;  %v2074_v33 = vmul.f32 %v11360_v22, %v11360_v22  ;;  %v2076_v25 = vmul.f32 %v11362_v56, %v11362_v56  ;;  %v11398_v51 = vpop.f32.mrf.mxu0 }
 0x442   : > { %v7992_v35 = vpop.eup %7991  ;;  %v4366_v61 = vadd.f32 1.0, %v7990_v41  ;;  %8001 = vtanh.f32 %v3605_v34  ;;  %v2838_v4 = vmul.f32 0.044715, %v2454_v36  ;;  %v2457_v44 = vmul.f32 %v2073_v23, %v11349_v40 }
 0x443   : > { %v4368_v49 = vadd.f32 1.0, %v7992_v35  ;;  %8003 = vtanh.f32 %v3607_v52  ;;  %v2840_v32 = vmul.f32 0.044715, %v2456_v21  ;;  %v2459_v39 = vmul.f32 %v2075_v54, %v11351_v55  ;;  %v11403_v54 = vpop.f32.mrf.mxu1 }
 0x444   : > { %v4750_v53 = vmul.f32 0.5, %v4366_v61  ;;  %v3222_v14 = vadd.f32 %v2838_v4, %v11341_v6  ;;  %v2841_v50 = vmul.f32 0.044715, %v2457_v44  ;;  %v2458_v7 = vmul.f32 %v2074_v33, %v11360_v22 }
 0x445   : > { %v4752_v9 = vmul.f32 0.5, %v4368_v49  ;;  %v3224_v24 = vadd.f32 %v2840_v32, %v11343_v59  ;;  %v2843_v15 = vmul.f32 0.044715, %v2459_v39  ;;  %v2460_v28 = vmul.f32 %v2076_v25, %v11362_v56  ;;  %v11416_v49 = vpop.f32.mrf.mxu0 }
 0x446   : > { %v5134_v17 = vmul.f32 %v4750_v53, %v11264_v18  ;;  %v3606_v29 = vmul.f32 0.7978846, %v3222_v14  ;;  %v3225_v8 = vadd.f32 %v2841_v50, %v11349_v40  ;;  %v2842_v26 = vmul.f32 0.044715, %v2458_v7  ;;  %v11419_v50 = vpop.f32.mrf.mxu1 }
 0x447   : > { %v7994_v45 = vpop.eup %7993  ;;  %v5136_v58 = vmul.f32 %v4752_v9, %v11273_v10  ;;  %v3608_v0 = vmul.f32 0.7978846, %v3224_v24  ;;  %v3227_v2 = vadd.f32 %v2843_v15, %v11351_v55  ;;  %v2844_v46 = vmul.f32 0.044715, %v2460_v28 }
 0x448   : > { %v7996_v16 = vpop.eup %7995  ;;  %v7135_v11 = vpack.c.bf16 %v5134_v17, %v5133_v42  ;;  %v4369_v31 = vadd.f32 1.0, %v7994_v45  ;;  %8005 = vtanh.f32 %v3606_v29  ;;  %v3609_v18 = vmul.f32 0.7978846, %v3225_v8 }
 0x449   : > { %v7998_v38 = vpop.eup %7997  ;;  %v7136_v37 = vpack.c.bf16 %v5136_v58, %v5135_v13  ;;  %v4371_v47 = vadd.f32 1.0, %v7996_v16  ;;  %8007 = vtanh.f32 %v3608_v0  ;;  %v3611_v10 = vmul.f32 0.7978846, %v3227_v2 }
 0x44a   : > { %v8000_v5 = vpop.eup %7999  ;;  %6493 = vst [vmem:[%s8604_s12 + $0x580] sm:$0xff] %v7135_v11  ;;  %v4753_v63 = vmul.f32 0.5, %v4369_v31  ;;  %v4370_v48 = vadd.f32 1.0, %v7998_v38  ;;  %8009 = vtanh.f32 %v3609_v18  ;;  %v3226_v60 = vadd.f32 %v2842_v26, %v11360_v22  ;;  %v11433_v11 = vpop.f32.mrf.mxu0 }
 0x44b   : > { %6494 = vst [vmem:[%s8604_s12 + $0x588] sm:$0xff] %v7136_v37  ;;  %v4755_v42 = vmul.f32 0.5, %v4371_v47  ;;  %v4372_v27 = vadd.f32 1.0, %v8000_v5  ;;  %8011 = vtanh.f32 %v3611_v10  ;;  %v3228_v19 = vadd.f32 %v2844_v46, %v11362_v56  ;;  %v11435_v31 = vpop.f32.mrf.mxu1 }
 0x44c   : > { %v5137_v13 = vmul.f32 %v4753_v63, %v11296_v57  ;;  %v4754_v34 = vmul.f32 0.5, %v4370_v48  ;;  %v3610_v36 = vmul.f32 0.7978846, %v3226_v60  ;;  %v2077_v23 = vmul.f32 %v11390_v20, %v11390_v20 }
 0x44d   : > { %v5139_v41 = vmul.f32 %v4755_v42, %v11298_v43  ;;  %v4756_v52 = vmul.f32 0.5, %v4372_v27  ;;  %v3612_v21 = vmul.f32 0.7978846, %v3228_v19  ;;  %v2079_v33 = vmul.f32 %v11392_v62, %v11392_v62 }
 0x44e   : > { %v5138_v25 = vmul.f32 %v4754_v34, %v11302_v12  ;;  %8013 = vtanh.f32 %v3610_v36  ;;  %v2461_v35 = vmul.f32 %v2077_v23, %v11390_v20  ;;  %v2078_v57 = vmul.f32 %v11398_v51, %v11398_v51  ;;  %v11441_v23 = vpop.f32.mrf.mxu0 }
 0x44f   : > { %v8002_v61 = vpop.eup %8001  ;;  %v5140_v4 = vmul.f32 %v4756_v52, %v11306_v3  ;;  %8015 = vtanh.f32 %v3612_v21  ;;  %v2463_v43 = vmul.f32 %v2079_v33, %v11392_v62  ;;  %v2080_v44 = vmul.f32 %v11403_v54, %v11403_v54 }
 0x450   : > { %v8004_v12 = vpop.eup %8003  ;;  %v7137_v32 = vpack.c.bf16 %v5138_v25, %v5137_v13  ;;  %v4373_v39 = vadd.f32 1.0, %v8002_v61  ;;  %v2845_v53 = vmul.f32 0.044715, %v2461_v35  ;;  %v2462_v14 = vmul.f32 %v2078_v57, %v11398_v51 }
 0x451   : > { %v7138_v7 = vpack.c.bf16 %v5140_v4, %v5139_v41  ;;  %v4375_v9 = vadd.f32 1.0, %v8004_v12  ;;  %v2847_v3 = vmul.f32 0.044715, %v2463_v43  ;;  %v2464_v24 = vmul.f32 %v2080_v44, %v11403_v54  ;;  %v11443_v41 = vpop.f32.mrf.mxu1 }
 0x452   : > { %6495 = vst [vmem:[%s8604_s12 + $0x590] sm:$0xff] %v7137_v32  ;;  %v4757_v15 = vmul.f32 0.5, %v4373_v39  ;;  %v3229_v28 = vadd.f32 %v2845_v53, %v11390_v20  ;;  %v2846_v17 = vmul.f32 0.044715, %v2462_v14  ;;  %v2081_v29 = vmul.f32 %v11416_v49, %v11416_v49 }
 0x453   : > { %6496 = vst [vmem:[%s8604_s12 + $0x598] sm:$0xff] %v7138_v7  ;;  %v4759_v8 = vmul.f32 0.5, %v4375_v9  ;;  %v3231_v26 = vadd.f32 %v2847_v3, %v11392_v62  ;;  %v2848_v45 = vmul.f32 0.044715, %v2464_v24  ;;  %v2083_v58 = vmul.f32 %v11419_v50, %v11419_v50  ;;  %v11453_v7 = vpop.f32.mrf.mxu0  ;;  %v11455_v9 = vpop.f32.mrf.mxu1 }
 0x454   : > { %v5141_v0 = vmul.f32 %v4757_v15, %v11324_v1  ;;  %v3613_v2 = vmul.f32 0.7978846, %v3229_v28  ;;  %v3230_v46 = vadd.f32 %v2846_v17, %v11398_v51  ;;  %v2465_v16 = vmul.f32 %v2081_v29, %v11416_v49 }
 0x455   : > { %v8006_v18 = vpop.eup %8005  ;;  %v5143_v38 = vmul.f32 %v4759_v8, %v11328_v30  ;;  %v3615_v37 = vmul.f32 0.7978846, %v3231_v26  ;;  %v3232_v47 = vadd.f32 %v2848_v45, %v11403_v54  ;;  %v2467_v10 = vmul.f32 %v2083_v58, %v11419_v50 }
 0x456   : > { %v8008_v5 = vpop.eup %8007  ;;  %v4374_v63 = vadd.f32 1.0, %v8006_v18  ;;  %8017 = vtanh.f32 %v3613_v2  ;;  %v3614_v1 = vmul.f32 0.7978846, %v3230_v46  ;;  %v2849_v48 = vmul.f32 0.044715, %v2465_v16 }
 0x457   : > { %v8010_v60 = vpop.eup %8009  ;;  %v4376_v42 = vadd.f32 1.0, %v8008_v5  ;;  %8019 = vtanh.f32 %v3615_v37  ;;  %v3616_v27 = vmul.f32 0.7978846, %v3232_v47  ;;  %v2851_v19 = vmul.f32 0.044715, %v2467_v10 }
 0x458   : > { %v8012_v13 = vpop.eup %8011  ;;  %v4758_v34 = vmul.f32 0.5, %v4374_v63  ;;  %v4377_v36 = vadd.f32 1.0, %v8010_v60  ;;  %8021 = vtanh.f32 %v3614_v1  ;;  %v3233_v30 = vadd.f32 %v2849_v48, %v11416_v49 }
 0x459   : > { %v4760_v52 = vmul.f32 0.5, %v4376_v42  ;;  %v4379_v21 = vadd.f32 1.0, %v8012_v13  ;;  %8023 = vtanh.f32 %v3616_v27  ;;  %v3235_v33 = vadd.f32 %v2851_v19, %v11419_v50 }
 0x45a   : > { %v5142_v25 = vmul.f32 %v4758_v34, %v11341_v6  ;;  %v4761_v35 = vmul.f32 0.5, %v4377_v36  ;;  %v3617_v57 = vmul.f32 0.7978846, %v3233_v30  ;;  %v2082_v61 = vmul.f32 %v11433_v11, %v11433_v11 }
 0x45b   : > { %v8014_v4 = vpop.eup %8013  ;;  %v5144_v43 = vmul.f32 %v4760_v52, %v11343_v59  ;;  %v4763_v44 = vmul.f32 0.5, %v4379_v21  ;;  %v3619_v12 = vmul.f32 0.7978846, %v3235_v33  ;;  %v2084_v32 = vmul.f32 %v11435_v31, %v11435_v31  ;;  %v11484_v33 = vpop.f32.mrf.mxu0 }
 0x45c   : > { %v8016_v39 = vpop.eup %8015  ;;  %v7139_v53 = vpack.c.bf16 %v5142_v25, %v5141_v0  ;;  %v5145_v14 = vmul.f32 %v4761_v35, %v11349_v40  ;;  %v4378_v6 = vadd.f32 1.0, %v8014_v4  ;;  %8025 = vtanh.f32 %v3617_v57  ;;  %v11486_v4 = vpop.f32.mrf.mxu1 }
 0x45d   : > { %v7140_v3 = vpack.c.bf16 %v5144_v43, %v5143_v38  ;;  %v5147_v24 = vmul.f32 %v4763_v44, %v11351_v55  ;;  %v4380_v59 = vadd.f32 1.0, %v8016_v39  ;;  %8027 = vtanh.f32 %v3619_v12 }
 0x45e   : > { %6497 = vst [vmem:[%s8604_s12 + $0x5a0] sm:$0xff] %v7139_v53  ;;  %v4762_v15 = vmul.f32 0.5, %v4378_v6  ;;  %v2466_v28 = vmul.f32 %v2082_v61, %v11433_v11  ;;  %v2468_v17 = vmul.f32 %v2084_v32, %v11435_v31  ;;  %v2085_v40 = vmul.f32 %v11441_v23, %v11441_v23 }
 0x45f   : > { %6498 = vst [vmem:[%s8604_s12 + $0x5a8] sm:$0xff] %v7140_v3  ;;  %v4764_v29 = vmul.f32 0.5, %v4380_v59  ;;  %v2087_v8 = vmul.f32 %v11443_v41, %v11443_v41  ;;  %v2086_v26 = vmul.f32 %v11453_v7, %v11453_v7  ;;  %v2088_v55 = vmul.f32 %v11455_v9, %v11455_v9  ;;  %v11488_v3 = vpop.f32.mrf.mxu0 }
 0x460   : > { %v5146_v45 = vmul.f32 %v4762_v15, %v11360_v22  ;;  %v2850_v58 = vmul.f32 0.044715, %v2466_v28  ;;  %v2852_v0 = vmul.f32 0.044715, %v2468_v17  ;;  %v2469_v2 = vmul.f32 %v2085_v40, %v11441_v23  ;;  %v11494_v17 = vpop.f32.mrf.mxu1 }
 0x461   : > { %v5148_v46 = vmul.f32 %v4764_v29, %v11362_v56  ;;  %v2471_v16 = vmul.f32 %v2087_v8, %v11443_v41  ;;  %v2470_v18 = vmul.f32 %v2086_v26, %v11453_v7  ;;  %v2472_v38 = vmul.f32 %v2088_v55, %v11455_v9 }
 0x462   : > { %v7141_v37 = vpack.c.bf16 %v5146_v45, %v5145_v14  ;;  %v3234_v47 = vadd.f32 %v2850_v58, %v11433_v11  ;;  %v3236_v10 = vadd.f32 %v2852_v0, %v11435_v31  ;;  %v2853_v22 = vmul.f32 0.044715, %v2469_v2 }
 0x463   : > { %v8018_v5 = vpop.eup %8017  ;;  %v7142_v63 = vpack.c.bf16 %v5148_v46, %v5147_v24  ;;  %v2855_v1 = vmul.f32 0.044715, %v2471_v16  ;;  %v2854_v48 = vmul.f32 0.044715, %v2470_v18  ;;  %v2856_v60 = vmul.f32 0.044715, %v2472_v38 }
 0x464   : > { %v8020_v42 = vpop.eup %8019  ;;  %6499 = vst [vmem:[%s8604_s12 + $0x5b0] sm:$0xff] %v7141_v37  ;;  %v4381_v56 = vadd.f32 1.0, %v8018_v5  ;;  %v3618_v27 = vmul.f32 0.7978846, %v3234_v47  ;;  %v3620_v19 = vmul.f32 0.7978846, %v3236_v10  ;;  %v3237_v13 = vadd.f32 %v2853_v22, %v11441_v23 }
 0x465   : > { %v8022_v34 = vpop.eup %8021  ;;  %6500 = vst [vmem:[%s8604_s12 + $0x5b8] sm:$0xff] %v7142_v63  ;;  %v4383_v36 = vadd.f32 1.0, %v8020_v42  ;;  %v3239_v30 = vadd.f32 %v2855_v1, %v11443_v41  ;;  %v3238_v52 = vadd.f32 %v2854_v48, %v11453_v7  ;;  %v3240_v21 = vadd.f32 %v2856_v60, %v11455_v9 }
 0x466   : > { %v8024_v25 = vpop.eup %8023  ;;  %v4765_v35 = vmul.f32 0.5, %v4381_v56  ;;  %v4382_v57 = vadd.f32 1.0, %v8022_v34  ;;  %8029 = vtanh.f32 %v3618_v27  ;;  %v3621_v61 = vmul.f32 0.7978846, %v3237_v13 }
 0x467   : > { %v4767_v43 = vmul.f32 0.5, %v4383_v36  ;;  %v4384_v44 = vadd.f32 1.0, %v8024_v25  ;;  %8031 = vtanh.f32 %v3620_v19  ;;  %v3623_v12 = vmul.f32 0.7978846, %v3239_v30 }
 0x468   : > { %v4766_v32 = vmul.f32 0.5, %v4382_v57  ;;  %8033 = vtanh.f32 %v3621_v61  ;;  %v3622_v39 = vmul.f32 0.7978846, %v3238_v52  ;;  %v3624_v6 = vmul.f32 0.7978846, %v3240_v21 }
 0x469   : > { %v8026_v53 = vpop.eup %8025  ;;  %v4768_v14 = vmul.f32 0.5, %v4384_v44  ;;  %8035 = vtanh.f32 %v3623_v12  ;;  %v5149_v59 = vmul.f32 %v4765_v35, %v11390_v20  ;;  %v2089_v28 = vmul.f32 %v11484_v33, %v11484_v33 }
 0x46a   : > { %v8028_v24 = vpop.eup %8027  ;;  %v5150_v15 = vmul.f32 %v4766_v32, %v11398_v51  ;;  %8037 = vtanh.f32 %v3622_v39  ;;  %v5151_v40 = vmul.f32 %v4767_v43, %v11392_v62  ;;  %v2091_v8 = vmul.f32 %v11486_v4, %v11486_v4 }
 0x46b   : > { %v5152_v29 = vmul.f32 %v4768_v14, %v11403_v54  ;;  %8039 = vtanh.f32 %v3624_v6  ;;  %v2473_v20 = vmul.f32 %v2089_v28, %v11484_v33  ;;  %v2090_v51 = vmul.f32 %v11488_v3, %v11488_v3 }
 0x46c   : > { %v7143_v26 = vpack.c.bf16 %v5150_v15, %v5149_v59  ;;  %v2475_v45 = vmul.f32 %v2091_v8, %v11486_v4  ;;  %v2092_v58 = vmul.f32 %v11494_v17, %v11494_v17  ;;  %v4385_v46 = vadd.f32 1.0, %v8026_v53 }
 0x46d   : > { %v7144_v55 = vpack.c.bf16 %v5152_v29, %v5151_v40  ;;  %v2857_v62 = vmul.f32 0.044715, %v2473_v20  ;;  %v2474_v54 = vmul.f32 %v2090_v51, %v11488_v3  ;;  %v4387_v38 = vadd.f32 1.0, %v8028_v24 }
 0x46e   : > { %6501 = vst [vmem:[%s8604_s12 + $0x5c0] sm:$0xff] %v7143_v26  ;;  %v2859_v0 = vmul.f32 0.044715, %v2475_v45  ;;  %v2476_v2 = vmul.f32 %v2092_v58, %v11494_v17  ;;  %v4769_v60 = vmul.f32 0.5, %v4385_v46 }
 0x46f   : > { %6502 = vst [vmem:[%s8604_s12 + $0x5c8] sm:$0xff] %v7144_v55  ;;  %v3241_v16 = vadd.f32 %v2857_v62, %v11484_v33  ;;  %v2858_v18 = vmul.f32 0.044715, %v2474_v54  ;;  %v4771_v19 = vmul.f32 0.5, %v4387_v38 }
 0x470   : > { %v3243_v37 = vadd.f32 %v2859_v0, %v11486_v4  ;;  %v2860_v47 = vmul.f32 0.044715, %v2476_v2  ;;  %v5153_v61 = vmul.f32 %v4769_v60, %v11416_v49 }
 0x471   : > { %v3625_v10 = vmul.f32 0.7978846, %v3241_v16  ;;  %v3242_v22 = vadd.f32 %v2858_v18, %v11488_v3  ;;  %v5155_v32 = vmul.f32 %v4771_v19, %v11419_v50 }
 0x472   : > { %v3627_v63 = vmul.f32 0.7978846, %v3243_v37  ;;  %v3244_v1 = vadd.f32 %v2860_v47, %v11494_v17 }
 0x473   : > { %v8030_v5 = vpop.eup %8029  ;;  %8041 = vtanh.f32 %v3625_v10  ;;  %v3626_v56 = vmul.f32 0.7978846, %v3242_v22 }
 0x474   : > { %v8032_v48 = vpop.eup %8031  ;;  %v4386_v42 = vadd.f32 1.0, %v8030_v5  ;;  %8043 = vtanh.f32 %v3627_v63  ;;  %v3628_v34 = vmul.f32 0.7978846, %v3244_v1 }
 0x475   : > { %v8034_v27 = vpop.eup %8033  ;;  %v4388_v13 = vadd.f32 1.0, %v8032_v48  ;;  %8045 = vtanh.f32 %v3626_v56 }
 0x476   : > { %v8036_v36 = vpop.eup %8035  ;;  %v4770_v30 = vmul.f32 0.5, %v4386_v42  ;;  %v4389_v52 = vadd.f32 1.0, %v8034_v27  ;;  %8047 = vtanh.f32 %v3628_v34 }
 0x477   : > { %v8038_v21 = vpop.eup %8037  ;;  %v4772_v25 = vmul.f32 0.5, %v4388_v13  ;;  %v4391_v35 = vadd.f32 1.0, %v8036_v36 }
 0x478   : > { %v8040_v57 = vpop.eup %8039  ;;  %v5154_v43 = vmul.f32 %v4770_v30, %v11433_v11  ;;  %v4773_v44 = vmul.f32 0.5, %v4389_v52  ;;  %v4390_v12 = vadd.f32 1.0, %v8038_v21 }
 0x479   : > { %v5156_v39 = vmul.f32 %v4772_v25, %v11435_v31  ;;  %v4775_v53 = vmul.f32 0.5, %v4391_v35  ;;  %v4392_v14 = vadd.f32 1.0, %v8040_v57 }
 0x47a   : > { %v7145_v6 = vpack.c.bf16 %v5154_v43, %v5153_v61  ;;  %v4774_v24 = vmul.f32 0.5, %v4390_v12  ;;  %v5157_v49 = vmul.f32 %v4773_v44, %v11441_v23 }
 0x47b   : > { %v7146_v59 = vpack.c.bf16 %v5156_v39, %v5155_v32  ;;  %v4776_v15 = vmul.f32 0.5, %v4392_v14  ;;  %v5159_v28 = vmul.f32 %v4775_v53, %v11443_v41 }
 0x47c   : > { %6503 = vst [vmem:[%s8604_s12 + $0x5d0] sm:$0xff] %v7145_v6  ;;  %v5158_v11 = vmul.f32 %v4774_v24, %v11453_v7 }
 0x47d   : > { %6504 = vst [vmem:[%s8604_s12 + $0x5d8] sm:$0xff] %v7146_v59  ;;  %v5160_v50 = vmul.f32 %v4776_v15, %v11455_v9 }
 0x47e   : > { %v7147_v31 = vpack.c.bf16 %v5158_v11, %v5157_v49 }
 0x47f   : > { %v7148_v40 = vpack.c.bf16 %v5160_v50, %v5159_v28 }
 0x480   : > { %6505 = vst [vmem:[%s8604_s12 + $0x5e0] sm:$0xff] %v7147_v31  ;;  %v8042_v29 = vpop.eup %8041 }
 0x481   : > { %6506 = vst [vmem:[%s8604_s12 + $0x5e8] sm:$0xff] %v7148_v40  ;;  %v8044_v8 = vpop.eup %8043  ;;  %v4393_v26 = vadd.f32 1.0, %v8042_v29 }
 0x482   : > { %v8046_v20 = vpop.eup %8045  ;;  %v4395_v51 = vadd.f32 1.0, %v8044_v8 }
 0x483   : > { %v8048_v23 = vpop.eup %8047  ;;  %v4777_v55 = vmul.f32 0.5, %v4393_v26  ;;  %v4394_v7 = vadd.f32 1.0, %v8046_v20 }
 0x484   : > { %v4779_v41 = vmul.f32 0.5, %v4395_v51  ;;  %v4396_v9 = vadd.f32 1.0, %v8048_v23 }
 0x485   : > { %v4778_v45 = vmul.f32 0.5, %v4394_v7  ;;  %v5161_v62 = vmul.f32 %v4777_v55, %v11484_v33 }
 0x486   : > { %v4780_v58 = vmul.f32 0.5, %v4396_v9  ;;  %v5163_v0 = vmul.f32 %v4779_v41, %v11486_v4 }
 0x487   : > { %v5162_v54 = vmul.f32 %v4778_v45, %v11488_v3 }
 0x488   : > { %v5164_v2 = vmul.f32 %v4780_v58, %v11494_v17 }
 0x489   : > { %v7149_v46 = vpack.c.bf16 %v5162_v54, %v5161_v62 }
 0x48a   : > { %v7150_v16 = vpack.c.bf16 %v5164_v2, %v5163_v0 }
 0x48b   : > { %6507 = vst [vmem:[%s8604_s12 + $0x5f0] sm:$0xff] %v7149_v46 }
 0x48c   : > { %6508 = vst [vmem:[%s8604_s12 + $0x5f8] sm:$0xff] %v7150_v16 }
 0x48d   : > { %8062 = shalt.err (!%p8059_p7)
}
 0x48e   : > { %s8063_s5 = scalar_lea.hbm %s11534_s24, 24576  ;;  %s8067_s6 = scalar_lea.hbm %s11597_s2, 98304 }
 0x48f   : > { %p8064_p9 = scmp.ne.s32.totalorder %s11534_s24, %s8063_s5  ;;  %p8068_p12 = scmp.lt.s32.totalorder %s11534_s24, %s11597_s2 }
 0x490   : > { %p8069_p13 = scmp.lt.s32.totalorder %s8067_s6, %s8063_s5 }
 0x491   : > { %p8065_p10 = pnand %p8064_p9, %p8215_p3 }
 0x492   : > { %p8070_p0 = por %p8069_p13, %p8068_p12 }
 0x493   : > { %p8066_p11 = pneg %p8065_p10 }
 0x495   : > { %p8071_p1 = pnand %p8070_p0, %p8066_p11 }
 0x497   : > { %8074 = shalt.err (!%p8071_p1)
}
 0x498   : > { %s8146_s17 = smov 256   ;;  %s8147_s18 = smov 512  }
 0x499   : > { %s8148_s21 = smov 16  }
 0x49a   : > { %7153 = dma.vmem_to_hbm [thread:$0]  (%p8215_p3), %s11538_s13, 24576, %s11534_s24, %s11544_s25, %s8146_s17, %s8147_s18, %s8148_s21  }
 0x49b PF: > { %p7159_p2 = scmp.ge.s32.totalorder %s8141_s16, 2  ;;  %s6540_s28 = sand.u32 1, %s8113_s9  }
 0x49c   : > { %s6541_s26 = scalar_lea.sflag [#allocation3], %s6540_s28 }
 0x49d   : > { %p7156_p4 = pnand %p7159_p2, %p8224_p8 }
 0x49f   : > { %p7157_p5 = pneg %p7156_p4 }
 0x4a1   : > { %8108 = dma.done.wait (%p7157_p5), %s6541_s26, 24576  }
 0x4a2   : > { %8110 = vsyncadd (%p7157_p5), %s6541_s26, 4294942720  ;;  %s15_s16 = sadd.s32 1, %s8141_s16   ;;  %s11624_s9 = smov %s8117_s10 }
 0x4a3   : > { %p12_p6 = scmp.ge.s32.totalorder %s15_s16, 6   ;;  %s11625_s10 = smov %s8121_s11 }
 0x4a4   : > { %s11626_s11 = smov %s8233_s27  ;;  %s11627_s12 = smov %s8133_s14 }
 0x4a5   : > { %s11628_s13 = smov %s8137_s15  ;;  %s11629_s14 = smov %s11632_s19 }
 0x4a6   : > { %s11630_s15 = smov %s11636_s20  ;;  %14 = sbr.rel (!%p12_p6) target bundleno = 5 (0x5), region = 63 }
 0x4ab   :  { %6546 = vsyncpa [#allocation3], 1 }
 0x4ac   :  { %6548 = vsyncpa [#allocation3 + $0x1], 1 }

</bundles_post_ra>
